<compile_context>
chip_gen: v5e
topology: v5e:2x2
jax: 0.10.0
libtpu: 0.0.40
codegen_flags: <defaults>
</compile_context>

<pallas_src>
import jax
import jax.numpy as jnp
from jax import lax
from jax.experimental import pallas as pl
from jax.experimental.pallas import tpu as pltpu


# ----------------------------- helpers -----------------------------

def _pick_tile(dim, target, align):
    """Largest `align`-multiple <= target that divides `dim`, else full dim."""
    if dim <= target:
        return dim
    t = (target // align) * align
    while t >= align:
        if dim % t == 0:
            return t
        t -= align
    return dim


def _pick_head_group(num_heads, head_dim, target_lanes=512):
    """Largest head-group g (dividing num_heads) with g*head_dim a multiple of
    128 and <= target_lanes; falls back to the smallest 128-aligned group."""
    best = None
    smallest = None
    for g in range(1, num_heads + 1):
        if num_heads % g != 0 or (g * head_dim) % 128 != 0:
            continue
        if smallest is None:
            smallest = g
        if g * head_dim <= target_lanes:
            best = g
    if best is None:
        best = smallest
    if best is None:
        # TODO(synk): support head dims with no 128-lane-aligned grouping.
        raise NotImplementedError("d_model must allow a 128-lane head group")
    return best


# ----------------------- tiled linear (x @ w_t + b) -----------------------

def _matmul_bias_kernel(x_ref, w_ref, b_ref, o_ref, acc_ref):
    kk = pl.program_id(2)

    @pl.when(kk == 0)
    def _():
        acc_ref[...] = jnp.zeros_like(acc_ref)

    # Activation tile cast to bf16 in-kernel (input stays f32 in HBM);
    # weight already (K, N) bf16 -> plain MXU matmul with f32 accumulation.
    acc_ref[...] += jnp.dot(x_ref[...].astype(jnp.bfloat16), w_ref[...],
                            preferred_element_type=jnp.float32)

    @pl.when(kk == pl.num_programs(2) - 1)
    def _():
        o_ref[...] = (acc_ref[...] + b_ref[...]).astype(o_ref.dtype)


def linear_bias(x, w_t, b, *, out_dtype, tm=1024, tn=512, tk=512):
    """y = x @ w_t + b.   x:(M,K) f32/bf16,  w_t:(K,N) bf16 (pre-transposed
    PyTorch weight), b:(N,) f32."""
    m, k = x.shape
    n = w_t.shape[1]
    tm = _pick_tile(m, tm, 8)
    tn = _pick_tile(n, tn, 128)
    tk = _pick_tile(k, k if k <= 1024 else tk, 128)
    grid = (m // tm, n // tn, k // tk)
    cost = pl.CostEstimate(
        flops=2 * m * n * k,
        transcendentals=0,
        bytes_accessed=(m * k * x.dtype.itemsize + 2 * n * k
                        + m * n * jnp.dtype(out_dtype).itemsize + 4 * n))
    return pl.pallas_call(
        _matmul_bias_kernel,
        out_shape=jax.ShapeDtypeStruct((m, n), out_dtype),
        grid_spec=pltpu.PrefetchScalarGridSpec(
            num_scalar_prefetch=0,
            grid=grid,
            in_specs=[
                pl.BlockSpec((tm, tk), lambda i, j, kk: (i, kk)),
                pl.BlockSpec((tk, tn), lambda i, j, kk: (kk, j)),
                pl.BlockSpec((1, tn), lambda i, j, kk: (0, j)),
            ],
            out_specs=pl.BlockSpec((tm, tn), lambda i, j, kk: (i, j)),
            scratch_shapes=[pltpu.VMEM((tm, tn), jnp.float32)]),
        compiler_params=pltpu.CompilerParams(
            dimension_semantics=("parallel", "parallel", "arbitrary")),
        cost_estimate=cost,
    )(x, w_t, b.reshape(1, n))


# ----------------------- flash-style multi-head attention -----------------------

def _make_flash_single_kernel(scale, g_heads, head_dim):
    """Single-KV-tile fast path: plain softmax, no online recurrence / scratch."""
    def kernel(q_ref, k_ref, v_ref, o_ref):
        q_blk = q_ref[0]                      # (tq,  g*Dh) bf16
        k_blk = k_ref[0]                      # (tkv, g*Dh) bf16
        v_blk = v_ref[0]                      # (tkv, g*Dh) bf16
        for h in range(g_heads):
            if g_heads == 1:
                qh, kh, vh = q_blk, k_blk, v_blk
            else:
                sl = slice(h * head_dim, (h + 1) * head_dim)
                qh, kh, vh = q_blk[:, sl], k_blk[:, sl], v_blk[:, sl]
            # Contract head_dim of q and k -> (tq, tkv); no k.T / XLU transpose.
            s = lax.dot_general(
                qh, kh, dimension_numbers=(((1,), (1,)), ((), ())),
                preferred_element_type=jnp.float32) * scale
            m = jnp.max(s, axis=-1, keepdims=True)
            p = jnp.exp(s - m)
            l = jnp.sum(p, axis=-1, keepdims=True)
            ctx = jnp.dot(p.astype(vh.dtype), vh,
                          preferred_element_type=jnp.float32)
            ctx = (ctx * pl.reciprocal(l, approx=True)).astype(o_ref.dtype)
            if g_heads == 1:
                o_ref[0] = ctx
            else:
                o_ref[0, :, h * head_dim:(h + 1) * head_dim] = ctx
        # TODO(synk): attention-weight dropout is a no-op (inference / eval mode).
    return kernel


def _make_flash_online_kernel(scale, g_heads, head_dim):
    """Multi-KV-tile path: online softmax, running max/denom/acc in VMEM."""
    def kernel(q_ref, k_ref, v_ref, o_ref, m_sc, l_sc, acc_sc):
        ik = pl.program_id(3)

        @pl.when(ik == 0)
        def _():
            m_sc[...] = jnp.full_like(m_sc, -jnp.inf)
            l_sc[...] = jnp.zeros_like(l_sc)
            acc_sc[...] = jnp.zeros_like(acc_sc)

        q_blk = q_ref[0]
        k_blk = k_ref[0]
        v_blk = v_ref[0]
        for h in range(g_heads):
            if g_heads == 1:
                qh, kh, vh = q_blk, k_blk, v_blk
            else:
                sl = slice(h * head_dim, (h + 1) * head_dim)
                qh, kh, vh = q_blk[:, sl], k_blk[:, sl], v_blk[:, sl]
            s = lax.dot_general(
                qh, kh, dimension_numbers=(((1,), (1,)), ((), ())),
                preferred_element_type=jnp.float32) * scale
            m_prev = m_sc[h]                                  # (tq, 1)
            m_new = jnp.maximum(m_prev, jnp.max(s, axis=-1, keepdims=True))
            alpha = jnp.exp(m_prev - m_new)
            p = jnp.exp(s - m_new)                            # (tq, tkv) f32
            l_sc[h] = alpha * l_sc[h] + jnp.sum(p, axis=-1, keepdims=True)
            acc_sc[h] = alpha * acc_sc[h] + jnp.dot(
                p.astype(vh.dtype), vh, preferred_element_type=jnp.float32)
            m_sc[h] = m_new

        # TODO(synk): attention-weight dropout is a no-op (inference / eval mode).

        @pl.when(ik == pl.num_programs(3) - 1)
        def _():
            for h in range(g_heads):
                ctx = (acc_sc[h] * pl.reciprocal(l_sc[h], approx=True)
                       ).astype(o_ref.dtype)
                if g_heads == 1:
                    o_ref[0] = ctx
                else:
                    o_ref[0, :, h * head_dim:(h + 1) * head_dim] = ctx
    return kernel


def flash_attention(q, k, v, *, num_heads, d_model, scale,
                    q_col_off=0, k_col_off=0, v_col_off=0,
                    out_dtype=jnp.bfloat16, tq=512, tkv=512):
    """Flash attention with head split/merge folded into BlockSpec index_maps.

    q: (B, Sq, _), k/v: (B, Skv, _).  Head columns start at q_col_off /
    k_col_off / v_col_off (element offsets), so the fused self-attention path
    passes the same (B, S, 3*d_model) buffer three times with offsets 0/D/2D
    (no wrapper-side split/concat).  Output is (B, Sq, d_model), already in the
    PyTorch `context.transpose(1,2).view(B,-1,D)` layout.
    """
    batch, seq_q = q.shape[0], q.shape[1]
    seq_kv = k.shape[1]
    head_dim = d_model // num_heads
    g = _pick_head_group(num_heads, head_dim)
    gdh = g * head_dim
    hg = num_heads // g
    assert q_col_off % gdh == 0 and k_col_off % gdh == 0 and v_col_off % gdh == 0
    q_bo, k_bo, v_bo = q_col_off // gdh, k_col_off // gdh, v_col_off // gdh

    tq = _pick_tile(seq_q, tq, 16)      # sublane dim (bf16 packing friendly)
    tkv = _pick_tile(seq_kv, tkv, 128)  # lane / MXU-N dim of the score matrix
    kv_steps = seq_kv // tkv
    grid = (batch, hg, seq_q // tq, kv_steps)

    cost = pl.CostEstimate(
        flops=4 * batch * num_heads * seq_q * seq_kv * head_dim,
        transcendentals=batch * num_heads * seq_q * seq_kv,
        bytes_accessed=(batch * seq_q * d_model + 2 * batch * seq_kv * d_model) * 2
        + batch * seq_q * d_model * jnp.dtype(out_dtype).itemsize)

    if kv_steps == 1:
        kernel = _make_flash_single_kernel(scale, g, head_dim)
        scratch = []
    else:
        kernel = _make_flash_online_kernel(scale, g, head_dim)
        scratch = [pltpu.VMEM((g, tq, 1), jnp.float32),          # running max
                   pltpu.VMEM((g, tq, 1), jnp.float32),          # running denom
                   pltpu.VMEM((g, tq, head_dim), jnp.float32)]   # weighted-V acc

    return pl.pallas_call(
        kernel,
        out_shape=jax.ShapeDtypeStruct((batch, seq_q, d_model), out_dtype),
        grid_spec=pltpu.PrefetchScalarGridSpec(
            num_scalar_prefetch=0,
            grid=grid,
            in_specs=[
                pl.BlockSpec((1, tq, gdh), lambda b, gi, iq, ik: (b, iq, q_bo + gi)),
                pl.BlockSpec((1, tkv, gdh), lambda b, gi, iq, ik: (b, ik, k_bo + gi)),
                pl.BlockSpec((1, tkv, gdh), lambda b, gi, iq, ik: (b, ik, v_bo + gi)),
            ],
            out_specs=pl.BlockSpec((1, tq, gdh), lambda b, gi, iq, ik: (b, iq, gi)),
            scratch_shapes=scratch),
        compiler_params=pltpu.CompilerParams(
            dimension_semantics=("parallel", "parallel", "parallel", "arbitrary")),
        cost_estimate=cost,
    )(q, k, v)


# ----------------------------- module wrapper -----------------------------

class MultiHeadAttentionPallas:
    def __init__(self, d_model, num_heads, key, dropout=0.1,
                 attn_tq=512, attn_tkv=512):
        assert d_model % num_heads == 0
        self.d_model = d_model
        self.num_heads = num_heads
        self.head_dim = d_model // num_heads
        self.scale = self.head_dim ** (-0.5)
        self.dropout = dropout  # TODO(synk): dropout is a no-op (eval mode).
        self.attn_tq = attn_tq
        self.attn_tkv = attn_tkv

        ks = jax.random.split(key, 8)
        bound = 1.0 / (d_model ** 0.5)

        def uni(k, shape):
            return jax.random.uniform(k, shape, jnp.float32, -bound, bound)

        # PyTorch nn.Linear layout: weight (out, in), bias (out,).
        self.wq, self.bq = uni(ks[0], (d_model, d_model)), uni(ks[1], (d_model,))
        self.wk, self.bk = uni(ks[2], (d_model, d_model)), uni(ks[3], (d_model,))
        self.wv, self.bv = uni(ks[4], (d_model, d_model)), uni(ks[5], (d_model,))
        self.wo, self.bo = uni(ks[6], (d_model, d_model)), uni(ks[7], (d_model,))

        # One-time host-side pre-transpose to (in, out) bf16 MXU copies.
        t = lambda w: jnp.asarray(w.T, jnp.bfloat16)
        self.wt_q, self.wt_k = t(self.wq), t(self.wk)
        self.wt_v, self.wt_o = t(self.wv), t(self.wo)
        # Fused QKV projection weight/bias for the self-attention path.
        self.wt_qkv = jnp.concatenate([self.wt_q, self.wt_k, self.wt_v], axis=1)
        self.b_qkv = jnp.concatenate([self.bq, self.bk, self.bv], axis=0)

    def __call__(self, query, key, value, mask=None):
        # TODO(synk): masked_fill(mask==0, -1e9) path not implemented.
        assert mask is None, "mask path not implemented in the Pallas kernel"
        B, Sq, D = query.shape
        assert D == self.d_model
        assert key.shape == value.shape and key.shape[0] == B and key.shape[2] == D
        Skv = key.shape[1]

        if key is query and value is query:
            # Self-attention: fused QKV projection (reads x from HBM once);
            # the flash kernel slices the fused buffer via column offsets.
            qkv = linear_bias(query.reshape(B * Sq, D), self.wt_qkv, self.b_qkv,
                              out_dtype=jnp.bfloat16).reshape(B, Sq, 3 * D)
            ctx = flash_attention(
                qkv, qkv, qkv, num_heads=self.num_heads, d_model=D,
                scale=self.scale, q_col_off=0, k_col_off=D, v_col_off=2 * D,
                tq=self.attn_tq, tkv=self.attn_tkv)
        else:
            q = linear_bias(query.reshape(B * Sq, D), self.wt_q, self.bq,
                            out_dtype=jnp.bfloat16).reshape(B, Sq, D)
            k = linear_bias(key.reshape(B * Skv, D), self.wt_k, self.bk,
                            out_dtype=jnp.bfloat16).reshape(B, Skv, D)
            v = linear_bias(value.reshape(B * Skv, D), self.wt_v, self.bv,
                            out_dtype=jnp.bfloat16).reshape(B, Skv, D)
            ctx = flash_attention(
                q, k, v, num_heads=self.num_heads, d_model=D, scale=self.scale,
                tq=self.attn_tq, tkv=self.attn_tkv)

        out = linear_bias(ctx.reshape(B * Sq, D), self.wt_o, self.bo,
                          out_dtype=jnp.float32)
        return out.reshape(B, Sq, D)


# ----------------------------- pure-JAX reference -----------------------------

def reference_forward(mha, query, key, value):
    """Mirrors the kernel's bf16-operand / f32-accumulate numerics."""
    bf = lambda a: a.astype(jnp.bfloat16).astype(jnp.float32)
    B, Sq, D = query.shape
    Skv = key.shape[1]
    H, Dh = mha.num_heads, mha.head_dim

    q = bf(jnp.dot(bf(query.reshape(B * Sq, D)), bf(mha.wq).T) + mha.bq)
    k = bf(jnp.dot(bf(key.reshape(B * Skv, D)), bf(mha.wk).T) + mha.bk)
    v = bf(jnp.dot(bf(value.reshape(B * Skv, D)), bf(mha.wv).T) + mha.bv)

    qh = q.reshape(B, Sq, H, Dh).transpose(0, 2, 1, 3)
    kh = k.reshape(B, Skv, H, Dh).transpose(0, 2, 1, 3)
    vh = v.reshape(B, Skv, H, Dh).transpose(0, 2, 1, 3)
    scores = jnp.einsum("bhqd,bhkd->bhqk", qh, kh) * mha.scale
    attn = bf(jax.nn.softmax(scores, axis=-1))
    ctx = bf(jnp.einsum("bhqk,bhkd->bhqd", attn, vh))
    ctx = ctx.transpose(0, 2, 1, 3).reshape(B * Sq, D)
    out = jnp.dot(ctx, bf(mha.wo).T) + mha.bo
    return out.reshape(B, Sq, D)


if __name__ == "__main__":
    B, S, D, H = 2, 256, 512, 4   # head_dim = 128 -> lane-aligned heads
    root = jax.random.PRNGKey(0)
    k_param, k_x, k_kv = jax.random.split(root, 3)

    # attn_tkv=128 forces the multi-KV-tile online-softmax path on the
    # self-attention test; the cross-attention test (Skv=128) exercises the
    # single-KV-tile fast path plus the separate-projection branch.
    mha = MultiHeadAttentionPallas(D, H, k_param, attn_tq=256, attn_tkv=128)

    x = jax.random.normal(k_x, (B, S, D), jnp.float32)

    # Self-attention (fused-QKV path, online softmax over 2 KV tiles).
    out = jax.block_until_ready(mha(x, x, x))
    ref = reference_forward(mha, x, x, x)
    assert out.shape == (B, S, D)
    assert bool(jnp.all(jnp.isfinite(out))), "non-finite output"
    assert bool(jnp.allclose(out, ref, atol=2e-2, rtol=2e-2)), "self-attn mismatch vs reference"

    # Cross-attention (separate projections, shorter KV sequence, fast path).
    kv = jax.random.normal(k_kv, (B, S // 2, D), jnp.float32)
    out2 = jax.block_until_ready(mha(x, kv, kv))
    ref2 = reference_forward(mha, x, kv, kv)
    assert out2.shape == (B, S, D)
    assert bool(jnp.allclose(out2, ref2, atol=2e-2, rtol=2e-2)), "cross-attn mismatch vs reference"

    print("KERNEL_OK")
</pallas_src>

<mosaic_0001>
module attributes {stable_mosaic.version = 11 : i64} {
  func.func @_matmul_bias_kernel(%arg0: i32, %arg1: i32, %arg2: i32, %arg3: memref<512x512xf32, #tpu.memory_space<vmem>>, %arg4: memref<512x512xbf16, #tpu.memory_space<vmem>>, %arg5: memref<1x512xf32, #tpu.memory_space<vmem>>, %arg6: memref<512x512xbf16, #tpu.memory_space<vmem>>, %arg7: memref<512x512xf32, #tpu.memory_space<vmem>>) attributes {dimension_semantics = [#tpu.dimension_semantics<parallel>, #tpu.dimension_semantics<parallel>, #tpu.dimension_semantics<arbitrary>], iteration_bounds = array<i64: 1, 3, 1>, scalar_prefetch = 0 : i64, scratch_operands = 1 : i64, tpu.core_type = #tpu.core_type<tc>, window_params = [{transform_indices = @transform_0, window_bounds = array<i64: 512, 512>}, {transform_indices = @transform_1, window_bounds = array<i64: 512, 512>}, {transform_indices = @transform_2, window_bounds = array<i64: 1, 512>}, {transform_indices = @transform_3, window_bounds = array<i64: 512, 512>}]} {
    %c0_i32 = arith.constant 0 : i32
    %0 = arith.cmpi eq, %arg2, %c0_i32 : i32
    %1 = arith.extui %0 : i1 to i32
    %c0_i32_0 = arith.constant 0 : i32
    %2 = arith.cmpi ne, %1, %c0_i32_0 : i32
    scf.if %2 {
      %cst_10 = arith.constant 0.000000e+00 : f32
      %13 = vector.broadcast %cst_10 : f32 to vector<512x512xf32>
      %c0_11 = arith.constant 0 : index
      %c0_12 = arith.constant 0 : index
      %14 = vector.load %arg7[%c0_11, %c0_12] : memref<512x512xf32, #tpu.memory_space<vmem>>, vector<512x512xf32>
      tpu.vector_store %arg7[%c0_11, %c0_12], %13 {strides = array<i32>} : memref<512x512xf32, #tpu.memory_space<vmem>>, vector<512x512xf32>,
    } else {
    }
    %c0 = arith.constant 0 : index
    %c0_1 = arith.constant 0 : index
    %3 = vector.load %arg7[%c0, %c0_1] : memref<512x512xf32, #tpu.memory_space<vmem>>, vector<512x512xf32>
    %c0_2 = arith.constant 0 : index
    %c0_3 = arith.constant 0 : index
    %4 = vector.load %arg3[%c0_2, %c0_3] : memref<512x512xf32, #tpu.memory_space<vmem>>, vector<512x512xf32>
    %5 = arith.truncf %4 : vector<512x512xf32> to vector<512x512xbf16>
    %c0_4 = arith.constant 0 : index
    %c0_5 = arith.constant 0 : index
    %6 = vector.load %arg4[%c0_4, %c0_5] : memref<512x512xbf16, #tpu.memory_space<vmem>>, vector<512x512xbf16>
    %cst = arith.constant dense<0.000000e+00> : vector<512x512xf32>
    %7 = tpu.matmul %5, %6, %cst {dimension_numbers = #tpu.dot_dimension_numbers<[1], [0], [0], [1], [0, 0, 1, 1], [], []>} : vector<512x512xbf16>, vector<512x512xbf16>, vector<512x512xf32> -> vector<512x512xf32>
    %8 = arith.addf %3, %7 : vector<512x512xf32>
    %c0_6 = arith.constant 0 : index
    %c0_7 = arith.constant 0 : index
    %9 = vector.load %arg7[%c0_6, %c0_7] : memref<512x512xf32, #tpu.memory_space<vmem>>, vector<512x512xf32>
    tpu.vector_store %arg7[%c0_6, %c0_7], %8 {strides = array<i32>} : memref<512x512xf32, #tpu.memory_space<vmem>>, vector<512x512xf32>,
    %c0_i32_8 = arith.constant 0 : i32
    %10 = arith.cmpi eq, %arg2, %c0_i32_8 : i32
    %11 = arith.extui %10 : i1 to i32
    %c0_i32_9 = arith.constant 0 : i32
    %12 = arith.cmpi ne, %11, %c0_i32_9 : i32
    scf.if %12 {
      %c0_10 = arith.constant 0 : index
      %c0_11 = arith.constant 0 : index
      %13 = vector.load %arg7[%c0_10, %c0_11] : memref<512x512xf32, #tpu.memory_space<vmem>>, vector<512x512xf32>
      %c0_12 = arith.constant 0 : index
      %c0_13 = arith.constant 0 : index
      %14 = vector.load %arg5[%c0_12, %c0_13] : memref<1x512xf32, #tpu.memory_space<vmem>>, vector<1x512xf32>
      %15 = vector.broadcast %14 : vector<1x512xf32> to vector<512x512xf32>
      %16 = arith.addf %13, %15 : vector<512x512xf32>
      %17 = arith.truncf %16 : vector<512x512xf32> to vector<512x512xbf16>
      %c0_14 = arith.constant 0 : index
      %c0_15 = arith.constant 0 : index
      %18 = vector.load %arg6[%c0_14, %c0_15] : memref<512x512xbf16, #tpu.memory_space<vmem>>, vector<512x512xbf16>
      tpu.vector_store %arg6[%c0_14, %c0_15], %17 {strides = array<i32>} : memref<512x512xbf16, #tpu.memory_space<vmem>>, vector<512x512xbf16>,
    } else {
    }
    return
  }
  func.func @transform_0(%arg0: i32, %arg1: i32, %arg2: i32) -> (i32, i32) {
    %c0_i32 = arith.constant 0 : i32
    return %arg0, %arg2 : i32, i32
  }
  func.func @transform_1(%arg0: i32, %arg1: i32, %arg2: i32) -> (i32, i32) {
    %c0_i32 = arith.constant 0 : i32
    return %arg2, %arg1 : i32, i32
  }
  func.func @transform_2(%arg0: i32, %arg1: i32, %arg2: i32) -> (i32, i32) {
    %c0_i32 = arith.constant 0 : i32
    %c0_i32_0 = arith.constant 0 : i32
    return %c0_i32, %arg1 : i32, i32
  }
  func.func @transform_3(%arg0: i32, %arg1: i32, %arg2: i32) -> (i32, i32) {
    %c0_i32 = arith.constant 0 : i32
    return %arg0, %arg1 : i32, i32
  }
}

</mosaic_0001>

<bundles_post_ra>
// kernel: tpu_custom_call.1
= control target key start
LH: loop header
LB: loop body
LE: loop exit
PB: predicated region body
PF: predicated region fallthrough
CT: control target
= control target key end

     0   :  { %s9041_s0 = inlined_call_operand.hbm [shape: f32[512,512], index: 0, kind: input, shape index: {}]   ;;  %s9042_s1 = inlined_call_operand.hbm [shape: bf16[512,1536], index: 1, kind: input, shape index: {}]   ;;  %s9043_s2 = inlined_call_operand.hbm [shape: f32[1,1536], index: 2, kind: input, shape index: {}]   ;;  %s9044_s3 = inlined_call_operand.hbm [shape: bf16[512,1536], index: 3, kind: output, shape index: {}]  }
   0x1   :  { %9250 = sst [smem:[#allocation163_spill]] %s9041_s0 }
   0x2   :  { %9251 = sst [smem:[#allocation164_spill]] %s9042_s1 }
   0x3   :  { %8 = vsyncpa [#allocation4], 0 }
   0x4   :  { %9 = vsyncpa [#allocation7], 0 }
   0x5   :  { %11 = vsyncpa [#allocation7 + $0x1], 0 }
   0x6   :  { %12 = vsyncpa [#allocation5], 0 }
   0x7   :  { %14 = vsyncpa [#allocation5 + $0x1], 0  ;;  %s7057_s12 = smov 0   ;;  %s7059_s13 = smov 0  }
   0x8   :  { %s7061_s14 = smov 0   ;;  %s7063_s15 = smov 0  }
   0x9   :  { %s7065_s16 = smov 0   ;;  %s7067_s17 = smov 0  }
   0xa LB: > { %s35_s18 = sadd.s32 1, %s7022_s16  ;;  %s76_s19 = sadd.s32 1, %s7014_s14  ;;  %s7026_s17 = sphi %s7067_s17, %s20_s17   ;;  %s7022_s16 = sphi %s7065_s16, %s9815_s16   ;;  %s7018_s15 = sphi %s7063_s15, %s9814_s15   ;;  %s7014_s14 = sphi %s7061_s14, %s9813_s14   ;;  %s7010_s13 = sphi %s7059_s13, %s9812_s13   ;;  %s7006_s12 = sphi %s7057_s12, %s9811_s12  }
   0xb   : > { %p37_p0 = scmp.ge.s32.totalorder %s35_s18, 3  ;;  %p83_p1 = scmp.ne.s32.totalorder %s7014_s14, %s7010_s13 }
   0xc   : > { %p84_p2 = scmp.eq.s32.totalorder %s7026_s17, 0  ;;  %p6789_p4 = scmp.lt.s32.totalorder %s7026_s17, 3 }
   0xd   : > { %s9817_s18 = smov (%p37_p0, %s35_s18), 0  ;;  %s187_s22 = sand.u32 1, %s7026_s17  }
   0xe   : > { %p7097_p3 = por %p84_p2, %p83_p1  ;;  %s72_s21 = ssub.s32 %s7022_s16, %s9817_s18 }
   0xf   : > { %p74_p5 = scmp.eq.s32.totalorder %s72_s21, 0  ;;  %s189_s23 = sand.u32 1, %s7014_s14  }
  0x10   : > { %s6633_s24 = sshll.u32 %s7022_s16, 4  ;;  %s6106_s26 = sshll.u32 %s189_s23, 10 }
  0x11   : > { %s7108_s25 = scalar_select %p74_p5, %s7014_s14, %s76_s19  }
  0x12   : > { %s9253_s1 = sld [smem:[#allocation164_spill]]  ;;  %s191_s4 = scalar_lea.vmem [#allocation6], %s6106_s26 }
  0x13   : > { %s202_s5 = sshll.u32 %s191_s4, 4  ;;  %p7119_p6 = pnand %p6789_p4, %p7097_p3  ;;  %s203_s5 = int_to_ptr.vmem [resolvable:$true] %s202_s5 }
  0x14   : > { %s7123_s7 = scalar_lea.sflag [#allocation7], %s187_s22  ;;  %s7028_s8 = smov 768  }
  0x15   : > { %s7029_s9 = smov 256   ;;  %s7030_s10 = smov 16  }
  0x16   : > { %s7129_s11 = sadd.s32 4294967295, %s7026_s17   ;;  %s6102_s19 = sadd.s32 4294967294, %s7026_s17  }
  0x17   : > { %p89_p7 = scmp.ne.s32.totalorder %s7010_s13, %s7006_s12  ;;  %p90_p8 = scmp.eq.s32.totalorder %s7129_s11, 0 }
  0x18   : > { %s199_s29 = scalar_lea.hbm %s9253_s1, %s6633_s24  ;;  %p141_p9 = scmp.eq.s32.totalorder %s7129_s11, 2 }
  0x19   : > { %s200_s30 = sshll.u32 %s199_s29, 4  ;;  %p147_p10 = scmp.eq.s32.totalorder %s6102_s19, 2  ;;  %s201_s30 = int_to_ptr.hbm [resolvable:$true] %s200_s30 }
  0x1a   : > { %6780 = dma.hbm_to_vmem [thread:$0]  (!%p7119_p6), %s201_s30, 16384, %s203_s5, %s7123_s7, %s7028_s8, %s7029_s9, %s7030_s10  }
  0x1b   : > { %p7138_p11 = por %p90_p8, %p89_p7  ;;  %p6103_p12 = scmp.ge.s32.totalorder %s7026_s17, 1 }
  0x1c   : > { %p7146_p13 = por %p141_p9, %p83_p1  ;;  %p7150_p0 = por %p147_p10, %p89_p7 }
  0x1d   : > { %p154_p2 = scmp.lt.s32.totalorder %s7026_s17, 4  ;;  %s9258_s0 = sld [smem:[#allocation163_spill]] }
  0x1e   : > { %s7031_s29 = smov [#allocation3]   ;;  %s6109_s4 = sshll.u32 %s189_s23, 2 }
  0x1f   : > { %p7158_p3 = pnand %p6103_p12, %p154_p2  ;;  %s173_s30 = sshll.u32 %s7031_s29, 4  ;;  %s174_s30 = int_to_ptr.vmem [resolvable:$true] %s173_s30 }
  0x20   : > { %s6110_s5 = sshll.u32 %s7022_s16, 2  ;;  %s216_s8 = scalar_lea.vmem [#allocation8], %s6109_s4 }
  0x21   : > { %p6773_p1 = pneg %p7158_p3  ;;  %s224_s9 = sshll.u32 %s216_s8, 4  ;;  %s225_s9 = int_to_ptr.vmem [resolvable:$true] %s224_s9 }
  0x22   : > { %s220_s24 = scalar_lea.hbm %s9043_s2, %s6110_s5  ;;  %s7032_s26 = smov 512  }
  0x23   : > { %s171_s27 = sshll.u32 %s9258_s0, 4  ;;  %p6774_p4 = pnand %p6773_p1, %p90_p8  ;;  %s172_s27 = int_to_ptr.hbm [resolvable:$true] %s171_s27 }
  0x24   : > { %s7033_s0 = smov 32   ;;  %s222_s1 = sshll.u32 %s220_s24, 4  ;;  %s223_s1 = int_to_ptr.hbm [resolvable:$true] %s222_s1 }
  0x25   : > { %6776 = dma.hbm_to_vmem [thread:$0]  (!%p6774_p4), %s172_s27, 32768, %s174_s30, [#allocation4], %s7032_s26, %s7032_s26, %s7033_s0  }
  0x26   : > { %6783 = dma.hbm_to_vmem [thread:$0]  (!%p7119_p6), %s223_s1, 64, %s225_s9, %s7123_s7  }
  0x27   : > { %233 = sbr.rel (%p7158_p3) target bundleno = 2270 (0x8de), region = 32 }
  0x2c   : > { %6993 = dma.done.wait (%p90_p8), [#allocation4], 32768  }
  0x2d   : > { %6995 = vsyncadd (%p90_p8), [#allocation4], 4294934528  ;;  %s240_s23 = sand.u32 1, %s7129_s11   ;;  %s7183_s29 = sand.u32 1, %s7010_s13  }
  0x2e   : > { %s6113_s0 = sshll.u32 %s7183_s29, 10  ;;  %s241_s6 = scalar_lea.sflag [#allocation7], %s240_s23 }
  0x2f   : > { %s7188_s1 = scalar_lea.vmem [#allocation6], %s6113_s0 }
  0x30   : > { %6997 = dma.done.wait (%p7138_p11), %s241_s6, 16448  }
  0x31   : > { %6999 = vsyncadd (%p7138_p11), %s241_s6, 4294950848  ;;  %v6230_v0 = vld [vmem:[%s7188_s1 + $0xe0] sm:$0xf]  ;;  %v6664_v1 = vld [vmem:[%s7188_s1 + $0xec] sm:$0xf0]  ;;  %s6114_s7 = sshll.u32 %s7183_s29, 2 }
  0x32   : > { %v6358_v2 = vld [vmem:[%s7188_s1 + $0x1e0] sm:$0xf]  ;;  %v6231_v3 = vor.u32 %v6664_v1, %v6230_v0  ;;  %v6696_v4 = vld [vmem:[%s7188_s1 + $0x1ec] sm:$0xf0]  ;;  %s7894_s11 = scalar_lea.vmem [#allocation8], %s6114_s7  ;;  %s7907_s20 = scalar_lea.vmem [#allocation9], %s6113_s0 }
  0x33   : > { %v6486_v5 = vld [vmem:[%s7188_s1 + $0x2e0] sm:$0xf]  ;;  %v6728_v6 = vld [vmem:[%s7188_s1 + $0x2ec] sm:$0xf0]  ;;  %v6359_v7 = vor.u32 %v6696_v4, %v6358_v2  ;;  %s6762_s27 = sshll.u32 %s7018_s15, 4  ;;  %s5971_s5 = sshll.u32 %s7907_s20, 4  ;;  %s5972_s5 = int_to_ptr.vmem [resolvable:$true] %s5971_s5 }
  0x34   : > { %v6487_v8 = vor.u32 %v6728_v6, %v6486_v5  ;;  %v6614_v9 = vld [vmem:[%s7188_s1 + $0x3e0] sm:$0xf]  ;;  %v6760_v10 = vld [vmem:[%s7188_s1 + $0x3ec] sm:$0xf0]  ;;  %1958 = vmatpush.bf16.msra.mxu0 %v6231_v3  ;;  %s5970_s4 = scalar_lea.hbm %s9044_s3, %s6762_s27  ;;  %s5956_s15 = scalar_lea.sflag [#allocation5], %s7183_s29 }
  0x35   : > { %v6214_v11 = vld [vmem:[%s7188_s1 + $0xc0] sm:$0xf]  ;;  %v6615_v12 = vor.u32 %v6760_v10, %v6614_v9  ;;  %v6660_v13 = vld [vmem:[%s7188_s1 + $0xcc] sm:$0xf0]  ;;  %2127 = vmatpush.bf16.msra.mxu1 %v6359_v7  ;;  %s5973_s8 = sshll.u32 %s5970_s4, 4  ;;  %s6960_s26 = scalar_lea.hbm %s9044_s3, 3072  ;;  %s5974_s8 = int_to_ptr.hbm [resolvable:$true] %s5973_s8 }
  0x36   : > { %v6342_v14 = vld [vmem:[%s7188_s1 + $0x1c0] sm:$0xf]  ;;  %v6692_v15 = vld [vmem:[%s7188_s1 + $0x1cc] sm:$0xf0]  ;;  %2296 = vmatpush.bf16.msra.mxu2 %v6487_v8  ;;  %v6215_v16 = vor.u32 %v6660_v13, %v6214_v11  ;;  %s6954_s9 = sshra.s32 %s5974_s8, 4  ;;  %s6955_s9 = int_to_ptr.hbm [resolvable:$true] %s6954_s9 }
  0x37   : > { %v6343_v17 = vor.u32 %v6692_v15, %v6342_v14  ;;  %v6470_v18 = vld [vmem:[%s7188_s1 + $0x2c0] sm:$0xf]  ;;  %v6724_v19 = vld [vmem:[%s7188_s1 + $0x2cc] sm:$0xf0]  ;;  %2465 = vmatpush.bf16.msra.mxu3 %v6615_v12  ;;  %s6956_s10 = scalar_lea.hbm %s6955_s9, 1024  ;;  %p6961_p8 = scmp.lt.s32.totalorder %s6955_s9, %s9044_s3 }
  0x38   : > { %v6598_v20 = vld [vmem:[%s7188_s1 + $0x3c0] sm:$0xf]  ;;  %v6471_v21 = vor.u32 %v6724_v19, %v6470_v18  ;;  %v6756_v22 = vld [vmem:[%s7188_s1 + $0x3cc] sm:$0xf0]  ;;  %1959 = vmatpush.bf16.msra.mxu0 %v6215_v16  ;;  %p6957_p5 = scmp.ne.s32.totalorder %s6955_s9, %s6956_s10  ;;  %p6962_p9 = scmp.lt.s32.totalorder %s6960_s26, %s6956_s10 }
  0x39   : > { %v6198_v23 = vld [vmem:[%s7188_s1 + $0xa0] sm:$0xf]  ;;  %v6656_v24 = vld [vmem:[%s7188_s1 + $0xac] sm:$0xf0]  ;;  %v6599_v25 = vor.u32 %v6756_v22, %v6598_v20  ;;  %2128 = vmatpush.bf16.msra.mxu1 %v6343_v17 }
  0x3a   : > { %v6326_v26 = vld [vmem:[%s7188_s1 + $0x1a0] sm:$0xf]  ;;  %v6688_v27 = vld [vmem:[%s7188_s1 + $0x1ac] sm:$0xf0]  ;;  %v6199_v29 = vor.u32 %v6656_v24, %v6198_v23  ;;  %2297 = vmatpush.bf16.msra.mxu2 %v6471_v21  ;;  %p6958_p6 = pnand %p6957_p5, %p7146_p13  ;;  %p6963_p10 = por %p6962_p9, %p6961_p8 }
  0x3b   : > { %v6454_v28 = vld [vmem:[%s7188_s1 + $0x2a0] sm:$0xf]  ;;  %v6720_v30 = vld [vmem:[%s7188_s1 + $0x2ac] sm:$0xf0]  ;;  %v6327_v33 = vor.u32 %v6688_v27, %v6326_v26  ;;  %2466 = vmatpush.bf16.msra.mxu3 %v6599_v25 }
  0x3c   : > { %v6582_v31 = vld [vmem:[%s7188_s1 + $0x3a0] sm:$0xf]  ;;  %v6752_v32 = vld [vmem:[%s7188_s1 + $0x3ac] sm:$0xf0]  ;;  %v6455_v34 = vor.u32 %v6720_v30, %v6454_v28  ;;  %1960 = vmatpush.bf16.msra.mxu0 %v6199_v29  ;;  %v807_v30 = vld [vmem:[#allocation3 + $0x8] sm:$0xff]  ;;  %p6959_p7 = pneg %p6958_p6 }
  0x3d   : > { %v6182_v35 = vld [vmem:[%s7188_s1 + $0x80] sm:$0xf]  ;;  %v6652_v36 = vld [vmem:[%s7188_s1 + $0x8c] sm:$0xf0]  ;;  %v6583_v38 = vor.u32 %v6752_v32, %v6582_v31  ;;  %2129 = vmatpush.bf16.msra.mxu1 %v6327_v33  ;;  %v6726_v31 = vld [vmem:[%s7188_s1 + $0x2e4] sm:$0xf] }
  0x3e   : > { %v6310_v37 = vld [vmem:[%s7188_s1 + $0x180] sm:$0xf]  ;;  %v6684_v39 = vld [vmem:[%s7188_s1 + $0x18c] sm:$0xf0]  ;;  %v6183_v44 = vor.u32 %v6652_v36, %v6182_v35  ;;  %2298 = vmatpush.bf16.msra.mxu2 %v6455_v34  ;;  %v6488_v32 = vld [vmem:[%s7188_s1 + $0x2f0] sm:$0xf0]  ;;  %p6964_p11 = pnand %p6963_p10, %p6959_p7 }
  0x3f   : > { %v6438_v40 = vld [vmem:[%s7188_s1 + $0x280] sm:$0xf]  ;;  %v6716_v41 = vld [vmem:[%s7188_s1 + $0x28c] sm:$0xf0]  ;;  %v6311_v45 = vor.u32 %v6684_v39, %v6310_v37  ;;  %2467 = vmatpush.bf16.msra.mxu3 %v6583_v38  ;;  %v811_v34 = vld [vmem:[#allocation3 + $0x28] sm:$0xff] }
  0x40   : > { %v6566_v42 = vld [vmem:[%s7188_s1 + $0x380] sm:$0xf]  ;;  %v6748_v43 = vld [vmem:[%s7188_s1 + $0x38c] sm:$0xf0]  ;;  %v6439_v46 = vor.u32 %v6716_v41, %v6438_v40  ;;  %1961 = vmatpush.bf16.msra.mxu0 %v6183_v44  ;;  %v6758_v35 = vld [vmem:[%s7188_s1 + $0x3e4] sm:$0xf]  ;;  %v6491_v44 = vor.u32 %v6726_v31, %v6488_v32 }
  0x41   : > { %v6166_v47 = vld [vmem:[%s7188_s1 + $0x60] sm:$0xf]  ;;  %v6648_v48 = vld [vmem:[%s7188_s1 + $0x6c] sm:$0xf0]  ;;  %v6567_v50 = vor.u32 %v6748_v43, %v6566_v42  ;;  %2130 = vmatpush.bf16.msra.mxu1 %v6311_v45  ;;  %v6616_v36 = vld [vmem:[%s7188_s1 + $0x3f0] sm:$0xf0] }
  0x42   : > { %v6294_v49 = vld [vmem:[%s7188_s1 + $0x160] sm:$0xf]  ;;  %v6680_v51 = vld [vmem:[%s7188_s1 + $0x16c] sm:$0xf0]  ;;  %v6167_v56 = vor.u32 %v6648_v48, %v6166_v47  ;;  %2299 = vmatpush.bf16.msra.mxu2 %v6439_v46  ;;  %v809_v41 = vld [vmem:[#allocation3 + $0x18] sm:$0xff]  ;;  %v6619_v48 = vor.u32 %v6758_v35, %v6616_v36 }
  0x43   : > { %v6422_v52 = vld [vmem:[%s7188_s1 + $0x260] sm:$0xf]  ;;  %v6712_v53 = vld [vmem:[%s7188_s1 + $0x26c] sm:$0xf0]  ;;  %v6295_v57 = vor.u32 %v6680_v51, %v6294_v49  ;;  %2468 = vmatpush.bf16.msra.mxu3 %v6567_v50  ;;  %v813_v43 = vld [vmem:[#allocation3 + $0x38] sm:$0xff]  ;;  %v7268_v51 = vpack.c.bf16 %v811_v34, %v807_v30 }
  0x44   : > { %v6550_v54 = vld [vmem:[%s7188_s1 + $0x360] sm:$0xf]  ;;  %v6744_v55 = vld [vmem:[%s7188_s1 + $0x36c] sm:$0xf0]  ;;  %v6423_v58 = vor.u32 %v6712_v53, %v6422_v52  ;;  %1962 = vmatpush.bf16.msra.mxu0 %v6167_v56  ;;  %v6662_v45 = vld [vmem:[%s7188_s1 + $0xe4] sm:$0xf]  ;;  %v7272_v53 = vpack.c.bf16 %v813_v43, %v809_v41 }
  0x45   : > { %v6150_v59 = vld [vmem:[%s7188_s1 + $0x40] sm:$0xf]  ;;  %v6644_v60 = vld [vmem:[%s7188_s1 + $0x4c] sm:$0xf0]  ;;  %v6551_v62 = vor.u32 %v6744_v55, %v6550_v54  ;;  %2131 = vmatpush.bf16.msra.mxu1 %v6295_v57  ;;  %v6232_v46 = vld [vmem:[%s7188_s1 + $0xf0] sm:$0xf0] }
  0x46   : > { %v6278_v61 = vld [vmem:[%s7188_s1 + $0x140] sm:$0xf]  ;;  %v6676_v63 = vld [vmem:[%s7188_s1 + $0x14c] sm:$0xf0]  ;;  %v6151_v4 = vor.u32 %v6644_v60, %v6150_v59  ;;  %2300 = vmatpush.bf16.msra.mxu2 %v6423_v58  ;;  %v6694_v49 = vld [vmem:[%s7188_s1 + $0x1e4] sm:$0xf]  ;;  %v6235_v54 = vor.u32 %v6662_v45, %v6232_v46 }
  0x47   : > { %v6406_v0 = vld [vmem:[%s7188_s1 + $0x240] sm:$0xf]  ;;  %v6708_v1 = vld [vmem:[%s7188_s1 + $0x24c] sm:$0xf0]  ;;  %v6279_v5 = vor.u32 %v6676_v63, %v6278_v61  ;;  %2469 = vmatpush.bf16.msra.mxu3 %v6551_v62  ;;  %v6360_v50 = vld [vmem:[%s7188_s1 + $0x1f0] sm:$0xf0] }
  0x48   : > { %v6534_v2 = vld [vmem:[%s7188_s1 + $0x340] sm:$0xf]  ;;  %v6740_v3 = vld [vmem:[%s7188_s1 + $0x34c] sm:$0xf0]  ;;  %v6407_v6 = vor.u32 %v6708_v1, %v6406_v0  ;;  %1963 = vmatpush.bf16.msra.mxu0 %v6151_v4  ;;  %v6363_v55 = vor.u32 %v6694_v49, %v6360_v50  ;;  %v815_v58 = vld [vmem:[#allocation3 + $0x48] sm:$0xff] }
  0x49   : > { %v6134_v7 = vld [vmem:[%s7188_s1 + $0x20] sm:$0xf]  ;;  %v6640_v8 = vld [vmem:[%s7188_s1 + $0x2c] sm:$0xf0]  ;;  %v6535_v10 = vor.u32 %v6740_v3, %v6534_v2  ;;  %2132 = vmatpush.bf16.msra.mxu1 %v6279_v5  ;;  %v819_v59 = vld [vmem:[#allocation3 + $0x68] sm:$0xff] }
  0x4a   : > { %v6262_v9 = vld [vmem:[%s7188_s1 + $0x120] sm:$0xf]  ;;  %v6672_v11 = vld [vmem:[%s7188_s1 + $0x12c] sm:$0xf0]  ;;  %v6135_v17 = vor.u32 %v6640_v8, %v6134_v7  ;;  %2301 = vmatpush.bf16.msra.mxu2 %v6407_v6  ;;  %v817_v62 = vld [vmem:[#allocation3 + $0x58] sm:$0xff]  ;;  %v7280_v1 = vpack.c.bf16 %v819_v59, %v815_v58 }
  0x4b   : > { %v6390_v12 = vld [vmem:[%s7188_s1 + $0x220] sm:$0xf]  ;;  %v6704_v13 = vld [vmem:[%s7188_s1 + $0x22c] sm:$0xf0]  ;;  %v6263_v21 = vor.u32 %v6672_v11, %v6262_v9  ;;  %2470 = vmatpush.bf16.msra.mxu3 %v6535_v10  ;;  %v821_v63 = vld [vmem:[#allocation3 + $0x78] sm:$0xff] }
  0x4c   : > { %v6518_v14 = vld [vmem:[%s7188_s1 + $0x320] sm:$0xf]  ;;  %v6736_v15 = vld [vmem:[%s7188_s1 + $0x32c] sm:$0xf0]  ;;  %v6391_v22 = vor.u32 %v6704_v13, %v6390_v12  ;;  %1964 = vmatpush.bf16.msra.mxu0 %v6135_v17  ;;  %v7284_v3 = vpack.c.bf16 %v821_v63, %v817_v62  ;;  %v823_v6 = vld [vmem:[#allocation3 + $0x88] sm:$0xff] }
  0x4d   : > { %v6118_v16 = vld [vmem:[%s7188_s1] sm:$0xf]  ;;  %v6636_v18 = vld [vmem:[%s7188_s1 + $0xc] sm:$0xf0]  ;;  %v6519_v26 = vor.u32 %v6736_v15, %v6518_v14  ;;  %2133 = vmatpush.bf16.msra.mxu1 %v6263_v21  ;;  %v827_v7 = vld [vmem:[#allocation3 + $0xa8] sm:$0xff] }
  0x4e   : > { %v6246_v19 = vld [vmem:[%s7188_s1 + $0x100] sm:$0xf]  ;;  %v6668_v20 = vld [vmem:[%s7188_s1 + $0x10c] sm:$0xf0]  ;;  %v6119_v33 = vor.u32 %v6636_v18, %v6118_v16  ;;  %2302 = vmatpush.bf16.msra.mxu2 %v6391_v22  ;;  %9261 = vst [vmem:[#allocation14_spill] sm:$0xff] %v7284_v3  ;;  %v825_v10 = vld [vmem:[#allocation3 + $0x98] sm:$0xff]  ;;  %v7292_v13 = vpack.c.bf16 %v827_v7, %v823_v6 }
  0x4f   : > { %v6374_v23 = vld [vmem:[%s7188_s1 + $0x200] sm:$0xf]  ;;  %v6700_v24 = vld [vmem:[%s7188_s1 + $0x20c] sm:$0xf0]  ;;  %v6247_v37 = vor.u32 %v6668_v20, %v6246_v19  ;;  %2471 = vmatpush.bf16.msra.mxu3 %v6519_v26  ;;  %v829_v11 = vld [vmem:[#allocation3 + $0xb8] sm:$0xff] }
  0x50   : > { %v6502_v25 = vld [vmem:[%s7188_s1 + $0x300] sm:$0xf]  ;;  %v6732_v27 = vld [vmem:[%s7188_s1 + $0x30c] sm:$0xf0]  ;;  %v6375_v38 = vor.u32 %v6700_v24, %v6374_v23  ;;  %1965 = vmatpush.bf16.msra.mxu0 %v6119_v33  ;;  %9263 = vst [vmem:[#allocation16_spill] sm:$0xff] %v7292_v13  ;;  %v7296_v15 = vpack.c.bf16 %v829_v11, %v825_v10  ;;  %v831_v30 = vld [vmem:[#allocation3 + $0xc8] sm:$0xff] }
  0x51   : > { %v806_v28 = vld [vmem:[#allocation3] sm:$0xff]  ;;  %v808_v39 = vld [vmem:[#allocation3 + $0x10] sm:$0xff]  ;;  %v6503_v42 = vor.u32 %v6732_v27, %v6502_v25  ;;  %2134 = vmatpush.bf16.msra.mxu1 %v6247_v37  ;;  %v835_v31 = vld [vmem:[#allocation3 + $0xe8] sm:$0xff] }
  0x52   : > { %v810_v29 = vld [vmem:[#allocation3 + $0x20] sm:$0xff]  ;;  %v812_v40 = vld [vmem:[#allocation3 + $0x30] sm:$0xff]  ;;  %2303 = vmatpush.bf16.msra.mxu2 %v6375_v38  ;;  %9265 = vst [vmem:[#allocation18_spill] sm:$0xff] %v7296_v15  ;;  %v833_v34 = vld [vmem:[#allocation3 + $0xd8] sm:$0xff]  ;;  %v7312_v37 = vpack.c.bf16 %v835_v31, %v831_v30 }
  0x53   : > { %v7264_v47 = vpack.c.bf16 %v810_v29, %v806_v28  ;;  %v7270_v52 = vpack.c.bf16 %v812_v40, %v808_v39  ;;  %2472 = vmatpush.bf16.msra.mxu3 %v6503_v42  ;;  %v814_v56 = vld [vmem:[#allocation3 + $0x40] sm:$0xff]  ;;  %v816_v60 = vld [vmem:[#allocation3 + $0x50] sm:$0xff]  ;;  %v837_v35 = vld [vmem:[#allocation3 + $0xf8] sm:$0xff] }
  0x54   : > { %2135 = vmatmul.bf16.vlgmr.msra.gmra.mxu1 %v7268_v51  ;;  %2634 = vmatpush.bf16.msrb.mxu0 %v6235_v54  ;;  %v818_v57 = vld [vmem:[#allocation3 + $0x60] sm:$0xff]  ;;  %v820_v61 = vld [vmem:[#allocation3 + $0x70] sm:$0xff]  ;;  %v7316_v39 = vpack.c.bf16 %v837_v35, %v833_v34  ;;  %v839_v42 = vld [vmem:[#allocation3 + $0x108] sm:$0xff] }
  0x55   : > { %1966 = vmatmul.bf16.vlgmr.msra.gmra.mxu0 %v7264_v47  ;;  %2304 = vmatmul.bf16.vlgmr.msra.gmra.mxu2 %v7270_v52  ;;  %v7278_v0 = vpack.c.bf16 %v818_v57, %v814_v56  ;;  %v7282_v2 = vpack.c.bf16 %v820_v61, %v816_v60  ;;  %v822_v4 = vld [vmem:[#allocation3 + $0x80] sm:$0xff]  ;;  %v824_v8 = vld [vmem:[#allocation3 + $0x90] sm:$0xff]  ;;  %v843_v43 = vld [vmem:[#allocation3 + $0x128] sm:$0xff] }
  0x56   : > { %2972 = vmatpush.bf16.msrb.mxu2 %v6491_v44  ;;  %2473 = vmatmul.bf16.vlgmr.msra.gmra.mxu3 %v7272_v53  ;;  %v826_v5 = vld [vmem:[#allocation3 + $0xa0] sm:$0xff]  ;;  %v828_v9 = vld [vmem:[#allocation3 + $0xb0] sm:$0xff]  ;;  %v841_v46 = vld [vmem:[#allocation3 + $0x118] sm:$0xff]  ;;  %v7324_v50 = vpack.c.bf16 %v843_v43, %v839_v42 }
  0x57   : > { %3141 = vmatpush.bf16.msrb.mxu3 %v6619_v48  ;;  %2803 = vmatpush.bf16.msrb.mxu1 %v6363_v55  ;;  %9260 = vst [vmem:[#allocation13_spill] sm:$0xff] %v7282_v2  ;;  %v7290_v12 = vpack.c.bf16 %v826_v5, %v822_v4  ;;  %v7294_v14 = vpack.c.bf16 %v828_v9, %v824_v8  ;;  %v6722_v16 = vld [vmem:[%s7188_s1 + $0x2c4] sm:$0xf]  ;;  %v6472_v17 = vld [vmem:[%s7188_s1 + $0x2d0] sm:$0xf0]  ;;  %v845_v48 = vld [vmem:[#allocation3 + $0x138] sm:$0xff] }
  0x58   : > { %v6754_v18 = vld [vmem:[%s7188_s1 + $0x3c4] sm:$0xf]  ;;  %v6475_v19 = vor.u32 %v6722_v16, %v6472_v17  ;;  %v6600_v20 = vld [vmem:[%s7188_s1 + $0x3d0] sm:$0xf0]  ;;  %v7328_v55 = vpack.c.bf16 %v845_v48, %v841_v46  ;;  %v847_v58 = vld [vmem:[#allocation3 + $0x148] sm:$0xff] }
  0x59   : > { %9262 = vst [vmem:[#allocation15_spill] sm:$0xff] %v7290_v12  ;;  %v6658_v21 = vld [vmem:[%s7188_s1 + $0xc4] sm:$0xf]  ;;  %v6216_v22 = vld [vmem:[%s7188_s1 + $0xd0] sm:$0xf0]  ;;  %v6603_v23 = vor.u32 %v6754_v18, %v6600_v20  ;;  %v851_v59 = vld [vmem:[#allocation3 + $0x168] sm:$0xff] }
  0x5a   : > { %9264 = vst [vmem:[#allocation17_spill] sm:$0xff] %v7294_v14  ;;  %v6219_v24 = vor.u32 %v6658_v21, %v6216_v22  ;;  %v6690_v25 = vld [vmem:[%s7188_s1 + $0x1c4] sm:$0xf]  ;;  %v6344_v26 = vld [vmem:[%s7188_s1 + $0x1d0] sm:$0xf0]  ;;  %2973 = vmatpush.bf16.msrb.mxu2 %v6475_v19  ;;  %v849_v62 = vld [vmem:[#allocation3 + $0x158] sm:$0xff]  ;;  %v7336_v5 = vpack.c.bf16 %v851_v59, %v847_v58 }
  0x5b   : > { %v6347_v27 = vor.u32 %v6690_v25, %v6344_v26  ;;  %3142 = vmatpush.bf16.msrb.mxu3 %v6603_v23  ;;  %v830_v28 = vld [vmem:[#allocation3 + $0xc0] sm:$0xff]  ;;  %v832_v32 = vld [vmem:[#allocation3 + $0xd0] sm:$0xff]  ;;  %v853_v63 = vld [vmem:[#allocation3 + $0x178] sm:$0xff] }
  0x5c   : > { %2635 = vmatpush.bf16.msrb.mxu0 %v6219_v24  ;;  %v834_v29 = vld [vmem:[#allocation3 + $0xe0] sm:$0xff]  ;;  %v836_v33 = vld [vmem:[#allocation3 + $0xf0] sm:$0xff]  ;;  %v7340_v7 = vpack.c.bf16 %v853_v63, %v849_v62  ;;  %v855_v10 = vld [vmem:[#allocation3 + $0x188] sm:$0xff] }
  0x5d   : > { %2804 = vmatpush.bf16.msrb.mxu1 %v6347_v27  ;;  %v7310_v36 = vpack.c.bf16 %v834_v29, %v830_v28  ;;  %v7314_v38 = vpack.c.bf16 %v836_v33, %v832_v32  ;;  %v838_v40 = vld [vmem:[#allocation3 + $0x100] sm:$0xff]  ;;  %v840_v44 = vld [vmem:[#allocation3 + $0x110] sm:$0xff]  ;;  %v859_v11 = vld [vmem:[#allocation3 + $0x1a8] sm:$0xff] }
  0x5e   : > { %v842_v41 = vld [vmem:[#allocation3 + $0x120] sm:$0xff]  ;;  %v844_v45 = vld [vmem:[#allocation3 + $0x130] sm:$0xff]  ;;  %9267 = vst [vmem:[#allocation20_spill] sm:$0xff] %v7340_v7  ;;  %v857_v18 = vld [vmem:[#allocation3 + $0x198] sm:$0xff]  ;;  %v7348_v21 = vpack.c.bf16 %v859_v11, %v855_v10 }
  0x5f   : > { %v7322_v49 = vpack.c.bf16 %v842_v41, %v838_v40  ;;  %v7326_v54 = vpack.c.bf16 %v844_v45, %v840_v44  ;;  %v846_v56 = vld [vmem:[#allocation3 + $0x140] sm:$0xff]  ;;  %v848_v60 = vld [vmem:[#allocation3 + $0x150] sm:$0xff]  ;;  %v861_v19 = vld [vmem:[#allocation3 + $0x1b8] sm:$0xff] }
  0x60   : > { %v850_v57 = vld [vmem:[#allocation3 + $0x160] sm:$0xff]  ;;  %v852_v61 = vld [vmem:[#allocation3 + $0x170] sm:$0xff]  ;;  %9269 = vst [vmem:[#allocation22_spill] sm:$0xff] %v7348_v21  ;;  %v7352_v23 = vpack.c.bf16 %v861_v19, %v857_v18  ;;  %v863_v32 = vld [vmem:[#allocation3 + $0x1c8] sm:$0xff] }
  0x61   : > { %v7334_v4 = vpack.c.bf16 %v850_v57, %v846_v56  ;;  %v7338_v6 = vpack.c.bf16 %v852_v61, %v848_v60  ;;  %v854_v8 = vld [vmem:[#allocation3 + $0x180] sm:$0xff]  ;;  %v856_v16 = vld [vmem:[#allocation3 + $0x190] sm:$0xff]  ;;  %v867_v33 = vld [vmem:[#allocation3 + $0x1e8] sm:$0xff] }
  0x62   : > { %v858_v9 = vld [vmem:[#allocation3 + $0x1a0] sm:$0xff]  ;;  %v860_v17 = vld [vmem:[#allocation3 + $0x1b0] sm:$0xff]  ;;  %9271 = vst [vmem:[#allocation24_spill] sm:$0xff] %v7352_v23  ;;  %v865_v45 = vld [vmem:[#allocation3 + $0x1d8] sm:$0xff]  ;;  %v7368_v57 = vpack.c.bf16 %v867_v33, %v863_v32 }
  0x63   : > { %9266 = vst [vmem:[#allocation19_spill] sm:$0xff] %v7338_v6  ;;  %v7346_v20 = vpack.c.bf16 %v858_v9, %v854_v8  ;;  %v7350_v22 = vpack.c.bf16 %v860_v17, %v856_v16  ;;  %v6718_v24 = vld [vmem:[%s7188_s1 + $0x2a4] sm:$0xf]  ;;  %v6456_v25 = vld [vmem:[%s7188_s1 + $0x2b0] sm:$0xf0]  ;;  %v869_v46 = vld [vmem:[#allocation3 + $0x1f8] sm:$0xff] }
  0x64   : > { %2140 = vmatmul.bf16.gmra.mxu1 %v7280_v1  ;;  %v6750_v26 = vld [vmem:[%s7188_s1 + $0x3a4] sm:$0xf]  ;;  %v6459_v27 = vor.u32 %v6718_v24, %v6456_v25  ;;  %v6584_v28 = vld [vmem:[%s7188_s1 + $0x3b0] sm:$0xf0]  ;;  %v7372_v59 = vpack.c.bf16 %v869_v46, %v865_v45  ;;  %v871_v62 = vld [vmem:[#allocation3 + $0x208] sm:$0xff] }
  0x65   : > { %1971 = vmatmul.bf16.gmra.mxu0 %v7278_v0  ;;  %2309 = vmatmul.bf16.gmra.mxu2 %v7282_v2  ;;  %9268 = vst [vmem:[#allocation21_spill] sm:$0xff] %v7346_v20  ;;  %v6587_v29 = vor.u32 %v6750_v26, %v6584_v28  ;;  %v862_v30 = vld [vmem:[#allocation3 + $0x1c0] sm:$0xff]  ;;  %v6200_v35 = vld [vmem:[%s7188_s1 + $0xb0] sm:$0xf0]  ;;  %v875_v63 = vld [vmem:[#allocation3 + $0x228] sm:$0xff] }
  0x66   : > { %2478 = vmatmul.bf16.gmra.mxu3 %v7284_v3  ;;  %9270 = vst [vmem:[#allocation23_spill] sm:$0xff] %v7350_v22  ;;  %2974 = vmatpush.bf16.msrb.mxu2 %v6459_v27  ;;  %v866_v31 = vld [vmem:[#allocation3 + $0x1e0] sm:$0xff]  ;;  %v864_v41 = vld [vmem:[#allocation3 + $0x1d0] sm:$0xff]  ;;  %v873_v10 = vld [vmem:[#allocation3 + $0x218] sm:$0xff]  ;;  %v7380_v18 = vpack.c.bf16 %v875_v63, %v871_v62 }
  0x67   : > { %3143 = vmatpush.bf16.msrb.mxu3 %v6587_v29  ;;  %v6654_v34 = vld [vmem:[%s7188_s1 + $0xa4] sm:$0xf]  ;;  %v868_v42 = vld [vmem:[#allocation3 + $0x1f0] sm:$0xff]  ;;  %v7366_v56 = vpack.c.bf16 %v866_v31, %v862_v30  ;;  %v877_v11 = vld [vmem:[#allocation3 + $0x238] sm:$0xff] }
  0x68   : > { %v6686_v40 = vld [vmem:[%s7188_s1 + $0x1a4] sm:$0xf]  ;;  %v6203_v43 = vor.u32 %v6654_v34, %v6200_v35  ;;  %v6328_v44 = vld [vmem:[%s7188_s1 + $0x1b0] sm:$0xf0]  ;;  %v7370_v58 = vpack.c.bf16 %v868_v42, %v864_v41  ;;  %v7384_v25 = vpack.c.bf16 %v877_v11, %v873_v10  ;;  %v883_v41 = vld [vmem:[#allocation3 + $0x268] sm:$0xff] }
  0x69   : > { %v6331_v48 = vor.u32 %v6686_v40, %v6328_v44  ;;  %v870_v60 = vld [vmem:[#allocation3 + $0x200] sm:$0xff]  ;;  %v872_v8 = vld [vmem:[#allocation3 + $0x210] sm:$0xff]  ;;  %v879_v40 = vld [vmem:[#allocation3 + $0x248] sm:$0xff] }
  0x6a   : > { %2636 = vmatpush.bf16.msrb.mxu0 %v6203_v43  ;;  %v874_v61 = vld [vmem:[#allocation3 + $0x220] sm:$0xff]  ;;  %v876_v9 = vld [vmem:[#allocation3 + $0x230] sm:$0xff]  ;;  %9273 = vst [vmem:[#allocation26_spill] sm:$0xff] %v7384_v25  ;;  %v881_v44 = vld [vmem:[#allocation3 + $0x258] sm:$0xff]  ;;  %v7394_v63 = vpack.c.bf16 %v883_v41, %v879_v40 }
  0x6b   : > { %2805 = vmatpush.bf16.msrb.mxu1 %v6331_v48  ;;  %v7378_v16 = vpack.c.bf16 %v874_v61, %v870_v60  ;;  %v7382_v19 = vpack.c.bf16 %v876_v9, %v872_v8  ;;  %v878_v34 = vld [vmem:[#allocation3 + $0x240] sm:$0xff]  ;;  %v880_v42 = vld [vmem:[#allocation3 + $0x250] sm:$0xff]  ;;  %v885_v45 = vld [vmem:[#allocation3 + $0x278] sm:$0xff] }
  0x6c   : > { %v882_v35 = vld [vmem:[#allocation3 + $0x260] sm:$0xff]  ;;  %v884_v43 = vld [vmem:[#allocation3 + $0x270] sm:$0xff]  ;;  %9275 = vst [vmem:[#allocation28_spill] sm:$0xff] %v7394_v63  ;;  %v7398_v10 = vpack.c.bf16 %v885_v45, %v881_v44  ;;  %v891_v40 = vld [vmem:[#allocation3 + $0x2a8] sm:$0xff] }
  0x6d   : > { %9272 = vst [vmem:[#allocation25_spill] sm:$0xff] %v7382_v19  ;;  %v7392_v48 = vpack.c.bf16 %v882_v35, %v878_v34  ;;  %v7396_v8 = vpack.c.bf16 %v884_v43, %v880_v42  ;;  %v890_v34 = vld [vmem:[#allocation3 + $0x2a0] sm:$0xff]  ;;  %v887_v35 = vld [vmem:[#allocation3 + $0x288] sm:$0xff]  ;;  %v888_v41 = vld [vmem:[#allocation3 + $0x290] sm:$0xff] }
  0x6e   : > { %9277 = vst [vmem:[#allocation30_spill] sm:$0xff] %v7398_v10  ;;  %v892_v42 = vld [vmem:[#allocation3 + $0x2b0] sm:$0xff]  ;;  %v889_v43 = vld [vmem:[#allocation3 + $0x298] sm:$0xff] }
  0x6f   : > { %9274 = vst [vmem:[#allocation27_spill] sm:$0xff] %v7392_v48  ;;  %v893_v44 = vld [vmem:[#allocation3 + $0x2b8] sm:$0xff] }
  0x70   : > { %9276 = vst [vmem:[#allocation29_spill] sm:$0xff] %v7396_v8 }
  0x74   : > { %2145 = vmatmul.bf16.gmra.mxu1 %v7292_v13 }
  0x75   : > { %1976 = vmatmul.bf16.gmra.mxu0 %v7290_v12  ;;  %2314 = vmatmul.bf16.gmra.mxu2 %v7294_v14 }
  0x76   : > { %2483 = vmatmul.bf16.gmra.mxu3 %v7296_v15 }
  0x84   : > { %2150 = vmatmul.bf16.gmra.mxu1 %v7312_v37 }
  0x85   : > { %1981 = vmatmul.bf16.gmra.mxu0 %v7310_v36  ;;  %2319 = vmatmul.bf16.gmra.mxu2 %v7314_v38 }
  0x86   : > { %2488 = vmatmul.bf16.gmra.mxu3 %v7316_v39 }
  0x94   : > { %2155 = vmatmul.bf16.gmra.mxu1 %v7324_v50 }
  0x95   : > { %1986 = vmatmul.bf16.gmra.mxu0 %v7322_v49  ;;  %2324 = vmatmul.bf16.gmra.mxu2 %v7326_v54 }
  0x96   : > { %2493 = vmatmul.bf16.gmra.mxu3 %v7328_v55 }
  0xa4   : > { %2160 = vmatmul.bf16.gmra.mxu1 %v7336_v5 }
  0xa5   : > { %1991 = vmatmul.bf16.gmra.mxu0 %v7334_v4  ;;  %2329 = vmatmul.bf16.gmra.mxu2 %v7338_v6 }
  0xa6   : > { %2498 = vmatmul.bf16.gmra.mxu3 %v7340_v7 }
  0xb4   : > { %2165 = vmatmul.bf16.gmra.mxu1 %v7348_v21 }
  0xb5   : > { %1996 = vmatmul.bf16.gmra.mxu0 %v7346_v20  ;;  %2334 = vmatmul.bf16.gmra.mxu2 %v7350_v22 }
  0xb6   : > { %2503 = vmatmul.bf16.gmra.mxu3 %v7352_v23 }
  0xc4   : > { %2170 = vmatmul.bf16.gmra.mxu1 %v7368_v57 }
  0xc5   : > { %2001 = vmatmul.bf16.gmra.mxu0 %v7366_v56  ;;  %2339 = vmatmul.bf16.gmra.mxu2 %v7370_v58 }
  0xc6   : > { %2508 = vmatmul.bf16.gmra.mxu3 %v7372_v59 }
  0xd1   : > { %v2136_v24 = vpop.f32.mrf.mxu1 }
  0xd2   : > { %v1967_v17 = vpop.f32.mrf.mxu0 }
  0xd3   : > { %v2137_v26 = vadd.f32 %v2136_v24, %v1967_v17 }
  0xd4   : > { %2175 = vmatmul.bf16.gmra.mxu1 %v7380_v18 }
  0xd5   : > { %2006 = vmatmul.bf16.gmra.mxu0 %v7378_v16  ;;  %2344 = vmatmul.bf16.gmra.mxu2 %v7382_v19 }
  0xd6   : > { %2513 = vmatmul.bf16.gmra.mxu3 %v7384_v25 }
  0xd8   : > { %v2305_v27 = vpop.f32.mrf.mxu2 }
  0xd9   : > { %v2306_v28 = vadd.f32 %v2305_v27, %v2137_v26  ;;  %v2474_v29 = vpop.f32.mrf.mxu3  ;;  %v2138_v31 = vpop.f32.mrf.mxu1 }
  0xda   : > { %v1969_v30 = vpop.f32.mrf.mxu0 }
  0xdb   : > { %v7390_v32 = vadd.f32 %v2474_v29, %v2306_v28  ;;  %v2139_v33 = vadd.f32 %v2138_v31, %v1969_v30 }
  0xe0   : > { %v2307_v46 = vpop.f32.mrf.mxu2 }
  0xe1   : > { %v2308_v60 = vadd.f32 %v2307_v46, %v2139_v33  ;;  %v2476_v61 = vpop.f32.mrf.mxu3  ;;  %v2141_v9 = vpop.f32.mrf.mxu1  ;;  %v886_v33 = vld [vmem:[#allocation3 + $0x280] sm:$0xff] }
  0xe2   : > { %v1972_v62 = vpop.f32.mrf.mxu0  ;;  %v7408_v46 = vpack.c.bf16 %v890_v34, %v886_v33  ;;  %v6746_v33 = vld [vmem:[%s7188_s1 + $0x384] sm:$0xf] }
  0xe3   : > { %v7400_v11 = vadd.f32 %v2476_v61, %v2308_v60  ;;  %v2142_v17 = vadd.f32 %v2141_v9, %v1972_v62  ;;  %v7410_v9 = vpack.c.bf16 %v891_v40, %v887_v35  ;;  %v6568_v35 = vld [vmem:[%s7188_s1 + $0x390] sm:$0xf0] }
  0xe4   : > { %2180 = vmatmul.bf16.gmra.mxu1 %v7394_v63  ;;  %9279 = vst [vmem:[#allocation32_spill] sm:$0xff] %v7408_v46 }
  0xe5   : > { %2011 = vmatmul.bf16.gmra.mxu0 %v7392_v48  ;;  %2349 = vmatmul.bf16.gmra.mxu2 %v7396_v8  ;;  %9280 = vst [vmem:[#allocation33_spill] sm:$0xff] %v7410_v9 }
  0xe6   : > { %2518 = vmatmul.bf16.gmra.mxu3 %v7398_v10 }
  0xe8   : > { %v2310_v24 = vpop.f32.mrf.mxu2 }
  0xe9   : > { %v2311_v26 = vadd.f32 %v2310_v24, %v2142_v17  ;;  %v2479_v27 = vpop.f32.mrf.mxu3  ;;  %v2143_v29 = vpop.f32.mrf.mxu1  ;;  %v7412_v17 = vpack.c.bf16 %v892_v42, %v888_v41  ;;  %v6571_v41 = vor.u32 %v6746_v33, %v6568_v35  ;;  %v897_v35 = vld [vmem:[#allocation3 + $0x2d8] sm:$0xff] }
  0xea   : > { %v1974_v28 = vpop.f32.mrf.mxu0 }
  0xeb   : > { %v7406_v30 = vadd.f32 %v2479_v27, %v2311_v26  ;;  %v2144_v31 = vadd.f32 %v2143_v29, %v1974_v28  ;;  %9281 = vst [vmem:[#allocation34_spill] sm:$0xff] %v7412_v17  ;;  %v7414_v26 = vpack.c.bf16 %v893_v44, %v889_v43  ;;  %v6714_v29 = vld [vmem:[%s7188_s1 + $0x284] sm:$0xf]  ;;  %3144 = vmatpush.bf16.msrb.mxu3 %v6571_v41 }
  0xed   : > { %9278 = vst [vmem:[#allocation31_spill] sm:$0xff] %v7406_v30 }
  0xee   : > { %9282 = vst [vmem:[#allocation35_spill] sm:$0xff] %v7414_v26 }
  0xf0   : > { %v2312_v45 = vpop.f32.mrf.mxu2 }
  0xf1   : > { %v2313_v60 = vadd.f32 %v2312_v45, %v2144_v31  ;;  %v2481_v61 = vpop.f32.mrf.mxu3  ;;  %v2146_v24 = vpop.f32.mrf.mxu1  ;;  %v6440_v31 = vld [vmem:[%s7188_s1 + $0x290] sm:$0xf0] }
  0xf2   : > { %v1977_v62 = vpop.f32.mrf.mxu0  ;;  %v6443_v34 = vor.u32 %v6714_v29, %v6440_v31  ;;  %v899_v29 = vld [vmem:[#allocation3 + $0x2e8] sm:$0xff]  ;;  %v6650_v31 = vld [vmem:[%s7188_s1 + $0x84] sm:$0xf] }
  0xf3   : > { %v7416_v27 = vadd.f32 %v2481_v61, %v2313_v60  ;;  %v2147_v28 = vadd.f32 %v2146_v24, %v1977_v62  ;;  %v894_v62 = vld [vmem:[#allocation3 + $0x2c0] sm:$0xff] }
  0xf4   : > { %2185 = vmatmul.bf16.gmra.mxu1 %v7410_v9  ;;  %2975 = vmatpush.bf16.msrb.mxu2 %v6443_v34  ;;  %v898_v24 = vld [vmem:[#allocation3 + $0x2e0] sm:$0xff] }
  0xf5   : > { %9283 = vst [vmem:[#allocation36_spill] sm:$0xff] %v7416_v27  ;;  %2016 = vmatmul.bf16.gmra.mxu0 %v7408_v46  ;;  %2354 = vmatmul.bf16.gmra.mxu2 %v7412_v17  ;;  %v6184_v17 = vld [vmem:[%s7188_s1 + $0x90] sm:$0xf0]  ;;  %v6682_v9 = vld [vmem:[%s7188_s1 + $0x184] sm:$0xf]  ;;  %v7432_v10 = vpack.c.bf16 %v898_v24, %v894_v62 }
  0xf6   : > { %2523 = vmatmul.bf16.gmra.mxu3 %v7414_v26  ;;  %v895_v26 = vld [vmem:[#allocation3 + $0x2c8] sm:$0xff]  ;;  %v896_v27 = vld [vmem:[#allocation3 + $0x2d0] sm:$0xff]  ;;  %v6187_v33 = vor.u32 %v6650_v31, %v6184_v17  ;;  %v902_v24 = vld [vmem:[#allocation3 + $0x300] sm:$0xff] }
  0xf7   : > { %v900_v46 = vld [vmem:[#allocation3 + $0x2f0] sm:$0xff]  ;;  %9285 = vst [vmem:[#allocation38_spill] sm:$0xff] %v7432_v10 }
  0xf8   : > { %v2315_v40 = vpop.f32.mrf.mxu2  ;;  %2637 = vmatpush.bf16.msrb.mxu0 %v6187_v33  ;;  %v903_v33 = vld [vmem:[#allocation3 + $0x308] sm:$0xff] }
  0xf9   : > { %v2316_v42 = vadd.f32 %v2315_v40, %v2147_v28  ;;  %v2484_v43 = vpop.f32.mrf.mxu3  ;;  %v2148_v45 = vpop.f32.mrf.mxu1  ;;  %v6312_v28 = vld [vmem:[%s7188_s1 + $0x190] sm:$0xf0]  ;;  %v901_v40 = vld [vmem:[#allocation3 + $0x2f8] sm:$0xff] }
  0xfa   : > { %v1979_v44 = vpop.f32.mrf.mxu0  ;;  %v6315_v30 = vor.u32 %v6682_v9, %v6312_v28  ;;  %v7438_v8 = vpack.c.bf16 %v901_v40, %v897_v35  ;;  %v904_v28 = vld [vmem:[#allocation3 + $0x310] sm:$0xff]  ;;  %v905_v40 = vld [vmem:[#allocation3 + $0x318] sm:$0xff] }
  0xfb   : > { %v7426_v60 = vadd.f32 %v2484_v43, %v2316_v42  ;;  %v2149_v61 = vadd.f32 %v2148_v45, %v1979_v44  ;;  %v7434_v44 = vpack.c.bf16 %v899_v29, %v895_v26  ;;  %v7436_v45 = vpack.c.bf16 %v900_v46, %v896_v27  ;;  %v906_v29 = vld [vmem:[#allocation3 + $0x320] sm:$0xff]  ;;  %v908_v35 = vld [vmem:[#allocation3 + $0x330] sm:$0xff] }
  0xfc   : > { %2806 = vmatpush.bf16.msrb.mxu1 %v6315_v30  ;;  %9288 = vst [vmem:[#allocation41_spill] sm:$0xff] %v7438_v8 }
  0xfd   : > { %9284 = vst [vmem:[#allocation37_spill] sm:$0xff] %v7426_v60 }
  0xfe   : > { %9286 = vst [vmem:[#allocation39_spill] sm:$0xff] %v7434_v44 }
  0xff   : > { %9287 = vst [vmem:[#allocation40_spill] sm:$0xff] %v7436_v45 }
 0x100   : > { %v2317_v34 = vpop.f32.mrf.mxu2 }
 0x101   : > { %v2318_v41 = vadd.f32 %v2317_v34, %v2149_v61  ;;  %v2486_v42 = vpop.f32.mrf.mxu3  ;;  %v2151_v60 = vpop.f32.mrf.mxu1  ;;  %v909_v34 = vld [vmem:[#allocation3 + $0x338] sm:$0xff] }
 0x102   : > { %v1982_v43 = vpop.f32.mrf.mxu0 }
 0x103   : > { %v7440_v17 = vadd.f32 %v2486_v42, %v2318_v41  ;;  %v2152_v31 = vadd.f32 %v2151_v60, %v1982_v43  ;;  %v907_v60 = vld [vmem:[#allocation3 + $0x328] sm:$0xff]  ;;  %v7448_v42 = vpack.c.bf16 %v906_v29, %v902_v24 }
 0x104   : > { %2190 = vmatmul.bf16.gmra.mxu1 %v7434_v44 }
 0x105   : > { %9289 = vst [vmem:[#allocation42_spill] sm:$0xff] %v7440_v17  ;;  %2021 = vmatmul.bf16.gmra.mxu0 %v7432_v10  ;;  %2359 = vmatmul.bf16.gmra.mxu2 %v7436_v45  ;;  %v7452_v45 = vpack.c.bf16 %v908_v35, %v904_v28 }
 0x106   : > { %2528 = vmatmul.bf16.gmra.mxu3 %v7438_v8  ;;  %9291 = vst [vmem:[#allocation44_spill] sm:$0xff] %v7448_v42 }
 0x107   : > { %9293 = vst [vmem:[#allocation46_spill] sm:$0xff] %v7452_v45 }
 0x108   : > { %v2320_v9 = vpop.f32.mrf.mxu2 }
 0x109   : > { %v2321_v26 = vadd.f32 %v2320_v9, %v2152_v31  ;;  %v2489_v61 = vpop.f32.mrf.mxu3  ;;  %v2153_v27 = vpop.f32.mrf.mxu1  ;;  %v7450_v9 = vpack.c.bf16 %v907_v60, %v903_v33 }
 0x10a   : > { %v1984_v46 = vpop.f32.mrf.mxu0 }
 0x10b   : > { %v7446_v30 = vadd.f32 %v2489_v61, %v2321_v26  ;;  %v2154_v62 = vadd.f32 %v2153_v27, %v1984_v46  ;;  %9292 = vst [vmem:[#allocation45_spill] sm:$0xff] %v7450_v9  ;;  %v7454_v61 = vpack.c.bf16 %v909_v34, %v905_v40  ;;  %v910_v40 = vld [vmem:[#allocation3 + $0x340] sm:$0xff]  ;;  %v911_v34 = vld [vmem:[#allocation3 + $0x348] sm:$0xff] }
 0x10d   : > { %9290 = vst [vmem:[#allocation43_spill] sm:$0xff] %v7446_v30 }
 0x10e   : > { %9294 = vst [vmem:[#allocation47_spill] sm:$0xff] %v7454_v61 }
 0x110   : > { %v2322_v41 = vpop.f32.mrf.mxu2 }
 0x111   : > { %v2323_v43 = vadd.f32 %v2322_v41, %v2154_v62  ;;  %v2491_v8 = vpop.f32.mrf.mxu3  ;;  %v2156_v26 = vpop.f32.mrf.mxu1  ;;  %v915_v41 = vld [vmem:[#allocation3 + $0x368] sm:$0xff] }
 0x112   : > { %v1987_v31 = vpop.f32.mrf.mxu0 }
 0x113   : > { %v7456_v46 = vadd.f32 %v2491_v8, %v2323_v43  ;;  %v2157_v27 = vadd.f32 %v2156_v26, %v1987_v31  ;;  %v914_v8 = vld [vmem:[#allocation3 + $0x360] sm:$0xff]  ;;  %v912_v43 = vld [vmem:[#allocation3 + $0x350] sm:$0xff]  ;;  %v913_v26 = vld [vmem:[#allocation3 + $0x358] sm:$0xff] }
 0x114   : > { %2195 = vmatmul.bf16.gmra.mxu1 %v7450_v9  ;;  %v916_v31 = vld [vmem:[#allocation3 + $0x370] sm:$0xff]  ;;  %v917_v9 = vld [vmem:[#allocation3 + $0x378] sm:$0xff] }
 0x115   : > { %9295 = vst [vmem:[#allocation48_spill] sm:$0xff] %v7456_v46  ;;  %2026 = vmatmul.bf16.gmra.mxu0 %v7448_v42  ;;  %2364 = vmatmul.bf16.gmra.mxu2 %v7452_v45  ;;  %v7464_v45 = vpack.c.bf16 %v914_v8, %v910_v40  ;;  %v7468_v30 = vpack.c.bf16 %v916_v31, %v912_v43  ;;  %v918_v43 = vld [vmem:[#allocation3 + $0x380] sm:$0xff]  ;;  %v923_v31 = vld [vmem:[#allocation3 + $0x3a8] sm:$0xff] }
 0x116   : > { %2533 = vmatmul.bf16.gmra.mxu3 %v7454_v61 }
 0x117   : > { %9297 = vst [vmem:[#allocation50_spill] sm:$0xff] %v7464_v45 }
 0x118   : > { %v2325_v62 = vpop.f32.mrf.mxu2  ;;  %9299 = vst [vmem:[#allocation52_spill] sm:$0xff] %v7468_v30 }
 0x119   : > { %v2326_v24 = vadd.f32 %v2325_v62, %v2157_v27  ;;  %v2494_v29 = vpop.f32.mrf.mxu3  ;;  %v2158_v60 = vpop.f32.mrf.mxu1  ;;  %v7466_v62 = vpack.c.bf16 %v915_v41, %v911_v34 }
 0x11a   : > { %v1989_v33 = vpop.f32.mrf.mxu0 }
 0x11b   : > { %v7462_v28 = vadd.f32 %v2494_v29, %v2326_v24  ;;  %v2159_v35 = vadd.f32 %v2158_v60, %v1989_v33  ;;  %9298 = vst [vmem:[#allocation51_spill] sm:$0xff] %v7466_v62  ;;  %v7470_v29 = vpack.c.bf16 %v917_v9, %v913_v26  ;;  %v920_v26 = vld [vmem:[#allocation3 + $0x390] sm:$0xff] }
 0x11d   : > { %9296 = vst [vmem:[#allocation49_spill] sm:$0xff] %v7462_v28  ;;  %v932_v28 = vld [vmem:[#allocation3 + $0x3f0] sm:$0xff] }
 0x11e   : > { %9300 = vst [vmem:[#allocation53_spill] sm:$0xff] %v7470_v29 }
 0x120   : > { %v2327_v46 = vpop.f32.mrf.mxu2 }
 0x121   : > { %v2328_v61 = vadd.f32 %v2327_v46, %v2159_v35  ;;  %v2496_v42 = vpop.f32.mrf.mxu3  ;;  %v2161_v24 = vpop.f32.mrf.mxu1 }
 0x122   : > { %v1992_v27 = vpop.f32.mrf.mxu0 }
 0x123   : > { %v7472_v33 = vadd.f32 %v2496_v42, %v2328_v61  ;;  %v2162_v60 = vadd.f32 %v2161_v24, %v1992_v27  ;;  %v922_v42 = vld [vmem:[#allocation3 + $0x3a0] sm:$0xff]  ;;  %v919_v61 = vld [vmem:[#allocation3 + $0x388] sm:$0xff]  ;;  %v924_v27 = vld [vmem:[#allocation3 + $0x3b0] sm:$0xff] }
 0x124   : > { %2200 = vmatmul.bf16.gmra.mxu1 %v7466_v62  ;;  %v921_v24 = vld [vmem:[#allocation3 + $0x398] sm:$0xff] }
 0x125   : > { %9301 = vst [vmem:[#allocation54_spill] sm:$0xff] %v7472_v33  ;;  %2031 = vmatmul.bf16.gmra.mxu0 %v7464_v45  ;;  %2369 = vmatmul.bf16.gmra.mxu2 %v7468_v30  ;;  %v925_v62 = vld [vmem:[#allocation3 + $0x3b8] sm:$0xff] }
 0x126   : > { %2538 = vmatmul.bf16.gmra.mxu3 %v7470_v29  ;;  %v7480_v29 = vpack.c.bf16 %v922_v42, %v918_v43  ;;  %v6742_v43 = vld [vmem:[%s7188_s1 + $0x364] sm:$0xf] }
 0x128   : > { %v2330_v46 = vpop.f32.mrf.mxu2  ;;  %9303 = vst [vmem:[#allocation56_spill] sm:$0xff] %v7480_v29 }
 0x129   : > { %v2331_v35 = vadd.f32 %v2330_v46, %v2162_v60  ;;  %v2499_v40 = vpop.f32.mrf.mxu3  ;;  %v2163_v34 = vpop.f32.mrf.mxu1 }
 0x12a   : > { %v1994_v8 = vpop.f32.mrf.mxu0 }
 0x12b   : > { %v7478_v41 = vadd.f32 %v2499_v40, %v2331_v35  ;;  %v2164_v9 = vadd.f32 %v2163_v34, %v1994_v8  ;;  %v7482_v40 = vpack.c.bf16 %v923_v31, %v919_v61  ;;  %v7484_v8 = vpack.c.bf16 %v924_v27, %v920_v26  ;;  %v6552_v61 = vld [vmem:[%s7188_s1 + $0x370] sm:$0xf0] }
 0x12c   : > { %v6555_v31 = vor.u32 %v6742_v43, %v6552_v61  ;;  %v929_v61 = vld [vmem:[#allocation3 + $0x3d8] sm:$0xff] }
 0x12d   : > { %9302 = vst [vmem:[#allocation55_spill] sm:$0xff] %v7478_v41  ;;  %v7486_v41 = vpack.c.bf16 %v925_v62, %v921_v24 }
 0x12e   : > { %9304 = vst [vmem:[#allocation57_spill] sm:$0xff] %v7482_v40  ;;  %3145 = vmatpush.bf16.msrb.mxu3 %v6555_v31 }
 0x12f   : > { %9305 = vst [vmem:[#allocation58_spill] sm:$0xff] %v7484_v8 }
 0x130   : > { %v2332_v30 = vpop.f32.mrf.mxu2  ;;  %9306 = vst [vmem:[#allocation59_spill] sm:$0xff] %v7486_v41 }
 0x131   : > { %v2333_v60 = vadd.f32 %v2332_v30, %v2164_v9  ;;  %v2501_v46 = vpop.f32.mrf.mxu3  ;;  %v2166_v34 = vpop.f32.mrf.mxu1  ;;  %v6710_v30 = vld [vmem:[%s7188_s1 + $0x264] sm:$0xf]  ;;  %v6424_v9 = vld [vmem:[%s7188_s1 + $0x270] sm:$0xf0] }
 0x132   : > { %v1997_v35 = vpop.f32.mrf.mxu0  ;;  %v6427_v42 = vor.u32 %v6710_v30, %v6424_v9  ;;  %v931_v30 = vld [vmem:[#allocation3 + $0x3e8] sm:$0xff]  ;;  %v6646_v9 = vld [vmem:[%s7188_s1 + $0x64] sm:$0xf] }
 0x133   : > { %v7488_v33 = vadd.f32 %v2501_v46, %v2333_v60  ;;  %v2167_v45 = vadd.f32 %v2166_v34, %v1997_v35  ;;  %v926_v34 = vld [vmem:[#allocation3 + $0x3c0] sm:$0xff] }
 0x134   : > { %2205 = vmatmul.bf16.gmra.mxu1 %v7482_v40  ;;  %2976 = vmatpush.bf16.msrb.mxu2 %v6427_v42  ;;  %v6168_v40 = vld [vmem:[%s7188_s1 + $0x70] sm:$0xf0] }
 0x135   : > { %9307 = vst [vmem:[#allocation60_spill] sm:$0xff] %v7488_v33  ;;  %2036 = vmatmul.bf16.gmra.mxu0 %v7480_v29  ;;  %2374 = vmatmul.bf16.gmra.mxu2 %v7484_v8  ;;  %v927_v8 = vld [vmem:[#allocation3 + $0x3c8] sm:$0xff]  ;;  %v6678_v33 = vld [vmem:[%s7188_s1 + $0x164] sm:$0xf]  ;;  %v928_v29 = vld [vmem:[#allocation3 + $0x3d0] sm:$0xff]  ;;  %v6171_v43 = vor.u32 %v6646_v9, %v6168_v40 }
 0x136   : > { %2543 = vmatmul.bf16.gmra.mxu3 %v7486_v41  ;;  %v930_v41 = vld [vmem:[#allocation3 + $0x3e0] sm:$0xff] }
 0x137   : > { %v7504_v17 = vpack.c.bf16 %v930_v41, %v926_v34  ;;  %2638 = vmatpush.bf16.msrb.mxu0 %v6171_v43  ;;  %v934_v34 = vld [vmem:[#allocation3 + $0x400] sm:$0xff]  ;;  %v935_v43 = vld [vmem:[#allocation3 + $0x408] sm:$0xff] }
 0x138   : > { %v2335_v62 = vpop.f32.mrf.mxu2 }
 0x139   : > { %v2336_v26 = vadd.f32 %v2335_v62, %v2167_v45  ;;  %v2504_v27 = vpop.f32.mrf.mxu3  ;;  %v2168_v60 = vpop.f32.mrf.mxu1  ;;  %v6296_v45 = vld [vmem:[%s7188_s1 + $0x170] sm:$0xf0]  ;;  %v933_v62 = vld [vmem:[#allocation3 + $0x3f8] sm:$0xff]  ;;  %9309 = vst [vmem:[#allocation62_spill] sm:$0xff] %v7504_v17 }
 0x13a   : > { %v1999_v24 = vpop.f32.mrf.mxu0  ;;  %v6299_v44 = vor.u32 %v6678_v33, %v6296_v45  ;;  %v7510_v10 = vpack.c.bf16 %v933_v62, %v929_v61  ;;  %v936_v45 = vld [vmem:[#allocation3 + $0x410] sm:$0xff]  ;;  %v937_v62 = vld [vmem:[#allocation3 + $0x418] sm:$0xff] }
 0x13b   : > { %v7498_v46 = vadd.f32 %v2504_v27, %v2336_v26  ;;  %v2169_v35 = vadd.f32 %v2168_v60, %v1999_v24  ;;  %v7506_v24 = vpack.c.bf16 %v931_v30, %v927_v8  ;;  %v7508_v60 = vpack.c.bf16 %v932_v28, %v928_v29  ;;  %v938_v30 = vld [vmem:[#allocation3 + $0x420] sm:$0xff]  ;;  %v940_v61 = vld [vmem:[#allocation3 + $0x430] sm:$0xff] }
 0x13c   : > { %2807 = vmatpush.bf16.msrb.mxu1 %v6299_v44  ;;  %9312 = vst [vmem:[#allocation65_spill] sm:$0xff] %v7510_v10 }
 0x13d   : > { %9308 = vst [vmem:[#allocation61_spill] sm:$0xff] %v7498_v46 }
 0x13e   : > { %9310 = vst [vmem:[#allocation63_spill] sm:$0xff] %v7506_v24 }
 0x13f   : > { %9311 = vst [vmem:[#allocation64_spill] sm:$0xff] %v7508_v60 }
 0x140   : > { %v2337_v42 = vpop.f32.mrf.mxu2 }
 0x141   : > { %v2338_v31 = vadd.f32 %v2337_v42, %v2169_v35  ;;  %v2506_v26 = vpop.f32.mrf.mxu3  ;;  %v2171_v46 = vpop.f32.mrf.mxu1  ;;  %v941_v42 = vld [vmem:[#allocation3 + $0x438] sm:$0xff] }
 0x142   : > { %v2002_v27 = vpop.f32.mrf.mxu0 }
 0x143   : > { %v7512_v40 = vadd.f32 %v2506_v26, %v2338_v31  ;;  %v2172_v9 = vadd.f32 %v2171_v46, %v2002_v27  ;;  %v939_v46 = vld [vmem:[#allocation3 + $0x428] sm:$0xff]  ;;  %v7520_v26 = vpack.c.bf16 %v938_v30, %v934_v34 }
 0x144   : > { %2210 = vmatmul.bf16.gmra.mxu1 %v7506_v24 }
 0x145   : > { %9313 = vst [vmem:[#allocation66_spill] sm:$0xff] %v7512_v40  ;;  %2041 = vmatmul.bf16.gmra.mxu0 %v7504_v17  ;;  %2379 = vmatmul.bf16.gmra.mxu2 %v7508_v60  ;;  %v7524_v60 = vpack.c.bf16 %v940_v61, %v936_v45 }
 0x146   : > { %2548 = vmatmul.bf16.gmra.mxu3 %v7510_v10  ;;  %9315 = vst [vmem:[#allocation68_spill] sm:$0xff] %v7520_v26 }
 0x147   : > { %9317 = vst [vmem:[#allocation70_spill] sm:$0xff] %v7524_v60 }
 0x148   : > { %v2340_v33 = vpop.f32.mrf.mxu2 }
 0x149   : > { %v2341_v41 = vadd.f32 %v2340_v33, %v2172_v9  ;;  %v2509_v8 = vpop.f32.mrf.mxu3  ;;  %v2173_v29 = vpop.f32.mrf.mxu1  ;;  %v7522_v33 = vpack.c.bf16 %v939_v46, %v935_v43 }
 0x14a   : > { %v2004_v28 = vpop.f32.mrf.mxu0 }
 0x14b   : > { %v7518_v44 = vadd.f32 %v2509_v8, %v2341_v41  ;;  %v2174_v35 = vadd.f32 %v2173_v29, %v2004_v28  ;;  %9316 = vst [vmem:[#allocation69_spill] sm:$0xff] %v7522_v33  ;;  %v7526_v8 = vpack.c.bf16 %v941_v42, %v937_v62  ;;  %v942_v62 = vld [vmem:[#allocation3 + $0x440] sm:$0xff]  ;;  %v943_v42 = vld [vmem:[#allocation3 + $0x448] sm:$0xff] }
 0x14d   : > { %9314 = vst [vmem:[#allocation67_spill] sm:$0xff] %v7518_v44 }
 0x14e   : > { %9318 = vst [vmem:[#allocation71_spill] sm:$0xff] %v7526_v8 }
 0x150   : > { %v2342_v31 = vpop.f32.mrf.mxu2 }
 0x151   : > { %v2343_v27 = vadd.f32 %v2342_v31, %v2174_v35  ;;  %v2511_v10 = vpop.f32.mrf.mxu3  ;;  %v2176_v41 = vpop.f32.mrf.mxu1  ;;  %v947_v31 = vld [vmem:[#allocation3 + $0x468] sm:$0xff] }
 0x152   : > { %v2007_v9 = vpop.f32.mrf.mxu0 }
 0x153   : > { %v7528_v28 = vadd.f32 %v2511_v10, %v2343_v27  ;;  %v2177_v29 = vadd.f32 %v2176_v41, %v2007_v9  ;;  %v946_v10 = vld [vmem:[#allocation3 + $0x460] sm:$0xff]  ;;  %v944_v27 = vld [vmem:[#allocation3 + $0x450] sm:$0xff]  ;;  %v945_v41 = vld [vmem:[#allocation3 + $0x458] sm:$0xff] }
 0x154   : > { %2215 = vmatmul.bf16.gmra.mxu1 %v7522_v33  ;;  %v948_v9 = vld [vmem:[#allocation3 + $0x470] sm:$0xff]  ;;  %v949_v33 = vld [vmem:[#allocation3 + $0x478] sm:$0xff] }
 0x155   : > { %9319 = vst [vmem:[#allocation72_spill] sm:$0xff] %v7528_v28  ;;  %2046 = vmatmul.bf16.gmra.mxu0 %v7520_v26  ;;  %2384 = vmatmul.bf16.gmra.mxu2 %v7524_v60  ;;  %v7536_v60 = vpack.c.bf16 %v946_v10, %v942_v62  ;;  %v7540_v44 = vpack.c.bf16 %v948_v9, %v944_v27  ;;  %v950_v27 = vld [vmem:[#allocation3 + $0x480] sm:$0xff]  ;;  %v955_v9 = vld [vmem:[#allocation3 + $0x4a8] sm:$0xff] }
 0x156   : > { %2553 = vmatmul.bf16.gmra.mxu3 %v7526_v8 }
 0x157   : > { %9321 = vst [vmem:[#allocation74_spill] sm:$0xff] %v7536_v60 }
 0x158   : > { %v2345_v35 = vpop.f32.mrf.mxu2  ;;  %9323 = vst [vmem:[#allocation76_spill] sm:$0xff] %v7540_v44 }
 0x159   : > { %v2346_v34 = vadd.f32 %v2345_v35, %v2177_v29  ;;  %v2514_v30 = vpop.f32.mrf.mxu3  ;;  %v2178_v46 = vpop.f32.mrf.mxu1  ;;  %v7538_v35 = vpack.c.bf16 %v947_v31, %v943_v42 }
 0x15a   : > { %v2009_v43 = vpop.f32.mrf.mxu0 }
 0x15b   : > { %v7534_v45 = vadd.f32 %v2514_v30, %v2346_v34  ;;  %v2179_v61 = vadd.f32 %v2178_v46, %v2009_v43  ;;  %9322 = vst [vmem:[#allocation75_spill] sm:$0xff] %v7538_v35  ;;  %v7542_v30 = vpack.c.bf16 %v949_v33, %v945_v41  ;;  %v952_v41 = vld [vmem:[#allocation3 + $0x490] sm:$0xff] }
 0x15d   : > { %9320 = vst [vmem:[#allocation73_spill] sm:$0xff] %v7534_v45  ;;  %v964_v45 = vld [vmem:[#allocation3 + $0x4f0] sm:$0xff] }
 0x15e   : > { %9324 = vst [vmem:[#allocation77_spill] sm:$0xff] %v7542_v30 }
 0x160   : > { %v2347_v28 = vpop.f32.mrf.mxu2 }
 0x161   : > { %v2348_v8 = vadd.f32 %v2347_v28, %v2179_v61  ;;  %v2516_v26 = vpop.f32.mrf.mxu3  ;;  %v2181_v34 = vpop.f32.mrf.mxu1 }
 0x162   : > { %v2012_v29 = vpop.f32.mrf.mxu0 }
 0x163   : > { %v7544_v43 = vadd.f32 %v2516_v26, %v2348_v8  ;;  %v2182_v46 = vadd.f32 %v2181_v34, %v2012_v29  ;;  %v954_v26 = vld [vmem:[#allocation3 + $0x4a0] sm:$0xff]  ;;  %v951_v8 = vld [vmem:[#allocation3 + $0x488] sm:$0xff]  ;;  %v956_v29 = vld [vmem:[#allocation3 + $0x4b0] sm:$0xff] }
 0x164   : > { %2220 = vmatmul.bf16.gmra.mxu1 %v7538_v35  ;;  %v953_v34 = vld [vmem:[#allocation3 + $0x498] sm:$0xff] }
 0x165   : > { %9325 = vst [vmem:[#allocation78_spill] sm:$0xff] %v7544_v43  ;;  %2051 = vmatmul.bf16.gmra.mxu0 %v7536_v60  ;;  %2389 = vmatmul.bf16.gmra.mxu2 %v7540_v44  ;;  %v957_v35 = vld [vmem:[#allocation3 + $0x4b8] sm:$0xff] }
 0x166   : > { %2558 = vmatmul.bf16.gmra.mxu3 %v7542_v30  ;;  %v7552_v30 = vpack.c.bf16 %v954_v26, %v950_v27  ;;  %v6738_v27 = vld [vmem:[%s7188_s1 + $0x344] sm:$0xf] }
 0x168   : > { %v2350_v28 = vpop.f32.mrf.mxu2  ;;  %9327 = vst [vmem:[#allocation80_spill] sm:$0xff] %v7552_v30 }
 0x169   : > { %v2351_v61 = vadd.f32 %v2350_v28, %v2182_v46  ;;  %v2519_v62 = vpop.f32.mrf.mxu3  ;;  %v2183_v42 = vpop.f32.mrf.mxu1 }
 0x16a   : > { %v2014_v10 = vpop.f32.mrf.mxu0 }
 0x16b   : > { %v7550_v31 = vadd.f32 %v2519_v62, %v2351_v61  ;;  %v2184_v33 = vadd.f32 %v2183_v42, %v2014_v10  ;;  %v7554_v62 = vpack.c.bf16 %v955_v9, %v951_v8  ;;  %v7556_v10 = vpack.c.bf16 %v956_v29, %v952_v41  ;;  %v6536_v8 = vld [vmem:[%s7188_s1 + $0x350] sm:$0xf0] }
 0x16c   : > { %v6539_v9 = vor.u32 %v6738_v27, %v6536_v8  ;;  %v961_v8 = vld [vmem:[#allocation3 + $0x4d8] sm:$0xff] }
 0x16d   : > { %9326 = vst [vmem:[#allocation79_spill] sm:$0xff] %v7550_v31  ;;  %v7558_v31 = vpack.c.bf16 %v957_v35, %v953_v34 }
 0x16e   : > { %9328 = vst [vmem:[#allocation81_spill] sm:$0xff] %v7554_v62  ;;  %3146 = vmatpush.bf16.msrb.mxu3 %v6539_v9 }
 0x16f   : > { %9329 = vst [vmem:[#allocation82_spill] sm:$0xff] %v7556_v10 }
 0x170   : > { %v2352_v44 = vpop.f32.mrf.mxu2  ;;  %9330 = vst [vmem:[#allocation83_spill] sm:$0xff] %v7558_v31 }
 0x171   : > { %v2353_v46 = vadd.f32 %v2352_v44, %v2184_v33  ;;  %v2521_v28 = vpop.f32.mrf.mxu3  ;;  %v2186_v42 = vpop.f32.mrf.mxu1  ;;  %v6706_v44 = vld [vmem:[%s7188_s1 + $0x244] sm:$0xf]  ;;  %v6408_v33 = vld [vmem:[%s7188_s1 + $0x250] sm:$0xf0] }
 0x172   : > { %v2017_v61 = vpop.f32.mrf.mxu0  ;;  %v6411_v26 = vor.u32 %v6706_v44, %v6408_v33  ;;  %v963_v44 = vld [vmem:[#allocation3 + $0x4e8] sm:$0xff]  ;;  %v6642_v33 = vld [vmem:[%s7188_s1 + $0x44] sm:$0xf] }
 0x173   : > { %v7560_v43 = vadd.f32 %v2521_v28, %v2353_v46  ;;  %v2187_v60 = vadd.f32 %v2186_v42, %v2017_v61  ;;  %v958_v42 = vld [vmem:[#allocation3 + $0x4c0] sm:$0xff] }
 0x174   : > { %2225 = vmatmul.bf16.gmra.mxu1 %v7554_v62  ;;  %2977 = vmatpush.bf16.msrb.mxu2 %v6411_v26  ;;  %v6152_v62 = vld [vmem:[%s7188_s1 + $0x50] sm:$0xf0] }
 0x175   : > { %9331 = vst [vmem:[#allocation84_spill] sm:$0xff] %v7560_v43  ;;  %2056 = vmatmul.bf16.gmra.mxu0 %v7552_v30  ;;  %2394 = vmatmul.bf16.gmra.mxu2 %v7556_v10  ;;  %v959_v10 = vld [vmem:[#allocation3 + $0x4c8] sm:$0xff]  ;;  %v6674_v43 = vld [vmem:[%s7188_s1 + $0x144] sm:$0xf]  ;;  %v960_v30 = vld [vmem:[#allocation3 + $0x4d0] sm:$0xff]  ;;  %v6155_v27 = vor.u32 %v6642_v33, %v6152_v62 }
 0x176   : > { %2563 = vmatmul.bf16.gmra.mxu3 %v7558_v31  ;;  %v962_v31 = vld [vmem:[#allocation3 + $0x4e0] sm:$0xff] }
 0x177   : > { %v7576_v40 = vpack.c.bf16 %v962_v31, %v958_v42  ;;  %2639 = vmatpush.bf16.msrb.mxu0 %v6155_v27  ;;  %v966_v42 = vld [vmem:[#allocation3 + $0x500] sm:$0xff]  ;;  %v967_v27 = vld [vmem:[#allocation3 + $0x508] sm:$0xff] }
 0x178   : > { %v2355_v35 = vpop.f32.mrf.mxu2 }
 0x179   : > { %v2356_v41 = vadd.f32 %v2355_v35, %v2187_v60  ;;  %v2524_v29 = vpop.f32.mrf.mxu3  ;;  %v2188_v46 = vpop.f32.mrf.mxu1  ;;  %v6280_v60 = vld [vmem:[%s7188_s1 + $0x150] sm:$0xf0]  ;;  %v965_v35 = vld [vmem:[#allocation3 + $0x4f8] sm:$0xff]  ;;  %9333 = vst [vmem:[#allocation86_spill] sm:$0xff] %v7576_v40 }
 0x17a   : > { %v2019_v34 = vpop.f32.mrf.mxu0  ;;  %v6283_v24 = vor.u32 %v6674_v43, %v6280_v60  ;;  %v7582_v17 = vpack.c.bf16 %v965_v35, %v961_v8  ;;  %v968_v60 = vld [vmem:[#allocation3 + $0x510] sm:$0xff]  ;;  %v969_v35 = vld [vmem:[#allocation3 + $0x518] sm:$0xff] }
 0x17b   : > { %v7570_v28 = vadd.f32 %v2524_v29, %v2356_v41  ;;  %v2189_v61 = vadd.f32 %v2188_v46, %v2019_v34  ;;  %v7578_v34 = vpack.c.bf16 %v963_v44, %v959_v10  ;;  %v7580_v46 = vpack.c.bf16 %v964_v45, %v960_v30  ;;  %v970_v44 = vld [vmem:[#allocation3 + $0x520] sm:$0xff]  ;;  %v972_v8 = vld [vmem:[#allocation3 + $0x530] sm:$0xff] }
 0x17c   : > { %2808 = vmatpush.bf16.msrb.mxu1 %v6283_v24  ;;  %9336 = vst [vmem:[#allocation89_spill] sm:$0xff] %v7582_v17 }
 0x17d   : > { %9332 = vst [vmem:[#allocation85_spill] sm:$0xff] %v7570_v28 }
 0x17e   : > { %9334 = vst [vmem:[#allocation87_spill] sm:$0xff] %v7578_v34 }
 0x17f   : > { %9335 = vst [vmem:[#allocation88_spill] sm:$0xff] %v7580_v46 }
 0x180   : > { %v2357_v26 = vpop.f32.mrf.mxu2 }
 0x181   : > { %v2358_v9 = vadd.f32 %v2357_v26, %v2189_v61  ;;  %v2526_v41 = vpop.f32.mrf.mxu3  ;;  %v2191_v28 = vpop.f32.mrf.mxu1  ;;  %v973_v26 = vld [vmem:[#allocation3 + $0x538] sm:$0xff] }
 0x182   : > { %v2022_v29 = vpop.f32.mrf.mxu0 }
 0x183   : > { %v7584_v62 = vadd.f32 %v2526_v41, %v2358_v9  ;;  %v2192_v33 = vadd.f32 %v2191_v28, %v2022_v29  ;;  %v971_v28 = vld [vmem:[#allocation3 + $0x528] sm:$0xff]  ;;  %v7592_v41 = vpack.c.bf16 %v970_v44, %v966_v42 }
 0x184   : > { %2230 = vmatmul.bf16.gmra.mxu1 %v7578_v34 }
 0x185   : > { %9337 = vst [vmem:[#allocation90_spill] sm:$0xff] %v7584_v62  ;;  %2061 = vmatmul.bf16.gmra.mxu0 %v7576_v40  ;;  %2399 = vmatmul.bf16.gmra.mxu2 %v7580_v46  ;;  %v7596_v46 = vpack.c.bf16 %v972_v8, %v968_v60 }
 0x186   : > { %2568 = vmatmul.bf16.gmra.mxu3 %v7582_v17  ;;  %9339 = vst [vmem:[#allocation92_spill] sm:$0xff] %v7592_v41 }
 0x187   : > { %9341 = vst [vmem:[#allocation94_spill] sm:$0xff] %v7596_v46 }
 0x188   : > { %v2360_v43 = vpop.f32.mrf.mxu2 }
 0x189   : > { %v2361_v31 = vadd.f32 %v2360_v43, %v2192_v33  ;;  %v2529_v10 = vpop.f32.mrf.mxu3  ;;  %v2193_v30 = vpop.f32.mrf.mxu1  ;;  %v7594_v43 = vpack.c.bf16 %v971_v28, %v967_v27 }
 0x18a   : > { %v2024_v45 = vpop.f32.mrf.mxu0 }
 0x18b   : > { %v7590_v24 = vadd.f32 %v2529_v10, %v2361_v31  ;;  %v2194_v61 = vadd.f32 %v2193_v30, %v2024_v45  ;;  %9340 = vst [vmem:[#allocation93_spill] sm:$0xff] %v7594_v43  ;;  %v7598_v10 = vpack.c.bf16 %v973_v26, %v969_v35  ;;  %v974_v35 = vld [vmem:[#allocation3 + $0x540] sm:$0xff]  ;;  %v975_v26 = vld [vmem:[#allocation3 + $0x548] sm:$0xff] }
 0x18d   : > { %9338 = vst [vmem:[#allocation91_spill] sm:$0xff] %v7590_v24 }
 0x18e   : > { %9342 = vst [vmem:[#allocation95_spill] sm:$0xff] %v7598_v10 }
 0x190   : > { %v2362_v9 = vpop.f32.mrf.mxu2 }
 0x191   : > { %v2363_v29 = vadd.f32 %v2362_v9, %v2194_v61  ;;  %v2531_v17 = vpop.f32.mrf.mxu3  ;;  %v2196_v31 = vpop.f32.mrf.mxu1  ;;  %v979_v9 = vld [vmem:[#allocation3 + $0x568] sm:$0xff] }
 0x192   : > { %v2027_v33 = vpop.f32.mrf.mxu0 }
 0x193   : > { %v7600_v45 = vadd.f32 %v2531_v17, %v2363_v29  ;;  %v2197_v30 = vadd.f32 %v2196_v31, %v2027_v33  ;;  %v978_v17 = vld [vmem:[#allocation3 + $0x560] sm:$0xff]  ;;  %v976_v29 = vld [vmem:[#allocation3 + $0x550] sm:$0xff]  ;;  %v977_v31 = vld [vmem:[#allocation3 + $0x558] sm:$0xff] }
 0x194   : > { %2235 = vmatmul.bf16.gmra.mxu1 %v7594_v43  ;;  %v980_v33 = vld [vmem:[#allocation3 + $0x570] sm:$0xff]  ;;  %v981_v43 = vld [vmem:[#allocation3 + $0x578] sm:$0xff] }
 0x195   : > { %9343 = vst [vmem:[#allocation96_spill] sm:$0xff] %v7600_v45  ;;  %2066 = vmatmul.bf16.gmra.mxu0 %v7592_v41  ;;  %2404 = vmatmul.bf16.gmra.mxu2 %v7596_v46  ;;  %v7608_v46 = vpack.c.bf16 %v978_v17, %v974_v35  ;;  %v7612_v24 = vpack.c.bf16 %v980_v33, %v976_v29  ;;  %v982_v29 = vld [vmem:[#allocation3 + $0x580] sm:$0xff]  ;;  %v987_v33 = vld [vmem:[#allocation3 + $0x5a8] sm:$0xff] }
 0x196   : > { %2573 = vmatmul.bf16.gmra.mxu3 %v7598_v10 }
 0x197   : > { %9345 = vst [vmem:[#allocation98_spill] sm:$0xff] %v7608_v46 }
 0x198   : > { %v2365_v61 = vpop.f32.mrf.mxu2  ;;  %9347 = vst [vmem:[#allocation100_spill] sm:$0xff] %v7612_v24 }
 0x199   : > { %v2366_v42 = vadd.f32 %v2365_v61, %v2197_v30  ;;  %v2534_v44 = vpop.f32.mrf.mxu3  ;;  %v2198_v28 = vpop.f32.mrf.mxu1  ;;  %v7610_v61 = vpack.c.bf16 %v979_v9, %v975_v26 }
 0x19a   : > { %v2029_v27 = vpop.f32.mrf.mxu0 }
 0x19b   : > { %v7606_v60 = vadd.f32 %v2534_v44, %v2366_v42  ;;  %v2199_v8 = vadd.f32 %v2198_v28, %v2029_v27  ;;  %9346 = vst [vmem:[#allocation99_spill] sm:$0xff] %v7610_v61  ;;  %v7614_v44 = vpack.c.bf16 %v981_v43, %v977_v31  ;;  %v984_v31 = vld [vmem:[#allocation3 + $0x590] sm:$0xff] }
 0x19d   : > { %9344 = vst [vmem:[#allocation97_spill] sm:$0xff] %v7606_v60  ;;  %v996_v60 = vld [vmem:[#allocation3 + $0x5f0] sm:$0xff] }
 0x19e   : > { %9348 = vst [vmem:[#allocation101_spill] sm:$0xff] %v7614_v44 }
 0x1a0   : > { %v2367_v45 = vpop.f32.mrf.mxu2 }
 0x1a1   : > { %v2368_v10 = vadd.f32 %v2367_v45, %v2199_v8  ;;  %v2536_v41 = vpop.f32.mrf.mxu3  ;;  %v2201_v42 = vpop.f32.mrf.mxu1 }
 0x1a2   : > { %v2032_v30 = vpop.f32.mrf.mxu0 }
 0x1a3   : > { %v7616_v27 = vadd.f32 %v2536_v41, %v2368_v10  ;;  %v2202_v28 = vadd.f32 %v2201_v42, %v2032_v30  ;;  %v986_v41 = vld [vmem:[#allocation3 + $0x5a0] sm:$0xff]  ;;  %v983_v10 = vld [vmem:[#allocation3 + $0x588] sm:$0xff]  ;;  %v988_v30 = vld [vmem:[#allocation3 + $0x5b0] sm:$0xff] }
 0x1a4   : > { %2240 = vmatmul.bf16.gmra.mxu1 %v7610_v61  ;;  %v985_v42 = vld [vmem:[#allocation3 + $0x598] sm:$0xff] }
 0x1a5   : > { %9349 = vst [vmem:[#allocation102_spill] sm:$0xff] %v7616_v27  ;;  %2071 = vmatmul.bf16.gmra.mxu0 %v7608_v46  ;;  %2409 = vmatmul.bf16.gmra.mxu2 %v7612_v24  ;;  %v989_v61 = vld [vmem:[#allocation3 + $0x5b8] sm:$0xff] }
 0x1a6   : > { %2578 = vmatmul.bf16.gmra.mxu3 %v7614_v44  ;;  %v7624_v44 = vpack.c.bf16 %v986_v41, %v982_v29  ;;  %v6734_v29 = vld [vmem:[%s7188_s1 + $0x324] sm:$0xf] }
 0x1a8   : > { %v2370_v45 = vpop.f32.mrf.mxu2  ;;  %9351 = vst [vmem:[#allocation104_spill] sm:$0xff] %v7624_v44 }
 0x1a9   : > { %v2371_v8 = vadd.f32 %v2370_v45, %v2202_v28  ;;  %v2539_v35 = vpop.f32.mrf.mxu3  ;;  %v2203_v26 = vpop.f32.mrf.mxu1 }
 0x1aa   : > { %v2034_v17 = vpop.f32.mrf.mxu0 }
 0x1ab   : > { %v7622_v9 = vadd.f32 %v2539_v35, %v2371_v8  ;;  %v2204_v43 = vadd.f32 %v2203_v26, %v2034_v17  ;;  %v7626_v35 = vpack.c.bf16 %v987_v33, %v983_v10  ;;  %v7628_v17 = vpack.c.bf16 %v988_v30, %v984_v31  ;;  %v6520_v10 = vld [vmem:[%s7188_s1 + $0x330] sm:$0xf0] }
 0x1ac   : > { %v6523_v33 = vor.u32 %v6734_v29, %v6520_v10  ;;  %v993_v10 = vld [vmem:[#allocation3 + $0x5d8] sm:$0xff] }
 0x1ad   : > { %9350 = vst [vmem:[#allocation103_spill] sm:$0xff] %v7622_v9  ;;  %v7630_v9 = vpack.c.bf16 %v989_v61, %v985_v42 }
 0x1ae   : > { %9352 = vst [vmem:[#allocation105_spill] sm:$0xff] %v7626_v35  ;;  %3147 = vmatpush.bf16.msrb.mxu3 %v6523_v33 }
 0x1af   : > { %9353 = vst [vmem:[#allocation106_spill] sm:$0xff] %v7628_v17 }
 0x1b0   : > { %v2372_v24 = vpop.f32.mrf.mxu2  ;;  %9354 = vst [vmem:[#allocation107_spill] sm:$0xff] %v7630_v9 }
 0x1b1   : > { %v2373_v28 = vadd.f32 %v2372_v24, %v2204_v43  ;;  %v2541_v45 = vpop.f32.mrf.mxu3  ;;  %v2206_v26 = vpop.f32.mrf.mxu1  ;;  %v6702_v24 = vld [vmem:[%s7188_s1 + $0x224] sm:$0xf]  ;;  %v6392_v43 = vld [vmem:[%s7188_s1 + $0x230] sm:$0xf0] }
 0x1b2   : > { %v2037_v8 = vpop.f32.mrf.mxu0  ;;  %v6395_v41 = vor.u32 %v6702_v24, %v6392_v43  ;;  %v995_v24 = vld [vmem:[#allocation3 + $0x5e8] sm:$0xff]  ;;  %v6638_v43 = vld [vmem:[%s7188_s1 + $0x24] sm:$0xf] }
 0x1b3   : > { %v7632_v27 = vadd.f32 %v2541_v45, %v2373_v28  ;;  %v2207_v46 = vadd.f32 %v2206_v26, %v2037_v8  ;;  %v990_v26 = vld [vmem:[#allocation3 + $0x5c0] sm:$0xff] }
 0x1b4   : > { %2245 = vmatmul.bf16.gmra.mxu1 %v7626_v35  ;;  %2978 = vmatpush.bf16.msrb.mxu2 %v6395_v41  ;;  %v6136_v35 = vld [vmem:[%s7188_s1 + $0x30] sm:$0xf0] }
 0x1b5   : > { %9355 = vst [vmem:[#allocation108_spill] sm:$0xff] %v7632_v27  ;;  %2076 = vmatmul.bf16.gmra.mxu0 %v7624_v44  ;;  %2414 = vmatmul.bf16.gmra.mxu2 %v7628_v17  ;;  %v991_v17 = vld [vmem:[#allocation3 + $0x5c8] sm:$0xff]  ;;  %v6670_v27 = vld [vmem:[%s7188_s1 + $0x124] sm:$0xf]  ;;  %v992_v44 = vld [vmem:[#allocation3 + $0x5d0] sm:$0xff]  ;;  %v6139_v29 = vor.u32 %v6638_v43, %v6136_v35 }
 0x1b6   : > { %2583 = vmatmul.bf16.gmra.mxu3 %v7630_v9  ;;  %v994_v9 = vld [vmem:[#allocation3 + $0x5e0] sm:$0xff] }
 0x1b7   : > { %v7648_v62 = vpack.c.bf16 %v994_v9, %v990_v26  ;;  %2640 = vmatpush.bf16.msrb.mxu0 %v6139_v29  ;;  %v998_v26 = vld [vmem:[#allocation3 + $0x600] sm:$0xff]  ;;  %v999_v29 = vld [vmem:[#allocation3 + $0x608] sm:$0xff] }
 0x1b8   : > { %v2375_v61 = vpop.f32.mrf.mxu2 }
 0x1b9   : > { %v2376_v31 = vadd.f32 %v2375_v61, %v2207_v46  ;;  %v2544_v30 = vpop.f32.mrf.mxu3  ;;  %v2208_v28 = vpop.f32.mrf.mxu1  ;;  %v6264_v46 = vld [vmem:[%s7188_s1 + $0x130] sm:$0xf0]  ;;  %v997_v61 = vld [vmem:[#allocation3 + $0x5f8] sm:$0xff]  ;;  %9357 = vst [vmem:[#allocation110_spill] sm:$0xff] %v7648_v62 }
 0x1ba   : > { %v2039_v42 = vpop.f32.mrf.mxu0  ;;  %v6267_v34 = vor.u32 %v6670_v27, %v6264_v46  ;;  %v7654_v40 = vpack.c.bf16 %v997_v61, %v993_v10  ;;  %v1000_v46 = vld [vmem:[#allocation3 + $0x610] sm:$0xff]  ;;  %v1001_v61 = vld [vmem:[#allocation3 + $0x618] sm:$0xff] }
 0x1bb   : > { %v7642_v45 = vadd.f32 %v2544_v30, %v2376_v31  ;;  %v2209_v8 = vadd.f32 %v2208_v28, %v2039_v42  ;;  %v7650_v42 = vpack.c.bf16 %v995_v24, %v991_v17  ;;  %v7652_v28 = vpack.c.bf16 %v996_v60, %v992_v44  ;;  %v1002_v24 = vld [vmem:[#allocation3 + $0x620] sm:$0xff]  ;;  %v1004_v10 = vld [vmem:[#allocation3 + $0x630] sm:$0xff] }
 0x1bc   : > { %2809 = vmatpush.bf16.msrb.mxu1 %v6267_v34  ;;  %9360 = vst [vmem:[#allocation113_spill] sm:$0xff] %v7654_v40 }
 0x1bd   : > { %9356 = vst [vmem:[#allocation109_spill] sm:$0xff] %v7642_v45 }
 0x1be   : > { %9358 = vst [vmem:[#allocation111_spill] sm:$0xff] %v7650_v42 }
 0x1bf   : > { %9359 = vst [vmem:[#allocation112_spill] sm:$0xff] %v7652_v28 }
 0x1c0   : > { %v2377_v41 = vpop.f32.mrf.mxu2 }
 0x1c1   : > { %v2378_v33 = vadd.f32 %v2377_v41, %v2209_v8  ;;  %v2546_v31 = vpop.f32.mrf.mxu3  ;;  %v2211_v45 = vpop.f32.mrf.mxu1  ;;  %v1005_v41 = vld [vmem:[#allocation3 + $0x638] sm:$0xff] }
 0x1c2   : > { %v2042_v30 = vpop.f32.mrf.mxu0 }
 0x1c3   : > { %v7656_v35 = vadd.f32 %v2546_v31, %v2378_v33  ;;  %v2212_v43 = vadd.f32 %v2211_v45, %v2042_v30  ;;  %v1003_v45 = vld [vmem:[#allocation3 + $0x628] sm:$0xff]  ;;  %v7664_v31 = vpack.c.bf16 %v1002_v24, %v998_v26 }
 0x1c4   : > { %2250 = vmatmul.bf16.gmra.mxu1 %v7650_v42 }
 0x1c5   : > { %9361 = vst [vmem:[#allocation114_spill] sm:$0xff] %v7656_v35  ;;  %2081 = vmatmul.bf16.gmra.mxu0 %v7648_v62  ;;  %2419 = vmatmul.bf16.gmra.mxu2 %v7652_v28  ;;  %v7668_v28 = vpack.c.bf16 %v1004_v10, %v1000_v46 }
 0x1c6   : > { %2588 = vmatmul.bf16.gmra.mxu3 %v7654_v40  ;;  %9363 = vst [vmem:[#allocation116_spill] sm:$0xff] %v7664_v31 }
 0x1c7   : > { %9365 = vst [vmem:[#allocation118_spill] sm:$0xff] %v7668_v28 }
 0x1c8   : > { %v2380_v27 = vpop.f32.mrf.mxu2 }
 0x1c9   : > { %v2381_v9 = vadd.f32 %v2380_v27, %v2212_v43  ;;  %v2549_v17 = vpop.f32.mrf.mxu3  ;;  %v2213_v44 = vpop.f32.mrf.mxu1  ;;  %v7666_v27 = vpack.c.bf16 %v1003_v45, %v999_v29 }
 0x1ca   : > { %v2044_v60 = vpop.f32.mrf.mxu0 }
 0x1cb   : > { %v7662_v34 = vadd.f32 %v2549_v17, %v2381_v9  ;;  %v2214_v8 = vadd.f32 %v2213_v44, %v2044_v60  ;;  %9364 = vst [vmem:[#allocation117_spill] sm:$0xff] %v7666_v27  ;;  %v7670_v17 = vpack.c.bf16 %v1005_v41, %v1001_v61  ;;  %v1006_v61 = vld [vmem:[#allocation3 + $0x640] sm:$0xff]  ;;  %v1007_v41 = vld [vmem:[#allocation3 + $0x648] sm:$0xff] }
 0x1cd   : > { %9362 = vst [vmem:[#allocation115_spill] sm:$0xff] %v7662_v34 }
 0x1ce   : > { %9366 = vst [vmem:[#allocation119_spill] sm:$0xff] %v7670_v17 }
 0x1d0   : > { %v2382_v33 = vpop.f32.mrf.mxu2 }
 0x1d1   : > { %v2383_v30 = vadd.f32 %v2382_v33, %v2214_v8  ;;  %v2551_v40 = vpop.f32.mrf.mxu3  ;;  %v2216_v9 = vpop.f32.mrf.mxu1  ;;  %v1011_v33 = vld [vmem:[#allocation3 + $0x668] sm:$0xff] }
 0x1d2   : > { %v2047_v43 = vpop.f32.mrf.mxu0 }
 0x1d3   : > { %v7672_v60 = vadd.f32 %v2551_v40, %v2383_v30  ;;  %v2217_v44 = vadd.f32 %v2216_v9, %v2047_v43  ;;  %v1010_v40 = vld [vmem:[#allocation3 + $0x660] sm:$0xff]  ;;  %v1008_v30 = vld [vmem:[#allocation3 + $0x650] sm:$0xff]  ;;  %v1009_v9 = vld [vmem:[#allocation3 + $0x658] sm:$0xff] }
 0x1d4   : > { %2255 = vmatmul.bf16.gmra.mxu1 %v7666_v27  ;;  %v1012_v43 = vld [vmem:[#allocation3 + $0x670] sm:$0xff]  ;;  %v1013_v27 = vld [vmem:[#allocation3 + $0x678] sm:$0xff] }
 0x1d5   : > { %9367 = vst [vmem:[#allocation120_spill] sm:$0xff] %v7672_v60  ;;  %2086 = vmatmul.bf16.gmra.mxu0 %v7664_v31  ;;  %2424 = vmatmul.bf16.gmra.mxu2 %v7668_v28  ;;  %v7680_v28 = vpack.c.bf16 %v1010_v40, %v1006_v61  ;;  %v7684_v34 = vpack.c.bf16 %v1012_v43, %v1008_v30  ;;  %v1014_v30 = vld [vmem:[#allocation3 + $0x680] sm:$0xff]  ;;  %v1019_v43 = vld [vmem:[#allocation3 + $0x6a8] sm:$0xff] }
 0x1d6   : > { %2593 = vmatmul.bf16.gmra.mxu3 %v7670_v17 }
 0x1d7   : > { %9369 = vst [vmem:[#allocation122_spill] sm:$0xff] %v7680_v28 }
 0x1d8   : > { %v2385_v8 = vpop.f32.mrf.mxu2  ;;  %9371 = vst [vmem:[#allocation124_spill] sm:$0xff] %v7684_v34 }
 0x1d9   : > { %v2386_v26 = vadd.f32 %v2385_v8, %v2217_v44  ;;  %v2554_v24 = vpop.f32.mrf.mxu3  ;;  %v2218_v45 = vpop.f32.mrf.mxu1  ;;  %v7682_v8 = vpack.c.bf16 %v1011_v33, %v1007_v41 }
 0x1da   : > { %v2049_v29 = vpop.f32.mrf.mxu0 }
 0x1db   : > { %v7678_v46 = vadd.f32 %v2554_v24, %v2386_v26  ;;  %v2219_v10 = vadd.f32 %v2218_v45, %v2049_v29  ;;  %9370 = vst [vmem:[#allocation123_spill] sm:$0xff] %v7682_v8  ;;  %v7686_v24 = vpack.c.bf16 %v1013_v27, %v1009_v9  ;;  %v1016_v9 = vld [vmem:[#allocation3 + $0x690] sm:$0xff] }
 0x1dd   : > { %9368 = vst [vmem:[#allocation121_spill] sm:$0xff] %v7678_v46  ;;  %v1028_v46 = vld [vmem:[#allocation3 + $0x6f0] sm:$0xff] }
 0x1de   : > { %9372 = vst [vmem:[#allocation125_spill] sm:$0xff] %v7686_v24 }
 0x1e0   : > { %v2387_v60 = vpop.f32.mrf.mxu2 }
 0x1e1   : > { %v2388_v17 = vadd.f32 %v2387_v60, %v2219_v10  ;;  %v2556_v31 = vpop.f32.mrf.mxu3  ;;  %v2221_v26 = vpop.f32.mrf.mxu1 }
 0x1e2   : > { %v2052_v44 = vpop.f32.mrf.mxu0 }
 0x1e3   : > { %v7688_v29 = vadd.f32 %v2556_v31, %v2388_v17  ;;  %v2222_v45 = vadd.f32 %v2221_v26, %v2052_v44  ;;  %v1018_v31 = vld [vmem:[#allocation3 + $0x6a0] sm:$0xff]  ;;  %v1015_v17 = vld [vmem:[#allocation3 + $0x688] sm:$0xff]  ;;  %v1020_v44 = vld [vmem:[#allocation3 + $0x6b0] sm:$0xff] }
 0x1e4   : > { %2260 = vmatmul.bf16.gmra.mxu1 %v7682_v8  ;;  %v1017_v26 = vld [vmem:[#allocation3 + $0x698] sm:$0xff] }
 0x1e5   : > { %9373 = vst [vmem:[#allocation126_spill] sm:$0xff] %v7688_v29  ;;  %2091 = vmatmul.bf16.gmra.mxu0 %v7680_v28  ;;  %2429 = vmatmul.bf16.gmra.mxu2 %v7684_v34  ;;  %v1021_v8 = vld [vmem:[#allocation3 + $0x6b8] sm:$0xff] }
 0x1e6   : > { %2598 = vmatmul.bf16.gmra.mxu3 %v7686_v24  ;;  %v7696_v24 = vpack.c.bf16 %v1018_v31, %v1014_v30  ;;  %v6730_v30 = vld [vmem:[%s7188_s1 + $0x304] sm:$0xf] }
 0x1e8   : > { %v2390_v60 = vpop.f32.mrf.mxu2  ;;  %9375 = vst [vmem:[#allocation128_spill] sm:$0xff] %v7696_v24 }
 0x1e9   : > { %v2391_v10 = vadd.f32 %v2390_v60, %v2222_v45  ;;  %v2559_v61 = vpop.f32.mrf.mxu3  ;;  %v2223_v41 = vpop.f32.mrf.mxu1 }
 0x1ea   : > { %v2054_v40 = vpop.f32.mrf.mxu0 }
 0x1eb   : > { %v7694_v33 = vadd.f32 %v2559_v61, %v2391_v10  ;;  %v2224_v27 = vadd.f32 %v2223_v41, %v2054_v40  ;;  %v7698_v61 = vpack.c.bf16 %v1019_v43, %v1015_v17  ;;  %v7700_v40 = vpack.c.bf16 %v1020_v44, %v1016_v9  ;;  %v6504_v17 = vld [vmem:[%s7188_s1 + $0x310] sm:$0xf0] }
 0x1ec   : > { %v6507_v43 = vor.u32 %v6730_v30, %v6504_v17  ;;  %v1025_v17 = vld [vmem:[#allocation3 + $0x6d8] sm:$0xff] }
 0x1ed   : > { %9374 = vst [vmem:[#allocation127_spill] sm:$0xff] %v7694_v33  ;;  %v7702_v33 = vpack.c.bf16 %v1021_v8, %v1017_v26 }
 0x1ee   : > { %9376 = vst [vmem:[#allocation129_spill] sm:$0xff] %v7698_v61  ;;  %3148 = vmatpush.bf16.msrb.mxu3 %v6507_v43 }
 0x1ef   : > { %9377 = vst [vmem:[#allocation130_spill] sm:$0xff] %v7700_v40 }
 0x1f0   : > { %v2392_v34 = vpop.f32.mrf.mxu2  ;;  %9378 = vst [vmem:[#allocation131_spill] sm:$0xff] %v7702_v33 }
 0x1f1   : > { %v2393_v45 = vadd.f32 %v2392_v34, %v2224_v27  ;;  %v2561_v60 = vpop.f32.mrf.mxu3  ;;  %v2226_v41 = vpop.f32.mrf.mxu1  ;;  %v6698_v34 = vld [vmem:[%s7188_s1 + $0x204] sm:$0xf]  ;;  %v6376_v27 = vld [vmem:[%s7188_s1 + $0x210] sm:$0xf0] }
 0x1f2   : > { %v2057_v10 = vpop.f32.mrf.mxu0  ;;  %v6379_v31 = vor.u32 %v6698_v34, %v6376_v27  ;;  %v1027_v34 = vld [vmem:[#allocation3 + $0x6e8] sm:$0xff]  ;;  %v6634_v27 = vld [vmem:[%s7188_s1 + $0x4] sm:$0xf] }
 0x1f3   : > { %v7704_v29 = vadd.f32 %v2561_v60, %v2393_v45  ;;  %v2227_v28 = vadd.f32 %v2226_v41, %v2057_v10  ;;  %v1022_v41 = vld [vmem:[#allocation3 + $0x6c0] sm:$0xff] }
 0x1f4   : > { %2265 = vmatmul.bf16.gmra.mxu1 %v7698_v61  ;;  %2979 = vmatpush.bf16.msrb.mxu2 %v6379_v31  ;;  %v6120_v61 = vld [vmem:[%s7188_s1 + $0x10] sm:$0xf0] }
 0x1f5   : > { %9379 = vst [vmem:[#allocation132_spill] sm:$0xff] %v7704_v29  ;;  %2096 = vmatmul.bf16.gmra.mxu0 %v7696_v24  ;;  %2434 = vmatmul.bf16.gmra.mxu2 %v7700_v40  ;;  %v1023_v40 = vld [vmem:[#allocation3 + $0x6c8] sm:$0xff]  ;;  %v6666_v29 = vld [vmem:[%s7188_s1 + $0x104] sm:$0xf]  ;;  %v1024_v24 = vld [vmem:[#allocation3 + $0x6d0] sm:$0xff]  ;;  %v6123_v30 = vor.u32 %v6634_v27, %v6120_v61 }
 0x1f6   : > { %2603 = vmatmul.bf16.gmra.mxu3 %v7702_v33  ;;  %v1026_v33 = vld [vmem:[#allocation3 + $0x6e0] sm:$0xff] }
 0x1f7   : > { %v7720_v35 = vpack.c.bf16 %v1026_v33, %v1022_v41  ;;  %2641 = vmatpush.bf16.msrb.mxu0 %v6123_v30  ;;  %v1030_v41 = vld [vmem:[#allocation3 + $0x700] sm:$0xff]  ;;  %v1031_v30 = vld [vmem:[#allocation3 + $0x708] sm:$0xff] }
 0x1f8   : > { %v2395_v8 = vpop.f32.mrf.mxu2 }
 0x1f9   : > { %v2396_v9 = vadd.f32 %v2395_v8, %v2227_v28  ;;  %v2564_v44 = vpop.f32.mrf.mxu3  ;;  %v2228_v45 = vpop.f32.mrf.mxu1  ;;  %v6248_v28 = vld [vmem:[%s7188_s1 + $0x110] sm:$0xf0]  ;;  %v1029_v8 = vld [vmem:[#allocation3 + $0x6f8] sm:$0xff]  ;;  %9381 = vst [vmem:[#allocation134_spill] sm:$0xff] %v7720_v35 }
 0x1fa   : > { %v2059_v26 = vpop.f32.mrf.mxu0  ;;  %v6251_v42 = vor.u32 %v6666_v29, %v6248_v28  ;;  %v7726_v62 = vpack.c.bf16 %v1029_v8, %v1025_v17  ;;  %v1032_v28 = vld [vmem:[#allocation3 + $0x710] sm:$0xff]  ;;  %v1033_v8 = vld [vmem:[#allocation3 + $0x718] sm:$0xff] }
 0x1fb   : > { %v7714_v60 = vadd.f32 %v2564_v44, %v2396_v9  ;;  %v2229_v10 = vadd.f32 %v2228_v45, %v2059_v26  ;;  %v7722_v26 = vpack.c.bf16 %v1027_v34, %v1023_v40  ;;  %v7724_v45 = vpack.c.bf16 %v1028_v46, %v1024_v24  ;;  %v1034_v34 = vld [vmem:[#allocation3 + $0x720] sm:$0xff]  ;;  %v1036_v17 = vld [vmem:[#allocation3 + $0x730] sm:$0xff] }
 0x1fc   : > { %2810 = vmatpush.bf16.msrb.mxu1 %v6251_v42  ;;  %9384 = vst [vmem:[#allocation137_spill] sm:$0xff] %v7726_v62 }
 0x1fd   : > { %9380 = vst [vmem:[#allocation133_spill] sm:$0xff] %v7714_v60 }
 0x1fe   : > { %9382 = vst [vmem:[#allocation135_spill] sm:$0xff] %v7722_v26 }
 0x1ff   : > { %9383 = vst [vmem:[#allocation136_spill] sm:$0xff] %v7724_v45 }
 0x200   : > { %v2397_v31 = vpop.f32.mrf.mxu2 }
 0x201   : > { %v2398_v43 = vadd.f32 %v2397_v31, %v2229_v10  ;;  %v2566_v9 = vpop.f32.mrf.mxu3  ;;  %v2231_v60 = vpop.f32.mrf.mxu1  ;;  %v1037_v31 = vld [vmem:[#allocation3 + $0x738] sm:$0xff] }
 0x202   : > { %v2062_v44 = vpop.f32.mrf.mxu0 }
 0x203   : > { %v7728_v61 = vadd.f32 %v2566_v9, %v2398_v43  ;;  %v2232_v27 = vadd.f32 %v2231_v60, %v2062_v44  ;;  %v1035_v60 = vld [vmem:[#allocation3 + $0x728] sm:$0xff]  ;;  %v7736_v9 = vpack.c.bf16 %v1034_v34, %v1030_v41 }
 0x204   : > { %2270 = vmatmul.bf16.gmra.mxu1 %v7722_v26 }
 0x205   : > { %9385 = vst [vmem:[#allocation138_spill] sm:$0xff] %v7728_v61  ;;  %2101 = vmatmul.bf16.gmra.mxu0 %v7720_v35  ;;  %2439 = vmatmul.bf16.gmra.mxu2 %v7724_v45  ;;  %v7740_v45 = vpack.c.bf16 %v1036_v17, %v1032_v28 }
 0x206   : > { %2608 = vmatmul.bf16.gmra.mxu3 %v7726_v62  ;;  %9387 = vst [vmem:[#allocation140_spill] sm:$0xff] %v7736_v9 }
 0x207   : > { %9389 = vst [vmem:[#allocation142_spill] sm:$0xff] %v7740_v45 }
 0x208   : > { %v2400_v29 = vpop.f32.mrf.mxu2 }
 0x209   : > { %v2401_v33 = vadd.f32 %v2400_v29, %v2232_v27  ;;  %v2569_v40 = vpop.f32.mrf.mxu3  ;;  %v2233_v24 = vpop.f32.mrf.mxu1  ;;  %v7738_v29 = vpack.c.bf16 %v1035_v60, %v1031_v30 }
 0x20a   : > { %v2064_v46 = vpop.f32.mrf.mxu0 }
 0x20b   : > { %v7734_v42 = vadd.f32 %v2569_v40, %v2401_v33  ;;  %v2234_v10 = vadd.f32 %v2233_v24, %v2064_v46  ;;  %9388 = vst [vmem:[#allocation141_spill] sm:$0xff] %v7738_v29  ;;  %v7742_v40 = vpack.c.bf16 %v1037_v31, %v1033_v8  ;;  %v1038_v8 = vld [vmem:[#allocation3 + $0x740] sm:$0xff]  ;;  %v1039_v31 = vld [vmem:[#allocation3 + $0x748] sm:$0xff] }
 0x20d   : > { %9386 = vst [vmem:[#allocation139_spill] sm:$0xff] %v7734_v42 }
 0x20e   : > { %9390 = vst [vmem:[#allocation143_spill] sm:$0xff] %v7742_v40 }
 0x210   : > { %v2402_v43 = vpop.f32.mrf.mxu2 }
 0x211   : > { %v2403_v44 = vadd.f32 %v2402_v43, %v2234_v10  ;;  %v2571_v62 = vpop.f32.mrf.mxu3  ;;  %v2236_v33 = vpop.f32.mrf.mxu1  ;;  %v1043_v43 = vld [vmem:[#allocation3 + $0x768] sm:$0xff] }
 0x212   : > { %v2067_v27 = vpop.f32.mrf.mxu0 }
 0x213   : > { %v7744_v46 = vadd.f32 %v2571_v62, %v2403_v44  ;;  %v2237_v24 = vadd.f32 %v2236_v33, %v2067_v27  ;;  %v1042_v62 = vld [vmem:[#allocation3 + $0x760] sm:$0xff]  ;;  %v1040_v44 = vld [vmem:[#allocation3 + $0x750] sm:$0xff]  ;;  %v1041_v33 = vld [vmem:[#allocation3 + $0x758] sm:$0xff] }
 0x214   : > { %2275 = vmatmul.bf16.gmra.mxu1 %v7738_v29  ;;  %v1044_v27 = vld [vmem:[#allocation3 + $0x770] sm:$0xff]  ;;  %v1045_v29 = vld [vmem:[#allocation3 + $0x778] sm:$0xff] }
 0x215   : > { %9391 = vst [vmem:[#allocation144_spill] sm:$0xff] %v7744_v46  ;;  %2106 = vmatmul.bf16.gmra.mxu0 %v7736_v9  ;;  %2444 = vmatmul.bf16.gmra.mxu2 %v7740_v45  ;;  %v7752_v45 = vpack.c.bf16 %v1042_v62, %v1038_v8  ;;  %v7756_v42 = vpack.c.bf16 %v1044_v27, %v1040_v44  ;;  %v1046_v44 = vld [vmem:[#allocation3 + $0x780] sm:$0xff]  ;;  %v1051_v27 = vld [vmem:[#allocation3 + $0x7a8] sm:$0xff] }
 0x216   : > { %2613 = vmatmul.bf16.gmra.mxu3 %v7742_v40 }
 0x217   : > { %9393 = vst [vmem:[#allocation146_spill] sm:$0xff] %v7752_v45 }
 0x218   : > { %v2405_v10 = vpop.f32.mrf.mxu2  ;;  %9395 = vst [vmem:[#allocation148_spill] sm:$0xff] %v7756_v42 }
 0x219   : > { %v2406_v41 = vadd.f32 %v2405_v10, %v2237_v24  ;;  %v2574_v34 = vpop.f32.mrf.mxu3  ;;  %v2238_v60 = vpop.f32.mrf.mxu1  ;;  %v7754_v10 = vpack.c.bf16 %v1043_v43, %v1039_v31 }
 0x21a   : > { %v2069_v30 = vpop.f32.mrf.mxu0 }
 0x21b   : > { %v7750_v28 = vadd.f32 %v2574_v34, %v2406_v41  ;;  %v2239_v17 = vadd.f32 %v2238_v60, %v2069_v30  ;;  %9394 = vst [vmem:[#allocation147_spill] sm:$0xff] %v7754_v10  ;;  %v7758_v34 = vpack.c.bf16 %v1045_v29, %v1041_v33  ;;  %v1048_v33 = vld [vmem:[#allocation3 + $0x790] sm:$0xff] }
 0x21d   : > { %9392 = vst [vmem:[#allocation145_spill] sm:$0xff] %v7750_v28  ;;  %v1060_v28 = vld [vmem:[#allocation3 + $0x7f0] sm:$0xff] }
 0x21e   : > { %9396 = vst [vmem:[#allocation149_spill] sm:$0xff] %v7758_v34 }
 0x220   : > { %v2407_v46 = vpop.f32.mrf.mxu2 }
 0x221   : > { %v2408_v40 = vadd.f32 %v2407_v46, %v2239_v17  ;;  %v2576_v9 = vpop.f32.mrf.mxu3  ;;  %v2241_v41 = vpop.f32.mrf.mxu1 }
 0x222   : > { %v2072_v24 = vpop.f32.mrf.mxu0 }
 0x223   : > { %v7760_v30 = vadd.f32 %v2576_v9, %v2408_v40  ;;  %v2242_v60 = vadd.f32 %v2241_v41, %v2072_v24  ;;  %v1050_v9 = vld [vmem:[#allocation3 + $0x7a0] sm:$0xff]  ;;  %v1047_v40 = vld [vmem:[#allocation3 + $0x788] sm:$0xff]  ;;  %v1052_v24 = vld [vmem:[#allocation3 + $0x7b0] sm:$0xff] }
 0x224   : > { %2280 = vmatmul.bf16.gmra.mxu1 %v7754_v10  ;;  %v1049_v41 = vld [vmem:[#allocation3 + $0x798] sm:$0xff] }
 0x225   : > { %9397 = vst [vmem:[#allocation150_spill] sm:$0xff] %v7760_v30  ;;  %2111 = vmatmul.bf16.gmra.mxu0 %v7752_v45  ;;  %2449 = vmatmul.bf16.gmra.mxu2 %v7756_v42  ;;  %v1053_v10 = vld [vmem:[#allocation3 + $0x7b8] sm:$0xff] }
 0x226   : > { %2618 = vmatmul.bf16.gmra.mxu3 %v7758_v34  ;;  %v7768_v34 = vpack.c.bf16 %v1050_v9, %v1046_v44  ;;  %v6622_v44 = vld [vmem:[%s7188_s1 + $0x3e8] sm:$0xf] }
 0x228   : > { %v2410_v46 = vpop.f32.mrf.mxu2  ;;  %9399 = vst [vmem:[#allocation152_spill] sm:$0xff] %v7768_v34 }
 0x229   : > { %v2411_v17 = vadd.f32 %v2410_v46, %v2242_v60  ;;  %v2579_v8 = vpop.f32.mrf.mxu3  ;;  %v2243_v31 = vpop.f32.mrf.mxu1 }
 0x22a   : > { %v2074_v62 = vpop.f32.mrf.mxu0 }
 0x22b   : > { %v7766_v43 = vadd.f32 %v2579_v8, %v2411_v17  ;;  %v2244_v29 = vadd.f32 %v2243_v31, %v2074_v62  ;;  %v7770_v8 = vpack.c.bf16 %v1051_v27, %v1047_v40  ;;  %v7772_v62 = vpack.c.bf16 %v1052_v24, %v1048_v33  ;;  %v6761_v40 = vld [vmem:[%s7188_s1 + $0x3f4] sm:$0xf0] }
 0x22c   : > { %v6623_v27 = vor.u32 %v6761_v40, %v6622_v44  ;;  %v1057_v40 = vld [vmem:[#allocation3 + $0x7d8] sm:$0xff] }
 0x22d   : > { %9398 = vst [vmem:[#allocation151_spill] sm:$0xff] %v7766_v43  ;;  %v7774_v43 = vpack.c.bf16 %v1053_v10, %v1049_v41 }
 0x22e   : > { %9400 = vst [vmem:[#allocation153_spill] sm:$0xff] %v7770_v8  ;;  %3817 = vmatpush.bf16.msra.mxu3 %v6623_v27 }
 0x22f   : > { %9401 = vst [vmem:[#allocation154_spill] sm:$0xff] %v7772_v62 }
 0x230   : > { %v2412_v42 = vpop.f32.mrf.mxu2  ;;  %9402 = vst [vmem:[#allocation155_spill] sm:$0xff] %v7774_v43 }
 0x231   : > { %v2413_v60 = vadd.f32 %v2412_v42, %v2244_v29  ;;  %v2581_v46 = vpop.f32.mrf.mxu3  ;;  %v2246_v31 = vpop.f32.mrf.mxu1  ;;  %v6494_v42 = vld [vmem:[%s7188_s1 + $0x2e8] sm:$0xf]  ;;  %v6729_v29 = vld [vmem:[%s7188_s1 + $0x2f4] sm:$0xf0] }
 0x232   : > { %v2077_v17 = vpop.f32.mrf.mxu0  ;;  %v6495_v9 = vor.u32 %v6729_v29, %v6494_v42  ;;  %v1059_v42 = vld [vmem:[#allocation3 + $0x7e8] sm:$0xff] }
 0x233   : > { %v7776_v30 = vadd.f32 %v2581_v46, %v2413_v60  ;;  %v2247_v45 = vadd.f32 %v2246_v31, %v2077_v17  ;;  %v1054_v31 = vld [vmem:[#allocation3 + $0x7c0] sm:$0xff]  ;;  %v6238_v29 = vld [vmem:[%s7188_s1 + $0xe8] sm:$0xf] }
 0x234   : > { %2285 = vmatmul.bf16.gmra.mxu1 %v7770_v8  ;;  %3648 = vmatpush.bf16.msra.mxu2 %v6495_v9  ;;  %v6665_v8 = vld [vmem:[%s7188_s1 + $0xf4] sm:$0xf0] }
 0x235   : > { %9403 = vst [vmem:[#allocation156_spill] sm:$0xff] %v7776_v30  ;;  %2116 = vmatmul.bf16.gmra.mxu0 %v7768_v34  ;;  %2454 = vmatmul.bf16.gmra.mxu2 %v7772_v62  ;;  %v1055_v62 = vld [vmem:[#allocation3 + $0x7c8] sm:$0xff]  ;;  %v1056_v34 = vld [vmem:[#allocation3 + $0x7d0] sm:$0xff]  ;;  %v6239_v44 = vor.u32 %v6665_v8, %v6238_v29 }
 0x236   : > { %2623 = vmatmul.bf16.gmra.mxu3 %v7774_v43  ;;  %v1058_v43 = vld [vmem:[#allocation3 + $0x7e0] sm:$0xff]  ;;  %v6366_v30 = vld [vmem:[%s7188_s1 + $0x1e8] sm:$0xf] }
 0x237   : > { %v7792_v61 = vpack.c.bf16 %v1058_v43, %v1054_v31  ;;  %3310 = vmatpush.bf16.msra.mxu0 %v6239_v44 }
 0x238   : > { %v2415_v10 = vpop.f32.mrf.mxu2 }
 0x239   : > { %v2416_v33 = vadd.f32 %v2415_v10, %v2247_v45  ;;  %v2584_v24 = vpop.f32.mrf.mxu3  ;;  %v2248_v60 = vpop.f32.mrf.mxu1  ;;  %v6697_v45 = vld [vmem:[%s7188_s1 + $0x1f4] sm:$0xf0] }
 0x23a   : > { %v2079_v41 = vpop.f32.mrf.mxu0  ;;  %v1061_v10 = vld [vmem:[#allocation3 + $0x7f8] sm:$0xff]  ;;  %v6367_v26 = vor.u32 %v6697_v45, %v6366_v30 }
 0x23b   : > { %v7786_v46 = vadd.f32 %v2584_v24, %v2416_v33  ;;  %v2249_v17 = vadd.f32 %v2248_v60, %v2079_v41  ;;  %v7794_v41 = vpack.c.bf16 %v1059_v42, %v1055_v62  ;;  %v7796_v60 = vpack.c.bf16 %v1060_v28, %v1056_v34 }
 0x23c   : > { %3479 = vmatpush.bf16.msra.mxu1 %v6367_v26  ;;  %v7798_v35 = vpack.c.bf16 %v1061_v10, %v1057_v40 }
 0x23d   : > { %9404 = vst [vmem:[#allocation157_spill] sm:$0xff] %v7786_v46 }
 0x23e   : > { %9405 = vst [vmem:[#allocation158_spill] sm:$0xff] %v7794_v41 }
 0x240   : > { %v2417_v9 = vpop.f32.mrf.mxu2 }
 0x241   : > { %v2418_v27 = vadd.f32 %v2417_v9, %v2249_v17  ;;  %v2586_v33 = vpop.f32.mrf.mxu3  ;;  %v2251_v46 = vpop.f32.mrf.mxu1 }
 0x242   : > { %v2082_v24 = vpop.f32.mrf.mxu0 }
 0x243   : > { %v7800_v8 = vadd.f32 %v2586_v33, %v2418_v27  ;;  %v2252_v29 = vadd.f32 %v2251_v46, %v2082_v24 }
 0x244   : > { %2290 = vmatmul.bf16.gmra.mxu1 %v7794_v41 }
 0x245   : > { %2121 = vmatmul.bf16.gmra.mxu0 %v7792_v61  ;;  %2459 = vmatmul.bf16.gmra.mxu2 %v7796_v60 }
 0x246   : > { %2628 = vmatmul.bf16.gmra.mxu3 %v7798_v35 }
 0x248   : > { %v2420_v30 = vpop.f32.mrf.mxu2 }
 0x249   : > { %v2421_v43 = vadd.f32 %v2420_v30, %v2252_v29  ;;  %v2589_v62 = vpop.f32.mrf.mxu3  ;;  %v2253_v34 = vpop.f32.mrf.mxu1 }
 0x24a   : > { %v2084_v28 = vpop.f32.mrf.mxu0 }
 0x24b   : > { %v7806_v26 = vadd.f32 %v2589_v62, %v2421_v43  ;;  %v2254_v17 = vadd.f32 %v2253_v34, %v2084_v28 }
 0x250   : > { %v2422_v31 = vpop.f32.mrf.mxu2 }
 0x251   : > { %v2423_v42 = vadd.f32 %v2422_v31, %v2254_v17  ;;  %v2591_v44 = vpop.f32.mrf.mxu3  ;;  %v2256_v45 = vpop.f32.mrf.mxu1 }
 0x252   : > { %v2087_v46 = vpop.f32.mrf.mxu0 }
 0x253   : > { %v7808_v40 = vadd.f32 %v2591_v44, %v2423_v42  ;;  %v2257_v10 = vadd.f32 %v2256_v45, %v2087_v46 }
 0x254   : > { %2811 = vmatmul.bf16.vlgmr.msrb.gmra.mxu1 %v7268_v51 }
 0x255   : > { %2642 = vmatmul.bf16.vlgmr.msrb.gmra.mxu0 %v7264_v47  ;;  %2980 = vmatmul.bf16.vlgmr.msrb.gmra.mxu2 %v7270_v52 }
 0x256   : > { %3149 = vmatmul.bf16.vlgmr.msrb.gmra.mxu3 %v7272_v53 }
 0x258   : > { %v2425_v9 = vpop.f32.mrf.mxu2 }
 0x259   : > { %v2426_v27 = vadd.f32 %v2425_v9, %v2257_v10  ;;  %v2594_v33 = vpop.f32.mrf.mxu3  ;;  %v2258_v29 = vpop.f32.mrf.mxu1 }
 0x25a   : > { %v2089_v24 = vpop.f32.mrf.mxu0 }
 0x25b   : > { %v7814_v30 = vadd.f32 %v2594_v33, %v2426_v27  ;;  %v2259_v43 = vadd.f32 %v2258_v29, %v2089_v24 }
 0x260   : > { %v2427_v62 = vpop.f32.mrf.mxu2 }
 0x261   : > { %v2428_v28 = vadd.f32 %v2427_v62, %v2259_v43  ;;  %v2596_v34 = vpop.f32.mrf.mxu3  ;;  %v2261_v31 = vpop.f32.mrf.mxu1 }
 0x262   : > { %v2092_v17 = vpop.f32.mrf.mxu0 }
 0x263   : > { %v7816_v42 = vadd.f32 %v2596_v34, %v2428_v28  ;;  %v2262_v44 = vadd.f32 %v2261_v31, %v2092_v17 }
 0x264   : > { %2816 = vmatmul.bf16.gmra.mxu1 %v7280_v1 }
 0x265   : > { %2647 = vmatmul.bf16.gmra.mxu0 %v7278_v0  ;;  %2985 = vmatmul.bf16.gmra.mxu2 %v7282_v2 }
 0x266   : > { %3154 = vmatmul.bf16.gmra.mxu3 %v7284_v3 }
 0x268   : > { %v2430_v46 = vpop.f32.mrf.mxu2 }
 0x269   : > { %v2431_v45 = vadd.f32 %v2430_v46, %v2262_v44  ;;  %v2599_v10 = vpop.f32.mrf.mxu3  ;;  %v2263_v27 = vpop.f32.mrf.mxu1  ;;  %v6478_v44 = vld [vmem:[%s7188_s1 + $0x2c8] sm:$0xf]  ;;  %v6725_v46 = vld [vmem:[%s7188_s1 + $0x2d4] sm:$0xf0] }
 0x26a   : > { %v2094_v9 = vpop.f32.mrf.mxu0 }
 0x26b   : > { %v7822_v33 = vadd.f32 %v2599_v10, %v2431_v45  ;;  %v2264_v24 = vadd.f32 %v2263_v27, %v2094_v9  ;;  %v6606_v45 = vld [vmem:[%s7188_s1 + $0x3c8] sm:$0xf]  ;;  %v6479_v10 = vor.u32 %v6725_v46, %v6478_v44  ;;  %v6757_v9 = vld [vmem:[%s7188_s1 + $0x3d4] sm:$0xf0] }
 0x26d   : > { %9406 = vst [vmem:[#allocation159_spill] sm:$0xff] %v7822_v33  ;;  %3649 = vmatpush.bf16.msra.mxu2 %v6479_v10  ;;  %v6693_v33 = vld [vmem:[%s7188_s1 + $0x1d4] sm:$0xf0] }
 0x270   : > { %v2432_v29 = vpop.f32.mrf.mxu2 }
 0x271   : > { %v2433_v43 = vadd.f32 %v2432_v29, %v2264_v24  ;;  %v2601_v62 = vpop.f32.mrf.mxu3  ;;  %v2266_v34 = vpop.f32.mrf.mxu1  ;;  %v6607_v24 = vor.u32 %v6757_v9, %v6606_v45 }
 0x272   : > { %v2097_v28 = vpop.f32.mrf.mxu0 }
 0x273   : > { %v7824_v17 = vadd.f32 %v2601_v62, %v2433_v43  ;;  %v2267_v31 = vadd.f32 %v2266_v34, %v2097_v28  ;;  %3818 = vmatpush.bf16.msra.mxu3 %v6607_v24 }
 0x274   : > { %2821 = vmatmul.bf16.gmra.mxu1 %v7292_v13  ;;  %v6661_v13 = vld [vmem:[%s7188_s1 + $0xd4] sm:$0xf0] }
 0x275   : > { %9407 = vst [vmem:[#allocation160_spill] sm:$0xff] %v7824_v17  ;;  %2652 = vmatmul.bf16.gmra.mxu0 %v7290_v12  ;;  %2990 = vmatmul.bf16.gmra.mxu2 %v7294_v14  ;;  %v6222_v14 = vld [vmem:[%s7188_s1 + $0xc8] sm:$0xf] }
 0x276   : > { %3159 = vmatmul.bf16.gmra.mxu3 %v7296_v15  ;;  %v6350_v17 = vld [vmem:[%s7188_s1 + $0x1c8] sm:$0xf]  ;;  %v6223_v12 = vor.u32 %v6661_v13, %v6222_v14 }
 0x277   : > { %v6351_v3 = vor.u32 %v6693_v33, %v6350_v17 }
 0x278   : > { %v2435_v27 = vpop.f32.mrf.mxu2  ;;  %3311 = vmatpush.bf16.msra.mxu0 %v6223_v12 }
 0x279   : > { %v2436_v29 = vadd.f32 %v2435_v27, %v2267_v31  ;;  %v2604_v43 = vpop.f32.mrf.mxu3  ;;  %v2268_v28 = vpop.f32.mrf.mxu1  ;;  %3480 = vmatpush.bf16.msra.mxu1 %v6351_v3 }
 0x27a   : > { %v2099_v62 = vpop.f32.mrf.mxu0 }
 0x27b   : > { %v7834_v34 = vadd.f32 %v2604_v43, %v2436_v29  ;;  %v2269_v15 = vadd.f32 %v2268_v28, %v2099_v62 }
 0x280   : > { %v2437_v44 = vpop.f32.mrf.mxu2 }
 0x281   : > { %v2438_v46 = vadd.f32 %v2437_v44, %v2269_v15  ;;  %v2606_v2 = vpop.f32.mrf.mxu3  ;;  %v2271_v31 = vpop.f32.mrf.mxu1 }
 0x282   : > { %v2102_v45 = vpop.f32.mrf.mxu0 }
 0x283   : > { %v7840_v9 = vadd.f32 %v2606_v2, %v2438_v46  ;;  %v2272_v10 = vadd.f32 %v2271_v31, %v2102_v45 }
 0x284   : > { %2826 = vmatmul.bf16.gmra.mxu1 %v7312_v37 }
 0x285   : > { %2657 = vmatmul.bf16.gmra.mxu0 %v7310_v36  ;;  %2995 = vmatmul.bf16.gmra.mxu2 %v7314_v38 }
 0x286   : > { %3164 = vmatmul.bf16.gmra.mxu3 %v7316_v39 }
 0x288   : > { %v2440_v13 = vpop.f32.mrf.mxu2 }
 0x289   : > { %v2441_v14 = vadd.f32 %v2440_v13, %v2272_v10  ;;  %v2609_v33 = vpop.f32.mrf.mxu3  ;;  %v2273_v15 = vpop.f32.mrf.mxu1 }
 0x28a   : > { %v2104_v12 = vpop.f32.mrf.mxu0 }
 0x28b   : > { %v7846_v17 = vadd.f32 %v2609_v33, %v2441_v14  ;;  %v2274_v3 = vadd.f32 %v2273_v15, %v2104_v12 }
 0x290   : > { %v2442_v27 = vpop.f32.mrf.mxu2 }
 0x291   : > { %v2443_v2 = vadd.f32 %v2442_v27, %v2274_v3  ;;  %v2611_v24 = vpop.f32.mrf.mxu3  ;;  %v2276_v43 = vpop.f32.mrf.mxu1 }
 0x292   : > { %v2107_v29 = vpop.f32.mrf.mxu0 }
 0x293   : > { %v7848_v62 = vadd.f32 %v2611_v24, %v2443_v2  ;;  %v2277_v28 = vadd.f32 %v2276_v43, %v2107_v29 }
 0x294   : > { %2831 = vmatmul.bf16.gmra.mxu1 %v7324_v50 }
 0x295   : > { %2662 = vmatmul.bf16.gmra.mxu0 %v7322_v49  ;;  %3000 = vmatmul.bf16.gmra.mxu2 %v7326_v54 }
 0x296   : > { %3169 = vmatmul.bf16.gmra.mxu3 %v7328_v55 }
 0x298   : > { %v2445_v44 = vpop.f32.mrf.mxu2 }
 0x299   : > { %v2446_v46 = vadd.f32 %v2445_v44, %v2277_v28  ;;  %v2614_v45 = vpop.f32.mrf.mxu3  ;;  %v2278_v10 = vpop.f32.mrf.mxu1 }
 0x29a   : > { %v2109_v31 = vpop.f32.mrf.mxu0 }
 0x29b   : > { %v7854_v13 = vadd.f32 %v2614_v45, %v2446_v46  ;;  %v2279_v14 = vadd.f32 %v2278_v10, %v2109_v31 }
 0x2a0   : > { %v2447_v33 = vpop.f32.mrf.mxu2 }
 0x2a1   : > { %v2448_v12 = vadd.f32 %v2447_v33, %v2279_v14  ;;  %v2616_v15 = vpop.f32.mrf.mxu3  ;;  %v2281_v27 = vpop.f32.mrf.mxu1 }
 0x2a2   : > { %v2112_v3 = vpop.f32.mrf.mxu0 }
 0x2a3   : > { %v7856_v2 = vadd.f32 %v2616_v15, %v2448_v12  ;;  %v2282_v24 = vadd.f32 %v2281_v27, %v2112_v3 }
 0x2a4   : > { %2836 = vmatmul.bf16.gmra.mxu1 %v7336_v5 }
 0x2a5   : > { %2667 = vmatmul.bf16.gmra.mxu0 %v7334_v4  ;;  %3005 = vmatmul.bf16.gmra.mxu2 %v7338_v6 }
 0x2a6   : > { %3174 = vmatmul.bf16.gmra.mxu3 %v7340_v7 }
 0x2a8   : > { %v2450_v29 = vpop.f32.mrf.mxu2 }
 0x2a9   : > { %v2451_v43 = vadd.f32 %v2450_v29, %v2282_v24  ;;  %v2619_v28 = vpop.f32.mrf.mxu3  ;;  %v2283_v46 = vpop.f32.mrf.mxu1  ;;  %v6462_v24 = vld [vmem:[%s7188_s1 + $0x2a8] sm:$0xf]  ;;  %v6721_v29 = vld [vmem:[%s7188_s1 + $0x2b4] sm:$0xf0] }
 0x2aa   : > { %v2114_v44 = vpop.f32.mrf.mxu0 }
 0x2ab   : > { %v7862_v45 = vadd.f32 %v2619_v28, %v2451_v43  ;;  %v2284_v31 = vadd.f32 %v2283_v46, %v2114_v44  ;;  %v6590_v43 = vld [vmem:[%s7188_s1 + $0x3a8] sm:$0xf]  ;;  %v6463_v28 = vor.u32 %v6721_v29, %v6462_v24  ;;  %v6753_v44 = vld [vmem:[%s7188_s1 + $0x3b4] sm:$0xf0] }
 0x2ac   : > { %v6206_v29 = vld [vmem:[%s7188_s1 + $0xa8] sm:$0xf] }
 0x2ad   : > { %9408 = vst [vmem:[#allocation161_spill] sm:$0xff] %v7862_v45  ;;  %3650 = vmatpush.bf16.msra.mxu2 %v6463_v28  ;;  %v6334_v45 = vld [vmem:[%s7188_s1 + $0x1a8] sm:$0xf] }
 0x2b0   : > { %v2452_v10 = vpop.f32.mrf.mxu2 }
 0x2b1   : > { %v2453_v14 = vadd.f32 %v2452_v10, %v2284_v31  ;;  %v2621_v33 = vpop.f32.mrf.mxu3  ;;  %v2286_v15 = vpop.f32.mrf.mxu1  ;;  %v6591_v31 = vor.u32 %v6753_v44, %v6590_v43  ;;  %v6689_v43 = vld [vmem:[%s7188_s1 + $0x1b4] sm:$0xf0] }
 0x2b2   : > { %v2117_v12 = vpop.f32.mrf.mxu0  ;;  %v6335_v28 = vor.u32 %v6689_v43, %v6334_v45 }
 0x2b3   : > { %v7864_v3 = vadd.f32 %v2621_v33, %v2453_v14  ;;  %v2287_v27 = vadd.f32 %v2286_v15, %v2117_v12  ;;  %3819 = vmatpush.bf16.msra.mxu3 %v6591_v31 }
 0x2b4   : > { %2841 = vmatmul.bf16.gmra.mxu1 %v7348_v21 }
 0x2b5   : > { %9409 = vst [vmem:[#allocation162_spill] sm:$0xff] %v7864_v3  ;;  %2672 = vmatmul.bf16.gmra.mxu0 %v7346_v20  ;;  %3010 = vmatmul.bf16.gmra.mxu2 %v7350_v22  ;;  %v6657_v20 = vld [vmem:[%s7188_s1 + $0xb4] sm:$0xf0] }
 0x2b6   : > { %3179 = vmatmul.bf16.gmra.mxu3 %v7352_v23  ;;  %v6207_v6 = vor.u32 %v6657_v20, %v6206_v29  ;;  %3481 = vmatpush.bf16.msra.mxu1 %v6335_v28 }
 0x2b8   : > { %v2455_v46 = vpop.f32.mrf.mxu2  ;;  %3312 = vmatpush.bf16.msra.mxu0 %v6207_v6 }
 0x2b9   : > { %v2456_v10 = vadd.f32 %v2455_v46, %v2287_v27  ;;  %v2624_v14 = vpop.f32.mrf.mxu3  ;;  %v2288_v12 = vpop.f32.mrf.mxu1 }
 0x2ba   : > { %v2119_v33 = vpop.f32.mrf.mxu0 }
 0x2bb   : > { %v7874_v15 = vadd.f32 %v2624_v14, %v2456_v10  ;;  %v2289_v23 = vadd.f32 %v2288_v12, %v2119_v33 }
 0x2c0   : > { %v2457_v22 = vpop.f32.mrf.mxu2 }
 0x2c1   : > { %v2458_v21 = vadd.f32 %v2457_v22, %v2289_v23  ;;  %v2626_v3 = vpop.f32.mrf.mxu3  ;;  %v2291_v7 = vpop.f32.mrf.mxu1 }
 0x2c2   : > { %v2122_v24 = vpop.f32.mrf.mxu0 }
 0x2c3   : > { %v7880_v27 = vadd.f32 %v2626_v3, %v2458_v21  ;;  %v2292_v44 = vadd.f32 %v2291_v7, %v2122_v24  ;;  %v5433_v24 = vld [vmem:[%s7894_s11] sm:$0xf] }
 0x2c4   : > { %2846 = vmatmul.bf16.gmra.mxu1 %v7368_v57  ;;  %v7898_v43 = vperm.slane %v5433_v24, 0 }
 0x2c5   : > { %2677 = vmatmul.bf16.gmra.mxu0 %v7366_v56  ;;  %3015 = vmatmul.bf16.gmra.mxu2 %v7370_v58 }
 0x2c6   : > { %3184 = vmatmul.bf16.gmra.mxu3 %v7372_v59 }
 0x2c8   : > { %v2460_v22 = vpop.f32.mrf.mxu2 }
 0x2c9   : > { %v2461_v23 = vadd.f32 %v2460_v22, %v2292_v44  ;;  %v2629_v46 = vpop.f32.mrf.mxu3  ;;  %v2293_v31 = vpop.f32.mrf.mxu1  ;;  %v7900_v22 = vperm.slane %v5433_v24, 1 }
 0x2ca   : > { %v2124_v20 = vpop.f32.mrf.mxu0 }
 0x2cb   : > { %v7886_v21 = vadd.f32 %v2629_v46, %v2461_v23  ;;  %v2294_v3 = vadd.f32 %v2293_v31, %v2124_v20  ;;  %v5443_v31 = vadd.f32 %v7898_v43, %v7390_v32  ;;  %v5447_v32 = vadd.f32 %v7898_v43, %v7400_v11 }
 0x2d0   : > { %v2462_v7 = vpop.f32.mrf.mxu2 }
 0x2d1   : > { %v2463_v45 = vadd.f32 %v2462_v7, %v2294_v3  ;;  %v2631_v10 = vpop.f32.mrf.mxu3  ;;  %v2812_v33 = vpop.f32.mrf.mxu1 }
 0x2d2   : > { %v2643_v14 = vpop.f32.mrf.mxu0 }
 0x2d3   : > { %v7889_v12 = vadd.f32 %v2631_v10, %v2463_v45  ;;  %v2813_v6 = vadd.f32 %v2812_v33, %v2643_v14 }
 0x2d4   : > { %2851 = vmatmul.bf16.gmra.mxu1 %v7380_v18 }
 0x2d5   : > { %2682 = vmatmul.bf16.gmra.mxu0 %v7378_v16  ;;  %3020 = vmatmul.bf16.gmra.mxu2 %v7382_v19 }
 0x2d6   : > { %3189 = vmatmul.bf16.gmra.mxu3 %v7384_v25  ;;  %v6653_v25 = vld [vmem:[%s7188_s1 + $0x94] sm:$0xf0] }
 0x2d8   : > { %v2981_v29 = vpop.f32.mrf.mxu2 }
 0x2d9   : > { %v2982_v44 = vadd.f32 %v2981_v29, %v2813_v6  ;;  %v3150_v28 = vpop.f32.mrf.mxu3  ;;  %v2814_v46 = vpop.f32.mrf.mxu1 }
 0x2da   : > { %v2645_v23 = vpop.f32.mrf.mxu0 }
 0x2db   : > { %v3151_v20 = vadd.f32 %v3150_v28, %v2982_v44  ;;  %v2815_v45 = vadd.f32 %v2814_v46, %v2645_v23  ;;  %v9410_v23 = vld [vmem:[#allocation29_spill] sm:$0xff]  ;;  %v9411_v46 = vld [vmem:[#allocation30_spill] sm:$0xff] }
 0x2dd   : > { %v5444_v3 = vadd.f32 %v7900_v22, %v3151_v20 }
 0x2df   : > { %v5699_v7 = vpack.c.bf16 %v5444_v3, %v5443_v31 }
 0x2e0   : > { %v2983_v10 = vpop.f32.mrf.mxu2 }
 0x2e1   : > { %5827 = vst [vmem:[%s7907_s20] sm:$0xff] %v5699_v7  ;;  %v2984_v14 = vadd.f32 %v2983_v10, %v2815_v45  ;;  %v3152_v33 = vpop.f32.mrf.mxu3  ;;  %v2817_v24 = vpop.f32.mrf.mxu1 }
 0x2e2   : > { %v2648_v6 = vpop.f32.mrf.mxu0 }
 0x2e3   : > { %v3153_v29 = vadd.f32 %v3152_v33, %v2984_v14  ;;  %v2818_v28 = vadd.f32 %v2817_v24, %v2648_v6  ;;  %v9412_v33 = vld [vmem:[#allocation31_spill] sm:$0xff] }
 0x2e4   : > { %2856 = vmatmul.bf16.gmra.mxu1 %v7394_v63  ;;  %v5451_v11 = vadd.f32 %v7898_v43, %v9412_v33 }
 0x2e5   : > { %2687 = vmatmul.bf16.gmra.mxu0 %v7392_v48  ;;  %v5448_v44 = vadd.f32 %v7900_v22, %v3153_v29  ;;  %3025 = vmatmul.bf16.gmra.mxu2 %v9410_v23  ;;  %v6190_v48 = vld [vmem:[%s7188_s1 + $0x88] sm:$0xf] }
 0x2e6   : > { %3194 = vmatmul.bf16.gmra.mxu3 %v9411_v46 }
 0x2e7   : > { %v5701_v20 = vpack.c.bf16 %v5448_v44, %v5447_v32 }
 0x2e8   : > { %v2986_v31 = vpop.f32.mrf.mxu2 }
 0x2e9   : > { %5829 = vst [vmem:[%s7907_s20 + $0x10] sm:$0xff] %v5701_v20  ;;  %v2987_v3 = vadd.f32 %v2986_v31, %v2818_v28  ;;  %v3155_v7 = vpop.f32.mrf.mxu3  ;;  %v2819_v10 = vpop.f32.mrf.mxu1  ;;  %v9413_v20 = vld [vmem:[#allocation32_spill] sm:$0xff] }
 0x2ea   : > { %v2650_v45 = vpop.f32.mrf.mxu0  ;;  %v9414_v31 = vld [vmem:[#allocation36_spill] sm:$0xff] }
 0x2eb   : > { %v3156_v14 = vadd.f32 %v3155_v7, %v2987_v3  ;;  %v2820_v29 = vadd.f32 %v2819_v10, %v2650_v45  ;;  %v5455_v3 = vadd.f32 %v7898_v43, %v9414_v31  ;;  %v9415_v10 = vld [vmem:[#allocation33_spill] sm:$0xff] }
 0x2ed   : > { %v5452_v6 = vadd.f32 %v7900_v22, %v3156_v14  ;;  %v9416_v14 = vld [vmem:[#allocation34_spill] sm:$0xff] }
 0x2ef   : > { %v5703_v24 = vpack.c.bf16 %v5452_v6, %v5451_v11 }
 0x2f0   : > { %v2988_v63 = vpop.f32.mrf.mxu2 }
 0x2f1   : > { %5831 = vst [vmem:[%s7907_s20 + $0x20] sm:$0xff] %v5703_v24  ;;  %v2989_v23 = vadd.f32 %v2988_v63, %v2820_v29  ;;  %v3157_v46 = vpop.f32.mrf.mxu3  ;;  %v2822_v44 = vpop.f32.mrf.mxu1  ;;  %v9417_v63 = vld [vmem:[#allocation35_spill] sm:$0xff]  ;;  %v6446_v24 = vld [vmem:[%s7188_s1 + $0x288] sm:$0xf] }
 0x2f2   : > { %v2653_v32 = vpop.f32.mrf.mxu0  ;;  %v6717_v29 = vld [vmem:[%s7188_s1 + $0x294] sm:$0xf0] }
 0x2f3   : > { %v3158_v28 = vadd.f32 %v3157_v46, %v2989_v23  ;;  %v2823_v45 = vadd.f32 %v2822_v44, %v2653_v32  ;;  %v6749_v32 = vld [vmem:[%s7188_s1 + $0x394] sm:$0xf0] }
 0x2f4   : > { %2861 = vmatmul.bf16.gmra.mxu1 %v9415_v10 }
 0x2f5   : > { %2692 = vmatmul.bf16.gmra.mxu0 %v9413_v20  ;;  %v5456_v7 = vadd.f32 %v7900_v22, %v3158_v28  ;;  %3030 = vmatmul.bf16.gmra.mxu2 %v9416_v14  ;;  %v6447_v20 = vor.u32 %v6717_v29, %v6446_v24  ;;  %v6574_v28 = vld [vmem:[%s7188_s1 + $0x388] sm:$0xf] }
 0x2f6   : > { %3199 = vmatmul.bf16.gmra.mxu3 %v9417_v63  ;;  %v6575_v10 = vor.u32 %v6749_v32, %v6574_v28  ;;  %v9418_v63 = vld [vmem:[#allocation37_spill] sm:$0xff]  ;;  %v6685_v28 = vld [vmem:[%s7188_s1 + $0x194] sm:$0xf0] }
 0x2f7   : > { %v5705_v33 = vpack.c.bf16 %v5456_v7, %v5455_v3  ;;  %3651 = vmatpush.bf16.msra.mxu2 %v6447_v20  ;;  %v5459_v3 = vadd.f32 %v7898_v43, %v9418_v63  ;;  %v6318_v20 = vld [vmem:[%s7188_s1 + $0x188] sm:$0xf]  ;;  %v9419_v63 = vld [vmem:[#allocation38_spill] sm:$0xff] }
 0x2f8   : > { %v2991_v11 = vpop.f32.mrf.mxu2  ;;  %3820 = vmatpush.bf16.msra.mxu3 %v6575_v10  ;;  %v6319_v19 = vor.u32 %v6685_v28, %v6318_v20  ;;  %v9424_v28 = vld [vmem:[#allocation43_spill] sm:$0xff] }
 0x2f9   : > { %5833 = vst [vmem:[%s7907_s20 + $0x30] sm:$0xff] %v5705_v33  ;;  %v2992_v23 = vadd.f32 %v2991_v11, %v2823_v45  ;;  %v3160_v46 = vpop.f32.mrf.mxu3  ;;  %v2824_v31 = vpop.f32.mrf.mxu1 }
 0x2fa   : > { %v2655_v6 = vpop.f32.mrf.mxu0  ;;  %3482 = vmatpush.bf16.msra.mxu1 %v6319_v19 }
 0x2fb   : > { %v3161_v44 = vadd.f32 %v3160_v46, %v2992_v23  ;;  %v2825_v33 = vadd.f32 %v2824_v31, %v2655_v6  ;;  %v6191_v46 = vor.u32 %v6653_v25, %v6190_v48 }
 0x2fd   : > { %v5460_v7 = vadd.f32 %v7900_v22, %v3161_v44  ;;  %v9420_v44 = vld [vmem:[#allocation42_spill] sm:$0xff]  ;;  %3313 = vmatpush.bf16.msra.mxu0 %v6191_v46 }
 0x2fe   : > { %v5463_v10 = vadd.f32 %v7898_v43, %v9420_v44 }
 0x2ff   : > { %v5707_v45 = vpack.c.bf16 %v5460_v7, %v5459_v3  ;;  %v9421_v3 = vld [vmem:[#allocation39_spill] sm:$0xff]  ;;  %v9422_v7 = vld [vmem:[#allocation40_spill] sm:$0xff] }
 0x300   : > { %v2993_v11 = vpop.f32.mrf.mxu2 }
 0x301   : > { %5835 = vst [vmem:[%s7907_s20 + $0x40] sm:$0xff] %v5707_v45  ;;  %v2994_v24 = vadd.f32 %v2993_v11, %v2825_v33  ;;  %v3162_v29 = vpop.f32.mrf.mxu3  ;;  %v2827_v23 = vpop.f32.mrf.mxu1  ;;  %v9423_v45 = vld [vmem:[#allocation41_spill] sm:$0xff] }
 0x302   : > { %v2658_v14 = vpop.f32.mrf.mxu0 }
 0x303   : > { %v3163_v32 = vadd.f32 %v3162_v29, %v2994_v24  ;;  %v2828_v31 = vadd.f32 %v2827_v23, %v2658_v14  ;;  %v5467_v14 = vadd.f32 %v7898_v43, %v9424_v28 }
 0x304   : > { %2866 = vmatmul.bf16.gmra.mxu1 %v9421_v3  ;;  %v6649_v3 = vld [vmem:[%s7188_s1 + $0x74] sm:$0xf0] }
 0x305   : > { %2697 = vmatmul.bf16.gmra.mxu0 %v9419_v63  ;;  %v5464_v6 = vadd.f32 %v7900_v22, %v3163_v32  ;;  %3035 = vmatmul.bf16.gmra.mxu2 %v9422_v7 }
 0x306   : > { %3204 = vmatmul.bf16.gmra.mxu3 %v9423_v45  ;;  %v9427_v45 = vld [vmem:[#allocation45_spill] sm:$0xff] }
 0x307   : > { %v5709_v25 = vpack.c.bf16 %v5464_v6, %v5463_v10 }
 0x308   : > { %v2996_v48 = vpop.f32.mrf.mxu2 }
 0x309   : > { %5837 = vst [vmem:[%s7907_s20 + $0x50] sm:$0xff] %v5709_v25  ;;  %v2997_v33 = vadd.f32 %v2996_v48, %v2828_v31  ;;  %v3165_v11 = vpop.f32.mrf.mxu3  ;;  %v2829_v29 = vpop.f32.mrf.mxu1  ;;  %v9425_v31 = vld [vmem:[#allocation44_spill] sm:$0xff] }
 0x30a   : > { %v2660_v24 = vpop.f32.mrf.mxu0  ;;  %v9426_v48 = vld [vmem:[#allocation48_spill] sm:$0xff] }
 0x30b   : > { %v3166_v20 = vadd.f32 %v3165_v11, %v2997_v33  ;;  %v2830_v44 = vadd.f32 %v2829_v29, %v2660_v24  ;;  %v5471_v33 = vadd.f32 %v7898_v43, %v9426_v48  ;;  %v9429_v24 = vld [vmem:[#allocation47_spill] sm:$0xff] }
 0x30d   : > { %v5468_v23 = vadd.f32 %v7900_v22, %v3166_v20  ;;  %v9428_v20 = vld [vmem:[#allocation46_spill] sm:$0xff] }
 0x30f   : > { %v5711_v32 = vpack.c.bf16 %v5468_v23, %v5467_v14 }
 0x310   : > { %v2998_v7 = vpop.f32.mrf.mxu2 }
 0x311   : > { %5839 = vst [vmem:[%s7907_s20 + $0x60] sm:$0xff] %v5711_v32  ;;  %v2999_v46 = vadd.f32 %v2998_v7, %v2830_v44  ;;  %v3167_v10 = vpop.f32.mrf.mxu3  ;;  %v2832_v6 = vpop.f32.mrf.mxu1 }
 0x312   : > { %v2663_v19 = vpop.f32.mrf.mxu0 }
 0x313   : > { %v3168_v25 = vadd.f32 %v3167_v10, %v2999_v46  ;;  %v2833_v28 = vadd.f32 %v2832_v6, %v2663_v19  ;;  %v9430_v10 = vld [vmem:[#allocation49_spill] sm:$0xff] }
 0x314   : > { %2871 = vmatmul.bf16.gmra.mxu1 %v9427_v45  ;;  %v5475_v48 = vadd.f32 %v7898_v43, %v9430_v10 }
 0x315   : > { %2702 = vmatmul.bf16.gmra.mxu0 %v9425_v31  ;;  %v5472_v11 = vadd.f32 %v7900_v22, %v3168_v25  ;;  %3040 = vmatmul.bf16.gmra.mxu2 %v9428_v20  ;;  %v9433_v31 = vld [vmem:[#allocation51_spill] sm:$0xff] }
 0x316   : > { %3209 = vmatmul.bf16.gmra.mxu3 %v9429_v24 }
 0x317   : > { %v5713_v7 = vpack.c.bf16 %v5472_v11, %v5471_v33 }
 0x318   : > { %v3001_v29 = vpop.f32.mrf.mxu2 }
 0x319   : > { %5841 = vst [vmem:[%s7907_s20 + $0x70] sm:$0xff] %v5713_v7  ;;  %v3002_v14 = vadd.f32 %v3001_v29, %v2833_v28  ;;  %v3170_v23 = vpop.f32.mrf.mxu3  ;;  %v2834_v44 = vpop.f32.mrf.mxu1  ;;  %v9431_v28 = vld [vmem:[#allocation50_spill] sm:$0xff] }
 0x31a   : > { %v2665_v32 = vpop.f32.mrf.mxu0  ;;  %v9432_v29 = vld [vmem:[#allocation54_spill] sm:$0xff] }
 0x31b   : > { %v3171_v46 = vadd.f32 %v3170_v23, %v3002_v14  ;;  %v2835_v25 = vadd.f32 %v2834_v44, %v2665_v32  ;;  %v5479_v14 = vadd.f32 %v7898_v43, %v9432_v29  ;;  %v9435_v32 = vld [vmem:[#allocation53_spill] sm:$0xff] }
 0x31d   : > { %v5476_v19 = vadd.f32 %v7900_v22, %v3171_v46  ;;  %v9434_v46 = vld [vmem:[#allocation52_spill] sm:$0xff] }
 0x31f   : > { %v5715_v6 = vpack.c.bf16 %v5476_v19, %v5475_v48 }
 0x320   : > { %v3003_v45 = vpop.f32.mrf.mxu2 }
 0x321   : > { %5843 = vst [vmem:[%s7907_s20 + $0x80] sm:$0xff] %v5715_v6  ;;  %v3004_v20 = vadd.f32 %v3003_v45, %v2835_v25  ;;  %v3172_v24 = vpop.f32.mrf.mxu3  ;;  %v2837_v11 = vpop.f32.mrf.mxu1  ;;  %v9436_v25 = vld [vmem:[#allocation55_spill] sm:$0xff] }
 0x322   : > { %v2668_v33 = vpop.f32.mrf.mxu0  ;;  %v5483_v29 = vadd.f32 %v7898_v43, %v9436_v25 }
 0x323   : > { %v3173_v7 = vadd.f32 %v3172_v24, %v3004_v20  ;;  %v2838_v10 = vadd.f32 %v2837_v11, %v2668_v33 }
 0x324   : > { %2876 = vmatmul.bf16.gmra.mxu1 %v9433_v31 }
 0x325   : > { %2707 = vmatmul.bf16.gmra.mxu0 %v9431_v28  ;;  %v5480_v23 = vadd.f32 %v7900_v22, %v3173_v7  ;;  %3045 = vmatmul.bf16.gmra.mxu2 %v9434_v46  ;;  %v6174_v28 = vld [vmem:[%s7188_s1 + $0x68] sm:$0xf] }
 0x326   : > { %3214 = vmatmul.bf16.gmra.mxu3 %v9435_v32 }
 0x327   : > { %v5717_v45 = vpack.c.bf16 %v5480_v23, %v5479_v14 }
 0x328   : > { %v3006_v44 = vpop.f32.mrf.mxu2 }
 0x329   : > { %5845 = vst [vmem:[%s7907_s20 + $0x90] sm:$0xff] %v5717_v45  ;;  %v3007_v48 = vadd.f32 %v3006_v44, %v2838_v10  ;;  %v3175_v20 = vpop.f32.mrf.mxu3  ;;  %v2839_v19 = vpop.f32.mrf.mxu1  ;;  %v9437_v45 = vld [vmem:[#allocation56_spill] sm:$0xff] }
 0x32a   : > { %v2670_v24 = vpop.f32.mrf.mxu0  ;;  %v9438_v44 = vld [vmem:[#allocation60_spill] sm:$0xff] }
 0x32b   : > { %v3176_v6 = vadd.f32 %v3175_v20, %v3007_v48  ;;  %v2840_v7 = vadd.f32 %v2839_v19, %v2670_v24  ;;  %v5487_v48 = vadd.f32 %v7898_v43, %v9438_v44  ;;  %v9439_v19 = vld [vmem:[#allocation57_spill] sm:$0xff] }
 0x32d   : > { %v5484_v33 = vadd.f32 %v7900_v22, %v3176_v6  ;;  %v9440_v6 = vld [vmem:[#allocation58_spill] sm:$0xff] }
 0x32f   : > { %v5719_v11 = vpack.c.bf16 %v5484_v33, %v5483_v29 }
 0x330   : > { %v3008_v31 = vpop.f32.mrf.mxu2 }
 0x331   : > { %5847 = vst [vmem:[%s7907_s20 + $0xa0] sm:$0xff] %v5719_v11  ;;  %v3009_v46 = vadd.f32 %v3008_v31, %v2840_v7  ;;  %v3177_v32 = vpop.f32.mrf.mxu3  ;;  %v2842_v23 = vpop.f32.mrf.mxu1  ;;  %v9441_v31 = vld [vmem:[#allocation59_spill] sm:$0xff]  ;;  %v6430_v11 = vld [vmem:[%s7188_s1 + $0x268] sm:$0xf] }
 0x332   : > { %v2673_v14 = vpop.f32.mrf.mxu0  ;;  %v6713_v7 = vld [vmem:[%s7188_s1 + $0x274] sm:$0xf0] }
 0x333   : > { %v3178_v10 = vadd.f32 %v3177_v32, %v3009_v46  ;;  %v2843_v24 = vadd.f32 %v2842_v23, %v2673_v14  ;;  %v6745_v14 = vld [vmem:[%s7188_s1 + $0x374] sm:$0xf0] }
 0x334   : > { %2881 = vmatmul.bf16.gmra.mxu1 %v9439_v19 }
 0x335   : > { %2712 = vmatmul.bf16.gmra.mxu0 %v9437_v45  ;;  %v5488_v20 = vadd.f32 %v7900_v22, %v3178_v10  ;;  %3050 = vmatmul.bf16.gmra.mxu2 %v9440_v6  ;;  %v6431_v45 = vor.u32 %v6713_v7, %v6430_v11  ;;  %v6558_v10 = vld [vmem:[%s7188_s1 + $0x368] sm:$0xf] }
 0x336   : > { %3219 = vmatmul.bf16.gmra.mxu3 %v9441_v31  ;;  %v6559_v19 = vor.u32 %v6745_v14, %v6558_v10  ;;  %v9442_v31 = vld [vmem:[#allocation61_spill] sm:$0xff]  ;;  %v6681_v10 = vld [vmem:[%s7188_s1 + $0x174] sm:$0xf0] }
 0x337   : > { %v5721_v25 = vpack.c.bf16 %v5488_v20, %v5487_v48  ;;  %3652 = vmatpush.bf16.msra.mxu2 %v6431_v45  ;;  %v5491_v48 = vadd.f32 %v7898_v43, %v9442_v31  ;;  %v6302_v45 = vld [vmem:[%s7188_s1 + $0x168] sm:$0xf]  ;;  %v9443_v31 = vld [vmem:[#allocation62_spill] sm:$0xff] }
 0x338   : > { %v3011_v29 = vpop.f32.mrf.mxu2  ;;  %3821 = vmatpush.bf16.msra.mxu3 %v6559_v19  ;;  %v6303_v63 = vor.u32 %v6681_v10, %v6302_v45  ;;  %v9448_v10 = vld [vmem:[#allocation67_spill] sm:$0xff] }
 0x339   : > { %5849 = vst [vmem:[%s7907_s20 + $0xb0] sm:$0xff] %v5721_v25  ;;  %v3012_v46 = vadd.f32 %v3011_v29, %v2843_v24  ;;  %v3180_v32 = vpop.f32.mrf.mxu3  ;;  %v2844_v44 = vpop.f32.mrf.mxu1 }
 0x33a   : > { %v2675_v33 = vpop.f32.mrf.mxu0  ;;  %3483 = vmatpush.bf16.msra.mxu1 %v6303_v63 }
 0x33b   : > { %v3181_v23 = vadd.f32 %v3180_v32, %v3012_v46  ;;  %v2845_v25 = vadd.f32 %v2844_v44, %v2675_v33  ;;  %v6175_v32 = vor.u32 %v6649_v3, %v6174_v28 }
 0x33d   : > { %v5492_v20 = vadd.f32 %v7900_v22, %v3181_v23  ;;  %v9444_v23 = vld [vmem:[#allocation66_spill] sm:$0xff]  ;;  %3314 = vmatpush.bf16.msra.mxu0 %v6175_v32 }
 0x33e   : > { %v5495_v19 = vadd.f32 %v7898_v43, %v9444_v23 }
 0x33f   : > { %v5723_v24 = vpack.c.bf16 %v5492_v20, %v5491_v48  ;;  %v9445_v48 = vld [vmem:[#allocation63_spill] sm:$0xff]  ;;  %v9446_v20 = vld [vmem:[#allocation64_spill] sm:$0xff] }
 0x340   : > { %v3013_v29 = vpop.f32.mrf.mxu2 }
 0x341   : > { %5851 = vst [vmem:[%s7907_s20 + $0xc0] sm:$0xff] %v5723_v24  ;;  %v3014_v11 = vadd.f32 %v3013_v29, %v2845_v25  ;;  %v3182_v7 = vpop.f32.mrf.mxu3  ;;  %v2847_v46 = vpop.f32.mrf.mxu1  ;;  %v9447_v24 = vld [vmem:[#allocation65_spill] sm:$0xff] }
 0x342   : > { %v2678_v6 = vpop.f32.mrf.mxu0 }
 0x343   : > { %v3183_v14 = vadd.f32 %v3182_v7, %v3014_v11  ;;  %v2848_v44 = vadd.f32 %v2847_v46, %v2678_v6  ;;  %v5499_v6 = vadd.f32 %v7898_v43, %v9448_v10 }
 0x344   : > { %2886 = vmatmul.bf16.gmra.mxu1 %v9445_v48  ;;  %v6645_v48 = vld [vmem:[%s7188_s1 + $0x54] sm:$0xf0] }
 0x345   : > { %2717 = vmatmul.bf16.gmra.mxu0 %v9443_v31  ;;  %v5496_v33 = vadd.f32 %v7900_v22, %v3183_v14  ;;  %3055 = vmatmul.bf16.gmra.mxu2 %v9446_v20 }
 0x346   : > { %3224 = vmatmul.bf16.gmra.mxu3 %v9447_v24  ;;  %v9451_v24 = vld [vmem:[#allocation69_spill] sm:$0xff] }
 0x347   : > { %v5725_v3 = vpack.c.bf16 %v5496_v33, %v5495_v19 }
 0x348   : > { %v3016_v28 = vpop.f32.mrf.mxu2 }
 0x349   : > { %5853 = vst [vmem:[%s7907_s20 + $0xd0] sm:$0xff] %v5725_v3  ;;  %v3017_v25 = vadd.f32 %v3016_v28, %v2848_v44  ;;  %v3185_v29 = vpop.f32.mrf.mxu3  ;;  %v2849_v7 = vpop.f32.mrf.mxu1  ;;  %v9449_v44 = vld [vmem:[#allocation68_spill] sm:$0xff] }
 0x34a   : > { %v2680_v11 = vpop.f32.mrf.mxu0  ;;  %v9450_v28 = vld [vmem:[#allocation72_spill] sm:$0xff] }
 0x34b   : > { %v3186_v45 = vadd.f32 %v3185_v29, %v3017_v25  ;;  %v2850_v23 = vadd.f32 %v2849_v7, %v2680_v11  ;;  %v5503_v25 = vadd.f32 %v7898_v43, %v9450_v28  ;;  %v9453_v11 = vld [vmem:[#allocation71_spill] sm:$0xff] }
 0x34d   : > { %v5500_v46 = vadd.f32 %v7900_v22, %v3186_v45  ;;  %v9452_v45 = vld [vmem:[#allocation70_spill] sm:$0xff] }
 0x34f   : > { %v5727_v14 = vpack.c.bf16 %v5500_v46, %v5499_v6 }
 0x350   : > { %v3018_v20 = vpop.f32.mrf.mxu2 }
 0x351   : > { %5855 = vst [vmem:[%s7907_s20 + $0xe0] sm:$0xff] %v5727_v14  ;;  %v3019_v32 = vadd.f32 %v3018_v20, %v2850_v23  ;;  %v3187_v19 = vpop.f32.mrf.mxu3  ;;  %v2852_v33 = vpop.f32.mrf.mxu1 }
 0x352   : > { %v2683_v63 = vpop.f32.mrf.mxu0 }
 0x353   : > { %v3188_v3 = vadd.f32 %v3187_v19, %v3019_v32  ;;  %v2853_v10 = vadd.f32 %v2852_v33, %v2683_v63  ;;  %v9454_v19 = vld [vmem:[#allocation73_spill] sm:$0xff] }
 0x354   : > { %2891 = vmatmul.bf16.gmra.mxu1 %v9451_v24  ;;  %v5507_v28 = vadd.f32 %v7898_v43, %v9454_v19 }
 0x355   : > { %2722 = vmatmul.bf16.gmra.mxu0 %v9449_v44  ;;  %v5504_v29 = vadd.f32 %v7900_v22, %v3188_v3  ;;  %3060 = vmatmul.bf16.gmra.mxu2 %v9452_v45  ;;  %v9457_v44 = vld [vmem:[#allocation75_spill] sm:$0xff] }
 0x356   : > { %3229 = vmatmul.bf16.gmra.mxu3 %v9453_v11 }
 0x357   : > { %v5729_v20 = vpack.c.bf16 %v5504_v29, %v5503_v25 }
 0x358   : > { %v3021_v7 = vpop.f32.mrf.mxu2 }
 0x359   : > { %5857 = vst [vmem:[%s7907_s20 + $0xf0] sm:$0xff] %v5729_v20  ;;  %v3022_v6 = vadd.f32 %v3021_v7, %v2853_v10  ;;  %v3190_v46 = vpop.f32.mrf.mxu3  ;;  %v2854_v23 = vpop.f32.mrf.mxu1  ;;  %v9455_v10 = vld [vmem:[#allocation74_spill] sm:$0xff] }
 0x35a   : > { %v2685_v14 = vpop.f32.mrf.mxu0  ;;  %v9456_v7 = vld [vmem:[#allocation78_spill] sm:$0xff] }
 0x35b   : > { %v3191_v32 = vadd.f32 %v3190_v46, %v3022_v6  ;;  %v2855_v3 = vadd.f32 %v2854_v23, %v2685_v14  ;;  %v5511_v6 = vadd.f32 %v7898_v43, %v9456_v7  ;;  %v9459_v14 = vld [vmem:[#allocation77_spill] sm:$0xff] }
 0x35d   : > { %v5508_v63 = vadd.f32 %v7900_v22, %v3191_v32  ;;  %v9458_v32 = vld [vmem:[#allocation76_spill] sm:$0xff] }
 0x35f   : > { %v5731_v33 = vpack.c.bf16 %v5508_v63, %v5507_v28 }
 0x360   : > { %v3023_v24 = vpop.f32.mrf.mxu2 }
 0x361   : > { %5859 = vst [vmem:[%s7907_s20 + $0x100] sm:$0xff] %v5731_v33  ;;  %v3024_v45 = vadd.f32 %v3023_v24, %v2855_v3  ;;  %v3192_v11 = vpop.f32.mrf.mxu3  ;;  %v2857_v29 = vpop.f32.mrf.mxu1  ;;  %v9460_v3 = vld [vmem:[#allocation79_spill] sm:$0xff] }
 0x362   : > { %v2688_v25 = vpop.f32.mrf.mxu0  ;;  %v5515_v7 = vadd.f32 %v7898_v43, %v9460_v3 }
 0x363   : > { %v3193_v20 = vadd.f32 %v3192_v11, %v3024_v45  ;;  %v2858_v19 = vadd.f32 %v2857_v29, %v2688_v25 }
 0x364   : > { %2896 = vmatmul.bf16.gmra.mxu1 %v9457_v44 }
 0x365   : > { %2727 = vmatmul.bf16.gmra.mxu0 %v9455_v10  ;;  %v5512_v46 = vadd.f32 %v7900_v22, %v3193_v20  ;;  %3065 = vmatmul.bf16.gmra.mxu2 %v9458_v32  ;;  %v6158_v10 = vld [vmem:[%s7188_s1 + $0x48] sm:$0xf] }
 0x366   : > { %3234 = vmatmul.bf16.gmra.mxu3 %v9459_v14 }
 0x367   : > { %v5733_v24 = vpack.c.bf16 %v5512_v46, %v5511_v6 }
 0x368   : > { %v3026_v23 = vpop.f32.mrf.mxu2 }
 0x369   : > { %5861 = vst [vmem:[%s7907_s20 + $0x110] sm:$0xff] %v5733_v24  ;;  %v3027_v28 = vadd.f32 %v3026_v23, %v2858_v19  ;;  %v3195_v45 = vpop.f32.mrf.mxu3  ;;  %v2859_v63 = vpop.f32.mrf.mxu1  ;;  %v9461_v24 = vld [vmem:[#allocation80_spill] sm:$0xff] }
 0x36a   : > { %v2690_v11 = vpop.f32.mrf.mxu0  ;;  %v9462_v23 = vld [vmem:[#allocation84_spill] sm:$0xff] }
 0x36b   : > { %v3196_v33 = vadd.f32 %v3195_v45, %v3027_v28  ;;  %v2860_v20 = vadd.f32 %v2859_v63, %v2690_v11  ;;  %v5519_v28 = vadd.f32 %v7898_v43, %v9462_v23  ;;  %v9463_v63 = vld [vmem:[#allocation81_spill] sm:$0xff] }
 0x36d   : > { %v5516_v25 = vadd.f32 %v7900_v22, %v3196_v33  ;;  %v9464_v33 = vld [vmem:[#allocation82_spill] sm:$0xff] }
 0x36f   : > { %v5735_v29 = vpack.c.bf16 %v5516_v25, %v5515_v7 }
 0x370   : > { %v3028_v44 = vpop.f32.mrf.mxu2 }
 0x371   : > { %5863 = vst [vmem:[%s7907_s20 + $0x120] sm:$0xff] %v5735_v29  ;;  %v3029_v32 = vadd.f32 %v3028_v44, %v2860_v20  ;;  %v3197_v14 = vpop.f32.mrf.mxu3  ;;  %v2862_v46 = vpop.f32.mrf.mxu1  ;;  %v9465_v44 = vld [vmem:[#allocation83_spill] sm:$0xff]  ;;  %v6414_v29 = vld [vmem:[%s7188_s1 + $0x248] sm:$0xf] }
 0x372   : > { %v2693_v6 = vpop.f32.mrf.mxu0  ;;  %v6709_v20 = vld [vmem:[%s7188_s1 + $0x254] sm:$0xf0] }
 0x373   : > { %v3198_v19 = vadd.f32 %v3197_v14, %v3029_v32  ;;  %v2863_v11 = vadd.f32 %v2862_v46, %v2693_v6  ;;  %v6741_v6 = vld [vmem:[%s7188_s1 + $0x354] sm:$0xf0] }
 0x374   : > { %2901 = vmatmul.bf16.gmra.mxu1 %v9463_v63 }
 0x375   : > { %2732 = vmatmul.bf16.gmra.mxu0 %v9461_v24  ;;  %v5520_v45 = vadd.f32 %v7900_v22, %v3198_v19  ;;  %3070 = vmatmul.bf16.gmra.mxu2 %v9464_v33  ;;  %v6415_v24 = vor.u32 %v6709_v20, %v6414_v29  ;;  %v6542_v19 = vld [vmem:[%s7188_s1 + $0x348] sm:$0xf] }
 0x376   : > { %3239 = vmatmul.bf16.gmra.mxu3 %v9465_v44  ;;  %v6543_v63 = vor.u32 %v6741_v6, %v6542_v19  ;;  %v9466_v44 = vld [vmem:[#allocation85_spill] sm:$0xff]  ;;  %v6677_v19 = vld [vmem:[%s7188_s1 + $0x154] sm:$0xf0] }
 0x377   : > { %v5737_v3 = vpack.c.bf16 %v5520_v45, %v5519_v28  ;;  %3653 = vmatpush.bf16.msra.mxu2 %v6415_v24  ;;  %v5523_v28 = vadd.f32 %v7898_v43, %v9466_v44  ;;  %v6286_v24 = vld [vmem:[%s7188_s1 + $0x148] sm:$0xf]  ;;  %v9467_v44 = vld [vmem:[#allocation86_spill] sm:$0xff] }
 0x378   : > { %v3031_v7 = vpop.f32.mrf.mxu2  ;;  %3822 = vmatpush.bf16.msra.mxu3 %v6543_v63  ;;  %v6287_v31 = vor.u32 %v6677_v19, %v6286_v24  ;;  %v9472_v19 = vld [vmem:[#allocation91_spill] sm:$0xff] }
 0x379   : > { %5865 = vst [vmem:[%s7907_s20 + $0x130] sm:$0xff] %v5737_v3  ;;  %v3032_v32 = vadd.f32 %v3031_v7, %v2863_v11  ;;  %v3200_v14 = vpop.f32.mrf.mxu3  ;;  %v2864_v23 = vpop.f32.mrf.mxu1 }
 0x37a   : > { %v2695_v25 = vpop.f32.mrf.mxu0  ;;  %3484 = vmatpush.bf16.msra.mxu1 %v6287_v31 }
 0x37b   : > { %v3201_v46 = vadd.f32 %v3200_v14, %v3032_v32  ;;  %v2865_v3 = vadd.f32 %v2864_v23, %v2695_v25  ;;  %v6159_v14 = vor.u32 %v6645_v48, %v6158_v10 }
 0x37d   : > { %v5524_v45 = vadd.f32 %v7900_v22, %v3201_v46  ;;  %v9468_v46 = vld [vmem:[#allocation90_spill] sm:$0xff]  ;;  %3315 = vmatpush.bf16.msra.mxu0 %v6159_v14 }
 0x37e   : > { %v5527_v63 = vadd.f32 %v7898_v43, %v9468_v46 }
 0x37f   : > { %v5739_v11 = vpack.c.bf16 %v5524_v45, %v5523_v28  ;;  %v9469_v28 = vld [vmem:[#allocation87_spill] sm:$0xff]  ;;  %v9470_v45 = vld [vmem:[#allocation88_spill] sm:$0xff] }
 0x380   : > { %v3033_v7 = vpop.f32.mrf.mxu2 }
 0x381   : > { %5867 = vst [vmem:[%s7907_s20 + $0x140] sm:$0xff] %v5739_v11  ;;  %v3034_v29 = vadd.f32 %v3033_v7, %v2865_v3  ;;  %v3202_v20 = vpop.f32.mrf.mxu3  ;;  %v2867_v32 = vpop.f32.mrf.mxu1  ;;  %v9471_v11 = vld [vmem:[#allocation89_spill] sm:$0xff] }
 0x382   : > { %v2698_v33 = vpop.f32.mrf.mxu0 }
 0x383   : > { %v3203_v6 = vadd.f32 %v3202_v20, %v3034_v29  ;;  %v2868_v23 = vadd.f32 %v2867_v32, %v2698_v33  ;;  %v5531_v33 = vadd.f32 %v7898_v43, %v9472_v19 }
 0x384   : > { %2906 = vmatmul.bf16.gmra.mxu1 %v9469_v28  ;;  %v6641_v28 = vld [vmem:[%s7188_s1 + $0x34] sm:$0xf0] }
 0x385   : > { %2737 = vmatmul.bf16.gmra.mxu0 %v9467_v44  ;;  %v5528_v25 = vadd.f32 %v7900_v22, %v3203_v6  ;;  %3075 = vmatmul.bf16.gmra.mxu2 %v9470_v45 }
 0x386   : > { %3244 = vmatmul.bf16.gmra.mxu3 %v9471_v11  ;;  %v9475_v11 = vld [vmem:[#allocation93_spill] sm:$0xff] }
 0x387   : > { %v5741_v48 = vpack.c.bf16 %v5528_v25, %v5527_v63 }
 0x388   : > { %v3036_v10 = vpop.f32.mrf.mxu2 }
 0x389   : > { %5869 = vst [vmem:[%s7907_s20 + $0x150] sm:$0xff] %v5741_v48  ;;  %v3037_v3 = vadd.f32 %v3036_v10, %v2868_v23  ;;  %v3205_v7 = vpop.f32.mrf.mxu3  ;;  %v2869_v20 = vpop.f32.mrf.mxu1  ;;  %v9473_v23 = vld [vmem:[#allocation92_spill] sm:$0xff] }
 0x38a   : > { %v2700_v29 = vpop.f32.mrf.mxu0  ;;  %v9474_v10 = vld [vmem:[#allocation96_spill] sm:$0xff] }
 0x38b   : > { %v3206_v24 = vadd.f32 %v3205_v7, %v3037_v3  ;;  %v2870_v46 = vadd.f32 %v2869_v20, %v2700_v29  ;;  %v5535_v3 = vadd.f32 %v7898_v43, %v9474_v10  ;;  %v9477_v29 = vld [vmem:[#allocation95_spill] sm:$0xff] }
 0x38d   : > { %v5532_v32 = vadd.f32 %v7900_v22, %v3206_v24  ;;  %v9476_v24 = vld [vmem:[#allocation94_spill] sm:$0xff] }
 0x38f   : > { %v5743_v6 = vpack.c.bf16 %v5532_v32, %v5531_v33 }
 0x390   : > { %v3038_v45 = vpop.f32.mrf.mxu2 }
 0x391   : > { %5871 = vst [vmem:[%s7907_s20 + $0x160] sm:$0xff] %v5743_v6  ;;  %v3039_v14 = vadd.f32 %v3038_v45, %v2870_v46  ;;  %v3207_v63 = vpop.f32.mrf.mxu3  ;;  %v2872_v25 = vpop.f32.mrf.mxu1 }
 0x392   : > { %v2703_v31 = vpop.f32.mrf.mxu0 }
 0x393   : > { %v3208_v48 = vadd.f32 %v3207_v63, %v3039_v14  ;;  %v2873_v19 = vadd.f32 %v2872_v25, %v2703_v31  ;;  %v9478_v63 = vld [vmem:[#allocation97_spill] sm:$0xff] }
 0x394   : > { %2911 = vmatmul.bf16.gmra.mxu1 %v9475_v11  ;;  %v5539_v10 = vadd.f32 %v7898_v43, %v9478_v63 }
 0x395   : > { %2742 = vmatmul.bf16.gmra.mxu0 %v9473_v23  ;;  %v5536_v7 = vadd.f32 %v7900_v22, %v3208_v48  ;;  %3080 = vmatmul.bf16.gmra.mxu2 %v9476_v24  ;;  %v9481_v23 = vld [vmem:[#allocation99_spill] sm:$0xff] }
 0x396   : > { %3249 = vmatmul.bf16.gmra.mxu3 %v9477_v29 }
 0x397   : > { %v5745_v45 = vpack.c.bf16 %v5536_v7, %v5535_v3 }
 0x398   : > { %v3041_v20 = vpop.f32.mrf.mxu2 }
 0x399   : > { %5873 = vst [vmem:[%s7907_s20 + $0x170] sm:$0xff] %v5745_v45  ;;  %v3042_v33 = vadd.f32 %v3041_v20, %v2873_v19  ;;  %v3210_v32 = vpop.f32.mrf.mxu3  ;;  %v2874_v46 = vpop.f32.mrf.mxu1  ;;  %v9479_v19 = vld [vmem:[#allocation98_spill] sm:$0xff] }
 0x39a   : > { %v2705_v6 = vpop.f32.mrf.mxu0  ;;  %v9480_v20 = vld [vmem:[#allocation102_spill] sm:$0xff] }
 0x39b   : > { %v3211_v14 = vadd.f32 %v3210_v32, %v3042_v33  ;;  %v2875_v48 = vadd.f32 %v2874_v46, %v2705_v6  ;;  %v5543_v33 = vadd.f32 %v7898_v43, %v9480_v20  ;;  %v9483_v6 = vld [vmem:[#allocation101_spill] sm:$0xff] }
 0x39d   : > { %v5540_v31 = vadd.f32 %v7900_v22, %v3211_v14  ;;  %v9482_v14 = vld [vmem:[#allocation100_spill] sm:$0xff] }
 0x39f   : > { %v5747_v25 = vpack.c.bf16 %v5540_v31, %v5539_v10 }
 0x3a0   : > { %v3043_v11 = vpop.f32.mrf.mxu2 }
 0x3a1   : > { %5875 = vst [vmem:[%s7907_s20 + $0x180] sm:$0xff] %v5747_v25  ;;  %v3044_v24 = vadd.f32 %v3043_v11, %v2875_v48  ;;  %v3212_v29 = vpop.f32.mrf.mxu3  ;;  %v2877_v7 = vpop.f32.mrf.mxu1  ;;  %v9484_v48 = vld [vmem:[#allocation103_spill] sm:$0xff] }
 0x3a2   : > { %v2708_v3 = vpop.f32.mrf.mxu0  ;;  %v5547_v20 = vadd.f32 %v7898_v43, %v9484_v48 }
 0x3a3   : > { %v3213_v45 = vadd.f32 %v3212_v29, %v3044_v24  ;;  %v2878_v63 = vadd.f32 %v2877_v7, %v2708_v3 }
 0x3a4   : > { %2916 = vmatmul.bf16.gmra.mxu1 %v9481_v23 }
 0x3a5   : > { %2747 = vmatmul.bf16.gmra.mxu0 %v9479_v19  ;;  %v5544_v32 = vadd.f32 %v7900_v22, %v3213_v45  ;;  %3085 = vmatmul.bf16.gmra.mxu2 %v9482_v14  ;;  %v6142_v19 = vld [vmem:[%s7188_s1 + $0x28] sm:$0xf] }
 0x3a6   : > { %3254 = vmatmul.bf16.gmra.mxu3 %v9483_v6 }
 0x3a7   : > { %v5749_v11 = vpack.c.bf16 %v5544_v32, %v5543_v33 }
 0x3a8   : > { %v3046_v46 = vpop.f32.mrf.mxu2 }
 0x3a9   : > { %5877 = vst [vmem:[%s7907_s20 + $0x190] sm:$0xff] %v5749_v11  ;;  %v3047_v10 = vadd.f32 %v3046_v46, %v2878_v63  ;;  %v3215_v24 = vpop.f32.mrf.mxu3  ;;  %v2879_v31 = vpop.f32.mrf.mxu1  ;;  %v9485_v11 = vld [vmem:[#allocation104_spill] sm:$0xff] }
 0x3aa   : > { %v2710_v29 = vpop.f32.mrf.mxu0  ;;  %v9486_v46 = vld [vmem:[#allocation108_spill] sm:$0xff] }
 0x3ab   : > { %v3216_v25 = vadd.f32 %v3215_v24, %v3047_v10  ;;  %v2880_v45 = vadd.f32 %v2879_v31, %v2710_v29  ;;  %v5551_v10 = vadd.f32 %v7898_v43, %v9486_v46  ;;  %v9487_v31 = vld [vmem:[#allocation105_spill] sm:$0xff] }
 0x3ad   : > { %v5548_v3 = vadd.f32 %v7900_v22, %v3216_v25  ;;  %v9488_v25 = vld [vmem:[#allocation106_spill] sm:$0xff] }
 0x3af   : > { %v5751_v7 = vpack.c.bf16 %v5548_v3, %v5547_v20 }
 0x3b0   : > { %v3048_v23 = vpop.f32.mrf.mxu2 }
 0x3b1   : > { %5879 = vst [vmem:[%s7907_s20 + $0x1a0] sm:$0xff] %v5751_v7  ;;  %v3049_v14 = vadd.f32 %v3048_v23, %v2880_v45  ;;  %v3217_v6 = vpop.f32.mrf.mxu3  ;;  %v2882_v32 = vpop.f32.mrf.mxu1  ;;  %v9489_v23 = vld [vmem:[#allocation107_spill] sm:$0xff]  ;;  %v6398_v7 = vld [vmem:[%s7188_s1 + $0x228] sm:$0xf] }
 0x3b2   : > { %v2713_v33 = vpop.f32.mrf.mxu0  ;;  %v6705_v45 = vld [vmem:[%s7188_s1 + $0x234] sm:$0xf0] }
 0x3b3   : > { %v3218_v63 = vadd.f32 %v3217_v6, %v3049_v14  ;;  %v2883_v29 = vadd.f32 %v2882_v32, %v2713_v33  ;;  %v6737_v33 = vld [vmem:[%s7188_s1 + $0x334] sm:$0xf0] }
 0x3b4   : > { %2921 = vmatmul.bf16.gmra.mxu1 %v9487_v31 }
 0x3b5   : > { %2752 = vmatmul.bf16.gmra.mxu0 %v9485_v11  ;;  %v5552_v24 = vadd.f32 %v7900_v22, %v3218_v63  ;;  %3090 = vmatmul.bf16.gmra.mxu2 %v9488_v25  ;;  %v6399_v11 = vor.u32 %v6705_v45, %v6398_v7  ;;  %v6526_v63 = vld [vmem:[%s7188_s1 + $0x328] sm:$0xf] }
 0x3b6   : > { %3259 = vmatmul.bf16.gmra.mxu3 %v9489_v23  ;;  %v6527_v31 = vor.u32 %v6737_v33, %v6526_v63  ;;  %v9490_v23 = vld [vmem:[#allocation109_spill] sm:$0xff]  ;;  %v6673_v63 = vld [vmem:[%s7188_s1 + $0x134] sm:$0xf0] }
 0x3b7   : > { %v5753_v48 = vpack.c.bf16 %v5552_v24, %v5551_v10  ;;  %3654 = vmatpush.bf16.msra.mxu2 %v6399_v11  ;;  %v5555_v10 = vadd.f32 %v7898_v43, %v9490_v23  ;;  %v6270_v11 = vld [vmem:[%s7188_s1 + $0x128] sm:$0xf]  ;;  %v9491_v23 = vld [vmem:[#allocation110_spill] sm:$0xff] }
 0x3b8   : > { %v3051_v20 = vpop.f32.mrf.mxu2  ;;  %3823 = vmatpush.bf16.msra.mxu3 %v6527_v31  ;;  %v6271_v44 = vor.u32 %v6673_v63, %v6270_v11  ;;  %v9496_v63 = vld [vmem:[#allocation115_spill] sm:$0xff] }
 0x3b9   : > { %5881 = vst [vmem:[%s7907_s20 + $0x1b0] sm:$0xff] %v5753_v48  ;;  %v3052_v14 = vadd.f32 %v3051_v20, %v2883_v29  ;;  %v3220_v6 = vpop.f32.mrf.mxu3  ;;  %v2884_v46 = vpop.f32.mrf.mxu1 }
 0x3ba   : > { %v2715_v3 = vpop.f32.mrf.mxu0  ;;  %3485 = vmatpush.bf16.msra.mxu1 %v6271_v44 }
 0x3bb   : > { %v3221_v32 = vadd.f32 %v3220_v6, %v3052_v14  ;;  %v2885_v48 = vadd.f32 %v2884_v46, %v2715_v3  ;;  %v6143_v6 = vor.u32 %v6641_v28, %v6142_v19 }
 0x3bd   : > { %v5556_v24 = vadd.f32 %v7900_v22, %v3221_v32  ;;  %v9492_v32 = vld [vmem:[#allocation114_spill] sm:$0xff]  ;;  %3316 = vmatpush.bf16.msra.mxu0 %v6143_v6 }
 0x3be   : > { %v5559_v31 = vadd.f32 %v7898_v43, %v9492_v32 }
 0x3bf   : > { %v5755_v29 = vpack.c.bf16 %v5556_v24, %v5555_v10  ;;  %v9493_v10 = vld [vmem:[#allocation111_spill] sm:$0xff]  ;;  %v9494_v24 = vld [vmem:[#allocation112_spill] sm:$0xff] }
 0x3c0   : > { %v3053_v20 = vpop.f32.mrf.mxu2 }
 0x3c1   : > { %5883 = vst [vmem:[%s7907_s20 + $0x1c0] sm:$0xff] %v5755_v29  ;;  %v3054_v7 = vadd.f32 %v3053_v20, %v2885_v48  ;;  %v3222_v45 = vpop.f32.mrf.mxu3  ;;  %v2887_v14 = vpop.f32.mrf.mxu1  ;;  %v9495_v29 = vld [vmem:[#allocation113_spill] sm:$0xff] }
 0x3c2   : > { %v2718_v25 = vpop.f32.mrf.mxu0 }
 0x3c3   : > { %v3223_v33 = vadd.f32 %v3222_v45, %v3054_v7  ;;  %v2888_v46 = vadd.f32 %v2887_v14, %v2718_v25  ;;  %v5563_v25 = vadd.f32 %v7898_v43, %v9496_v63 }
 0x3c4   : > { %2926 = vmatmul.bf16.gmra.mxu1 %v9493_v10  ;;  %v6637_v10 = vld [vmem:[%s7188_s1 + $0x14] sm:$0xf0] }
 0x3c5   : > { %2757 = vmatmul.bf16.gmra.mxu0 %v9491_v23  ;;  %v5560_v3 = vadd.f32 %v7900_v22, %v3223_v33  ;;  %3095 = vmatmul.bf16.gmra.mxu2 %v9494_v24 }
 0x3c6   : > { %3264 = vmatmul.bf16.gmra.mxu3 %v9495_v29  ;;  %v9499_v29 = vld [vmem:[#allocation117_spill] sm:$0xff] }
 0x3c7   : > { %v5757_v28 = vpack.c.bf16 %v5560_v3, %v5559_v31 }
 0x3c8   : > { %v3056_v19 = vpop.f32.mrf.mxu2 }
 0x3c9   : > { %5885 = vst [vmem:[%s7907_s20 + $0x1d0] sm:$0xff] %v5757_v28  ;;  %v3057_v48 = vadd.f32 %v3056_v19, %v2888_v46  ;;  %v3225_v20 = vpop.f32.mrf.mxu3  ;;  %v2889_v45 = vpop.f32.mrf.mxu1  ;;  %v9497_v46 = vld [vmem:[#allocation116_spill] sm:$0xff] }
 0x3ca   : > { %v2720_v7 = vpop.f32.mrf.mxu0  ;;  %v9498_v19 = vld [vmem:[#allocation120_spill] sm:$0xff] }
 0x3cb   : > { %v3226_v11 = vadd.f32 %v3225_v20, %v3057_v48  ;;  %v2890_v32 = vadd.f32 %v2889_v45, %v2720_v7  ;;  %v5567_v48 = vadd.f32 %v7898_v43, %v9498_v19  ;;  %v9501_v7 = vld [vmem:[#allocation119_spill] sm:$0xff] }
 0x3cd   : > { %v5564_v14 = vadd.f32 %v7900_v22, %v3226_v11  ;;  %v9500_v11 = vld [vmem:[#allocation118_spill] sm:$0xff] }
 0x3cf   : > { %v5759_v33 = vpack.c.bf16 %v5564_v14, %v5563_v25 }
 0x3d0   : > { %v3058_v24 = vpop.f32.mrf.mxu2 }
 0x3d1   : > { %5887 = vst [vmem:[%s7907_s20 + $0x1e0] sm:$0xff] %v5759_v33  ;;  %v3059_v6 = vadd.f32 %v3058_v24, %v2890_v32  ;;  %v3227_v31 = vpop.f32.mrf.mxu3  ;;  %v2892_v3 = vpop.f32.mrf.mxu1 }
 0x3d2   : > { %v2723_v44 = vpop.f32.mrf.mxu0 }
 0x3d3   : > { %v3228_v28 = vadd.f32 %v3227_v31, %v3059_v6  ;;  %v2893_v63 = vadd.f32 %v2892_v3, %v2723_v44  ;;  %v9502_v31 = vld [vmem:[#allocation121_spill] sm:$0xff] }
 0x3d4   : > { %2931 = vmatmul.bf16.gmra.mxu1 %v9499_v29  ;;  %v5571_v19 = vadd.f32 %v7898_v43, %v9502_v31 }
 0x3d5   : > { %2762 = vmatmul.bf16.gmra.mxu0 %v9497_v46  ;;  %v5568_v20 = vadd.f32 %v7900_v22, %v3228_v28  ;;  %3100 = vmatmul.bf16.gmra.mxu2 %v9500_v11  ;;  %v9505_v46 = vld [vmem:[#allocation123_spill] sm:$0xff] }
 0x3d6   : > { %3269 = vmatmul.bf16.gmra.mxu3 %v9501_v7 }
 0x3d7   : > { %v5761_v24 = vpack.c.bf16 %v5568_v20, %v5567_v48 }
 0x3d8   : > { %v3061_v45 = vpop.f32.mrf.mxu2 }
 0x3d9   : > { %5889 = vst [vmem:[%s7907_s20 + $0x1f0] sm:$0xff] %v5761_v24  ;;  %v3062_v25 = vadd.f32 %v3061_v45, %v2893_v63  ;;  %v3230_v14 = vpop.f32.mrf.mxu3  ;;  %v2894_v32 = vpop.f32.mrf.mxu1  ;;  %v9503_v63 = vld [vmem:[#allocation122_spill] sm:$0xff] }
 0x3da   : > { %v2725_v33 = vpop.f32.mrf.mxu0  ;;  %v9504_v45 = vld [vmem:[#allocation126_spill] sm:$0xff] }
 0x3db   : > { %v3231_v6 = vadd.f32 %v3230_v14, %v3062_v25  ;;  %v2895_v28 = vadd.f32 %v2894_v32, %v2725_v33  ;;  %v5575_v25 = vadd.f32 %v7898_v43, %v9504_v45  ;;  %v9507_v33 = vld [vmem:[#allocation125_spill] sm:$0xff] }
 0x3dd   : > { %v5572_v44 = vadd.f32 %v7900_v22, %v3231_v6  ;;  %v9506_v6 = vld [vmem:[#allocation124_spill] sm:$0xff] }
 0x3df   : > { %v5763_v3 = vpack.c.bf16 %v5572_v44, %v5571_v19 }
 0x3e0   : > { %v3063_v29 = vpop.f32.mrf.mxu2 }
 0x3e1   : > { %5891 = vst [vmem:[%s7907_s20 + $0x200] sm:$0xff] %v5763_v3  ;;  %v3064_v11 = vadd.f32 %v3063_v29, %v2895_v28  ;;  %v3232_v7 = vpop.f32.mrf.mxu3  ;;  %v2897_v20 = vpop.f32.mrf.mxu1  ;;  %v9508_v28 = vld [vmem:[#allocation127_spill] sm:$0xff] }
 0x3e2   : > { %v2728_v48 = vpop.f32.mrf.mxu0  ;;  %v5579_v45 = vadd.f32 %v7898_v43, %v9508_v28 }
 0x3e3   : > { %v3233_v24 = vadd.f32 %v3232_v7, %v3064_v11  ;;  %v2898_v31 = vadd.f32 %v2897_v20, %v2728_v48 }
 0x3e4   : > { %2936 = vmatmul.bf16.gmra.mxu1 %v9505_v46 }
 0x3e5   : > { %2767 = vmatmul.bf16.gmra.mxu0 %v9503_v63  ;;  %v5576_v14 = vadd.f32 %v7900_v22, %v3233_v24  ;;  %3105 = vmatmul.bf16.gmra.mxu2 %v9506_v6  ;;  %v6126_v63 = vld [vmem:[%s7188_s1 + $0x8] sm:$0xf] }
 0x3e6   : > { %3274 = vmatmul.bf16.gmra.mxu3 %v9507_v33 }
 0x3e7   : > { %v5765_v29 = vpack.c.bf16 %v5576_v14, %v5575_v25 }
 0x3e8   : > { %v3066_v32 = vpop.f32.mrf.mxu2 }
 0x3e9   : > { %5893 = vst [vmem:[%s7907_s20 + $0x210] sm:$0xff] %v5765_v29  ;;  %v3067_v19 = vadd.f32 %v3066_v32, %v2898_v31  ;;  %v3235_v11 = vpop.f32.mrf.mxu3  ;;  %v2899_v44 = vpop.f32.mrf.mxu1  ;;  %v9509_v29 = vld [vmem:[#allocation128_spill] sm:$0xff] }
 0x3ea   : > { %v2730_v7 = vpop.f32.mrf.mxu0  ;;  %v9510_v32 = vld [vmem:[#allocation132_spill] sm:$0xff] }
 0x3eb   : > { %v3236_v3 = vadd.f32 %v3235_v11, %v3067_v19  ;;  %v2900_v24 = vadd.f32 %v2899_v44, %v2730_v7  ;;  %v5583_v19 = vadd.f32 %v7898_v43, %v9510_v32  ;;  %v9511_v44 = vld [vmem:[#allocation129_spill] sm:$0xff] }
 0x3ed   : > { %v5580_v48 = vadd.f32 %v7900_v22, %v3236_v3  ;;  %v9512_v3 = vld [vmem:[#allocation130_spill] sm:$0xff] }
 0x3ef   : > { %v5767_v20 = vpack.c.bf16 %v5580_v48, %v5579_v45 }
 0x3f0   : > { %v3068_v46 = vpop.f32.mrf.mxu2 }
 0x3f1   : > { %5895 = vst [vmem:[%s7907_s20 + $0x220] sm:$0xff] %v5767_v20  ;;  %v3069_v6 = vadd.f32 %v3068_v46, %v2900_v24  ;;  %v3237_v33 = vpop.f32.mrf.mxu3  ;;  %v2902_v14 = vpop.f32.mrf.mxu1  ;;  %v9513_v46 = vld [vmem:[#allocation131_spill] sm:$0xff]  ;;  %v6382_v20 = vld [vmem:[%s7188_s1 + $0x208] sm:$0xf] }
 0x3f2   : > { %v2733_v25 = vpop.f32.mrf.mxu0  ;;  %v6701_v24 = vld [vmem:[%s7188_s1 + $0x214] sm:$0xf0] }
 0x3f3   : > { %v3238_v31 = vadd.f32 %v3237_v33, %v3069_v6  ;;  %v2903_v7 = vadd.f32 %v2902_v14, %v2733_v25  ;;  %v6733_v25 = vld [vmem:[%s7188_s1 + $0x314] sm:$0xf0] }
 0x3f4   : > { %2941 = vmatmul.bf16.gmra.mxu1 %v9511_v44 }
 0x3f5   : > { %2772 = vmatmul.bf16.gmra.mxu0 %v9509_v29  ;;  %v5584_v11 = vadd.f32 %v7900_v22, %v3238_v31  ;;  %3110 = vmatmul.bf16.gmra.mxu2 %v9512_v3  ;;  %v6383_v29 = vor.u32 %v6701_v24, %v6382_v20  ;;  %v6510_v31 = vld [vmem:[%s7188_s1 + $0x308] sm:$0xf] }
 0x3f6   : > { %3279 = vmatmul.bf16.gmra.mxu3 %v9513_v46  ;;  %v6511_v44 = vor.u32 %v6733_v25, %v6510_v31  ;;  %v9514_v46 = vld [vmem:[#allocation133_spill] sm:$0xff]  ;;  %v6669_v31 = vld [vmem:[%s7188_s1 + $0x114] sm:$0xf0] }
 0x3f7   : > { %v5769_v28 = vpack.c.bf16 %v5584_v11, %v5583_v19  ;;  %3655 = vmatpush.bf16.msra.mxu2 %v6383_v29  ;;  %v5587_v19 = vadd.f32 %v7898_v43, %v9514_v46  ;;  %v6254_v29 = vld [vmem:[%s7188_s1 + $0x108] sm:$0xf]  ;;  %v9515_v46 = vld [vmem:[#allocation134_spill] sm:$0xff] }
 0x3f8   : > { %v3071_v45 = vpop.f32.mrf.mxu2  ;;  %3824 = vmatpush.bf16.msra.mxu3 %v6511_v44  ;;  %v6255_v23 = vor.u32 %v6669_v31, %v6254_v29  ;;  %v9520_v31 = vld [vmem:[#allocation139_spill] sm:$0xff] }
 0x3f9   : > { %5897 = vst [vmem:[%s7907_s20 + $0x230] sm:$0xff] %v5769_v28  ;;  %v3072_v6 = vadd.f32 %v3071_v45, %v2903_v7  ;;  %v3240_v33 = vpop.f32.mrf.mxu3  ;;  %v2904_v32 = vpop.f32.mrf.mxu1 }
 0x3fa   : > { %v2735_v48 = vpop.f32.mrf.mxu0  ;;  %3486 = vmatpush.bf16.msra.mxu1 %v6255_v23 }
 0x3fb   : > { %v3241_v14 = vadd.f32 %v3240_v33, %v3072_v6  ;;  %v2905_v28 = vadd.f32 %v2904_v32, %v2735_v48  ;;  %v6127_v33 = vor.u32 %v6637_v10, %v6126_v63 }
 0x3fd   : > { %v5588_v11 = vadd.f32 %v7900_v22, %v3241_v14  ;;  %v9516_v14 = vld [vmem:[#allocation138_spill] sm:$0xff]  ;;  %3317 = vmatpush.bf16.msra.mxu0 %v6127_v33 }
 0x3fe   : > { %v5591_v44 = vadd.f32 %v7898_v43, %v9516_v14 }
 0x3ff   : > { %v5771_v7 = vpack.c.bf16 %v5588_v11, %v5587_v19  ;;  %v9517_v19 = vld [vmem:[#allocation135_spill] sm:$0xff]  ;;  %v9518_v11 = vld [vmem:[#allocation136_spill] sm:$0xff] }
 0x400   : > { %v3073_v45 = vpop.f32.mrf.mxu2 }
 0x401   : > { %5899 = vst [vmem:[%s7907_s20 + $0x240] sm:$0xff] %v5771_v7  ;;  %v3074_v20 = vadd.f32 %v3073_v45, %v2905_v28  ;;  %v3242_v24 = vpop.f32.mrf.mxu3  ;;  %v2907_v6 = vpop.f32.mrf.mxu1  ;;  %v9519_v7 = vld [vmem:[#allocation137_spill] sm:$0xff] }
 0x402   : > { %v2738_v3 = vpop.f32.mrf.mxu0 }
 0x403   : > { %v3243_v25 = vadd.f32 %v3242_v24, %v3074_v20  ;;  %v2908_v32 = vadd.f32 %v2907_v6, %v2738_v3  ;;  %v5595_v3 = vadd.f32 %v7898_v43, %v9520_v31 }
 0x404   : > { %2946 = vmatmul.bf16.gmra.mxu1 %v9517_v19  ;;  %v6240_v19 = vld [vmem:[%s7188_s1 + $0xf8] sm:$0xf0] }
 0x405   : > { %2777 = vmatmul.bf16.gmra.mxu0 %v9515_v46  ;;  %v5592_v48 = vadd.f32 %v7900_v22, %v3243_v25  ;;  %3115 = vmatmul.bf16.gmra.mxu2 %v9518_v11 }
 0x406   : > { %3284 = vmatmul.bf16.gmra.mxu3 %v9519_v7  ;;  %v9523_v7 = vld [vmem:[#allocation141_spill] sm:$0xff] }
 0x407   : > { %v5773_v10 = vpack.c.bf16 %v5592_v48, %v5591_v44 }
 0x408   : > { %v3076_v63 = vpop.f32.mrf.mxu2 }
 0x409   : > { %5901 = vst [vmem:[%s7907_s20 + $0x250] sm:$0xff] %v5773_v10  ;;  %v3077_v28 = vadd.f32 %v3076_v63, %v2908_v32  ;;  %v3245_v45 = vpop.f32.mrf.mxu3  ;;  %v2909_v24 = vpop.f32.mrf.mxu1  ;;  %v9521_v32 = vld [vmem:[#allocation140_spill] sm:$0xff] }
 0x40a   : > { %v2740_v20 = vpop.f32.mrf.mxu0  ;;  %v9522_v63 = vld [vmem:[#allocation144_spill] sm:$0xff] }
 0x40b   : > { %v3246_v29 = vadd.f32 %v3245_v45, %v3077_v28  ;;  %v2910_v14 = vadd.f32 %v2909_v24, %v2740_v20  ;;  %v5599_v28 = vadd.f32 %v7898_v43, %v9522_v63  ;;  %v9525_v20 = vld [vmem:[#allocation143_spill] sm:$0xff] }
 0x40d   : > { %v5596_v6 = vadd.f32 %v7900_v22, %v3246_v29  ;;  %v9524_v29 = vld [vmem:[#allocation142_spill] sm:$0xff] }
 0x40f   : > { %v5775_v25 = vpack.c.bf16 %v5596_v6, %v5595_v3 }
 0x410   : > { %v3078_v11 = vpop.f32.mrf.mxu2 }
 0x411   : > { %5903 = vst [vmem:[%s7907_s20 + $0x260] sm:$0xff] %v5775_v25  ;;  %v3079_v33 = vadd.f32 %v3078_v11, %v2910_v14  ;;  %v3247_v44 = vpop.f32.mrf.mxu3  ;;  %v2912_v48 = vpop.f32.mrf.mxu1 }
 0x412   : > { %v2743_v23 = vpop.f32.mrf.mxu0 }
 0x413   : > { %v3248_v10 = vadd.f32 %v3247_v44, %v3079_v33  ;;  %v2913_v31 = vadd.f32 %v2912_v48, %v2743_v23  ;;  %v9526_v44 = vld [vmem:[#allocation145_spill] sm:$0xff] }
 0x414   : > { %2951 = vmatmul.bf16.gmra.mxu1 %v9523_v7  ;;  %v5603_v63 = vadd.f32 %v7898_v43, %v9526_v44 }
 0x415   : > { %2782 = vmatmul.bf16.gmra.mxu0 %v9521_v32  ;;  %v5600_v45 = vadd.f32 %v7900_v22, %v3248_v10  ;;  %3120 = vmatmul.bf16.gmra.mxu2 %v9524_v29  ;;  %v9529_v32 = vld [vmem:[#allocation147_spill] sm:$0xff] }
 0x416   : > { %3289 = vmatmul.bf16.gmra.mxu3 %v9525_v20 }
 0x417   : > { %v5777_v11 = vpack.c.bf16 %v5600_v45, %v5599_v28 }
 0x418   : > { %v3081_v24 = vpop.f32.mrf.mxu2 }
 0x419   : > { %5905 = vst [vmem:[%s7907_s20 + $0x270] sm:$0xff] %v5777_v11  ;;  %v3082_v3 = vadd.f32 %v3081_v24, %v2913_v31  ;;  %v3250_v6 = vpop.f32.mrf.mxu3  ;;  %v2914_v14 = vpop.f32.mrf.mxu1  ;;  %v9527_v31 = vld [vmem:[#allocation146_spill] sm:$0xff] }
 0x41a   : > { %v2745_v25 = vpop.f32.mrf.mxu0  ;;  %v9528_v24 = vld [vmem:[#allocation150_spill] sm:$0xff] }
 0x41b   : > { %v3251_v33 = vadd.f32 %v3250_v6, %v3082_v3  ;;  %v2915_v10 = vadd.f32 %v2914_v14, %v2745_v25  ;;  %v5607_v3 = vadd.f32 %v7898_v43, %v9528_v24  ;;  %v9531_v25 = vld [vmem:[#allocation149_spill] sm:$0xff] }
 0x41d   : > { %v5604_v23 = vadd.f32 %v7900_v22, %v3251_v33  ;;  %v9530_v33 = vld [vmem:[#allocation148_spill] sm:$0xff] }
 0x41f   : > { %v5779_v48 = vpack.c.bf16 %v5604_v23, %v5603_v63 }
 0x420   : > { %v3083_v7 = vpop.f32.mrf.mxu2 }
 0x421   : > { %5907 = vst [vmem:[%s7907_s20 + $0x280] sm:$0xff] %v5779_v48  ;;  %v3084_v29 = vadd.f32 %v3083_v7, %v2915_v10  ;;  %v3252_v20 = vpop.f32.mrf.mxu3  ;;  %v2917_v45 = vpop.f32.mrf.mxu1  ;;  %v9532_v10 = vld [vmem:[#allocation151_spill] sm:$0xff] }
 0x422   : > { %v2748_v28 = vpop.f32.mrf.mxu0  ;;  %v5611_v24 = vadd.f32 %v7898_v43, %v9532_v10 }
 0x423   : > { %v3253_v11 = vadd.f32 %v3252_v20, %v3084_v29  ;;  %v2918_v44 = vadd.f32 %v2917_v45, %v2748_v28 }
 0x424   : > { %2956 = vmatmul.bf16.gmra.mxu1 %v9529_v32 }
 0x425   : > { %2787 = vmatmul.bf16.gmra.mxu0 %v9527_v31  ;;  %v5608_v6 = vadd.f32 %v7900_v22, %v3253_v11  ;;  %3125 = vmatmul.bf16.gmra.mxu2 %v9530_v33  ;;  %v6663_v31 = vld [vmem:[%s7188_s1 + $0xec] sm:$0xf] }
 0x426   : > { %3294 = vmatmul.bf16.gmra.mxu3 %v9531_v25 }
 0x427   : > { %v5781_v7 = vpack.c.bf16 %v5608_v6, %v5607_v3 }
 0x428   : > { %v3086_v14 = vpop.f32.mrf.mxu2 }
 0x429   : > { %5909 = vst [vmem:[%s7907_s20 + $0x290] sm:$0xff] %v5781_v7  ;;  %v3087_v63 = vadd.f32 %v3086_v14, %v2918_v44  ;;  %v3255_v29 = vpop.f32.mrf.mxu3  ;;  %v2919_v23 = vpop.f32.mrf.mxu1  ;;  %v9533_v7 = vld [vmem:[#allocation152_spill] sm:$0xff] }
 0x42a   : > { %v2750_v20 = vpop.f32.mrf.mxu0  ;;  %v9534_v14 = vld [vmem:[#allocation156_spill] sm:$0xff] }
 0x42b   : > { %v3256_v48 = vadd.f32 %v3255_v29, %v3087_v63  ;;  %v2920_v11 = vadd.f32 %v2919_v23, %v2750_v20  ;;  %v5615_v63 = vadd.f32 %v7898_v43, %v9534_v14  ;;  %v9535_v23 = vld [vmem:[#allocation153_spill] sm:$0xff] }
 0x42d   : > { %v5612_v28 = vadd.f32 %v7900_v22, %v3256_v48  ;;  %v9536_v48 = vld [vmem:[#allocation154_spill] sm:$0xff] }
 0x42f   : > { %v5783_v45 = vpack.c.bf16 %v5612_v28, %v5611_v24 }
 0x430   : > { %v3088_v32 = vpop.f32.mrf.mxu2 }
 0x431   : > { %5911 = vst [vmem:[%s7907_s20 + $0x2a0] sm:$0xff] %v5783_v45  ;;  %v3089_v33 = vadd.f32 %v3088_v32, %v2920_v11  ;;  %v3257_v25 = vpop.f32.mrf.mxu3  ;;  %v2922_v6 = vpop.f32.mrf.mxu1  ;;  %v9537_v32 = vld [vmem:[#allocation155_spill] sm:$0xff]  ;;  %v6727_v45 = vld [vmem:[%s7188_s1 + $0x2ec] sm:$0xf] }
 0x432   : > { %v2753_v3 = vpop.f32.mrf.mxu0  ;;  %v6496_v11 = vld [vmem:[%s7188_s1 + $0x2f8] sm:$0xf0] }
 0x433   : > { %v3258_v44 = vadd.f32 %v3257_v25, %v3089_v33  ;;  %v2923_v20 = vadd.f32 %v2922_v6, %v2753_v3  ;;  %v6624_v3 = vld [vmem:[%s7188_s1 + $0x3f8] sm:$0xf0] }
 0x434   : > { %2961 = vmatmul.bf16.gmra.mxu1 %v9535_v23 }
 0x435   : > { %2792 = vmatmul.bf16.gmra.mxu0 %v9533_v7  ;;  %v5616_v29 = vadd.f32 %v7900_v22, %v3258_v44  ;;  %3130 = vmatmul.bf16.gmra.mxu2 %v9536_v48  ;;  %v6499_v7 = vor.u32 %v6727_v45, %v6496_v11  ;;  %v6759_v44 = vld [vmem:[%s7188_s1 + $0x3ec] sm:$0xf] }
 0x436   : > { %3299 = vmatmul.bf16.gmra.mxu3 %v9537_v32  ;;  %v6627_v23 = vor.u32 %v6759_v44, %v6624_v3  ;;  %v9538_v32 = vld [vmem:[#allocation157_spill] sm:$0xff]  ;;  %v6368_v44 = vld [vmem:[%s7188_s1 + $0x1f8] sm:$0xf0] }
 0x437   : > { %v5785_v10 = vpack.c.bf16 %v5616_v29, %v5615_v63  ;;  %4324 = vmatpush.bf16.msrb.mxu2 %v6499_v7  ;;  %v5619_v63 = vadd.f32 %v7898_v43, %v9538_v32  ;;  %v6695_v7 = vld [vmem:[%s7188_s1 + $0x1ec] sm:$0xf] }
 0x438   : > { %v3091_v24 = vpop.f32.mrf.mxu2  ;;  %4493 = vmatpush.bf16.msrb.mxu3 %v6627_v23  ;;  %v6371_v46 = vor.u32 %v6695_v7, %v6368_v44  ;;  %v5623_v23 = vadd.f32 %v7898_v43, %v7800_v8  ;;  %v5631_v44 = vadd.f32 %v7898_v43, %v7808_v40  ;;  %v5635_v40 = vadd.f32 %v7898_v43, %v7814_v30 }
 0x439   : > { %5913 = vst [vmem:[%s7907_s20 + $0x2b0] sm:$0xff] %v5785_v10  ;;  %v3092_v33 = vadd.f32 %v3091_v24, %v2923_v20  ;;  %v3260_v25 = vpop.f32.mrf.mxu3  ;;  %v2924_v14 = vpop.f32.mrf.mxu1 }
 0x43a   : > { %v2755_v28 = vpop.f32.mrf.mxu0  ;;  %4155 = vmatpush.bf16.msrb.mxu1 %v6371_v46 }
 0x43b   : > { %v3261_v6 = vadd.f32 %v3260_v25, %v3092_v33  ;;  %v2925_v10 = vadd.f32 %v2924_v14, %v2755_v28  ;;  %v6243_v25 = vor.u32 %v6663_v31, %v6240_v19 }
 0x43d   : > { %v5620_v29 = vadd.f32 %v7900_v22, %v3261_v6  ;;  %3986 = vmatpush.bf16.msrb.mxu0 %v6243_v25 }
 0x43f   : > { %v5787_v20 = vpack.c.bf16 %v5620_v29, %v5619_v63 }
 0x440   : > { %v3093_v24 = vpop.f32.mrf.mxu2 }
 0x441   : > { %5915 = vst [vmem:[%s7907_s20 + $0x2c0] sm:$0xff] %v5787_v20  ;;  %v3094_v45 = vadd.f32 %v3093_v24, %v2925_v10  ;;  %v3262_v11 = vpop.f32.mrf.mxu3  ;;  %v2927_v33 = vpop.f32.mrf.mxu1 }
 0x442   : > { %v2758_v48 = vpop.f32.mrf.mxu0 }
 0x443   : > { %v3263_v3 = vadd.f32 %v3262_v11, %v3094_v45  ;;  %v2928_v28 = vadd.f32 %v2927_v33, %v2758_v48  ;;  %v5627_v48 = vadd.f32 %v7898_v43, %v7806_v26 }
 0x444   : > { %2966 = vmatmul.bf16.gmra.mxu1 %v7794_v41 }
 0x445   : > { %2797 = vmatmul.bf16.gmra.mxu0 %v7792_v61  ;;  %v5624_v32 = vadd.f32 %v7900_v22, %v3263_v3  ;;  %3135 = vmatmul.bf16.gmra.mxu2 %v7796_v60 }
 0x446   : > { %3304 = vmatmul.bf16.gmra.mxu3 %v7798_v35 }
 0x447   : > { %v5789_v19 = vpack.c.bf16 %v5624_v32, %v5623_v23 }
 0x448   : > { %v3096_v31 = vpop.f32.mrf.mxu2 }
 0x449   : > { %5917 = vst [vmem:[%s7907_s20 + $0x2d0] sm:$0xff] %v5789_v19  ;;  %v3097_v14 = vadd.f32 %v3096_v31, %v2928_v28  ;;  %v3265_v6 = vpop.f32.mrf.mxu3  ;;  %v2929_v29 = vpop.f32.mrf.mxu1 }
 0x44a   : > { %v2760_v63 = vpop.f32.mrf.mxu0 }
 0x44b   : > { %v3266_v8 = vadd.f32 %v3265_v6, %v3097_v14  ;;  %v2930_v24 = vadd.f32 %v2929_v29, %v2760_v63 }
 0x44d   : > { %v5628_v20 = vadd.f32 %v7900_v22, %v3266_v8 }
 0x44f   : > { %v5791_v10 = vpack.c.bf16 %v5628_v20, %v5627_v48 }
 0x450   : > { %v3098_v45 = vpop.f32.mrf.mxu2 }
 0x451   : > { %5919 = vst [vmem:[%s7907_s20 + $0x2e0] sm:$0xff] %v5791_v10  ;;  %v3099_v11 = vadd.f32 %v3098_v45, %v2930_v24  ;;  %v3267_v33 = vpop.f32.mrf.mxu3  ;;  %v2932_v25 = vpop.f32.mrf.mxu1 }
 0x452   : > { %v2763_v46 = vpop.f32.mrf.mxu0 }
 0x453   : > { %v3268_v7 = vadd.f32 %v3267_v33, %v3099_v11  ;;  %v2933_v26 = vadd.f32 %v2932_v25, %v2763_v46  ;;  %v5639_v33 = vadd.f32 %v7898_v43, %v7816_v42  ;;  %v9539_v25 = vld [vmem:[#allocation13_spill] sm:$0xff] }
 0x454   : > { %3487 = vmatmul.bf16.vlgmr.msra.gmra.mxu1 %v7268_v51 }
 0x455   : > { %3318 = vmatmul.bf16.vlgmr.msra.gmra.mxu0 %v7264_v47  ;;  %v5632_v3 = vadd.f32 %v7900_v22, %v3268_v7  ;;  %3656 = vmatmul.bf16.vlgmr.msra.gmra.mxu2 %v7270_v52  ;;  %v9540_v7 = vld [vmem:[#allocation14_spill] sm:$0xff] }
 0x456   : > { %3825 = vmatmul.bf16.vlgmr.msra.gmra.mxu3 %v7272_v53 }
 0x457   : > { %v5793_v23 = vpack.c.bf16 %v5632_v3, %v5631_v44 }
 0x458   : > { %v3101_v32 = vpop.f32.mrf.mxu2 }
 0x459   : > { %5921 = vst [vmem:[%s7907_s20 + $0x2f0] sm:$0xff] %v5793_v23  ;;  %v3102_v28 = vadd.f32 %v3101_v32, %v2933_v26  ;;  %v3270_v19 = vpop.f32.mrf.mxu3  ;;  %v2934_v14 = vpop.f32.mrf.mxu1 }
 0x45a   : > { %v2765_v31 = vpop.f32.mrf.mxu0 }
 0x45b   : > { %v3271_v6 = vadd.f32 %v3270_v19, %v3102_v28  ;;  %v2935_v8 = vadd.f32 %v2934_v14, %v2765_v31  ;;  %v9541_v31 = vld [vmem:[#allocation159_spill] sm:$0xff] }
 0x45c   : > { %v5643_v42 = vadd.f32 %v7898_v43, %v9541_v31  ;;  %v6723_v31 = vld [vmem:[%s7188_s1 + $0x2cc] sm:$0xf] }
 0x45d   : > { %v5636_v63 = vadd.f32 %v7900_v22, %v3271_v6 }
 0x45f   : > { %v5795_v29 = vpack.c.bf16 %v5636_v63, %v5635_v40 }
 0x460   : > { %v3103_v48 = vpop.f32.mrf.mxu2 }
 0x461   : > { %5923 = vst [vmem:[%s7907_s20 + $0x300] sm:$0xff] %v5795_v29  ;;  %v3104_v20 = vadd.f32 %v3103_v48, %v2935_v8  ;;  %v3272_v10 = vpop.f32.mrf.mxu3  ;;  %v2937_v45 = vpop.f32.mrf.mxu1 }
 0x462   : > { %v2768_v24 = vpop.f32.mrf.mxu0 }
 0x463   : > { %v3273_v11 = vadd.f32 %v3272_v10, %v3104_v20  ;;  %v2938_v30 = vadd.f32 %v2937_v45, %v2768_v24  ;;  %v9542_v24 = vld [vmem:[#allocation15_spill] sm:$0xff]  ;;  %v9543_v45 = vld [vmem:[#allocation160_spill] sm:$0xff] }
 0x464   : > { %3492 = vmatmul.bf16.gmra.mxu1 %v7280_v1 }
 0x465   : > { %3323 = vmatmul.bf16.gmra.mxu0 %v7278_v0  ;;  %v5640_v46 = vadd.f32 %v7900_v22, %v3273_v11  ;;  %3661 = vmatmul.bf16.gmra.mxu2 %v9539_v25  ;;  %v5647_v11 = vadd.f32 %v7898_v43, %v9543_v45 }
 0x466   : > { %3830 = vmatmul.bf16.gmra.mxu3 %v9540_v7 }
 0x467   : > { %v5797_v44 = vpack.c.bf16 %v5640_v46, %v5639_v33 }
 0x468   : > { %v3106_v3 = vpop.f32.mrf.mxu2 }
 0x469   : > { %5925 = vst [vmem:[%s7907_s20 + $0x310] sm:$0xff] %v5797_v44  ;;  %v3107_v26 = vadd.f32 %v3106_v3, %v2938_v30  ;;  %v3275_v23 = vpop.f32.mrf.mxu3  ;;  %v2939_v28 = vpop.f32.mrf.mxu1  ;;  %v9544_v30 = vld [vmem:[#allocation16_spill] sm:$0xff]  ;;  %v9545_v44 = vld [vmem:[#allocation17_spill] sm:$0xff]  ;;  %v9546_v3 = vld [vmem:[#allocation18_spill] sm:$0xff] }
 0x46a   : > { %v2770_v32 = vpop.f32.mrf.mxu0 }
 0x46b   : > { %v3276_v19 = vadd.f32 %v3275_v23, %v3107_v26  ;;  %v2940_v40 = vadd.f32 %v2939_v28, %v2770_v32 }
 0x46d   : > { %v5644_v14 = vadd.f32 %v7900_v22, %v3276_v19 }
 0x46f   : > { %v5799_v6 = vpack.c.bf16 %v5644_v14, %v5643_v42  ;;  %v6480_v42 = vld [vmem:[%s7188_s1 + $0x2d8] sm:$0xf0] }
 0x470   : > { %v3108_v63 = vpop.f32.mrf.mxu2 }
 0x471   : > { %5927 = vst [vmem:[%s7907_s20 + $0x320] sm:$0xff] %v5799_v6  ;;  %v3109_v29 = vadd.f32 %v3108_v63, %v2940_v40  ;;  %v3277_v8 = vpop.f32.mrf.mxu3  ;;  %v2942_v20 = vpop.f32.mrf.mxu1  ;;  %v6483_v6 = vor.u32 %v6723_v31, %v6480_v42  ;;  %v6755_v40 = vld [vmem:[%s7188_s1 + $0x3cc] sm:$0xf]  ;;  %v6608_v63 = vld [vmem:[%s7188_s1 + $0x3d8] sm:$0xf0] }
 0x472   : > { %v2773_v48 = vpop.f32.mrf.mxu0  ;;  %v6224_v31 = vld [vmem:[%s7188_s1 + $0xd8] sm:$0xf0]  ;;  %v6691_v42 = vld [vmem:[%s7188_s1 + $0x1cc] sm:$0xf] }
 0x473   : > { %v3278_v10 = vadd.f32 %v3277_v8, %v3109_v29  ;;  %v2943_v46 = vadd.f32 %v2942_v20, %v2773_v48  ;;  %v6611_v8 = vor.u32 %v6755_v40, %v6608_v63  ;;  %4325 = vmatpush.bf16.msrb.mxu2 %v6483_v6  ;;  %v5651_v48 = vadd.f32 %v7898_v43, %v7834_v34  ;;  %v6352_v6 = vld [vmem:[%s7188_s1 + $0x1d8] sm:$0xf0] }
 0x474   : > { %3497 = vmatmul.bf16.gmra.mxu1 %v9544_v30  ;;  %v6355_v63 = vor.u32 %v6691_v42, %v6352_v6  ;;  %v5655_v34 = vadd.f32 %v7898_v43, %v7840_v9 }
 0x475   : > { %3328 = vmatmul.bf16.gmra.mxu0 %v9542_v24  ;;  %v5648_v33 = vadd.f32 %v7900_v22, %v3278_v10  ;;  %3666 = vmatmul.bf16.gmra.mxu2 %v9545_v44 }
 0x476   : > { %3835 = vmatmul.bf16.gmra.mxu3 %v9546_v3  ;;  %4156 = vmatpush.bf16.msrb.mxu1 %v6355_v63 }
 0x477   : > { %v5801_v26 = vpack.c.bf16 %v5648_v33, %v5647_v11  ;;  %4494 = vmatpush.bf16.msrb.mxu3 %v6611_v8 }
 0x478   : > { %v3111_v23 = vpop.f32.mrf.mxu2 }
 0x479   : > { %5929 = vst [vmem:[%s7907_s20 + $0x330] sm:$0xff] %v5801_v26  ;;  %v3112_v32 = vadd.f32 %v3111_v23, %v2943_v46  ;;  %v3280_v28 = vpop.f32.mrf.mxu3  ;;  %v2944_v14 = vpop.f32.mrf.mxu1  ;;  %v6659_v23 = vld [vmem:[%s7188_s1 + $0xcc] sm:$0xf] }
 0x47a   : > { %v2775_v19 = vpop.f32.mrf.mxu0 }
 0x47b   : > { %v3281_v29 = vadd.f32 %v3280_v28, %v3112_v32  ;;  %v2945_v45 = vadd.f32 %v2944_v14, %v2775_v19  ;;  %v6227_v28 = vor.u32 %v6659_v23, %v6224_v31 }
 0x47d   : > { %v5652_v20 = vadd.f32 %v7900_v22, %v3281_v29  ;;  %3987 = vmatpush.bf16.msrb.mxu0 %v6227_v28 }
 0x47f   : > { %v5803_v10 = vpack.c.bf16 %v5652_v20, %v5651_v48 }
 0x480   : > { %v3113_v11 = vpop.f32.mrf.mxu2 }
 0x481   : > { %5931 = vst [vmem:[%s7907_s20 + $0x340] sm:$0xff] %v5803_v10  ;;  %v3114_v33 = vadd.f32 %v3113_v11, %v2945_v45  ;;  %v3282_v46 = vpop.f32.mrf.mxu3  ;;  %v2947_v32 = vpop.f32.mrf.mxu1  ;;  %v5659_v11 = vadd.f32 %v7898_v43, %v7846_v17 }
 0x482   : > { %v2778_v26 = vpop.f32.mrf.mxu0 }
 0x483   : > { %v3283_v40 = vadd.f32 %v3282_v46, %v3114_v33  ;;  %v2948_v14 = vadd.f32 %v2947_v32, %v2778_v26 }
 0x484   : > { %3502 = vmatmul.bf16.gmra.mxu1 %v7312_v37 }
 0x485   : > { %3333 = vmatmul.bf16.gmra.mxu0 %v7310_v36  ;;  %v5656_v19 = vadd.f32 %v7900_v22, %v3283_v40  ;;  %3671 = vmatmul.bf16.gmra.mxu2 %v7314_v38  ;;  %v5663_v40 = vadd.f32 %v7898_v43, %v7848_v62  ;;  %v5667_v62 = vadd.f32 %v7898_v43, %v7854_v13 }
 0x486   : > { %3840 = vmatmul.bf16.gmra.mxu3 %v7316_v39 }
 0x487   : > { %v5805_v29 = vpack.c.bf16 %v5656_v19, %v5655_v34 }
 0x488   : > { %v3116_v8 = vpop.f32.mrf.mxu2 }
 0x489   : > { %5933 = vst [vmem:[%s7907_s20 + $0x350] sm:$0xff] %v5805_v29  ;;  %v3117_v48 = vadd.f32 %v3116_v8, %v2948_v14  ;;  %v3285_v20 = vpop.f32.mrf.mxu3  ;;  %v2949_v45 = vpop.f32.mrf.mxu1 }
 0x48a   : > { %v2780_v10 = vpop.f32.mrf.mxu0 }
 0x48b   : > { %v3286_v9 = vadd.f32 %v3285_v20, %v3117_v48  ;;  %v2950_v26 = vadd.f32 %v2949_v45, %v2780_v10 }
 0x48d   : > { %v5660_v33 = vadd.f32 %v7900_v22, %v3286_v9 }
 0x48f   : > { %v5807_v46 = vpack.c.bf16 %v5660_v33, %v5659_v11 }
 0x490   : > { %v3118_v23 = vpop.f32.mrf.mxu2 }
 0x491   : > { %5935 = vst [vmem:[%s7907_s20 + $0x360] sm:$0xff] %v5807_v46  ;;  %v3119_v31 = vadd.f32 %v3118_v23, %v2950_v26  ;;  %v3287_v32 = vpop.f32.mrf.mxu3  ;;  %v2952_v42 = vpop.f32.mrf.mxu1 }
 0x492   : > { %v2783_v28 = vpop.f32.mrf.mxu0 }
 0x493   : > { %v3288_v6 = vadd.f32 %v3287_v32, %v3119_v31  ;;  %v2953_v17 = vadd.f32 %v2952_v42, %v2783_v28  ;;  %v5671_v32 = vadd.f32 %v7898_v43, %v7856_v2  ;;  %v9547_v42 = vld [vmem:[#allocation19_spill] sm:$0xff] }
 0x494   : > { %3507 = vmatmul.bf16.gmra.mxu1 %v7324_v50 }
 0x495   : > { %3338 = vmatmul.bf16.gmra.mxu0 %v7322_v49  ;;  %v5664_v63 = vadd.f32 %v7900_v22, %v3288_v6  ;;  %3676 = vmatmul.bf16.gmra.mxu2 %v7326_v54  ;;  %v9548_v6 = vld [vmem:[#allocation20_spill] sm:$0xff] }
 0x496   : > { %3845 = vmatmul.bf16.gmra.mxu3 %v7328_v55 }
 0x497   : > { %v5809_v34 = vpack.c.bf16 %v5664_v63, %v5663_v40 }
 0x498   : > { %v3121_v19 = vpop.f32.mrf.mxu2 }
 0x499   : > { %5937 = vst [vmem:[%s7907_s20 + $0x370] sm:$0xff] %v5809_v34  ;;  %v3122_v14 = vadd.f32 %v3121_v19, %v2953_v17  ;;  %v3290_v29 = vpop.f32.mrf.mxu3  ;;  %v2954_v48 = vpop.f32.mrf.mxu1 }
 0x49a   : > { %v2785_v8 = vpop.f32.mrf.mxu0 }
 0x49b   : > { %v3291_v20 = vadd.f32 %v3290_v29, %v3122_v14  ;;  %v2955_v9 = vadd.f32 %v2954_v48, %v2785_v8  ;;  %v9549_v8 = vld [vmem:[#allocation161_spill] sm:$0xff] }
 0x49c   : > { %v5675_v2 = vadd.f32 %v7898_v43, %v9549_v8  ;;  %v6719_v8 = vld [vmem:[%s7188_s1 + $0x2ac] sm:$0xf] }
 0x49d   : > { %v5668_v10 = vadd.f32 %v7900_v22, %v3291_v20 }
 0x49f   : > { %v5811_v45 = vpack.c.bf16 %v5668_v10, %v5667_v62 }
 0x4a0   : > { %v3123_v11 = vpop.f32.mrf.mxu2 }
 0x4a1   : > { %5939 = vst [vmem:[%s7907_s20 + $0x380] sm:$0xff] %v5811_v45  ;;  %v3124_v33 = vadd.f32 %v3123_v11, %v2955_v9  ;;  %v3292_v46 = vpop.f32.mrf.mxu3  ;;  %v2957_v23 = vpop.f32.mrf.mxu1 }
 0x4a2   : > { %v2788_v26 = vpop.f32.mrf.mxu0 }
 0x4a3   : > { %v3293_v31 = vadd.f32 %v3292_v46, %v3124_v33  ;;  %v2958_v13 = vadd.f32 %v2957_v23, %v2788_v26  ;;  %v9550_v26 = vld [vmem:[#allocation21_spill] sm:$0xff]  ;;  %v9551_v23 = vld [vmem:[#allocation162_spill] sm:$0xff] }
 0x4a4   : > { %3512 = vmatmul.bf16.gmra.mxu1 %v7336_v5 }
 0x4a5   : > { %3343 = vmatmul.bf16.gmra.mxu0 %v7334_v4  ;;  %v5672_v28 = vadd.f32 %v7900_v22, %v3293_v31  ;;  %3681 = vmatmul.bf16.gmra.mxu2 %v9547_v42  ;;  %v5679_v31 = vadd.f32 %v7898_v43, %v9551_v23  ;;  %v6208_v23 = vld [vmem:[%s7188_s1 + $0xb8] sm:$0xf0] }
 0x4a6   : > { %3850 = vmatmul.bf16.gmra.mxu3 %v9548_v6 }
 0x4a7   : > { %v5813_v40 = vpack.c.bf16 %v5672_v28, %v5671_v32 }
 0x4a8   : > { %v3126_v63 = vpop.f32.mrf.mxu2 }
 0x4a9   : > { %5941 = vst [vmem:[%s7907_s20 + $0x390] sm:$0xff] %v5813_v40  ;;  %v3127_v17 = vadd.f32 %v3126_v63, %v2958_v13  ;;  %v3295_v34 = vpop.f32.mrf.mxu3  ;;  %v2959_v14 = vpop.f32.mrf.mxu1  ;;  %v9552_v13 = vld [vmem:[#allocation22_spill] sm:$0xff]  ;;  %v9553_v40 = vld [vmem:[#allocation23_spill] sm:$0xff]  ;;  %v9554_v63 = vld [vmem:[#allocation24_spill] sm:$0xff] }
 0x4aa   : > { %v2790_v19 = vpop.f32.mrf.mxu0 }
 0x4ab   : > { %v3296_v29 = vadd.f32 %v3295_v34, %v3127_v17  ;;  %v2960_v62 = vadd.f32 %v2959_v14, %v2790_v19 }
 0x4ad   : > { %v5676_v48 = vadd.f32 %v7900_v22, %v3296_v29 }
 0x4af   : > { %v5815_v20 = vpack.c.bf16 %v5676_v48, %v5675_v2  ;;  %v6464_v2 = vld [vmem:[%s7188_s1 + $0x2b8] sm:$0xf0] }
 0x4b0   : > { %v3128_v10 = vpop.f32.mrf.mxu2 }
 0x4b1   : > { %5943 = vst [vmem:[%s7907_s20 + $0x3a0] sm:$0xff] %v5815_v20  ;;  %v3129_v45 = vadd.f32 %v3128_v10, %v2960_v62  ;;  %v3297_v9 = vpop.f32.mrf.mxu3  ;;  %v2962_v33 = vpop.f32.mrf.mxu1  ;;  %v6467_v20 = vor.u32 %v6719_v8, %v6464_v2  ;;  %v6751_v62 = vld [vmem:[%s7188_s1 + $0x3ac] sm:$0xf]  ;;  %v6592_v10 = vld [vmem:[%s7188_s1 + $0x3b8] sm:$0xf0] }
 0x4b2   : > { %v2793_v11 = vpop.f32.mrf.mxu0 }
 0x4b3   : > { %v3298_v46 = vadd.f32 %v3297_v9, %v3129_v45  ;;  %v2963_v28 = vadd.f32 %v2962_v33, %v2793_v11  ;;  %v6595_v9 = vor.u32 %v6751_v62, %v6592_v10  ;;  %4326 = vmatpush.bf16.msrb.mxu2 %v6467_v20  ;;  %v5683_v11 = vadd.f32 %v7898_v43, %v7874_v15 }
 0x4b4   : > { %3517 = vmatmul.bf16.gmra.mxu1 %v9552_v13  ;;  %v5687_v10 = vadd.f32 %v7898_v43, %v7880_v27  ;;  %v5691_v27 = vadd.f32 %v7898_v43, %v7886_v21 }
 0x4b5   : > { %3348 = vmatmul.bf16.gmra.mxu0 %v9550_v26  ;;  %v5680_v32 = vadd.f32 %v7900_v22, %v3298_v46  ;;  %3686 = vmatmul.bf16.gmra.mxu2 %v9553_v40  ;;  %v6655_v46 = vld [vmem:[%s7188_s1 + $0xac] sm:$0xf] }
 0x4b6   : > { %3855 = vmatmul.bf16.gmra.mxu3 %v9554_v63 }
 0x4b7   : > { %v5817_v17 = vpack.c.bf16 %v5680_v32, %v5679_v31  ;;  %4495 = vmatpush.bf16.msrb.mxu3 %v6595_v9  ;;  %v6687_v31 = vld [vmem:[%s7188_s1 + $0x1ac] sm:$0xf]  ;;  %v6211_v32 = vor.u32 %v6655_v46, %v6208_v23 }
 0x4b8   : > { %v3131_v34 = vpop.f32.mrf.mxu2 }
 0x4b9   : > { %5945 = vst [vmem:[%s7907_s20 + $0x3b0] sm:$0xff] %v5817_v17  ;;  %v3132_v19 = vadd.f32 %v3131_v34, %v2963_v28  ;;  %v3300_v14 = vpop.f32.mrf.mxu3  ;;  %v2964_v48 = vpop.f32.mrf.mxu1  ;;  %v6336_v28 = vld [vmem:[%s7188_s1 + $0x1b8] sm:$0xf0]  ;;  %3988 = vmatpush.bf16.msrb.mxu0 %v6211_v32 }
 0x4ba   : > { %v2795_v29 = vpop.f32.mrf.mxu0  ;;  %v6339_v8 = vor.u32 %v6687_v31, %v6336_v28 }
 0x4bb   : > { %v3301_v45 = vadd.f32 %v3300_v14, %v3132_v19  ;;  %v2965_v34 = vadd.f32 %v2964_v48, %v2795_v29 }
 0x4bc   : > { %4157 = vmatpush.bf16.msrb.mxu1 %v6339_v8 }
 0x4bd   : > { %v5684_v33 = vadd.f32 %v7900_v22, %v3301_v45 }
 0x4bf   : > { %v5819_v17 = vpack.c.bf16 %v5684_v33, %v5683_v11 }
 0x4c0   : > { %v3133_v2 = vpop.f32.mrf.mxu2 }
 0x4c1   : > { %5947 = vst [vmem:[%s7907_s20 + $0x3c0] sm:$0xff] %v5819_v17  ;;  %v3134_v19 = vadd.f32 %v3133_v2, %v2965_v34  ;;  %v3302_v14 = vpop.f32.mrf.mxu3  ;;  %v2967_v15 = vpop.f32.mrf.mxu1 }
 0x4c2   : > { %v2798_v20 = vpop.f32.mrf.mxu0 }
 0x4c3   : > { %v3303_v62 = vadd.f32 %v3302_v14, %v3134_v19  ;;  %v2968_v9 = vadd.f32 %v2967_v15, %v2798_v20 }
 0x4c4   : > { %3522 = vmatmul.bf16.gmra.mxu1 %v7368_v57 }
 0x4c5   : > { %3353 = vmatmul.bf16.gmra.mxu0 %v7366_v56  ;;  %v5688_v45 = vadd.f32 %v7900_v22, %v3303_v62  ;;  %3691 = vmatmul.bf16.gmra.mxu2 %v7370_v58  ;;  %v5695_v62 = vadd.f32 %v7898_v43, %v7889_v12 }
 0x4c6   : > { %3860 = vmatmul.bf16.gmra.mxu3 %v7372_v59 }
 0x4c7   : > { %v5821_v29 = vpack.c.bf16 %v5688_v45, %v5687_v10  ;;  %v9555_v10 = vld [vmem:[#allocation25_spill] sm:$0xff]  ;;  %v9556_v45 = vld [vmem:[#allocation26_spill] sm:$0xff] }
 0x4c8   : > { %v3136_v48 = vpop.f32.mrf.mxu2 }
 0x4c9   : > { %5949 = vst [vmem:[%s7907_s20 + $0x3d0] sm:$0xff] %v5821_v29  ;;  %v3137_v11 = vadd.f32 %v3136_v48, %v2968_v9  ;;  %v3305_v33 = vpop.f32.mrf.mxu3  ;;  %v2969_v23 = vpop.f32.mrf.mxu1 }
 0x4ca   : > { %v2800_v46 = vpop.f32.mrf.mxu0 }
 0x4cb   : > { %v3306_v31 = vadd.f32 %v3305_v33, %v3137_v11  ;;  %v2970_v17 = vadd.f32 %v2969_v23, %v2800_v46 }
 0x4cd   : > { %v5692_v32 = vadd.f32 %v7900_v22, %v3306_v31 }
 0x4cf   : > { %v5823_v28 = vpack.c.bf16 %v5692_v32, %v5691_v27 }
 0x4d0   : > { %v3138_v34 = vpop.f32.mrf.mxu2 }
 0x4d1   : > { %5951 = vst [vmem:[%s7907_s20 + $0x3e0] sm:$0xff] %v5823_v28  ;;  %v3139_v8 = vadd.f32 %v3138_v34, %v2970_v17  ;;  %v3307_v2 = vpop.f32.mrf.mxu3  ;;  %v3488_v14 = vpop.f32.mrf.mxu1  ;;  %v9557_v34 = vld [vmem:[#allocation27_spill] sm:$0xff] }
 0x4d2   : > { %v3319_v19 = vpop.f32.mrf.mxu0 }
 0x4d3   : > { %v3308_v20 = vadd.f32 %v3307_v2, %v3139_v8  ;;  %v3489_v15 = vadd.f32 %v3488_v14, %v3319_v19  ;;  %v9558_v8 = vld [vmem:[#allocation28_spill] sm:$0xff]  ;;  %v9559_v2 = vld [vmem:[#allocation29_spill] sm:$0xff]  ;;  %v9560_v19 = vld [vmem:[#allocation30_spill] sm:$0xff] }
 0x4d4   : > { %3527 = vmatmul.bf16.gmra.mxu1 %v7380_v18 }
 0x4d5   : > { %3358 = vmatmul.bf16.gmra.mxu0 %v7378_v16  ;;  %v5696_v21 = vadd.f32 %v7900_v22, %v3308_v20  ;;  %3696 = vmatmul.bf16.gmra.mxu2 %v9555_v10 }
 0x4d6   : > { %3865 = vmatmul.bf16.gmra.mxu3 %v9556_v45 }
 0x4d7   : > { %v5825_v9 = vpack.c.bf16 %v5696_v21, %v5695_v62 }
 0x4d8   : > { %v3657_v29 = vpop.f32.mrf.mxu2 }
 0x4d9   : > { %5953 = vst [vmem:[%s7907_s20 + $0x3f0] sm:$0xff] %v5825_v9  ;;  %v3658_v48 = vadd.f32 %v3657_v29, %v3489_v15  ;;  %v3826_v11 = vpop.f32.mrf.mxu3  ;;  %v3490_v46 = vpop.f32.mrf.mxu1 }
 0x4da   : > { %v3321_v33 = vpop.f32.mrf.mxu0 }
 0x4db   : > { %v8354_v23 = vadd.f32 %v3826_v11, %v3658_v48  ;;  %v3491_v31 = vadd.f32 %v3490_v46, %v3321_v33 }
 0x4e0   : > { %v3659_v27 = vpop.f32.mrf.mxu2 }
 0x4e1   : > { %v3660_v12 = vadd.f32 %v3659_v27, %v3491_v31  ;;  %v3828_v43 = vpop.f32.mrf.mxu3  ;;  %v3493_v32 = vpop.f32.mrf.mxu1 }
 0x4e2   : > { %v3324_v22 = vpop.f32.mrf.mxu0 }
 0x4e3   : > { %v8356_v28 = vadd.f32 %v3828_v43, %v3660_v12  ;;  %v3494_v17 = vadd.f32 %v3493_v32, %v3324_v22  ;;  %v9563_v43 = vld [vmem:[#allocation32_spill] sm:$0xff]  ;;  %v9564_v22 = vld [vmem:[#allocation33_spill] sm:$0xff]  ;;  %v9565_v32 = vld [vmem:[#allocation34_spill] sm:$0xff] }
 0x4e4   : > { %3532 = vmatmul.bf16.gmra.mxu1 %v9558_v8 }
 0x4e5   : > { %3363 = vmatmul.bf16.gmra.mxu0 %v9557_v34  ;;  %3701 = vmatmul.bf16.gmra.mxu2 %v9559_v2 }
 0x4e6   : > { %3870 = vmatmul.bf16.gmra.mxu3 %v9560_v19  ;;  %v6320_v19 = vld [vmem:[%s7188_s1 + $0x198] sm:$0xf0] }
 0x4e8   : > { %v3662_v14 = vpop.f32.mrf.mxu2 }
 0x4e9   : > { %v3663_v20 = vadd.f32 %v3662_v14, %v3494_v17  ;;  %v3831_v15 = vpop.f32.mrf.mxu3  ;;  %v3495_v21 = vpop.f32.mrf.mxu1  ;;  %v9566_v17 = vld [vmem:[#allocation35_spill] sm:$0xff]  ;;  %v6715_v14 = vld [vmem:[%s7188_s1 + $0x28c] sm:$0xf] }
 0x4ea   : > { %v3326_v62 = vpop.f32.mrf.mxu0 }
 0x4eb   : > { %v8362_v9 = vadd.f32 %v3831_v15, %v3663_v20  ;;  %v3496_v29 = vadd.f32 %v3495_v21, %v3326_v62  ;;  %v6448_v20 = vld [vmem:[%s7188_s1 + $0x298] sm:$0xf0]  ;;  %v6747_v15 = vld [vmem:[%s7188_s1 + $0x38c] sm:$0xf] }
 0x4ec   : > { %v6451_v62 = vor.u32 %v6715_v14, %v6448_v20  ;;  %v6576_v21 = vld [vmem:[%s7188_s1 + $0x398] sm:$0xf0] }
 0x4ed   : > { %9561 = vst [vmem:[#allocation31_spill] sm:$0xff] %v8362_v9 }
 0x4ee   : > { %4327 = vmatpush.bf16.msrb.mxu2 %v6451_v62 }
 0x4f0   : > { %v3664_v48 = vpop.f32.mrf.mxu2 }
 0x4f1   : > { %v3665_v11 = vadd.f32 %v3664_v48, %v3496_v29  ;;  %v3833_v33 = vpop.f32.mrf.mxu3  ;;  %v3498_v31 = vpop.f32.mrf.mxu1  ;;  %v6579_v48 = vor.u32 %v6747_v15, %v6576_v21 }
 0x4f2   : > { %v3329_v46 = vpop.f32.mrf.mxu0 }
 0x4f3   : > { %v8364_v27 = vadd.f32 %v3833_v33, %v3665_v11  ;;  %v3499_v12 = vadd.f32 %v3498_v31, %v3329_v46  ;;  %4496 = vmatpush.bf16.msrb.mxu3 %v6579_v48  ;;  %v9570_v48 = vld [vmem:[#allocation39_spill] sm:$0xff] }
 0x4f4   : > { %3537 = vmatmul.bf16.gmra.mxu1 %v9564_v22  ;;  %v6651_v22 = vld [vmem:[%s7188_s1 + $0x8c] sm:$0xf] }
 0x4f5   : > { %9562 = vst [vmem:[#allocation36_spill] sm:$0xff] %v8364_v27  ;;  %3368 = vmatmul.bf16.gmra.mxu0 %v9563_v43  ;;  %3706 = vmatmul.bf16.gmra.mxu2 %v9565_v32  ;;  %v6192_v27 = vld [vmem:[%s7188_s1 + $0x98] sm:$0xf0]  ;;  %v6683_v43 = vld [vmem:[%s7188_s1 + $0x18c] sm:$0xf] }
 0x4f6   : > { %3875 = vmatmul.bf16.gmra.mxu3 %v9566_v17  ;;  %v6195_v9 = vor.u32 %v6651_v22, %v6192_v27  ;;  %v6323_v2 = vor.u32 %v6683_v43, %v6320_v19 }
 0x4f8   : > { %v3667_v29 = vpop.f32.mrf.mxu2  ;;  %3989 = vmatpush.bf16.msrb.mxu0 %v6195_v9  ;;  %4158 = vmatpush.bf16.msrb.mxu1 %v6323_v2 }
 0x4f9   : > { %v3668_v11 = vadd.f32 %v3667_v29, %v3499_v12  ;;  %v3836_v33 = vpop.f32.mrf.mxu3  ;;  %v3500_v31 = vpop.f32.mrf.mxu1  ;;  %v9569_v29 = vld [vmem:[#allocation38_spill] sm:$0xff] }
 0x4fa   : > { %v3331_v46 = vpop.f32.mrf.mxu0 }
 0x4fb   : > { %v8374_v32 = vadd.f32 %v3836_v33, %v3668_v11  ;;  %v3501_v17 = vadd.f32 %v3500_v31, %v3331_v46  ;;  %v9571_v11 = vld [vmem:[#allocation40_spill] sm:$0xff]  ;;  %v9572_v33 = vld [vmem:[#allocation41_spill] sm:$0xff] }
 0x4fd   : > { %9567 = vst [vmem:[#allocation37_spill] sm:$0xff] %v8374_v32 }
 0x500   : > { %v3669_v14 = vpop.f32.mrf.mxu2 }
 0x501   : > { %v3670_v20 = vadd.f32 %v3669_v14, %v3501_v17  ;;  %v3838_v8 = vpop.f32.mrf.mxu3  ;;  %v3503_v12 = vpop.f32.mrf.mxu1 }
 0x502   : > { %v3334_v15 = vpop.f32.mrf.mxu0 }
 0x503   : > { %v8380_v21 = vadd.f32 %v3838_v8, %v3670_v20  ;;  %v3504_v62 = vadd.f32 %v3503_v12, %v3334_v15 }
 0x504   : > { %3542 = vmatmul.bf16.gmra.mxu1 %v9570_v48  ;;  %v9575_v48 = vld [vmem:[#allocation44_spill] sm:$0xff] }
 0x505   : > { %9568 = vst [vmem:[#allocation42_spill] sm:$0xff] %v8380_v21  ;;  %3373 = vmatmul.bf16.gmra.mxu0 %v9569_v29  ;;  %3711 = vmatmul.bf16.gmra.mxu2 %v9571_v11  ;;  %v9576_v11 = vld [vmem:[#allocation45_spill] sm:$0xff]  ;;  %v6304_v21 = vld [vmem:[%s7188_s1 + $0x178] sm:$0xf0] }
 0x506   : > { %3880 = vmatmul.bf16.gmra.mxu3 %v9572_v33  ;;  %v9577_v33 = vld [vmem:[#allocation46_spill] sm:$0xff] }
 0x508   : > { %v3672_v27 = vpop.f32.mrf.mxu2 }
 0x509   : > { %v3673_v19 = vadd.f32 %v3672_v27, %v3504_v62  ;;  %v3841_v43 = vpop.f32.mrf.mxu3  ;;  %v3505_v22 = vpop.f32.mrf.mxu1  ;;  %v9578_v62 = vld [vmem:[#allocation47_spill] sm:$0xff] }
 0x50a   : > { %v3336_v9 = vpop.f32.mrf.mxu0 }
 0x50b   : > { %v8386_v17 = vadd.f32 %v3841_v43, %v3673_v19  ;;  %v3506_v2 = vadd.f32 %v3505_v22, %v3336_v9 }
 0x50d   : > { %9573 = vst [vmem:[#allocation43_spill] sm:$0xff] %v8386_v17 }
 0x510   : > { %v3674_v46 = vpop.f32.mrf.mxu2 }
 0x511   : > { %v3675_v8 = vadd.f32 %v3674_v46, %v3506_v2  ;;  %v3843_v31 = vpop.f32.mrf.mxu3  ;;  %v3508_v20 = vpop.f32.mrf.mxu1 }
 0x512   : > { %v3339_v14 = vpop.f32.mrf.mxu0 }
 0x513   : > { %v8388_v15 = vadd.f32 %v3843_v31, %v3675_v8  ;;  %v3509_v12 = vadd.f32 %v3508_v20, %v3339_v14 }
 0x514   : > { %3547 = vmatmul.bf16.gmra.mxu1 %v9576_v11 }
 0x515   : > { %9574 = vst [vmem:[#allocation48_spill] sm:$0xff] %v8388_v15  ;;  %3378 = vmatmul.bf16.gmra.mxu0 %v9575_v48  ;;  %3716 = vmatmul.bf16.gmra.mxu2 %v9577_v33  ;;  %v9581_v48 = vld [vmem:[#allocation50_spill] sm:$0xff]  ;;  %v9582_v33 = vld [vmem:[#allocation51_spill] sm:$0xff] }
 0x516   : > { %3885 = vmatmul.bf16.gmra.mxu3 %v9578_v62  ;;  %v9583_v62 = vld [vmem:[#allocation52_spill] sm:$0xff] }
 0x518   : > { %v3677_v27 = vpop.f32.mrf.mxu2 }
 0x519   : > { %v3678_v19 = vadd.f32 %v3677_v27, %v3509_v12  ;;  %v3846_v43 = vpop.f32.mrf.mxu3  ;;  %v3510_v22 = vpop.f32.mrf.mxu1  ;;  %v9584_v12 = vld [vmem:[#allocation53_spill] sm:$0xff] }
 0x51a   : > { %v3341_v9 = vpop.f32.mrf.mxu0 }
 0x51b   : > { %v8394_v2 = vadd.f32 %v3846_v43, %v3678_v19  ;;  %v3511_v46 = vadd.f32 %v3510_v22, %v3341_v9 }
 0x51d   : > { %9579 = vst [vmem:[#allocation49_spill] sm:$0xff] %v8394_v2 }
 0x520   : > { %v3679_v17 = vpop.f32.mrf.mxu2 }
 0x521   : > { %v3680_v8 = vadd.f32 %v3679_v17, %v3511_v46  ;;  %v3848_v31 = vpop.f32.mrf.mxu3  ;;  %v3513_v20 = vpop.f32.mrf.mxu1 }
 0x522   : > { %v3344_v14 = vpop.f32.mrf.mxu0 }
 0x523   : > { %v8396_v15 = vadd.f32 %v3848_v31, %v3680_v8  ;;  %v3514_v11 = vadd.f32 %v3513_v20, %v3344_v14 }
 0x524   : > { %3552 = vmatmul.bf16.gmra.mxu1 %v9582_v33 }
 0x525   : > { %9580 = vst [vmem:[#allocation54_spill] sm:$0xff] %v8396_v15  ;;  %3383 = vmatmul.bf16.gmra.mxu0 %v9581_v48  ;;  %3721 = vmatmul.bf16.gmra.mxu2 %v9583_v62  ;;  %v9587_v15 = vld [vmem:[#allocation56_spill] sm:$0xff]  ;;  %v9590_v48 = vld [vmem:[#allocation59_spill] sm:$0xff] }
 0x526   : > { %3890 = vmatmul.bf16.gmra.mxu3 %v9584_v12 }
 0x528   : > { %v3682_v27 = vpop.f32.mrf.mxu2 }
 0x529   : > { %v3683_v19 = vadd.f32 %v3682_v27, %v3514_v11  ;;  %v3851_v43 = vpop.f32.mrf.mxu3  ;;  %v3515_v17 = vpop.f32.mrf.mxu1  ;;  %v9588_v11 = vld [vmem:[#allocation57_spill] sm:$0xff]  ;;  %v9589_v27 = vld [vmem:[#allocation58_spill] sm:$0xff] }
 0x52a   : > { %v3346_v9 = vpop.f32.mrf.mxu0 }
 0x52b   : > { %v8402_v22 = vadd.f32 %v3851_v43, %v3683_v19  ;;  %v3516_v46 = vadd.f32 %v3515_v17, %v3346_v9  ;;  %v6711_v19 = vld [vmem:[%s7188_s1 + $0x26c] sm:$0xf]  ;;  %v6432_v43 = vld [vmem:[%s7188_s1 + $0x278] sm:$0xf0] }
 0x52c   : > { %v6743_v9 = vld [vmem:[%s7188_s1 + $0x36c] sm:$0xf]  ;;  %v6435_v17 = vor.u32 %v6711_v19, %v6432_v43 }
 0x52d   : > { %9585 = vst [vmem:[#allocation55_spill] sm:$0xff] %v8402_v22  ;;  %v6679_v22 = vld [vmem:[%s7188_s1 + $0x16c] sm:$0xf] }
 0x52e   : > { %4328 = vmatpush.bf16.msrb.mxu2 %v6435_v17  ;;  %v6307_v29 = vor.u32 %v6679_v22, %v6304_v21 }
 0x530   : > { %v3684_v8 = vpop.f32.mrf.mxu2  ;;  %4159 = vmatpush.bf16.msrb.mxu1 %v6307_v29 }
 0x531   : > { %v3685_v31 = vadd.f32 %v3684_v8, %v3516_v46  ;;  %v3853_v14 = vpop.f32.mrf.mxu3  ;;  %v3518_v33 = vpop.f32.mrf.mxu1  ;;  %v6560_v46 = vld [vmem:[%s7188_s1 + $0x378] sm:$0xf0] }
 0x532   : > { %v3349_v20 = vpop.f32.mrf.mxu0 }
 0x533   : > { %v8404_v62 = vadd.f32 %v3853_v14, %v3685_v31  ;;  %v3519_v12 = vadd.f32 %v3518_v33, %v3349_v20  ;;  %v6563_v31 = vor.u32 %v6743_v9, %v6560_v46 }
 0x534   : > { %3557 = vmatmul.bf16.gmra.mxu1 %v9588_v11 }
 0x535   : > { %9586 = vst [vmem:[#allocation60_spill] sm:$0xff] %v8404_v62  ;;  %3388 = vmatmul.bf16.gmra.mxu0 %v9587_v15  ;;  %3726 = vmatmul.bf16.gmra.mxu2 %v9589_v27  ;;  %v6647_v62 = vld [vmem:[%s7188_s1 + $0x6c] sm:$0xf]  ;;  %v6176_v15 = vld [vmem:[%s7188_s1 + $0x78] sm:$0xf0] }
 0x536   : > { %3895 = vmatmul.bf16.gmra.mxu3 %v9590_v48  ;;  %v6179_v2 = vor.u32 %v6647_v62, %v6176_v15 }
 0x537   : > { %4497 = vmatpush.bf16.msrb.mxu3 %v6563_v31  ;;  %v9594_v31 = vld [vmem:[#allocation63_spill] sm:$0xff] }
 0x538   : > { %v3687_v8 = vpop.f32.mrf.mxu2  ;;  %3990 = vmatpush.bf16.msrb.mxu0 %v6179_v2 }
 0x539   : > { %v3688_v33 = vadd.f32 %v3687_v8, %v3519_v12  ;;  %v3856_v14 = vpop.f32.mrf.mxu3  ;;  %v3520_v11 = vpop.f32.mrf.mxu1  ;;  %v9593_v8 = vld [vmem:[#allocation62_spill] sm:$0xff] }
 0x53a   : > { %v3351_v20 = vpop.f32.mrf.mxu0 }
 0x53b   : > { %v8414_v27 = vadd.f32 %v3856_v14, %v3688_v33  ;;  %v3521_v48 = vadd.f32 %v3520_v11, %v3351_v20  ;;  %v9595_v11 = vld [vmem:[#allocation64_spill] sm:$0xff]  ;;  %v9596_v33 = vld [vmem:[#allocation65_spill] sm:$0xff] }
 0x53d   : > { %9591 = vst [vmem:[#allocation61_spill] sm:$0xff] %v8414_v27 }
 0x540   : > { %v3689_v19 = vpop.f32.mrf.mxu2 }
 0x541   : > { %v3690_v43 = vadd.f32 %v3689_v19, %v3521_v48  ;;  %v3858_v32 = vpop.f32.mrf.mxu3  ;;  %v3523_v12 = vpop.f32.mrf.mxu1 }
 0x542   : > { %v3354_v9 = vpop.f32.mrf.mxu0 }
 0x543   : > { %v8420_v46 = vadd.f32 %v3858_v32, %v3690_v43  ;;  %v3524_v17 = vadd.f32 %v3523_v12, %v3354_v9 }
 0x544   : > { %3562 = vmatmul.bf16.gmra.mxu1 %v9594_v31  ;;  %v9599_v31 = vld [vmem:[#allocation68_spill] sm:$0xff] }
 0x545   : > { %9592 = vst [vmem:[#allocation66_spill] sm:$0xff] %v8420_v46  ;;  %3393 = vmatmul.bf16.gmra.mxu0 %v9593_v8  ;;  %3731 = vmatmul.bf16.gmra.mxu2 %v9595_v11  ;;  %v9600_v11 = vld [vmem:[#allocation69_spill] sm:$0xff]  ;;  %v6288_v46 = vld [vmem:[%s7188_s1 + $0x158] sm:$0xf0] }
 0x546   : > { %3900 = vmatmul.bf16.gmra.mxu3 %v9596_v33  ;;  %v9601_v33 = vld [vmem:[#allocation70_spill] sm:$0xff] }
 0x548   : > { %v3692_v15 = vpop.f32.mrf.mxu2 }
 0x549   : > { %v3693_v21 = vadd.f32 %v3692_v15, %v3524_v17  ;;  %v3861_v62 = vpop.f32.mrf.mxu3  ;;  %v3525_v48 = vpop.f32.mrf.mxu1  ;;  %v9602_v17 = vld [vmem:[#allocation71_spill] sm:$0xff] }
 0x54a   : > { %v3356_v2 = vpop.f32.mrf.mxu0 }
 0x54b   : > { %v8426_v22 = vadd.f32 %v3861_v62, %v3693_v21  ;;  %v3526_v29 = vadd.f32 %v3525_v48, %v3356_v2 }
 0x54d   : > { %9597 = vst [vmem:[#allocation67_spill] sm:$0xff] %v8426_v22 }
 0x550   : > { %v3694_v14 = vpop.f32.mrf.mxu2 }
 0x551   : > { %v3695_v32 = vadd.f32 %v3694_v14, %v3526_v29  ;;  %v3863_v20 = vpop.f32.mrf.mxu3  ;;  %v3528_v43 = vpop.f32.mrf.mxu1 }
 0x552   : > { %v3359_v19 = vpop.f32.mrf.mxu0 }
 0x553   : > { %v8428_v9 = vadd.f32 %v3863_v20, %v3695_v32  ;;  %v3529_v12 = vadd.f32 %v3528_v43, %v3359_v19 }
 0x554   : > { %3567 = vmatmul.bf16.gmra.mxu1 %v9600_v11 }
 0x555   : > { %9598 = vst [vmem:[#allocation72_spill] sm:$0xff] %v8428_v9  ;;  %3398 = vmatmul.bf16.gmra.mxu0 %v9599_v31  ;;  %3736 = vmatmul.bf16.gmra.mxu2 %v9601_v33  ;;  %v9605_v31 = vld [vmem:[#allocation74_spill] sm:$0xff]  ;;  %v9606_v33 = vld [vmem:[#allocation75_spill] sm:$0xff] }
 0x556   : > { %3905 = vmatmul.bf16.gmra.mxu3 %v9602_v17  ;;  %v9607_v17 = vld [vmem:[#allocation76_spill] sm:$0xff] }
 0x558   : > { %v3697_v15 = vpop.f32.mrf.mxu2 }
 0x559   : > { %v3698_v21 = vadd.f32 %v3697_v15, %v3529_v12  ;;  %v3866_v62 = vpop.f32.mrf.mxu3  ;;  %v3530_v48 = vpop.f32.mrf.mxu1  ;;  %v9608_v12 = vld [vmem:[#allocation77_spill] sm:$0xff] }
 0x55a   : > { %v3361_v2 = vpop.f32.mrf.mxu0 }
 0x55b   : > { %v8434_v29 = vadd.f32 %v3866_v62, %v3698_v21  ;;  %v3531_v14 = vadd.f32 %v3530_v48, %v3361_v2 }
 0x55d   : > { %9603 = vst [vmem:[#allocation73_spill] sm:$0xff] %v8434_v29 }
 0x560   : > { %v3699_v22 = vpop.f32.mrf.mxu2 }
 0x561   : > { %v3700_v32 = vadd.f32 %v3699_v22, %v3531_v14  ;;  %v3868_v20 = vpop.f32.mrf.mxu3  ;;  %v3533_v43 = vpop.f32.mrf.mxu1 }
 0x562   : > { %v3364_v19 = vpop.f32.mrf.mxu0 }
 0x563   : > { %v8436_v9 = vadd.f32 %v3868_v20, %v3700_v32  ;;  %v3534_v11 = vadd.f32 %v3533_v43, %v3364_v19 }
 0x564   : > { %3572 = vmatmul.bf16.gmra.mxu1 %v9606_v33 }
 0x565   : > { %9604 = vst [vmem:[#allocation78_spill] sm:$0xff] %v8436_v9  ;;  %3403 = vmatmul.bf16.gmra.mxu0 %v9605_v31  ;;  %3741 = vmatmul.bf16.gmra.mxu2 %v9607_v17  ;;  %v9611_v9 = vld [vmem:[#allocation80_spill] sm:$0xff]  ;;  %v9614_v31 = vld [vmem:[#allocation83_spill] sm:$0xff] }
 0x566   : > { %3910 = vmatmul.bf16.gmra.mxu3 %v9608_v12 }
 0x568   : > { %v3702_v15 = vpop.f32.mrf.mxu2 }
 0x569   : > { %v3703_v21 = vadd.f32 %v3702_v15, %v3534_v11  ;;  %v3871_v62 = vpop.f32.mrf.mxu3  ;;  %v3535_v22 = vpop.f32.mrf.mxu1  ;;  %v9612_v11 = vld [vmem:[#allocation81_spill] sm:$0xff]  ;;  %v9613_v15 = vld [vmem:[#allocation82_spill] sm:$0xff] }
 0x56a   : > { %v3366_v2 = vpop.f32.mrf.mxu0 }
 0x56b   : > { %v8442_v48 = vadd.f32 %v3871_v62, %v3703_v21  ;;  %v3536_v14 = vadd.f32 %v3535_v22, %v3366_v2  ;;  %v6707_v21 = vld [vmem:[%s7188_s1 + $0x24c] sm:$0xf]  ;;  %v6416_v62 = vld [vmem:[%s7188_s1 + $0x258] sm:$0xf0] }
 0x56c   : > { %v6739_v2 = vld [vmem:[%s7188_s1 + $0x34c] sm:$0xf]  ;;  %v6419_v22 = vor.u32 %v6707_v21, %v6416_v62 }
 0x56d   : > { %9609 = vst [vmem:[#allocation79_spill] sm:$0xff] %v8442_v48  ;;  %v6675_v48 = vld [vmem:[%s7188_s1 + $0x14c] sm:$0xf] }
 0x56e   : > { %4329 = vmatpush.bf16.msrb.mxu2 %v6419_v22  ;;  %v6291_v8 = vor.u32 %v6675_v48, %v6288_v46 }
 0x570   : > { %v3704_v32 = vpop.f32.mrf.mxu2  ;;  %4160 = vmatpush.bf16.msrb.mxu1 %v6291_v8 }
 0x571   : > { %v3705_v20 = vadd.f32 %v3704_v32, %v3536_v14  ;;  %v3873_v19 = vpop.f32.mrf.mxu3  ;;  %v3538_v33 = vpop.f32.mrf.mxu1  ;;  %v6544_v14 = vld [vmem:[%s7188_s1 + $0x358] sm:$0xf0] }
 0x572   : > { %v3369_v43 = vpop.f32.mrf.mxu0 }
 0x573   : > { %v8444_v17 = vadd.f32 %v3873_v19, %v3705_v20  ;;  %v3539_v12 = vadd.f32 %v3538_v33, %v3369_v43  ;;  %v6547_v20 = vor.u32 %v6739_v2, %v6544_v14 }
 0x574   : > { %3577 = vmatmul.bf16.gmra.mxu1 %v9612_v11 }
 0x575   : > { %9610 = vst [vmem:[#allocation84_spill] sm:$0xff] %v8444_v17  ;;  %3408 = vmatmul.bf16.gmra.mxu0 %v9611_v9  ;;  %3746 = vmatmul.bf16.gmra.mxu2 %v9613_v15  ;;  %v6643_v17 = vld [vmem:[%s7188_s1 + $0x4c] sm:$0xf]  ;;  %v6160_v9 = vld [vmem:[%s7188_s1 + $0x58] sm:$0xf0] }
 0x576   : > { %3915 = vmatmul.bf16.gmra.mxu3 %v9614_v31  ;;  %v6163_v29 = vor.u32 %v6643_v17, %v6160_v9 }
 0x577   : > { %4498 = vmatpush.bf16.msrb.mxu3 %v6547_v20  ;;  %v9618_v20 = vld [vmem:[#allocation87_spill] sm:$0xff] }
 0x578   : > { %v3707_v32 = vpop.f32.mrf.mxu2  ;;  %3991 = vmatpush.bf16.msrb.mxu0 %v6163_v29 }
 0x579   : > { %v3708_v33 = vadd.f32 %v3707_v32, %v3539_v12  ;;  %v3876_v19 = vpop.f32.mrf.mxu3  ;;  %v3540_v11 = vpop.f32.mrf.mxu1  ;;  %v9617_v32 = vld [vmem:[#allocation86_spill] sm:$0xff] }
 0x57a   : > { %v3371_v43 = vpop.f32.mrf.mxu0 }
 0x57b   : > { %v8454_v15 = vadd.f32 %v3876_v19, %v3708_v33  ;;  %v3541_v31 = vadd.f32 %v3540_v11, %v3371_v43  ;;  %v9619_v11 = vld [vmem:[#allocation88_spill] sm:$0xff]  ;;  %v9620_v33 = vld [vmem:[#allocation89_spill] sm:$0xff] }
 0x57d   : > { %9615 = vst [vmem:[#allocation85_spill] sm:$0xff] %v8454_v15 }
 0x580   : > { %v3709_v21 = vpop.f32.mrf.mxu2 }
 0x581   : > { %v3710_v62 = vadd.f32 %v3709_v21, %v3541_v31  ;;  %v3878_v27 = vpop.f32.mrf.mxu3  ;;  %v3543_v12 = vpop.f32.mrf.mxu1 }
 0x582   : > { %v3374_v2 = vpop.f32.mrf.mxu0 }
 0x583   : > { %v8460_v14 = vadd.f32 %v3878_v27, %v3710_v62  ;;  %v3544_v22 = vadd.f32 %v3543_v12, %v3374_v2 }
 0x584   : > { %3582 = vmatmul.bf16.gmra.mxu1 %v9618_v20  ;;  %v9623_v20 = vld [vmem:[#allocation92_spill] sm:$0xff] }
 0x585   : > { %9616 = vst [vmem:[#allocation90_spill] sm:$0xff] %v8460_v14  ;;  %3413 = vmatmul.bf16.gmra.mxu0 %v9617_v32  ;;  %3751 = vmatmul.bf16.gmra.mxu2 %v9619_v11  ;;  %v9624_v11 = vld [vmem:[#allocation93_spill] sm:$0xff]  ;;  %v6272_v14 = vld [vmem:[%s7188_s1 + $0x138] sm:$0xf0] }
 0x586   : > { %3920 = vmatmul.bf16.gmra.mxu3 %v9620_v33  ;;  %v9625_v33 = vld [vmem:[#allocation94_spill] sm:$0xff] }
 0x588   : > { %v3712_v9 = vpop.f32.mrf.mxu2 }
 0x589   : > { %v3713_v46 = vadd.f32 %v3712_v9, %v3544_v22  ;;  %v3881_v17 = vpop.f32.mrf.mxu3  ;;  %v3545_v31 = vpop.f32.mrf.mxu1  ;;  %v9626_v22 = vld [vmem:[#allocation95_spill] sm:$0xff] }
 0x58a   : > { %v3376_v29 = vpop.f32.mrf.mxu0 }
 0x58b   : > { %v8466_v48 = vadd.f32 %v3881_v17, %v3713_v46  ;;  %v3546_v8 = vadd.f32 %v3545_v31, %v3376_v29 }
 0x58d   : > { %9621 = vst [vmem:[#allocation91_spill] sm:$0xff] %v8466_v48 }
 0x590   : > { %v3714_v19 = vpop.f32.mrf.mxu2 }
 0x591   : > { %v3715_v27 = vadd.f32 %v3714_v19, %v3546_v8  ;;  %v3883_v43 = vpop.f32.mrf.mxu3  ;;  %v3548_v62 = vpop.f32.mrf.mxu1 }
 0x592   : > { %v3379_v21 = vpop.f32.mrf.mxu0 }
 0x593   : > { %v8468_v2 = vadd.f32 %v3883_v43, %v3715_v27  ;;  %v3549_v12 = vadd.f32 %v3548_v62, %v3379_v21 }
 0x594   : > { %3587 = vmatmul.bf16.gmra.mxu1 %v9624_v11 }
 0x595   : > { %9622 = vst [vmem:[#allocation96_spill] sm:$0xff] %v8468_v2  ;;  %3418 = vmatmul.bf16.gmra.mxu0 %v9623_v20  ;;  %3756 = vmatmul.bf16.gmra.mxu2 %v9625_v33  ;;  %v9629_v20 = vld [vmem:[#allocation98_spill] sm:$0xff]  ;;  %v9630_v33 = vld [vmem:[#allocation99_spill] sm:$0xff] }
 0x596   : > { %3925 = vmatmul.bf16.gmra.mxu3 %v9626_v22  ;;  %v9631_v22 = vld [vmem:[#allocation100_spill] sm:$0xff] }
 0x598   : > { %v3717_v9 = vpop.f32.mrf.mxu2 }
 0x599   : > { %v3718_v46 = vadd.f32 %v3717_v9, %v3549_v12  ;;  %v3886_v17 = vpop.f32.mrf.mxu3  ;;  %v3550_v31 = vpop.f32.mrf.mxu1  ;;  %v9632_v12 = vld [vmem:[#allocation101_spill] sm:$0xff] }
 0x59a   : > { %v3381_v29 = vpop.f32.mrf.mxu0 }
 0x59b   : > { %v8474_v8 = vadd.f32 %v3886_v17, %v3718_v46  ;;  %v3551_v19 = vadd.f32 %v3550_v31, %v3381_v29 }
 0x59d   : > { %9627 = vst [vmem:[#allocation97_spill] sm:$0xff] %v8474_v8 }
 0x5a0   : > { %v3719_v48 = vpop.f32.mrf.mxu2 }
 0x5a1   : > { %v3720_v27 = vadd.f32 %v3719_v48, %v3551_v19  ;;  %v3888_v43 = vpop.f32.mrf.mxu3  ;;  %v3553_v62 = vpop.f32.mrf.mxu1 }
 0x5a2   : > { %v3384_v21 = vpop.f32.mrf.mxu0 }
 0x5a3   : > { %v8476_v2 = vadd.f32 %v3888_v43, %v3720_v27  ;;  %v3554_v11 = vadd.f32 %v3553_v62, %v3384_v21 }
 0x5a4   : > { %3592 = vmatmul.bf16.gmra.mxu1 %v9630_v33 }
 0x5a5   : > { %9628 = vst [vmem:[#allocation102_spill] sm:$0xff] %v8476_v2  ;;  %3423 = vmatmul.bf16.gmra.mxu0 %v9629_v20  ;;  %3761 = vmatmul.bf16.gmra.mxu2 %v9631_v22  ;;  %v9635_v2 = vld [vmem:[#allocation104_spill] sm:$0xff]  ;;  %v9638_v20 = vld [vmem:[#allocation107_spill] sm:$0xff] }
 0x5a6   : > { %3930 = vmatmul.bf16.gmra.mxu3 %v9632_v12 }
 0x5a8   : > { %v3722_v9 = vpop.f32.mrf.mxu2 }
 0x5a9   : > { %v3723_v46 = vadd.f32 %v3722_v9, %v3554_v11  ;;  %v3891_v17 = vpop.f32.mrf.mxu3  ;;  %v3555_v48 = vpop.f32.mrf.mxu1  ;;  %v9636_v11 = vld [vmem:[#allocation105_spill] sm:$0xff]  ;;  %v9637_v9 = vld [vmem:[#allocation106_spill] sm:$0xff] }
 0x5aa   : > { %v3386_v29 = vpop.f32.mrf.mxu0 }
 0x5ab   : > { %v8482_v31 = vadd.f32 %v3891_v17, %v3723_v46  ;;  %v3556_v19 = vadd.f32 %v3555_v48, %v3386_v29  ;;  %v6703_v46 = vld [vmem:[%s7188_s1 + $0x22c] sm:$0xf]  ;;  %v6400_v17 = vld [vmem:[%s7188_s1 + $0x238] sm:$0xf0] }
 0x5ac   : > { %v6735_v29 = vld [vmem:[%s7188_s1 + $0x32c] sm:$0xf]  ;;  %v6403_v48 = vor.u32 %v6703_v46, %v6400_v17 }
 0x5ad   : > { %9633 = vst [vmem:[#allocation103_spill] sm:$0xff] %v8482_v31  ;;  %v6671_v31 = vld [vmem:[%s7188_s1 + $0x12c] sm:$0xf] }
 0x5ae   : > { %4330 = vmatpush.bf16.msrb.mxu2 %v6403_v48  ;;  %v6275_v32 = vor.u32 %v6671_v31, %v6272_v14 }
 0x5b0   : > { %v3724_v27 = vpop.f32.mrf.mxu2  ;;  %4161 = vmatpush.bf16.msrb.mxu1 %v6275_v32 }
 0x5b1   : > { %v3725_v43 = vadd.f32 %v3724_v27, %v3556_v19  ;;  %v3893_v21 = vpop.f32.mrf.mxu3  ;;  %v3558_v33 = vpop.f32.mrf.mxu1  ;;  %v6528_v19 = vld [vmem:[%s7188_s1 + $0x338] sm:$0xf0] }
 0x5b2   : > { %v3389_v62 = vpop.f32.mrf.mxu0 }
 0x5b3   : > { %v8484_v22 = vadd.f32 %v3893_v21, %v3725_v43  ;;  %v3559_v12 = vadd.f32 %v3558_v33, %v3389_v62  ;;  %v6531_v43 = vor.u32 %v6735_v29, %v6528_v19 }
 0x5b4   : > { %3597 = vmatmul.bf16.gmra.mxu1 %v9636_v11 }
 0x5b5   : > { %9634 = vst [vmem:[#allocation108_spill] sm:$0xff] %v8484_v22  ;;  %3428 = vmatmul.bf16.gmra.mxu0 %v9635_v2  ;;  %3766 = vmatmul.bf16.gmra.mxu2 %v9637_v9  ;;  %v6639_v22 = vld [vmem:[%s7188_s1 + $0x2c] sm:$0xf]  ;;  %v6144_v2 = vld [vmem:[%s7188_s1 + $0x38] sm:$0xf0] }
 0x5b6   : > { %3935 = vmatmul.bf16.gmra.mxu3 %v9638_v20  ;;  %v6147_v8 = vor.u32 %v6639_v22, %v6144_v2 }
 0x5b7   : > { %4499 = vmatpush.bf16.msrb.mxu3 %v6531_v43  ;;  %v9642_v43 = vld [vmem:[#allocation111_spill] sm:$0xff] }
 0x5b8   : > { %v3727_v27 = vpop.f32.mrf.mxu2  ;;  %3992 = vmatpush.bf16.msrb.mxu0 %v6147_v8 }
 0x5b9   : > { %v3728_v33 = vadd.f32 %v3727_v27, %v3559_v12  ;;  %v3896_v21 = vpop.f32.mrf.mxu3  ;;  %v3560_v11 = vpop.f32.mrf.mxu1  ;;  %v9641_v27 = vld [vmem:[#allocation110_spill] sm:$0xff] }
 0x5ba   : > { %v3391_v62 = vpop.f32.mrf.mxu0 }
 0x5bb   : > { %v8494_v9 = vadd.f32 %v3896_v21, %v3728_v33  ;;  %v3561_v20 = vadd.f32 %v3560_v11, %v3391_v62  ;;  %v9643_v11 = vld [vmem:[#allocation112_spill] sm:$0xff]  ;;  %v9644_v33 = vld [vmem:[#allocation113_spill] sm:$0xff] }
 0x5bd   : > { %9639 = vst [vmem:[#allocation109_spill] sm:$0xff] %v8494_v9 }
 0x5c0   : > { %v3729_v46 = vpop.f32.mrf.mxu2 }
 0x5c1   : > { %v3730_v17 = vadd.f32 %v3729_v46, %v3561_v20  ;;  %v3898_v15 = vpop.f32.mrf.mxu3  ;;  %v3563_v12 = vpop.f32.mrf.mxu1 }
 0x5c2   : > { %v3394_v29 = vpop.f32.mrf.mxu0 }
 0x5c3   : > { %v8500_v19 = vadd.f32 %v3898_v15, %v3730_v17  ;;  %v3564_v48 = vadd.f32 %v3563_v12, %v3394_v29 }
 0x5c4   : > { %3602 = vmatmul.bf16.gmra.mxu1 %v9642_v43  ;;  %v9647_v43 = vld [vmem:[#allocation116_spill] sm:$0xff] }
 0x5c5   : > { %9640 = vst [vmem:[#allocation114_spill] sm:$0xff] %v8500_v19  ;;  %3433 = vmatmul.bf16.gmra.mxu0 %v9641_v27  ;;  %3771 = vmatmul.bf16.gmra.mxu2 %v9643_v11  ;;  %v9648_v11 = vld [vmem:[#allocation117_spill] sm:$0xff]  ;;  %v6256_v19 = vld [vmem:[%s7188_s1 + $0x118] sm:$0xf0] }
 0x5c6   : > { %3940 = vmatmul.bf16.gmra.mxu3 %v9644_v33  ;;  %v9649_v33 = vld [vmem:[#allocation118_spill] sm:$0xff] }
 0x5c8   : > { %v3732_v2 = vpop.f32.mrf.mxu2 }
 0x5c9   : > { %v3733_v14 = vadd.f32 %v3732_v2, %v3564_v48  ;;  %v3901_v22 = vpop.f32.mrf.mxu3  ;;  %v3565_v20 = vpop.f32.mrf.mxu1  ;;  %v9650_v48 = vld [vmem:[#allocation119_spill] sm:$0xff] }
 0x5ca   : > { %v3396_v8 = vpop.f32.mrf.mxu0 }
 0x5cb   : > { %v8506_v31 = vadd.f32 %v3901_v22, %v3733_v14  ;;  %v3566_v32 = vadd.f32 %v3565_v20, %v3396_v8 }
 0x5cd   : > { %9645 = vst [vmem:[#allocation115_spill] sm:$0xff] %v8506_v31 }
 0x5d0   : > { %v3734_v21 = vpop.f32.mrf.mxu2 }
 0x5d1   : > { %v3735_v15 = vadd.f32 %v3734_v21, %v3566_v32  ;;  %v3903_v62 = vpop.f32.mrf.mxu3  ;;  %v3568_v17 = vpop.f32.mrf.mxu1 }
 0x5d2   : > { %v3399_v46 = vpop.f32.mrf.mxu0 }
 0x5d3   : > { %v8508_v29 = vadd.f32 %v3903_v62, %v3735_v15  ;;  %v3569_v12 = vadd.f32 %v3568_v17, %v3399_v46 }
 0x5d4   : > { %3607 = vmatmul.bf16.gmra.mxu1 %v9648_v11 }
 0x5d5   : > { %9646 = vst [vmem:[#allocation120_spill] sm:$0xff] %v8508_v29  ;;  %3438 = vmatmul.bf16.gmra.mxu0 %v9647_v43  ;;  %3776 = vmatmul.bf16.gmra.mxu2 %v9649_v33  ;;  %v9653_v43 = vld [vmem:[#allocation122_spill] sm:$0xff]  ;;  %v9654_v33 = vld [vmem:[#allocation123_spill] sm:$0xff] }
 0x5d6   : > { %3945 = vmatmul.bf16.gmra.mxu3 %v9650_v48  ;;  %v9655_v48 = vld [vmem:[#allocation124_spill] sm:$0xff] }
 0x5d8   : > { %v3737_v2 = vpop.f32.mrf.mxu2 }
 0x5d9   : > { %v3738_v14 = vadd.f32 %v3737_v2, %v3569_v12  ;;  %v3906_v22 = vpop.f32.mrf.mxu3  ;;  %v3570_v20 = vpop.f32.mrf.mxu1  ;;  %v9656_v12 = vld [vmem:[#allocation125_spill] sm:$0xff] }
 0x5da   : > { %v3401_v8 = vpop.f32.mrf.mxu0 }
 0x5db   : > { %v8514_v32 = vadd.f32 %v3906_v22, %v3738_v14  ;;  %v3571_v21 = vadd.f32 %v3570_v20, %v3401_v8 }
 0x5dd   : > { %9651 = vst [vmem:[#allocation121_spill] sm:$0xff] %v8514_v32 }
 0x5e0   : > { %v3739_v31 = vpop.f32.mrf.mxu2 }
 0x5e1   : > { %v3740_v15 = vadd.f32 %v3739_v31, %v3571_v21  ;;  %v3908_v62 = vpop.f32.mrf.mxu3  ;;  %v3573_v17 = vpop.f32.mrf.mxu1 }
 0x5e2   : > { %v3404_v46 = vpop.f32.mrf.mxu0 }
 0x5e3   : > { %v8516_v29 = vadd.f32 %v3908_v62, %v3740_v15  ;;  %v3574_v11 = vadd.f32 %v3573_v17, %v3404_v46 }
 0x5e4   : > { %3612 = vmatmul.bf16.gmra.mxu1 %v9654_v33 }
 0x5e5   : > { %9652 = vst [vmem:[#allocation126_spill] sm:$0xff] %v8516_v29  ;;  %3443 = vmatmul.bf16.gmra.mxu0 %v9653_v43  ;;  %3781 = vmatmul.bf16.gmra.mxu2 %v9655_v48  ;;  %v9659_v29 = vld [vmem:[#allocation128_spill] sm:$0xff]  ;;  %v9662_v43 = vld [vmem:[#allocation131_spill] sm:$0xff] }
 0x5e6   : > { %3950 = vmatmul.bf16.gmra.mxu3 %v9656_v12 }
 0x5e8   : > { %v3742_v2 = vpop.f32.mrf.mxu2 }
 0x5e9   : > { %v3743_v14 = vadd.f32 %v3742_v2, %v3574_v11  ;;  %v3911_v22 = vpop.f32.mrf.mxu3  ;;  %v3575_v31 = vpop.f32.mrf.mxu1  ;;  %v9660_v11 = vld [vmem:[#allocation129_spill] sm:$0xff]  ;;  %v9661_v2 = vld [vmem:[#allocation130_spill] sm:$0xff] }
 0x5ea   : > { %v3406_v8 = vpop.f32.mrf.mxu0 }
 0x5eb   : > { %v8522_v20 = vadd.f32 %v3911_v22, %v3743_v14  ;;  %v3576_v21 = vadd.f32 %v3575_v31, %v3406_v8  ;;  %v6699_v14 = vld [vmem:[%s7188_s1 + $0x20c] sm:$0xf]  ;;  %v6384_v22 = vld [vmem:[%s7188_s1 + $0x218] sm:$0xf0] }
 0x5ec   : > { %v6731_v8 = vld [vmem:[%s7188_s1 + $0x30c] sm:$0xf]  ;;  %v6387_v31 = vor.u32 %v6699_v14, %v6384_v22 }
 0x5ed   : > { %9657 = vst [vmem:[#allocation127_spill] sm:$0xff] %v8522_v20  ;;  %v6667_v20 = vld [vmem:[%s7188_s1 + $0x10c] sm:$0xf] }
 0x5ee   : > { %4331 = vmatpush.bf16.msrb.mxu2 %v6387_v31  ;;  %v6259_v27 = vor.u32 %v6667_v20, %v6256_v19 }
 0x5f0   : > { %v3744_v15 = vpop.f32.mrf.mxu2  ;;  %4162 = vmatpush.bf16.msrb.mxu1 %v6259_v27 }
 0x5f1   : > { %v3745_v62 = vadd.f32 %v3744_v15, %v3576_v21  ;;  %v3913_v46 = vpop.f32.mrf.mxu3  ;;  %v3578_v33 = vpop.f32.mrf.mxu1  ;;  %v6512_v21 = vld [vmem:[%s7188_s1 + $0x318] sm:$0xf0] }
 0x5f2   : > { %v3409_v17 = vpop.f32.mrf.mxu0 }
 0x5f3   : > { %v8524_v48 = vadd.f32 %v3913_v46, %v3745_v62  ;;  %v3579_v12 = vadd.f32 %v3578_v33, %v3409_v17  ;;  %v6515_v62 = vor.u32 %v6731_v8, %v6512_v21 }
 0x5f4   : > { %3617 = vmatmul.bf16.gmra.mxu1 %v9660_v11 }
 0x5f5   : > { %9658 = vst [vmem:[#allocation132_spill] sm:$0xff] %v8524_v48  ;;  %3448 = vmatmul.bf16.gmra.mxu0 %v9659_v29  ;;  %3786 = vmatmul.bf16.gmra.mxu2 %v9661_v2  ;;  %v6635_v48 = vld [vmem:[%s7188_s1 + $0xc] sm:$0xf]  ;;  %v6128_v29 = vld [vmem:[%s7188_s1 + $0x18] sm:$0xf0] }
 0x5f6   : > { %3955 = vmatmul.bf16.gmra.mxu3 %v9662_v43  ;;  %v6131_v32 = vor.u32 %v6635_v48, %v6128_v29 }
 0x5f7   : > { %4500 = vmatpush.bf16.msrb.mxu3 %v6515_v62  ;;  %v9664_v62 = vld [vmem:[#allocation135_spill] sm:$0xff] }
 0x5f8   : > { %v3747_v15 = vpop.f32.mrf.mxu2  ;;  %3993 = vmatpush.bf16.msrb.mxu0 %v6131_v32 }
 0x5f9   : > { %v3748_v33 = vadd.f32 %v3747_v15, %v3579_v12  ;;  %v3916_v46 = vpop.f32.mrf.mxu3  ;;  %v3580_v11 = vpop.f32.mrf.mxu1  ;;  %v9663_v15 = vld [vmem:[#allocation134_spill] sm:$0xff] }
 0x5fa   : > { %v3411_v17 = vpop.f32.mrf.mxu0 }
 0x5fb   : > { %v8534_v2 = vadd.f32 %v3916_v46, %v3748_v33  ;;  %v3581_v43 = vadd.f32 %v3580_v11, %v3411_v17  ;;  %v9665_v11 = vld [vmem:[#allocation136_spill] sm:$0xff]  ;;  %v9666_v33 = vld [vmem:[#allocation137_spill] sm:$0xff] }
 0x600   : > { %v3749_v14 = vpop.f32.mrf.mxu2 }
 0x601   : > { %v3750_v22 = vadd.f32 %v3749_v14, %v3581_v43  ;;  %v3918_v9 = vpop.f32.mrf.mxu3  ;;  %v3583_v12 = vpop.f32.mrf.mxu1 }
 0x602   : > { %v3414_v8 = vpop.f32.mrf.mxu0 }
 0x603   : > { %v8540_v21 = vadd.f32 %v3918_v9, %v3750_v22  ;;  %v3584_v31 = vadd.f32 %v3583_v12, %v3414_v8 }
 0x604   : > { %3622 = vmatmul.bf16.gmra.mxu1 %v9664_v62  ;;  %v9669_v62 = vld [vmem:[#allocation140_spill] sm:$0xff] }
 0x605   : > { %3453 = vmatmul.bf16.gmra.mxu0 %v9663_v15  ;;  %3791 = vmatmul.bf16.gmra.mxu2 %v9665_v11  ;;  %v9670_v11 = vld [vmem:[#allocation141_spill] sm:$0xff] }
 0x606   : > { %3960 = vmatmul.bf16.gmra.mxu3 %v9666_v33  ;;  %v9671_v33 = vld [vmem:[#allocation142_spill] sm:$0xff] }
 0x608   : > { %v3752_v29 = vpop.f32.mrf.mxu2 }
 0x609   : > { %v3753_v19 = vadd.f32 %v3752_v29, %v3584_v31  ;;  %v3921_v48 = vpop.f32.mrf.mxu3  ;;  %v3585_v43 = vpop.f32.mrf.mxu1  ;;  %v9672_v31 = vld [vmem:[#allocation143_spill] sm:$0xff] }
 0x60a   : > { %v3416_v32 = vpop.f32.mrf.mxu0 }
 0x60b   : > { %v8546_v20 = vadd.f32 %v3921_v48, %v3753_v19  ;;  %v3586_v27 = vadd.f32 %v3585_v43, %v3416_v32 }
 0x60d   : > { %9667 = vst [vmem:[#allocation133_spill] sm:$0xff] %v8546_v20 }
 0x610   : > { %v3754_v46 = vpop.f32.mrf.mxu2 }
 0x611   : > { %v3755_v9 = vadd.f32 %v3754_v46, %v3586_v27  ;;  %v3923_v17 = vpop.f32.mrf.mxu3  ;;  %v3588_v22 = vpop.f32.mrf.mxu1 }
 0x612   : > { %v3419_v14 = vpop.f32.mrf.mxu0 }
 0x613   : > { %v8548_v8 = vadd.f32 %v3923_v17, %v3755_v9  ;;  %v3589_v12 = vadd.f32 %v3588_v22, %v3419_v14 }
 0x614   : > { %3627 = vmatmul.bf16.gmra.mxu1 %v9670_v11 }
 0x615   : > { %9668 = vst [vmem:[#allocation138_spill] sm:$0xff] %v8548_v8  ;;  %3458 = vmatmul.bf16.gmra.mxu0 %v9669_v62  ;;  %3796 = vmatmul.bf16.gmra.mxu2 %v9671_v33  ;;  %v9675_v62 = vld [vmem:[#allocation146_spill] sm:$0xff]  ;;  %v9676_v33 = vld [vmem:[#allocation147_spill] sm:$0xff] }
 0x616   : > { %3965 = vmatmul.bf16.gmra.mxu3 %v9672_v31  ;;  %v9677_v31 = vld [vmem:[#allocation148_spill] sm:$0xff] }
 0x618   : > { %v3757_v29 = vpop.f32.mrf.mxu2 }
 0x619   : > { %v3758_v19 = vadd.f32 %v3757_v29, %v3589_v12  ;;  %v3926_v48 = vpop.f32.mrf.mxu3  ;;  %v3590_v43 = vpop.f32.mrf.mxu1  ;;  %v9678_v12 = vld [vmem:[#allocation149_spill] sm:$0xff] }
 0x61a   : > { %v3421_v32 = vpop.f32.mrf.mxu0 }
 0x61b   : > { %v8554_v27 = vadd.f32 %v3926_v48, %v3758_v19  ;;  %v3591_v46 = vadd.f32 %v3590_v43, %v3421_v32 }
 0x61d   : > { %9673 = vst [vmem:[#allocation139_spill] sm:$0xff] %v8554_v27 }
 0x620   : > { %v3759_v20 = vpop.f32.mrf.mxu2 }
 0x621   : > { %v3760_v9 = vadd.f32 %v3759_v20, %v3591_v46  ;;  %v3928_v17 = vpop.f32.mrf.mxu3  ;;  %v3593_v22 = vpop.f32.mrf.mxu1 }
 0x622   : > { %v3424_v14 = vpop.f32.mrf.mxu0 }
 0x623   : > { %v8556_v8 = vadd.f32 %v3928_v17, %v3760_v9  ;;  %v3594_v11 = vadd.f32 %v3593_v22, %v3424_v14 }
 0x624   : > { %3632 = vmatmul.bf16.gmra.mxu1 %v9676_v33 }
 0x625   : > { %9674 = vst [vmem:[#allocation144_spill] sm:$0xff] %v8556_v8  ;;  %3463 = vmatmul.bf16.gmra.mxu0 %v9675_v62  ;;  %3801 = vmatmul.bf16.gmra.mxu2 %v9677_v31  ;;  %v9681_v62 = vld [vmem:[#allocation152_spill] sm:$0xff]  ;;  %v9682_v31 = vld [vmem:[#allocation153_spill] sm:$0xff] }
 0x626   : > { %3970 = vmatmul.bf16.gmra.mxu3 %v9678_v12  ;;  %v9683_v12 = vld [vmem:[#allocation154_spill] sm:$0xff] }
 0x628   : > { %v3762_v29 = vpop.f32.mrf.mxu2 }
 0x629   : > { %v3763_v19 = vadd.f32 %v3762_v29, %v3594_v11  ;;  %v3931_v48 = vpop.f32.mrf.mxu3  ;;  %v3595_v43 = vpop.f32.mrf.mxu1  ;;  %v9684_v11 = vld [vmem:[#allocation155_spill] sm:$0xff] }
 0x62a   : > { %v3426_v32 = vpop.f32.mrf.mxu0 }
 0x62b   : > { %v8562_v20 = vadd.f32 %v3931_v48, %v3763_v19  ;;  %v3596_v46 = vadd.f32 %v3595_v43, %v3426_v32 }
 0x62d   : > { %9679 = vst [vmem:[#allocation145_spill] sm:$0xff] %v8562_v20 }
 0x630   : > { %v3764_v27 = vpop.f32.mrf.mxu2 }
 0x631   : > { %v3765_v9 = vadd.f32 %v3764_v27, %v3596_v46  ;;  %v3933_v17 = vpop.f32.mrf.mxu3  ;;  %v3598_v22 = vpop.f32.mrf.mxu1 }
 0x632   : > { %v3429_v14 = vpop.f32.mrf.mxu0 }
 0x633   : > { %v8564_v8 = vadd.f32 %v3933_v17, %v3765_v9  ;;  %v3599_v33 = vadd.f32 %v3598_v22, %v3429_v14 }
 0x634   : > { %3637 = vmatmul.bf16.gmra.mxu1 %v9682_v31 }
 0x635   : > { %9680 = vst [vmem:[#allocation150_spill] sm:$0xff] %v8564_v8  ;;  %3468 = vmatmul.bf16.gmra.mxu0 %v9681_v62  ;;  %3806 = vmatmul.bf16.gmra.mxu2 %v9683_v12 }
 0x636   : > { %3975 = vmatmul.bf16.gmra.mxu3 %v9684_v11 }
 0x638   : > { %v3767_v29 = vpop.f32.mrf.mxu2 }
 0x639   : > { %v3768_v19 = vadd.f32 %v3767_v29, %v3599_v33  ;;  %v3936_v48 = vpop.f32.mrf.mxu3  ;;  %v3600_v43 = vpop.f32.mrf.mxu1 }
 0x63a   : > { %v3431_v32 = vpop.f32.mrf.mxu0 }
 0x63b   : > { %v8570_v27 = vadd.f32 %v3936_v48, %v3768_v19  ;;  %v3601_v46 = vadd.f32 %v3600_v43, %v3431_v32 }
 0x640   : > { %v3769_v20 = vpop.f32.mrf.mxu2 }
 0x641   : > { %v3770_v9 = vadd.f32 %v3769_v20, %v3601_v46  ;;  %v3938_v17 = vpop.f32.mrf.mxu3  ;;  %v3603_v22 = vpop.f32.mrf.mxu1 }
 0x642   : > { %v3434_v14 = vpop.f32.mrf.mxu0 }
 0x643   : > { %v8572_v8 = vadd.f32 %v3938_v17, %v3770_v9  ;;  %v3604_v31 = vadd.f32 %v3603_v22, %v3434_v14 }
 0x644   : > { %3642 = vmatmul.bf16.gmra.mxu1 %v7794_v41 }
 0x645   : > { %9685 = vst [vmem:[#allocation151_spill] sm:$0xff] %v8572_v8  ;;  %3473 = vmatmul.bf16.gmra.mxu0 %v7792_v61  ;;  %3811 = vmatmul.bf16.gmra.mxu2 %v7796_v60 }
 0x646   : > { %3980 = vmatmul.bf16.gmra.mxu3 %v7798_v35 }
 0x648   : > { %v3772_v33 = vpop.f32.mrf.mxu2 }
 0x649   : > { %v3773_v29 = vadd.f32 %v3772_v33, %v3604_v31  ;;  %v3941_v19 = vpop.f32.mrf.mxu3  ;;  %v3605_v32 = vpop.f32.mrf.mxu1 }
 0x64a   : > { %v3436_v48 = vpop.f32.mrf.mxu0 }
 0x64b   : > { %v8578_v20 = vadd.f32 %v3941_v19, %v3773_v29  ;;  %v3606_v43 = vadd.f32 %v3605_v32, %v3436_v48 }
 0x650   : > { %v3774_v46 = vpop.f32.mrf.mxu2 }
 0x651   : > { %v3775_v9 = vadd.f32 %v3774_v46, %v3606_v43  ;;  %v3943_v17 = vpop.f32.mrf.mxu3  ;;  %v3608_v22 = vpop.f32.mrf.mxu1 }
 0x652   : > { %v3439_v14 = vpop.f32.mrf.mxu0 }
 0x653   : > { %v8580_v8 = vadd.f32 %v3943_v17, %v3775_v9  ;;  %v3609_v41 = vadd.f32 %v3608_v22, %v3439_v14 }
 0x654   : > { %4163 = vmatmul.bf16.vlgmr.msrb.gmra.mxu1 %v7268_v51 }
 0x655   : > { %3994 = vmatmul.bf16.vlgmr.msrb.gmra.mxu0 %v7264_v47  ;;  %4332 = vmatmul.bf16.vlgmr.msrb.gmra.mxu2 %v7270_v52 }
 0x656   : > { %4501 = vmatmul.bf16.vlgmr.msrb.gmra.mxu3 %v7272_v53 }
 0x658   : > { %v3777_v31 = vpop.f32.mrf.mxu2 }
 0x659   : > { %v3778_v33 = vadd.f32 %v3777_v31, %v3609_v41  ;;  %v3946_v29 = vpop.f32.mrf.mxu3  ;;  %v3610_v48 = vpop.f32.mrf.mxu1 }
 0x65a   : > { %v3441_v19 = vpop.f32.mrf.mxu0 }
 0x65b   : > { %v8586_v32 = vadd.f32 %v3946_v29, %v3778_v33  ;;  %v3611_v43 = vadd.f32 %v3610_v48, %v3441_v19 }
 0x660   : > { %v3779_v46 = vpop.f32.mrf.mxu2 }
 0x661   : > { %v3780_v9 = vadd.f32 %v3779_v46, %v3611_v43  ;;  %v3948_v17 = vpop.f32.mrf.mxu3  ;;  %v3613_v22 = vpop.f32.mrf.mxu1 }
 0x662   : > { %v3444_v14 = vpop.f32.mrf.mxu0 }
 0x663   : > { %v8588_v47 = vadd.f32 %v3948_v17, %v3780_v9  ;;  %v3614_v51 = vadd.f32 %v3613_v22, %v3444_v14 }
 0x664   : > { %4168 = vmatmul.bf16.gmra.mxu1 %v7280_v1 }
 0x665   : > { %3999 = vmatmul.bf16.gmra.mxu0 %v7278_v0  ;;  %4337 = vmatmul.bf16.gmra.mxu2 %v9539_v25 }
 0x666   : > { %4506 = vmatmul.bf16.gmra.mxu3 %v9540_v7 }
 0x668   : > { %v3782_v52 = vpop.f32.mrf.mxu2 }
 0x669   : > { %v3783_v53 = vadd.f32 %v3782_v52, %v3614_v51  ;;  %v3951_v41 = vpop.f32.mrf.mxu3  ;;  %v3615_v33 = vpop.f32.mrf.mxu1 }
 0x66a   : > { %v3446_v31 = vpop.f32.mrf.mxu0 }
 0x66b   : > { %v8594_v29 = vadd.f32 %v3951_v41, %v3783_v53  ;;  %v3616_v19 = vadd.f32 %v3615_v33, %v3446_v31 }
 0x670   : > { %v3784_v48 = vpop.f32.mrf.mxu2 }
 0x671   : > { %v3785_v43 = vadd.f32 %v3784_v48, %v3616_v19  ;;  %v3953_v46 = vpop.f32.mrf.mxu3  ;;  %v3618_v17 = vpop.f32.mrf.mxu1 }
 0x672   : > { %v3449_v9 = vpop.f32.mrf.mxu0 }
 0x673   : > { %v8596_v0 = vadd.f32 %v3953_v46, %v3785_v43  ;;  %v3619_v1 = vadd.f32 %v3618_v17, %v3449_v9 }
 0x674   : > { %4173 = vmatmul.bf16.gmra.mxu1 %v9544_v30 }
 0x675   : > { %4004 = vmatmul.bf16.gmra.mxu0 %v9542_v24  ;;  %4342 = vmatmul.bf16.gmra.mxu2 %v9545_v44 }
 0x676   : > { %4511 = vmatmul.bf16.gmra.mxu3 %v9546_v3 }
 0x678   : > { %v3787_v25 = vpop.f32.mrf.mxu2 }
 0x679   : > { %v3788_v7 = vadd.f32 %v3787_v25, %v3619_v1  ;;  %v3956_v14 = vpop.f32.mrf.mxu3  ;;  %v3620_v51 = vpop.f32.mrf.mxu1 }
 0x67a   : > { %v3451_v22 = vpop.f32.mrf.mxu0 }
 0x67b   : > { %v8602_v52 = vadd.f32 %v3956_v14, %v3788_v7  ;;  %v3621_v53 = vadd.f32 %v3620_v51, %v3451_v22 }
 0x680   : > { %v3789_v41 = vpop.f32.mrf.mxu2 }
 0x681   : > { %v3790_v31 = vadd.f32 %v3789_v41, %v3621_v53  ;;  %v3958_v33 = vpop.f32.mrf.mxu3  ;;  %v3623_v48 = vpop.f32.mrf.mxu1 }
 0x682   : > { %v3454_v19 = vpop.f32.mrf.mxu0 }
 0x683   : > { %v8604_v24 = vadd.f32 %v3958_v33, %v3790_v31  ;;  %v3624_v30 = vadd.f32 %v3623_v48, %v3454_v19 }
 0x684   : > { %4178 = vmatmul.bf16.gmra.mxu1 %v7312_v37 }
 0x685   : > { %4009 = vmatmul.bf16.gmra.mxu0 %v7310_v36  ;;  %4347 = vmatmul.bf16.gmra.mxu2 %v7314_v38 }
 0x686   : > { %4516 = vmatmul.bf16.gmra.mxu3 %v7316_v39 }
 0x688   : > { %v3792_v44 = vpop.f32.mrf.mxu2 }
 0x689   : > { %v3793_v3 = vadd.f32 %v3792_v44, %v3624_v30  ;;  %v3961_v43 = vpop.f32.mrf.mxu3  ;;  %v3625_v9 = vpop.f32.mrf.mxu1 }
 0x68a   : > { %v3456_v46 = vpop.f32.mrf.mxu0 }
 0x68b   : > { %v8610_v17 = vadd.f32 %v3961_v43, %v3793_v3  ;;  %v3626_v1 = vadd.f32 %v3625_v9, %v3456_v46 }
 0x690   : > { %v3794_v25 = vpop.f32.mrf.mxu2 }
 0x691   : > { %v3795_v7 = vadd.f32 %v3794_v25, %v3626_v1  ;;  %v3963_v14 = vpop.f32.mrf.mxu3  ;;  %v3628_v51 = vpop.f32.mrf.mxu1 }
 0x692   : > { %v3459_v22 = vpop.f32.mrf.mxu0 }
 0x693   : > { %v8612_v36 = vadd.f32 %v3963_v14, %v3795_v7  ;;  %v3629_v37 = vadd.f32 %v3628_v51, %v3459_v22 }
 0x694   : > { %4183 = vmatmul.bf16.gmra.mxu1 %v7324_v50 }
 0x695   : > { %4014 = vmatmul.bf16.gmra.mxu0 %v7322_v49  ;;  %4352 = vmatmul.bf16.gmra.mxu2 %v7326_v54 }
 0x696   : > { %4521 = vmatmul.bf16.gmra.mxu3 %v7328_v55 }
 0x698   : > { %v3797_v38 = vpop.f32.mrf.mxu2 }
 0x699   : > { %v3798_v39 = vadd.f32 %v3797_v38, %v3629_v37  ;;  %v3966_v53 = vpop.f32.mrf.mxu3  ;;  %v3630_v31 = vpop.f32.mrf.mxu1 }
 0x69a   : > { %v3461_v41 = vpop.f32.mrf.mxu0 }
 0x69b   : > { %v8618_v33 = vadd.f32 %v3966_v53, %v3798_v39  ;;  %v3631_v19 = vadd.f32 %v3630_v31, %v3461_v41 }
 0x6a0   : > { %v3799_v48 = vpop.f32.mrf.mxu2 }
 0x6a1   : > { %v3800_v30 = vadd.f32 %v3799_v48, %v3631_v19  ;;  %v3968_v44 = vpop.f32.mrf.mxu3  ;;  %v3633_v43 = vpop.f32.mrf.mxu1 }
 0x6a2   : > { %v3464_v3 = vpop.f32.mrf.mxu0 }
 0x6a3   : > { %v8620_v49 = vadd.f32 %v3968_v44, %v3800_v30  ;;  %v3634_v50 = vadd.f32 %v3633_v43, %v3464_v3 }
 0x6a4   : > { %4188 = vmatmul.bf16.gmra.mxu1 %v7336_v5 }
 0x6a5   : > { %4019 = vmatmul.bf16.gmra.mxu0 %v7334_v4  ;;  %4357 = vmatmul.bf16.gmra.mxu2 %v9547_v42 }
 0x6a6   : > { %4526 = vmatmul.bf16.gmra.mxu3 %v9548_v6 }
 0x6a8   : > { %v3802_v54 = vpop.f32.mrf.mxu2 }
 0x6a9   : > { %v3803_v55 = vadd.f32 %v3802_v54, %v3634_v50  ;;  %v3971_v46 = vpop.f32.mrf.mxu3  ;;  %v3635_v1 = vpop.f32.mrf.mxu1 }
 0x6aa   : > { %v3466_v9 = vpop.f32.mrf.mxu0 }
 0x6ab   : > { %v8626_v25 = vadd.f32 %v3971_v46, %v3803_v55  ;;  %v3636_v7 = vadd.f32 %v3635_v1, %v3466_v9 }
 0x6b0   : > { %v3804_v14 = vpop.f32.mrf.mxu2 }
 0x6b1   : > { %v3805_v22 = vadd.f32 %v3804_v14, %v3636_v7  ;;  %v3973_v51 = vpop.f32.mrf.mxu3  ;;  %v3638_v38 = vpop.f32.mrf.mxu1 }
 0x6b2   : > { %v3469_v37 = vpop.f32.mrf.mxu0 }
 0x6b3   : > { %v8628_v4 = vadd.f32 %v3973_v51, %v3805_v22  ;;  %v3639_v5 = vadd.f32 %v3638_v38, %v3469_v37 }
 0x6b4   : > { %4193 = vmatmul.bf16.gmra.mxu1 %v9552_v13 }
 0x6b5   : > { %4024 = vmatmul.bf16.gmra.mxu0 %v9550_v26  ;;  %4362 = vmatmul.bf16.gmra.mxu2 %v9553_v40 }
 0x6b6   : > { %4531 = vmatmul.bf16.gmra.mxu3 %v9554_v63 }
 0x6b8   : > { %v3807_v42 = vpop.f32.mrf.mxu2 }
 0x6b9   : > { %v3808_v6 = vadd.f32 %v3807_v42, %v3639_v5  ;;  %v3976_v39 = vpop.f32.mrf.mxu3  ;;  %v3640_v41 = vpop.f32.mrf.mxu1 }
 0x6ba   : > { %v3471_v53 = vpop.f32.mrf.mxu0 }
 0x6bb   : > { %v8634_v31 = vadd.f32 %v3976_v39, %v3808_v6  ;;  %v3641_v19 = vadd.f32 %v3640_v41, %v3471_v53 }
 0x6c0   : > { %v3809_v48 = vpop.f32.mrf.mxu2 }
 0x6c1   : > { %v3810_v30 = vadd.f32 %v3809_v48, %v3641_v19  ;;  %v3978_v44 = vpop.f32.mrf.mxu3  ;;  %v3643_v43 = vpop.f32.mrf.mxu1 }
 0x6c2   : > { %v3474_v3 = vpop.f32.mrf.mxu0 }
 0x6c3   : > { %v8636_v26 = vadd.f32 %v3978_v44, %v3810_v30  ;;  %v3644_v13 = vadd.f32 %v3643_v43, %v3474_v3 }
 0x6c4   : > { %4198 = vmatmul.bf16.gmra.mxu1 %v7368_v57 }
 0x6c5   : > { %4029 = vmatmul.bf16.gmra.mxu0 %v7366_v56  ;;  %4367 = vmatmul.bf16.gmra.mxu2 %v7370_v58 }
 0x6c6   : > { %4536 = vmatmul.bf16.gmra.mxu3 %v7372_v59  ;;  %v6849_v59 = vld [vmem:[%s7894_s11] sm:$0xf] }
 0x6c7   : > { %v8651_v37 = vperm.slane %v6849_v59, 2  ;;  %v8653_v42 = vperm.slane %v6849_v59, 3 }
 0x6c8   : > { %v3812_v40 = vpop.f32.mrf.mxu2 }
 0x6c9   : > { %v3813_v63 = vadd.f32 %v3812_v40, %v3644_v13  ;;  %v3981_v50 = vpop.f32.mrf.mxu3  ;;  %v3645_v55 = vpop.f32.mrf.mxu1  ;;  %v5449_v43 = vadd.f32 %v8651_v37, %v8356_v28  ;;  %v9686_v40 = vld [vmem:[#allocation28_spill] sm:$0xff] }
 0x6ca   : > { %v3476_v54 = vpop.f32.mrf.mxu0 }
 0x6cb   : > { %v8642_v46 = vadd.f32 %v3981_v50, %v3813_v63  ;;  %v3646_v9 = vadd.f32 %v3645_v55, %v3476_v54  ;;  %v9687_v63 = vld [vmem:[#allocation29_spill] sm:$0xff]  ;;  %v9688_v50 = vld [vmem:[#allocation30_spill] sm:$0xff] }
 0x6d0   : > { %v3814_v1 = vpop.f32.mrf.mxu2 }
 0x6d1   : > { %v3815_v7 = vadd.f32 %v3814_v1, %v3646_v9  ;;  %v3983_v14 = vpop.f32.mrf.mxu3  ;;  %v4164_v56 = vpop.f32.mrf.mxu1 }
 0x6d2   : > { %v3995_v22 = vpop.f32.mrf.mxu0 }
 0x6d3   : > { %v8644_v51 = vadd.f32 %v3983_v14, %v3815_v7  ;;  %v4165_v57 = vadd.f32 %v4164_v56, %v3995_v22  ;;  %v9689_v22 = vld [vmem:[#allocation31_spill] sm:$0xff] }
 0x6d4   : > { %4203 = vmatmul.bf16.gmra.mxu1 %v7380_v18  ;;  %v5453_v28 = vadd.f32 %v8651_v37, %v9689_v22 }
 0x6d5   : > { %4034 = vmatmul.bf16.gmra.mxu0 %v7378_v16  ;;  %4372 = vmatmul.bf16.gmra.mxu2 %v9555_v10  ;;  %v5445_v16 = vadd.f32 %v8651_v37, %v8354_v23 }
 0x6d6   : > { %4541 = vmatmul.bf16.gmra.mxu3 %v9556_v45 }
 0x6d8   : > { %v4333_v58 = vpop.f32.mrf.mxu2 }
 0x6d9   : > { %v4334_v38 = vadd.f32 %v4333_v58, %v4165_v57  ;;  %v4502_v5 = vpop.f32.mrf.mxu3  ;;  %v4166_v39 = vpop.f32.mrf.mxu1 }
 0x6da   : > { %v3997_v6 = vpop.f32.mrf.mxu0 }
 0x6db   : > { %v4503_v53 = vadd.f32 %v4502_v5, %v4334_v38  ;;  %v4167_v41 = vadd.f32 %v4166_v39, %v3997_v6 }
 0x6dd   : > { %v5446_v18 = vadd.f32 %v8653_v42, %v4503_v53 }
 0x6df   : > { %v5700_v10 = vpack.c.bf16 %v5446_v18, %v5445_v16  ;;  %v9690_v16 = vld [vmem:[#allocation32_spill] sm:$0xff] }
 0x6e0   : > { %v4335_v19 = vpop.f32.mrf.mxu2  ;;  %v9691_v18 = vld [vmem:[#allocation36_spill] sm:$0xff] }
 0x6e1   : > { %5828 = vst [vmem:[%s7907_s20 + $0x8] sm:$0xff] %v5700_v10  ;;  %v4336_v45 = vadd.f32 %v4335_v19, %v4167_v41  ;;  %v4504_v48 = vpop.f32.mrf.mxu3  ;;  %v4169_v44 = vpop.f32.mrf.mxu1  ;;  %v5457_v10 = vadd.f32 %v8651_v37, %v9691_v18 }
 0x6e2   : > { %v4000_v30 = vpop.f32.mrf.mxu0 }
 0x6e3   : > { %v4505_v3 = vadd.f32 %v4504_v48, %v4336_v45  ;;  %v4170_v23 = vadd.f32 %v4169_v44, %v4000_v30  ;;  %v9692_v45 = vld [vmem:[#allocation33_spill] sm:$0xff]  ;;  %v9693_v48 = vld [vmem:[#allocation34_spill] sm:$0xff]  ;;  %v9694_v30 = vld [vmem:[#allocation35_spill] sm:$0xff] }
 0x6e4   : > { %4208 = vmatmul.bf16.gmra.mxu1 %v9686_v40 }
 0x6e5   : > { %4039 = vmatmul.bf16.gmra.mxu0 %v9557_v34  ;;  %v5450_v13 = vadd.f32 %v8653_v42, %v4505_v3  ;;  %4377 = vmatmul.bf16.gmra.mxu2 %v9687_v63 }
 0x6e6   : > { %4546 = vmatmul.bf16.gmra.mxu3 %v9688_v50  ;;  %v9695_v50 = vld [vmem:[#allocation37_spill] sm:$0xff] }
 0x6e7   : > { %v5702_v54 = vpack.c.bf16 %v5450_v13, %v5449_v43 }
 0x6e8   : > { %v4338_v55 = vpop.f32.mrf.mxu2 }
 0x6e9   : > { %5830 = vst [vmem:[%s7907_s20 + $0x18] sm:$0xff] %v5702_v54  ;;  %v4339_v9 = vadd.f32 %v4338_v55, %v4170_v23  ;;  %v4507_v1 = vpop.f32.mrf.mxu3  ;;  %v4171_v34 = vpop.f32.mrf.mxu1  ;;  %v5461_v54 = vadd.f32 %v8651_v37, %v9695_v50 }
 0x6ea   : > { %v4002_v7 = vpop.f32.mrf.mxu0 }
 0x6eb   : > { %v4508_v14 = vadd.f32 %v4507_v1, %v4339_v9  ;;  %v4172_v58 = vadd.f32 %v4171_v34, %v4002_v7 }
 0x6ed   : > { %v5454_v56 = vadd.f32 %v8653_v42, %v4508_v14 }
 0x6ef   : > { %v5704_v57 = vpack.c.bf16 %v5454_v56, %v5453_v28 }
 0x6f0   : > { %v4340_v59 = vpop.f32.mrf.mxu2 }
 0x6f1   : > { %5832 = vst [vmem:[%s7907_s20 + $0x28] sm:$0xff] %v5704_v57  ;;  %v4341_v38 = vadd.f32 %v4340_v59, %v4172_v58  ;;  %v4509_v5 = vpop.f32.mrf.mxu3  ;;  %v4174_v39 = vpop.f32.mrf.mxu1  ;;  %v9696_v57 = vld [vmem:[#allocation38_spill] sm:$0xff] }
 0x6f2   : > { %v4005_v6 = vpop.f32.mrf.mxu0  ;;  %v9697_v58 = vld [vmem:[#allocation42_spill] sm:$0xff] }
 0x6f3   : > { %v4510_v53 = vadd.f32 %v4509_v5, %v4341_v38  ;;  %v4175_v19 = vadd.f32 %v4174_v39, %v4005_v6  ;;  %v5465_v59 = vadd.f32 %v8651_v37, %v9697_v58  ;;  %v9698_v6 = vld [vmem:[#allocation39_spill] sm:$0xff]  ;;  %v9699_v39 = vld [vmem:[#allocation40_spill] sm:$0xff] }
 0x6f4   : > { %4213 = vmatmul.bf16.gmra.mxu1 %v9692_v45 }
 0x6f5   : > { %4044 = vmatmul.bf16.gmra.mxu0 %v9690_v16  ;;  %v5458_v41 = vadd.f32 %v8653_v42, %v4510_v53  ;;  %4382 = vmatmul.bf16.gmra.mxu2 %v9693_v48  ;;  %v9700_v53 = vld [vmem:[#allocation41_spill] sm:$0xff] }
 0x6f6   : > { %4551 = vmatmul.bf16.gmra.mxu3 %v9694_v30  ;;  %v9701_v30 = vld [vmem:[#allocation43_spill] sm:$0xff] }
 0x6f7   : > { %v5706_v44 = vpack.c.bf16 %v5458_v41, %v5457_v10 }
 0x6f8   : > { %v4343_v3 = vpop.f32.mrf.mxu2 }
 0x6f9   : > { %5834 = vst [vmem:[%s7907_s20 + $0x38] sm:$0xff] %v5706_v44  ;;  %v4344_v43 = vadd.f32 %v4343_v3, %v4175_v19  ;;  %v4512_v13 = vpop.f32.mrf.mxu3  ;;  %v4176_v40 = vpop.f32.mrf.mxu1  ;;  %v5469_v44 = vadd.f32 %v8651_v37, %v9701_v30 }
 0x6fa   : > { %v4007_v23 = vpop.f32.mrf.mxu0 }
 0x6fb   : > { %v4513_v63 = vadd.f32 %v4512_v13, %v4344_v43  ;;  %v4177_v1 = vadd.f32 %v4176_v40, %v4007_v23 }
 0x6fd   : > { %v5462_v55 = vadd.f32 %v8653_v42, %v4513_v63 }
 0x6ff   : > { %v5708_v9 = vpack.c.bf16 %v5462_v55, %v5461_v54 }
 0x700   : > { %v4345_v7 = vpop.f32.mrf.mxu2 }
 0x701   : > { %5836 = vst [vmem:[%s7907_s20 + $0x48] sm:$0xff] %v5708_v9  ;;  %v4346_v34 = vadd.f32 %v4345_v7, %v4177_v1  ;;  %v4514_v14 = vpop.f32.mrf.mxu3  ;;  %v4179_v28 = vpop.f32.mrf.mxu1  ;;  %v9702_v9 = vld [vmem:[#allocation44_spill] sm:$0xff] }
 0x702   : > { %v4010_v22 = vpop.f32.mrf.mxu0  ;;  %v9703_v1 = vld [vmem:[#allocation48_spill] sm:$0xff] }
 0x703   : > { %v4515_v56 = vadd.f32 %v4514_v14, %v4346_v34  ;;  %v4180_v5 = vadd.f32 %v4179_v28, %v4010_v22  ;;  %v5473_v7 = vadd.f32 %v8651_v37, %v9703_v1  ;;  %v9704_v22 = vld [vmem:[#allocation45_spill] sm:$0xff]  ;;  %v9705_v28 = vld [vmem:[#allocation46_spill] sm:$0xff] }
 0x704   : > { %4218 = vmatmul.bf16.gmra.mxu1 %v9698_v6 }
 0x705   : > { %4049 = vmatmul.bf16.gmra.mxu0 %v9696_v57  ;;  %v5466_v38 = vadd.f32 %v8653_v42, %v4515_v56  ;;  %4387 = vmatmul.bf16.gmra.mxu2 %v9699_v39  ;;  %v9706_v56 = vld [vmem:[#allocation47_spill] sm:$0xff] }
 0x706   : > { %4556 = vmatmul.bf16.gmra.mxu3 %v9700_v53  ;;  %v9707_v53 = vld [vmem:[#allocation49_spill] sm:$0xff] }
 0x707   : > { %v5710_v16 = vpack.c.bf16 %v5466_v38, %v5465_v59 }
 0x708   : > { %v4348_v18 = vpop.f32.mrf.mxu2 }
 0x709   : > { %5838 = vst [vmem:[%s7907_s20 + $0x58] sm:$0xff] %v5710_v16  ;;  %v4349_v10 = vadd.f32 %v4348_v18, %v4180_v5  ;;  %v4517_v41 = vpop.f32.mrf.mxu3  ;;  %v4181_v45 = vpop.f32.mrf.mxu1  ;;  %v5477_v16 = vadd.f32 %v8651_v37, %v9707_v53 }
 0x70a   : > { %v4012_v19 = vpop.f32.mrf.mxu0 }
 0x70b   : > { %v4518_v48 = vadd.f32 %v4517_v41, %v4349_v10  ;;  %v4182_v13 = vadd.f32 %v4181_v45, %v4012_v19 }
 0x70d   : > { %v5470_v3 = vadd.f32 %v8653_v42, %v4518_v48 }
 0x70f   : > { %v5712_v43 = vpack.c.bf16 %v5470_v3, %v5469_v44 }
 0x710   : > { %v4350_v23 = vpop.f32.mrf.mxu2 }
 0x711   : > { %5840 = vst [vmem:[%s7907_s20 + $0x68] sm:$0xff] %v5712_v43  ;;  %v4351_v40 = vadd.f32 %v4350_v23, %v4182_v13  ;;  %v4519_v63 = vpop.f32.mrf.mxu3  ;;  %v4184_v54 = vpop.f32.mrf.mxu1  ;;  %v9708_v43 = vld [vmem:[#allocation50_spill] sm:$0xff] }
 0x712   : > { %v4015_v50 = vpop.f32.mrf.mxu0  ;;  %v9709_v13 = vld [vmem:[#allocation54_spill] sm:$0xff] }
 0x713   : > { %v4520_v55 = vadd.f32 %v4519_v63, %v4351_v40  ;;  %v4185_v14 = vadd.f32 %v4184_v54, %v4015_v50  ;;  %v5481_v23 = vadd.f32 %v8651_v37, %v9709_v13  ;;  %v9710_v50 = vld [vmem:[#allocation51_spill] sm:$0xff]  ;;  %v9711_v54 = vld [vmem:[#allocation52_spill] sm:$0xff] }
 0x714   : > { %4223 = vmatmul.bf16.gmra.mxu1 %v9704_v22 }
 0x715   : > { %4054 = vmatmul.bf16.gmra.mxu0 %v9702_v9  ;;  %v5474_v34 = vadd.f32 %v8653_v42, %v4520_v55  ;;  %4392 = vmatmul.bf16.gmra.mxu2 %v9705_v28  ;;  %v9712_v55 = vld [vmem:[#allocation53_spill] sm:$0xff] }
 0x716   : > { %4561 = vmatmul.bf16.gmra.mxu3 %v9706_v56  ;;  %v9713_v56 = vld [vmem:[#allocation55_spill] sm:$0xff] }
 0x717   : > { %v5714_v57 = vpack.c.bf16 %v5474_v34, %v5473_v7 }
 0x718   : > { %v4353_v58 = vpop.f32.mrf.mxu2 }
 0x719   : > { %5842 = vst [vmem:[%s7907_s20 + $0x78] sm:$0xff] %v5714_v57  ;;  %v4354_v59 = vadd.f32 %v4353_v58, %v4185_v14  ;;  %v4522_v38 = vpop.f32.mrf.mxu3  ;;  %v4186_v6 = vpop.f32.mrf.mxu1  ;;  %v5485_v57 = vadd.f32 %v8651_v37, %v9713_v56 }
 0x71a   : > { %v4017_v5 = vpop.f32.mrf.mxu0 }
 0x71b   : > { %v4523_v39 = vadd.f32 %v4522_v38, %v4354_v59  ;;  %v4187_v41 = vadd.f32 %v4186_v6, %v4017_v5 }
 0x71d   : > { %v5478_v18 = vadd.f32 %v8653_v42, %v4523_v39 }
 0x71f   : > { %v5716_v10 = vpack.c.bf16 %v5478_v18, %v5477_v16 }
 0x720   : > { %v4355_v19 = vpop.f32.mrf.mxu2 }
 0x721   : > { %5844 = vst [vmem:[%s7907_s20 + $0x88] sm:$0xff] %v5716_v10  ;;  %v4356_v45 = vadd.f32 %v4355_v19, %v4187_v41  ;;  %v4524_v48 = vpop.f32.mrf.mxu3  ;;  %v4189_v44 = vpop.f32.mrf.mxu1  ;;  %v9714_v10 = vld [vmem:[#allocation56_spill] sm:$0xff] }
 0x722   : > { %v4020_v30 = vpop.f32.mrf.mxu0  ;;  %v9715_v41 = vld [vmem:[#allocation60_spill] sm:$0xff] }
 0x723   : > { %v4525_v3 = vadd.f32 %v4524_v48, %v4356_v45  ;;  %v4190_v63 = vadd.f32 %v4189_v44, %v4020_v30  ;;  %v5489_v19 = vadd.f32 %v8651_v37, %v9715_v41  ;;  %v9716_v30 = vld [vmem:[#allocation57_spill] sm:$0xff]  ;;  %v9717_v44 = vld [vmem:[#allocation58_spill] sm:$0xff] }
 0x724   : > { %4228 = vmatmul.bf16.gmra.mxu1 %v9710_v50 }
 0x725   : > { %4059 = vmatmul.bf16.gmra.mxu0 %v9708_v43  ;;  %v5482_v40 = vadd.f32 %v8653_v42, %v4525_v3  ;;  %4397 = vmatmul.bf16.gmra.mxu2 %v9711_v54  ;;  %v9718_v3 = vld [vmem:[#allocation59_spill] sm:$0xff] }
 0x726   : > { %4566 = vmatmul.bf16.gmra.mxu3 %v9712_v55  ;;  %v9719_v55 = vld [vmem:[#allocation61_spill] sm:$0xff] }
 0x727   : > { %v5718_v9 = vpack.c.bf16 %v5482_v40, %v5481_v23 }
 0x728   : > { %v4358_v1 = vpop.f32.mrf.mxu2 }
 0x729   : > { %5846 = vst [vmem:[%s7907_s20 + $0x98] sm:$0xff] %v5718_v9  ;;  %v4359_v7 = vadd.f32 %v4358_v1, %v4190_v63  ;;  %v4527_v34 = vpop.f32.mrf.mxu3  ;;  %v4191_v22 = vpop.f32.mrf.mxu1  ;;  %v5493_v9 = vadd.f32 %v8651_v37, %v9719_v55 }
 0x72a   : > { %v4022_v14 = vpop.f32.mrf.mxu0 }
 0x72b   : > { %v4528_v28 = vadd.f32 %v4527_v34, %v4359_v7  ;;  %v4192_v38 = vadd.f32 %v4191_v22, %v4022_v14 }
 0x72d   : > { %v5486_v58 = vadd.f32 %v8653_v42, %v4528_v28 }
 0x72f   : > { %v5720_v59 = vpack.c.bf16 %v5486_v58, %v5485_v57 }
 0x730   : > { %v4360_v5 = vpop.f32.mrf.mxu2 }
 0x731   : > { %5848 = vst [vmem:[%s7907_s20 + $0xa8] sm:$0xff] %v5720_v59  ;;  %v4361_v6 = vadd.f32 %v4360_v5, %v4192_v38  ;;  %v4529_v39 = vpop.f32.mrf.mxu3  ;;  %v4194_v16 = vpop.f32.mrf.mxu1  ;;  %v9720_v59 = vld [vmem:[#allocation62_spill] sm:$0xff] }
 0x732   : > { %v4025_v53 = vpop.f32.mrf.mxu0  ;;  %v9721_v38 = vld [vmem:[#allocation66_spill] sm:$0xff] }
 0x733   : > { %v4530_v18 = vadd.f32 %v4529_v39, %v4361_v6  ;;  %v4195_v48 = vadd.f32 %v4194_v16, %v4025_v53  ;;  %v5497_v5 = vadd.f32 %v8651_v37, %v9721_v38  ;;  %v9722_v53 = vld [vmem:[#allocation63_spill] sm:$0xff]  ;;  %v9723_v16 = vld [vmem:[#allocation64_spill] sm:$0xff] }
 0x734   : > { %4233 = vmatmul.bf16.gmra.mxu1 %v9716_v30 }
 0x735   : > { %4064 = vmatmul.bf16.gmra.mxu0 %v9714_v10  ;;  %v5490_v45 = vadd.f32 %v8653_v42, %v4530_v18  ;;  %4402 = vmatmul.bf16.gmra.mxu2 %v9717_v44  ;;  %v9724_v18 = vld [vmem:[#allocation65_spill] sm:$0xff] }
 0x736   : > { %4571 = vmatmul.bf16.gmra.mxu3 %v9718_v3  ;;  %v9725_v3 = vld [vmem:[#allocation67_spill] sm:$0xff] }
 0x737   : > { %v5722_v43 = vpack.c.bf16 %v5490_v45, %v5489_v19 }
 0x738   : > { %v4363_v13 = vpop.f32.mrf.mxu2 }
 0x739   : > { %5850 = vst [vmem:[%s7907_s20 + $0xb8] sm:$0xff] %v5722_v43  ;;  %v4364_v23 = vadd.f32 %v4363_v13, %v4195_v48  ;;  %v4532_v40 = vpop.f32.mrf.mxu3  ;;  %v4196_v50 = vpop.f32.mrf.mxu1  ;;  %v5501_v43 = vadd.f32 %v8651_v37, %v9725_v3 }
 0x73a   : > { %v4027_v63 = vpop.f32.mrf.mxu0 }
 0x73b   : > { %v4533_v54 = vadd.f32 %v4532_v40, %v4364_v23  ;;  %v4197_v34 = vadd.f32 %v4196_v50, %v4027_v63 }
 0x73d   : > { %v5494_v1 = vadd.f32 %v8653_v42, %v4533_v54 }
 0x73f   : > { %v5724_v7 = vpack.c.bf16 %v5494_v1, %v5493_v9 }
 0x740   : > { %v4365_v14 = vpop.f32.mrf.mxu2 }
 0x741   : > { %5852 = vst [vmem:[%s7907_s20 + $0xc8] sm:$0xff] %v5724_v7  ;;  %v4366_v22 = vadd.f32 %v4365_v14, %v4197_v34  ;;  %v4534_v28 = vpop.f32.mrf.mxu3  ;;  %v4199_v57 = vpop.f32.mrf.mxu1  ;;  %v9726_v7 = vld [vmem:[#allocation68_spill] sm:$0xff] }
 0x742   : > { %v4030_v56 = vpop.f32.mrf.mxu0  ;;  %v9727_v34 = vld [vmem:[#allocation72_spill] sm:$0xff] }
 0x743   : > { %v4535_v58 = vadd.f32 %v4534_v28, %v4366_v22  ;;  %v4200_v39 = vadd.f32 %v4199_v57, %v4030_v56  ;;  %v5505_v14 = vadd.f32 %v8651_v37, %v9727_v34  ;;  %v9728_v56 = vld [vmem:[#allocation69_spill] sm:$0xff]  ;;  %v9729_v57 = vld [vmem:[#allocation70_spill] sm:$0xff] }
 0x744   : > { %4238 = vmatmul.bf16.gmra.mxu1 %v9722_v53 }
 0x745   : > { %4069 = vmatmul.bf16.gmra.mxu0 %v9720_v59  ;;  %v5498_v6 = vadd.f32 %v8653_v42, %v4535_v58  ;;  %4407 = vmatmul.bf16.gmra.mxu2 %v9723_v16  ;;  %v9730_v58 = vld [vmem:[#allocation71_spill] sm:$0xff] }
 0x746   : > { %4576 = vmatmul.bf16.gmra.mxu3 %v9724_v18  ;;  %v9731_v18 = vld [vmem:[#allocation73_spill] sm:$0xff] }
 0x747   : > { %v5726_v10 = vpack.c.bf16 %v5498_v6, %v5497_v5 }
 0x748   : > { %v4368_v41 = vpop.f32.mrf.mxu2 }
 0x749   : > { %5854 = vst [vmem:[%s7907_s20 + $0xd8] sm:$0xff] %v5726_v10  ;;  %v4369_v19 = vadd.f32 %v4368_v41, %v4200_v39  ;;  %v4537_v45 = vpop.f32.mrf.mxu3  ;;  %v4201_v30 = vpop.f32.mrf.mxu1  ;;  %v5509_v10 = vadd.f32 %v8651_v37, %v9731_v18 }
 0x74a   : > { %v4032_v48 = vpop.f32.mrf.mxu0 }
 0x74b   : > { %v4538_v44 = vadd.f32 %v4537_v45, %v4369_v19  ;;  %v4202_v40 = vadd.f32 %v4201_v30, %v4032_v48 }
 0x74d   : > { %v5502_v13 = vadd.f32 %v8653_v42, %v4538_v44 }
 0x74f   : > { %v5728_v23 = vpack.c.bf16 %v5502_v13, %v5501_v43 }
 0x750   : > { %v4370_v63 = vpop.f32.mrf.mxu2 }
 0x751   : > { %5856 = vst [vmem:[%s7907_s20 + $0xe8] sm:$0xff] %v5728_v23  ;;  %v4371_v50 = vadd.f32 %v4370_v63, %v4202_v40  ;;  %v4539_v54 = vpop.f32.mrf.mxu3  ;;  %v4204_v9 = vpop.f32.mrf.mxu1  ;;  %v9732_v23 = vld [vmem:[#allocation74_spill] sm:$0xff] }
 0x752   : > { %v4035_v55 = vpop.f32.mrf.mxu0  ;;  %v9733_v40 = vld [vmem:[#allocation78_spill] sm:$0xff] }
 0x753   : > { %v4540_v1 = vadd.f32 %v4539_v54, %v4371_v50  ;;  %v4205_v28 = vadd.f32 %v4204_v9, %v4035_v55  ;;  %v5513_v63 = vadd.f32 %v8651_v37, %v9733_v40  ;;  %v9734_v55 = vld [vmem:[#allocation75_spill] sm:$0xff]  ;;  %v9735_v9 = vld [vmem:[#allocation76_spill] sm:$0xff] }
 0x754   : > { %4243 = vmatmul.bf16.gmra.mxu1 %v9728_v56 }
 0x755   : > { %4074 = vmatmul.bf16.gmra.mxu0 %v9726_v7  ;;  %v5506_v22 = vadd.f32 %v8653_v42, %v4540_v1  ;;  %4412 = vmatmul.bf16.gmra.mxu2 %v9729_v57  ;;  %v9736_v1 = vld [vmem:[#allocation77_spill] sm:$0xff] }
 0x756   : > { %4581 = vmatmul.bf16.gmra.mxu3 %v9730_v58  ;;  %v9737_v58 = vld [vmem:[#allocation79_spill] sm:$0xff] }
 0x757   : > { %v5730_v59 = vpack.c.bf16 %v5506_v22, %v5505_v14 }
 0x758   : > { %v4373_v38 = vpop.f32.mrf.mxu2 }
 0x759   : > { %5858 = vst [vmem:[%s7907_s20 + $0xf8] sm:$0xff] %v5730_v59  ;;  %v4374_v5 = vadd.f32 %v4373_v38, %v4205_v28  ;;  %v4542_v6 = vpop.f32.mrf.mxu3  ;;  %v4206_v53 = vpop.f32.mrf.mxu1  ;;  %v5517_v59 = vadd.f32 %v8651_v37, %v9737_v58 }
 0x75a   : > { %v4037_v39 = vpop.f32.mrf.mxu0 }
 0x75b   : > { %v4543_v16 = vadd.f32 %v4542_v6, %v4374_v5  ;;  %v4207_v45 = vadd.f32 %v4206_v53, %v4037_v39 }
 0x75d   : > { %v5510_v41 = vadd.f32 %v8653_v42, %v4543_v16 }
 0x75f   : > { %v5732_v19 = vpack.c.bf16 %v5510_v41, %v5509_v10 }
 0x760   : > { %v4375_v48 = vpop.f32.mrf.mxu2 }
 0x761   : > { %5860 = vst [vmem:[%s7907_s20 + $0x108] sm:$0xff] %v5732_v19  ;;  %v4376_v30 = vadd.f32 %v4375_v48, %v4207_v45  ;;  %v4544_v44 = vpop.f32.mrf.mxu3  ;;  %v4209_v43 = vpop.f32.mrf.mxu1  ;;  %v9738_v19 = vld [vmem:[#allocation80_spill] sm:$0xff] }
 0x762   : > { %v4040_v3 = vpop.f32.mrf.mxu0  ;;  %v9739_v45 = vld [vmem:[#allocation84_spill] sm:$0xff] }
 0x763   : > { %v4545_v13 = vadd.f32 %v4544_v44, %v4376_v30  ;;  %v4210_v54 = vadd.f32 %v4209_v43, %v4040_v3  ;;  %v5521_v48 = vadd.f32 %v8651_v37, %v9739_v45  ;;  %v9740_v3 = vld [vmem:[#allocation81_spill] sm:$0xff]  ;;  %v9741_v43 = vld [vmem:[#allocation82_spill] sm:$0xff] }
 0x764   : > { %4248 = vmatmul.bf16.gmra.mxu1 %v9734_v55 }
 0x765   : > { %4079 = vmatmul.bf16.gmra.mxu0 %v9732_v23  ;;  %v5514_v50 = vadd.f32 %v8653_v42, %v4545_v13  ;;  %4417 = vmatmul.bf16.gmra.mxu2 %v9735_v9  ;;  %v9742_v13 = vld [vmem:[#allocation83_spill] sm:$0xff] }
 0x766   : > { %4586 = vmatmul.bf16.gmra.mxu3 %v9736_v1  ;;  %v9743_v1 = vld [vmem:[#allocation85_spill] sm:$0xff] }
 0x767   : > { %v5734_v7 = vpack.c.bf16 %v5514_v50, %v5513_v63 }
 0x768   : > { %v4378_v34 = vpop.f32.mrf.mxu2 }
 0x769   : > { %5862 = vst [vmem:[%s7907_s20 + $0x118] sm:$0xff] %v5734_v7  ;;  %v4379_v14 = vadd.f32 %v4378_v34, %v4210_v54  ;;  %v4547_v22 = vpop.f32.mrf.mxu3  ;;  %v4211_v56 = vpop.f32.mrf.mxu1  ;;  %v5525_v7 = vadd.f32 %v8651_v37, %v9743_v1 }
 0x76a   : > { %v4042_v28 = vpop.f32.mrf.mxu0 }
 0x76b   : > { %v4548_v57 = vadd.f32 %v4547_v22, %v4379_v14  ;;  %v4212_v6 = vadd.f32 %v4211_v56, %v4042_v28 }
 0x76d   : > { %v5518_v38 = vadd.f32 %v8653_v42, %v4548_v57 }
 0x76f   : > { %v5736_v5 = vpack.c.bf16 %v5518_v38, %v5517_v59 }
 0x770   : > { %v4380_v39 = vpop.f32.mrf.mxu2 }
 0x771   : > { %5864 = vst [vmem:[%s7907_s20 + $0x128] sm:$0xff] %v5736_v5  ;;  %v4381_v53 = vadd.f32 %v4380_v39, %v4212_v6  ;;  %v4549_v16 = vpop.f32.mrf.mxu3  ;;  %v4214_v10 = vpop.f32.mrf.mxu1  ;;  %v9744_v5 = vld [vmem:[#allocation86_spill] sm:$0xff] }
 0x772   : > { %v4045_v18 = vpop.f32.mrf.mxu0  ;;  %v9745_v6 = vld [vmem:[#allocation90_spill] sm:$0xff] }
 0x773   : > { %v4550_v41 = vadd.f32 %v4549_v16, %v4381_v53  ;;  %v4215_v44 = vadd.f32 %v4214_v10, %v4045_v18  ;;  %v5529_v39 = vadd.f32 %v8651_v37, %v9745_v6  ;;  %v9746_v18 = vld [vmem:[#allocation87_spill] sm:$0xff]  ;;  %v9747_v10 = vld [vmem:[#allocation88_spill] sm:$0xff] }
 0x774   : > { %4253 = vmatmul.bf16.gmra.mxu1 %v9740_v3 }
 0x775   : > { %4084 = vmatmul.bf16.gmra.mxu0 %v9738_v19  ;;  %v5522_v30 = vadd.f32 %v8653_v42, %v4550_v41  ;;  %4422 = vmatmul.bf16.gmra.mxu2 %v9741_v43  ;;  %v9748_v41 = vld [vmem:[#allocation89_spill] sm:$0xff] }
 0x776   : > { %4591 = vmatmul.bf16.gmra.mxu3 %v9742_v13  ;;  %v9749_v13 = vld [vmem:[#allocation91_spill] sm:$0xff] }
 0x777   : > { %v5738_v23 = vpack.c.bf16 %v5522_v30, %v5521_v48 }
 0x778   : > { %v4383_v40 = vpop.f32.mrf.mxu2 }
 0x779   : > { %5866 = vst [vmem:[%s7907_s20 + $0x138] sm:$0xff] %v5738_v23  ;;  %v4384_v63 = vadd.f32 %v4383_v40, %v4215_v44  ;;  %v4552_v50 = vpop.f32.mrf.mxu3  ;;  %v4216_v55 = vpop.f32.mrf.mxu1  ;;  %v5533_v23 = vadd.f32 %v8651_v37, %v9749_v13 }
 0x77a   : > { %v4047_v54 = vpop.f32.mrf.mxu0 }
 0x77b   : > { %v4553_v9 = vadd.f32 %v4552_v50, %v4384_v63  ;;  %v4217_v22 = vadd.f32 %v4216_v55, %v4047_v54 }
 0x77d   : > { %v5526_v34 = vadd.f32 %v8653_v42, %v4553_v9 }
 0x77f   : > { %v5740_v14 = vpack.c.bf16 %v5526_v34, %v5525_v7 }
 0x780   : > { %v4385_v28 = vpop.f32.mrf.mxu2 }
 0x781   : > { %5868 = vst [vmem:[%s7907_s20 + $0x148] sm:$0xff] %v5740_v14  ;;  %v4386_v56 = vadd.f32 %v4385_v28, %v4217_v22  ;;  %v4554_v57 = vpop.f32.mrf.mxu3  ;;  %v4219_v59 = vpop.f32.mrf.mxu1  ;;  %v9750_v14 = vld [vmem:[#allocation92_spill] sm:$0xff] }
 0x782   : > { %v4050_v58 = vpop.f32.mrf.mxu0  ;;  %v9751_v22 = vld [vmem:[#allocation96_spill] sm:$0xff] }
 0x783   : > { %v4555_v38 = vadd.f32 %v4554_v57, %v4386_v56  ;;  %v4220_v16 = vadd.f32 %v4219_v59, %v4050_v58  ;;  %v5537_v28 = vadd.f32 %v8651_v37, %v9751_v22  ;;  %v9752_v58 = vld [vmem:[#allocation93_spill] sm:$0xff]  ;;  %v9753_v59 = vld [vmem:[#allocation94_spill] sm:$0xff] }
 0x784   : > { %4258 = vmatmul.bf16.gmra.mxu1 %v9746_v18 }
 0x785   : > { %4089 = vmatmul.bf16.gmra.mxu0 %v9744_v5  ;;  %v5530_v53 = vadd.f32 %v8653_v42, %v4555_v38  ;;  %4427 = vmatmul.bf16.gmra.mxu2 %v9747_v10  ;;  %v9754_v38 = vld [vmem:[#allocation95_spill] sm:$0xff] }
 0x786   : > { %4596 = vmatmul.bf16.gmra.mxu3 %v9748_v41  ;;  %v9755_v41 = vld [vmem:[#allocation97_spill] sm:$0xff] }
 0x787   : > { %v5742_v19 = vpack.c.bf16 %v5530_v53, %v5529_v39 }
 0x788   : > { %v4388_v45 = vpop.f32.mrf.mxu2 }
 0x789   : > { %5870 = vst [vmem:[%s7907_s20 + $0x158] sm:$0xff] %v5742_v19  ;;  %v4389_v48 = vadd.f32 %v4388_v45, %v4220_v16  ;;  %v4557_v30 = vpop.f32.mrf.mxu3  ;;  %v4221_v3 = vpop.f32.mrf.mxu1  ;;  %v5541_v19 = vadd.f32 %v8651_v37, %v9755_v41 }
 0x78a   : > { %v4052_v44 = vpop.f32.mrf.mxu0 }
 0x78b   : > { %v4558_v43 = vadd.f32 %v4557_v30, %v4389_v48  ;;  %v4222_v50 = vadd.f32 %v4221_v3, %v4052_v44 }
 0x78d   : > { %v5534_v40 = vadd.f32 %v8653_v42, %v4558_v43 }
 0x78f   : > { %v5744_v63 = vpack.c.bf16 %v5534_v40, %v5533_v23 }
 0x790   : > { %v4390_v54 = vpop.f32.mrf.mxu2 }
 0x791   : > { %5872 = vst [vmem:[%s7907_s20 + $0x168] sm:$0xff] %v5744_v63  ;;  %v4391_v55 = vadd.f32 %v4390_v54, %v4222_v50  ;;  %v4559_v9 = vpop.f32.mrf.mxu3  ;;  %v4224_v7 = vpop.f32.mrf.mxu1  ;;  %v9756_v63 = vld [vmem:[#allocation98_spill] sm:$0xff] }
 0x792   : > { %v4055_v1 = vpop.f32.mrf.mxu0  ;;  %v9757_v50 = vld [vmem:[#allocation102_spill] sm:$0xff] }
 0x793   : > { %v4560_v34 = vadd.f32 %v4559_v9, %v4391_v55  ;;  %v4225_v57 = vadd.f32 %v4224_v7, %v4055_v1  ;;  %v5545_v54 = vadd.f32 %v8651_v37, %v9757_v50  ;;  %v9758_v1 = vld [vmem:[#allocation99_spill] sm:$0xff]  ;;  %v9759_v7 = vld [vmem:[#allocation100_spill] sm:$0xff] }
 0x794   : > { %4263 = vmatmul.bf16.gmra.mxu1 %v9752_v58 }
 0x795   : > { %4094 = vmatmul.bf16.gmra.mxu0 %v9750_v14  ;;  %v5538_v56 = vadd.f32 %v8653_v42, %v4560_v34  ;;  %4432 = vmatmul.bf16.gmra.mxu2 %v9753_v59  ;;  %v9760_v34 = vld [vmem:[#allocation101_spill] sm:$0xff] }
 0x796   : > { %4601 = vmatmul.bf16.gmra.mxu3 %v9754_v38  ;;  %v9761_v38 = vld [vmem:[#allocation103_spill] sm:$0xff] }
 0x797   : > { %v5746_v5 = vpack.c.bf16 %v5538_v56, %v5537_v28 }
 0x798   : > { %v4393_v6 = vpop.f32.mrf.mxu2 }
 0x799   : > { %5874 = vst [vmem:[%s7907_s20 + $0x178] sm:$0xff] %v5746_v5  ;;  %v4394_v39 = vadd.f32 %v4393_v6, %v4225_v57  ;;  %v4562_v53 = vpop.f32.mrf.mxu3  ;;  %v4226_v18 = vpop.f32.mrf.mxu1  ;;  %v5549_v5 = vadd.f32 %v8651_v37, %v9761_v38 }
 0x79a   : > { %v4057_v16 = vpop.f32.mrf.mxu0 }
 0x79b   : > { %v4563_v10 = vadd.f32 %v4562_v53, %v4394_v39  ;;  %v4227_v30 = vadd.f32 %v4226_v18, %v4057_v16 }
 0x79d   : > { %v5542_v45 = vadd.f32 %v8653_v42, %v4563_v10 }
 0x79f   : > { %v5748_v48 = vpack.c.bf16 %v5542_v45, %v5541_v19 }
 0x7a0   : > { %v4395_v44 = vpop.f32.mrf.mxu2 }
 0x7a1   : > { %5876 = vst [vmem:[%s7907_s20 + $0x188] sm:$0xff] %v5748_v48  ;;  %v4396_v3 = vadd.f32 %v4395_v44, %v4227_v30  ;;  %v4564_v43 = vpop.f32.mrf.mxu3  ;;  %v4229_v23 = vpop.f32.mrf.mxu1  ;;  %v9762_v48 = vld [vmem:[#allocation104_spill] sm:$0xff] }
 0x7a2   : > { %v4060_v13 = vpop.f32.mrf.mxu0  ;;  %v9763_v30 = vld [vmem:[#allocation108_spill] sm:$0xff] }
 0x7a3   : > { %v4565_v40 = vadd.f32 %v4564_v43, %v4396_v3  ;;  %v4230_v9 = vadd.f32 %v4229_v23, %v4060_v13  ;;  %v5553_v44 = vadd.f32 %v8651_v37, %v9763_v30  ;;  %v9764_v13 = vld [vmem:[#allocation105_spill] sm:$0xff]  ;;  %v9765_v23 = vld [vmem:[#allocation106_spill] sm:$0xff] }
 0x7a4   : > { %4268 = vmatmul.bf16.gmra.mxu1 %v9758_v1 }
 0x7a5   : > { %4099 = vmatmul.bf16.gmra.mxu0 %v9756_v63  ;;  %v5546_v55 = vadd.f32 %v8653_v42, %v4565_v40  ;;  %4437 = vmatmul.bf16.gmra.mxu2 %v9759_v7  ;;  %v9766_v40 = vld [vmem:[#allocation107_spill] sm:$0xff] }
 0x7a6   : > { %4606 = vmatmul.bf16.gmra.mxu3 %v9760_v34  ;;  %v9767_v34 = vld [vmem:[#allocation109_spill] sm:$0xff] }
 0x7a7   : > { %v5750_v14 = vpack.c.bf16 %v5546_v55, %v5545_v54 }
 0x7a8   : > { %v4398_v22 = vpop.f32.mrf.mxu2 }
 0x7a9   : > { %5878 = vst [vmem:[%s7907_s20 + $0x198] sm:$0xff] %v5750_v14  ;;  %v4399_v28 = vadd.f32 %v4398_v22, %v4230_v9  ;;  %v4567_v56 = vpop.f32.mrf.mxu3  ;;  %v4231_v58 = vpop.f32.mrf.mxu1  ;;  %v5557_v14 = vadd.f32 %v8651_v37, %v9767_v34 }
 0x7aa   : > { %v4062_v57 = vpop.f32.mrf.mxu0 }
 0x7ab   : > { %v4568_v59 = vadd.f32 %v4567_v56, %v4399_v28  ;;  %v4232_v53 = vadd.f32 %v4231_v58, %v4062_v57 }
 0x7ad   : > { %v5550_v6 = vadd.f32 %v8653_v42, %v4568_v59 }
 0x7af   : > { %v5752_v39 = vpack.c.bf16 %v5550_v6, %v5549_v5 }
 0x7b0   : > { %v4400_v16 = vpop.f32.mrf.mxu2 }
 0x7b1   : > { %5880 = vst [vmem:[%s7907_s20 + $0x1a8] sm:$0xff] %v5752_v39  ;;  %v4401_v18 = vadd.f32 %v4400_v16, %v4232_v53  ;;  %v4569_v10 = vpop.f32.mrf.mxu3  ;;  %v4234_v19 = vpop.f32.mrf.mxu1  ;;  %v9768_v39 = vld [vmem:[#allocation110_spill] sm:$0xff] }
 0x7b2   : > { %v4065_v41 = vpop.f32.mrf.mxu0  ;;  %v9769_v53 = vld [vmem:[#allocation114_spill] sm:$0xff] }
 0x7b3   : > { %v4570_v45 = vadd.f32 %v4569_v10, %v4401_v18  ;;  %v4235_v43 = vadd.f32 %v4234_v19, %v4065_v41  ;;  %v5561_v16 = vadd.f32 %v8651_v37, %v9769_v53  ;;  %v9770_v41 = vld [vmem:[#allocation111_spill] sm:$0xff]  ;;  %v9771_v19 = vld [vmem:[#allocation112_spill] sm:$0xff] }
 0x7b4   : > { %4273 = vmatmul.bf16.gmra.mxu1 %v9764_v13 }
 0x7b5   : > { %4104 = vmatmul.bf16.gmra.mxu0 %v9762_v48  ;;  %v5554_v3 = vadd.f32 %v8653_v42, %v4570_v45  ;;  %4442 = vmatmul.bf16.gmra.mxu2 %v9765_v23  ;;  %v9772_v45 = vld [vmem:[#allocation113_spill] sm:$0xff] }
 0x7b6   : > { %4611 = vmatmul.bf16.gmra.mxu3 %v9766_v40  ;;  %v9773_v40 = vld [vmem:[#allocation115_spill] sm:$0xff] }
 0x7b7   : > { %v5754_v63 = vpack.c.bf16 %v5554_v3, %v5553_v44 }
 0x7b8   : > { %v4403_v50 = vpop.f32.mrf.mxu2 }
 0x7b9   : > { %5882 = vst [vmem:[%s7907_s20 + $0x1b8] sm:$0xff] %v5754_v63  ;;  %v4404_v54 = vadd.f32 %v4403_v50, %v4235_v43  ;;  %v4572_v55 = vpop.f32.mrf.mxu3  ;;  %v4236_v1 = vpop.f32.mrf.mxu1  ;;  %v5565_v63 = vadd.f32 %v8651_v37, %v9773_v40 }
 0x7ba   : > { %v4067_v9 = vpop.f32.mrf.mxu0 }
 0x7bb   : > { %v4573_v7 = vadd.f32 %v4572_v55, %v4404_v54  ;;  %v4237_v56 = vadd.f32 %v4236_v1, %v4067_v9 }
 0x7bd   : > { %v5558_v22 = vadd.f32 %v8653_v42, %v4573_v7 }
 0x7bf   : > { %v5756_v28 = vpack.c.bf16 %v5558_v22, %v5557_v14 }
 0x7c0   : > { %v4405_v57 = vpop.f32.mrf.mxu2 }
 0x7c1   : > { %5884 = vst [vmem:[%s7907_s20 + $0x1c8] sm:$0xff] %v5756_v28  ;;  %v4406_v58 = vadd.f32 %v4405_v57, %v4237_v56  ;;  %v4574_v59 = vpop.f32.mrf.mxu3  ;;  %v4239_v5 = vpop.f32.mrf.mxu1  ;;  %v9774_v28 = vld [vmem:[#allocation116_spill] sm:$0xff] }
 0x7c2   : > { %v4070_v38 = vpop.f32.mrf.mxu0  ;;  %v9775_v56 = vld [vmem:[#allocation120_spill] sm:$0xff] }
 0x7c3   : > { %v4575_v6 = vadd.f32 %v4574_v59, %v4406_v58  ;;  %v4240_v10 = vadd.f32 %v4239_v5, %v4070_v38  ;;  %v5569_v57 = vadd.f32 %v8651_v37, %v9775_v56  ;;  %v9776_v38 = vld [vmem:[#allocation117_spill] sm:$0xff]  ;;  %v9777_v5 = vld [vmem:[#allocation118_spill] sm:$0xff] }
 0x7c4   : > { %4278 = vmatmul.bf16.gmra.mxu1 %v9770_v41 }
 0x7c5   : > { %4109 = vmatmul.bf16.gmra.mxu0 %v9768_v39  ;;  %v5562_v18 = vadd.f32 %v8653_v42, %v4575_v6  ;;  %4447 = vmatmul.bf16.gmra.mxu2 %v9771_v19  ;;  %v9778_v6 = vld [vmem:[#allocation119_spill] sm:$0xff] }
 0x7c6   : > { %4616 = vmatmul.bf16.gmra.mxu3 %v9772_v45  ;;  %v9779_v45 = vld [vmem:[#allocation121_spill] sm:$0xff] }
 0x7c7   : > { %v5758_v48 = vpack.c.bf16 %v5562_v18, %v5561_v16 }
 0x7c8   : > { %v4408_v30 = vpop.f32.mrf.mxu2 }
 0x7c9   : > { %5886 = vst [vmem:[%s7907_s20 + $0x1d8] sm:$0xff] %v5758_v48  ;;  %v4409_v44 = vadd.f32 %v4408_v30, %v4240_v10  ;;  %v4577_v3 = vpop.f32.mrf.mxu3  ;;  %v4241_v13 = vpop.f32.mrf.mxu1  ;;  %v5573_v48 = vadd.f32 %v8651_v37, %v9779_v45 }
 0x7ca   : > { %v4072_v43 = vpop.f32.mrf.mxu0 }
 0x7cb   : > { %v4578_v23 = vadd.f32 %v4577_v3, %v4409_v44  ;;  %v4242_v55 = vadd.f32 %v4241_v13, %v4072_v43 }
 0x7cd   : > { %v5566_v50 = vadd.f32 %v8653_v42, %v4578_v23 }
 0x7cf   : > { %v5760_v54 = vpack.c.bf16 %v5566_v50, %v5565_v63 }
 0x7d0   : > { %v4410_v9 = vpop.f32.mrf.mxu2 }
 0x7d1   : > { %5888 = vst [vmem:[%s7907_s20 + $0x1e8] sm:$0xff] %v5760_v54  ;;  %v4411_v1 = vadd.f32 %v4410_v9, %v4242_v55  ;;  %v4579_v7 = vpop.f32.mrf.mxu3  ;;  %v4244_v14 = vpop.f32.mrf.mxu1  ;;  %v9780_v54 = vld [vmem:[#allocation122_spill] sm:$0xff] }
 0x7d2   : > { %v4075_v34 = vpop.f32.mrf.mxu0  ;;  %v9781_v55 = vld [vmem:[#allocation126_spill] sm:$0xff] }
 0x7d3   : > { %v4580_v22 = vadd.f32 %v4579_v7, %v4411_v1  ;;  %v4245_v59 = vadd.f32 %v4244_v14, %v4075_v34  ;;  %v5577_v9 = vadd.f32 %v8651_v37, %v9781_v55  ;;  %v9782_v34 = vld [vmem:[#allocation123_spill] sm:$0xff]  ;;  %v9783_v14 = vld [vmem:[#allocation124_spill] sm:$0xff] }
 0x7d4   : > { %4283 = vmatmul.bf16.gmra.mxu1 %v9776_v38 }
 0x7d5   : > { %4114 = vmatmul.bf16.gmra.mxu0 %v9774_v28  ;;  %v5570_v58 = vadd.f32 %v8653_v42, %v4580_v22  ;;  %4452 = vmatmul.bf16.gmra.mxu2 %v9777_v5  ;;  %v9784_v22 = vld [vmem:[#allocation125_spill] sm:$0xff] }
 0x7d6   : > { %4621 = vmatmul.bf16.gmra.mxu3 %v9778_v6  ;;  %v9785_v6 = vld [vmem:[#allocation127_spill] sm:$0xff] }
 0x7d7   : > { %v5762_v39 = vpack.c.bf16 %v5570_v58, %v5569_v57 }
 0x7d8   : > { %v4413_v53 = vpop.f32.mrf.mxu2 }
 0x7d9   : > { %5890 = vst [vmem:[%s7907_s20 + $0x1f8] sm:$0xff] %v5762_v39  ;;  %v4414_v16 = vadd.f32 %v4413_v53, %v4245_v59  ;;  %v4582_v18 = vpop.f32.mrf.mxu3  ;;  %v4246_v41 = vpop.f32.mrf.mxu1  ;;  %v5581_v39 = vadd.f32 %v8651_v37, %v9785_v6 }
 0x7da   : > { %v4077_v10 = vpop.f32.mrf.mxu0 }
 0x7db   : > { %v4583_v19 = vadd.f32 %v4582_v18, %v4414_v16  ;;  %v4247_v3 = vadd.f32 %v4246_v41, %v4077_v10 }
 0x7dd   : > { %v5574_v30 = vadd.f32 %v8653_v42, %v4583_v19 }
 0x7df   : > { %v5764_v44 = vpack.c.bf16 %v5574_v30, %v5573_v48 }
 0x7e0   : > { %v4415_v43 = vpop.f32.mrf.mxu2 }
 0x7e1   : > { %5892 = vst [vmem:[%s7907_s20 + $0x208] sm:$0xff] %v5764_v44  ;;  %v4416_v13 = vadd.f32 %v4415_v43, %v4247_v3  ;;  %v4584_v23 = vpop.f32.mrf.mxu3  ;;  %v4249_v63 = vpop.f32.mrf.mxu1  ;;  %v9786_v44 = vld [vmem:[#allocation128_spill] sm:$0xff] }
 0x7e2   : > { %v4080_v40 = vpop.f32.mrf.mxu0  ;;  %v9787_v3 = vld [vmem:[#allocation132_spill] sm:$0xff] }
 0x7e3   : > { %v4585_v50 = vadd.f32 %v4584_v23, %v4416_v13  ;;  %v4250_v7 = vadd.f32 %v4249_v63, %v4080_v40  ;;  %v5585_v43 = vadd.f32 %v8651_v37, %v9787_v3  ;;  %v9788_v40 = vld [vmem:[#allocation129_spill] sm:$0xff]  ;;  %v9789_v63 = vld [vmem:[#allocation130_spill] sm:$0xff] }
 0x7e4   : > { %4288 = vmatmul.bf16.gmra.mxu1 %v9782_v34 }
 0x7e5   : > { %4119 = vmatmul.bf16.gmra.mxu0 %v9780_v54  ;;  %v5578_v1 = vadd.f32 %v8653_v42, %v4585_v50  ;;  %4457 = vmatmul.bf16.gmra.mxu2 %v9783_v14  ;;  %v9790_v50 = vld [vmem:[#allocation131_spill] sm:$0xff] }
 0x7e6   : > { %4626 = vmatmul.bf16.gmra.mxu3 %v9784_v22  ;;  %v5589_v22 = vadd.f32 %v8651_v37, %v8534_v2 }
 0x7e7   : > { %v5766_v28 = vpack.c.bf16 %v5578_v1, %v5577_v9 }
 0x7e8   : > { %v4418_v56 = vpop.f32.mrf.mxu2 }
 0x7e9   : > { %5894 = vst [vmem:[%s7907_s20 + $0x218] sm:$0xff] %v5766_v28  ;;  %v4419_v57 = vadd.f32 %v4418_v56, %v4250_v7  ;;  %v4587_v58 = vpop.f32.mrf.mxu3  ;;  %v4251_v38 = vpop.f32.mrf.mxu1 }
 0x7ea   : > { %v4082_v59 = vpop.f32.mrf.mxu0 }
 0x7eb   : > { %v4588_v5 = vadd.f32 %v4587_v58, %v4419_v57  ;;  %v4252_v18 = vadd.f32 %v4251_v38, %v4082_v59 }
 0x7ed   : > { %v5582_v53 = vadd.f32 %v8653_v42, %v4588_v5 }
 0x7ef   : > { %v5768_v16 = vpack.c.bf16 %v5582_v53, %v5581_v39  ;;  %v5593_v53 = vadd.f32 %v8651_v37, %v8540_v21 }
 0x7f0   : > { %v4420_v10 = vpop.f32.mrf.mxu2 }
 0x7f1   : > { %5896 = vst [vmem:[%s7907_s20 + $0x228] sm:$0xff] %v5768_v16  ;;  %v4421_v41 = vadd.f32 %v4420_v10, %v4252_v18  ;;  %v4589_v19 = vpop.f32.mrf.mxu3  ;;  %v4254_v48 = vpop.f32.mrf.mxu1  ;;  %v9791_v18 = vld [vmem:[#allocation135_spill] sm:$0xff]  ;;  %v9792_v10 = vld [vmem:[#allocation136_spill] sm:$0xff] }
 0x7f2   : > { %v4085_v45 = vpop.f32.mrf.mxu0 }
 0x7f3   : > { %v4590_v30 = vadd.f32 %v4589_v19, %v4421_v41  ;;  %v4255_v23 = vadd.f32 %v4254_v48, %v4085_v45  ;;  %v9793_v41 = vld [vmem:[#allocation137_spill] sm:$0xff] }
 0x7f4   : > { %4293 = vmatmul.bf16.gmra.mxu1 %v9788_v40 }
 0x7f5   : > { %4124 = vmatmul.bf16.gmra.mxu0 %v9786_v44  ;;  %v5586_v13 = vadd.f32 %v8653_v42, %v4590_v30  ;;  %4462 = vmatmul.bf16.gmra.mxu2 %v9789_v63 }
 0x7f6   : > { %4631 = vmatmul.bf16.gmra.mxu3 %v9790_v50 }
 0x7f7   : > { %v5770_v54 = vpack.c.bf16 %v5586_v13, %v5585_v43  ;;  %v9794_v43 = vld [vmem:[#allocation133_spill] sm:$0xff] }
 0x7f8   : > { %v4423_v55 = vpop.f32.mrf.mxu2  ;;  %v5597_v21 = vadd.f32 %v8651_v37, %v9794_v43  ;;  %v9801_v43 = vld [vmem:[#allocation146_spill] sm:$0xff] }
 0x7f9   : > { %5898 = vst [vmem:[%s7907_s20 + $0x238] sm:$0xff] %v5770_v54  ;;  %v4424_v9 = vadd.f32 %v4423_v55, %v4255_v23  ;;  %v4592_v1 = vpop.f32.mrf.mxu3  ;;  %v4256_v34 = vpop.f32.mrf.mxu1 }
 0x7fa   : > { %v4087_v7 = vpop.f32.mrf.mxu0 }
 0x7fb   : > { %v4593_v14 = vadd.f32 %v4592_v1, %v4424_v9  ;;  %v4257_v57 = vadd.f32 %v4256_v34, %v4087_v7  ;;  %v9795_v7 = vld [vmem:[#allocation140_spill] sm:$0xff]  ;;  %v9796_v34 = vld [vmem:[#allocation138_spill] sm:$0xff] }
 0x7fd   : > { %v5590_v28 = vadd.f32 %v8653_v42, %v4593_v14  ;;  %v5601_v14 = vadd.f32 %v8651_v37, %v9796_v34 }
 0x7ff   : > { %v5772_v56 = vpack.c.bf16 %v5590_v28, %v5589_v22 }
 0x800   : > { %v4425_v58 = vpop.f32.mrf.mxu2 }
 0x801   : > { %5900 = vst [vmem:[%s7907_s20 + $0x248] sm:$0xff] %v5772_v56  ;;  %v4426_v59 = vadd.f32 %v4425_v58, %v4257_v57  ;;  %v4594_v38 = vpop.f32.mrf.mxu3  ;;  %v4259_v6 = vpop.f32.mrf.mxu1  ;;  %v9797_v56 = vld [vmem:[#allocation141_spill] sm:$0xff]  ;;  %v9798_v57 = vld [vmem:[#allocation142_spill] sm:$0xff]  ;;  %v9799_v58 = vld [vmem:[#allocation143_spill] sm:$0xff] }
 0x802   : > { %v4090_v5 = vpop.f32.mrf.mxu0 }
 0x803   : > { %v4595_v39 = vadd.f32 %v4594_v38, %v4426_v59  ;;  %v4260_v2 = vadd.f32 %v4259_v6, %v4090_v5 }
 0x804   : > { %4298 = vmatmul.bf16.gmra.mxu1 %v9791_v18 }
 0x805   : > { %4129 = vmatmul.bf16.gmra.mxu0 %v9663_v15  ;;  %v5594_v16 = vadd.f32 %v8653_v42, %v4595_v39  ;;  %4467 = vmatmul.bf16.gmra.mxu2 %v9792_v10 }
 0x806   : > { %4636 = vmatmul.bf16.gmra.mxu3 %v9793_v41 }
 0x807   : > { %v5774_v19 = vpack.c.bf16 %v5594_v16, %v5593_v53 }
 0x808   : > { %v4428_v45 = vpop.f32.mrf.mxu2 }
 0x809   : > { %5902 = vst [vmem:[%s7907_s20 + $0x258] sm:$0xff] %v5774_v19  ;;  %v4429_v48 = vadd.f32 %v4428_v45, %v4260_v2  ;;  %v4597_v30 = vpop.f32.mrf.mxu3  ;;  %v4261_v15 = vpop.f32.mrf.mxu1  ;;  %v9800_v2 = vld [vmem:[#allocation139_spill] sm:$0xff] }
 0x80a   : > { %v4092_v44 = vpop.f32.mrf.mxu0  ;;  %v5605_v18 = vadd.f32 %v8651_v37, %v9800_v2  ;;  %v9807_v2 = vld [vmem:[#allocation150_spill] sm:$0xff] }
 0x80b   : > { %v4598_v3 = vadd.f32 %v4597_v30, %v4429_v48  ;;  %v4262_v40 = vadd.f32 %v4261_v15, %v4092_v44 }
 0x80d   : > { %v5598_v13 = vadd.f32 %v8653_v42, %v4598_v3 }
 0x80f   : > { %v5776_v23 = vpack.c.bf16 %v5598_v13, %v5597_v21  ;;  %v9802_v21 = vld [vmem:[#allocation144_spill] sm:$0xff] }
 0x810   : > { %v4430_v63 = vpop.f32.mrf.mxu2  ;;  %v5609_v13 = vadd.f32 %v8651_v37, %v9802_v21 }
 0x811   : > { %5904 = vst [vmem:[%s7907_s20 + $0x268] sm:$0xff] %v5776_v23  ;;  %v4431_v50 = vadd.f32 %v4430_v63, %v4262_v40  ;;  %v4599_v54 = vpop.f32.mrf.mxu3  ;;  %v4264_v9 = vpop.f32.mrf.mxu1  ;;  %v9803_v63 = vld [vmem:[#allocation147_spill] sm:$0xff] }
 0x812   : > { %v4095_v55 = vpop.f32.mrf.mxu0 }
 0x813   : > { %v4600_v1 = vadd.f32 %v4599_v54, %v4431_v50  ;;  %v4265_v28 = vadd.f32 %v4264_v9, %v4095_v55  ;;  %v9804_v50 = vld [vmem:[#allocation148_spill] sm:$0xff]  ;;  %v9805_v54 = vld [vmem:[#allocation149_spill] sm:$0xff] }
 0x814   : > { %4303 = vmatmul.bf16.gmra.mxu1 %v9797_v56 }
 0x815   : > { %4134 = vmatmul.bf16.gmra.mxu0 %v9795_v7  ;;  %v5602_v22 = vadd.f32 %v8653_v42, %v4600_v1  ;;  %4472 = vmatmul.bf16.gmra.mxu2 %v9798_v57 }
 0x816   : > { %4641 = vmatmul.bf16.gmra.mxu3 %v9799_v58 }
 0x817   : > { %v5778_v59 = vpack.c.bf16 %v5602_v22, %v5601_v14 }
 0x818   : > { %v4433_v38 = vpop.f32.mrf.mxu2 }
 0x819   : > { %5906 = vst [vmem:[%s7907_s20 + $0x278] sm:$0xff] %v5778_v59  ;;  %v4434_v5 = vadd.f32 %v4433_v38, %v4265_v28  ;;  %v4602_v6 = vpop.f32.mrf.mxu3  ;;  %v4266_v53 = vpop.f32.mrf.mxu1  ;;  %v9806_v28 = vld [vmem:[#allocation145_spill] sm:$0xff] }
 0x81a   : > { %v4097_v39 = vpop.f32.mrf.mxu0  ;;  %v5613_v56 = vadd.f32 %v8651_v37, %v9806_v28 }
 0x81b   : > { %v4603_v16 = vadd.f32 %v4602_v6, %v4434_v5  ;;  %v4267_v19 = vadd.f32 %v4266_v53, %v4097_v39 }
 0x81d   : > { %v5606_v10 = vadd.f32 %v8653_v42, %v4603_v16 }
 0x81f   : > { %v5780_v41 = vpack.c.bf16 %v5606_v10, %v5605_v18  ;;  %v5617_v18 = vadd.f32 %v8651_v37, %v9807_v2  ;;  %v5633_v2 = vadd.f32 %v8651_v37, %v8580_v8 }
 0x820   : > { %v4435_v45 = vpop.f32.mrf.mxu2 }
 0x821   : > { %5908 = vst [vmem:[%s7907_s20 + $0x288] sm:$0xff] %v5780_v41  ;;  %v4436_v48 = vadd.f32 %v4435_v45, %v4267_v19  ;;  %v4604_v30 = vpop.f32.mrf.mxu3  ;;  %v4269_v15 = vpop.f32.mrf.mxu1  ;;  %v9808_v19 = vld [vmem:[#allocation153_spill] sm:$0xff] }
 0x822   : > { %v4100_v44 = vpop.f32.mrf.mxu0 }
 0x823   : > { %v4605_v3 = vadd.f32 %v4604_v30, %v4436_v48  ;;  %v4270_v40 = vadd.f32 %v4269_v15, %v4100_v44 }
 0x824   : > { %4308 = vmatmul.bf16.gmra.mxu1 %v9803_v63 }
 0x825   : > { %4139 = vmatmul.bf16.gmra.mxu0 %v9801_v43  ;;  %v5610_v23 = vadd.f32 %v8653_v42, %v4605_v3  ;;  %4477 = vmatmul.bf16.gmra.mxu2 %v9804_v50  ;;  %v5621_v43 = vadd.f32 %v8651_v37, %v8570_v27 }
 0x826   : > { %4646 = vmatmul.bf16.gmra.mxu3 %v9805_v54 }
 0x827   : > { %v5782_v55 = vpack.c.bf16 %v5610_v23, %v5609_v13 }
 0x828   : > { %v4438_v9 = vpop.f32.mrf.mxu2 }
 0x829   : > { %5910 = vst [vmem:[%s7907_s20 + $0x298] sm:$0xff] %v5782_v55  ;;  %v4439_v1 = vadd.f32 %v4438_v9, %v4270_v40  ;;  %v4607_v7 = vpop.f32.mrf.mxu3  ;;  %v4271_v14 = vpop.f32.mrf.mxu1  ;;  %v9809_v55 = vld [vmem:[#allocation151_spill] sm:$0xff] }
 0x82a   : > { %v4102_v34 = vpop.f32.mrf.mxu0  ;;  %v5625_v9 = vadd.f32 %v8651_v37, %v9809_v55 }
 0x82b   : > { %v4608_v22 = vadd.f32 %v4607_v7, %v4439_v1  ;;  %v4272_v59 = vadd.f32 %v4271_v14, %v4102_v34  ;;  %v9810_v7 = vld [vmem:[#allocation158_spill] sm:$0xff] }
 0x82d   : > { %v5614_v57 = vadd.f32 %v8653_v42, %v4608_v22 }
 0x82f   : > { %v5784_v58 = vpack.c.bf16 %v5614_v57, %v5613_v56 }
 0x830   : > { %v4440_v38 = vpop.f32.mrf.mxu2 }
 0x831   : > { %5912 = vst [vmem:[%s7907_s20 + $0x2a8] sm:$0xff] %v5784_v58  ;;  %v4441_v5 = vadd.f32 %v4440_v38, %v4272_v59  ;;  %v4609_v6 = vpop.f32.mrf.mxu3  ;;  %v4274_v53 = vpop.f32.mrf.mxu1  ;;  %v5629_v58 = vadd.f32 %v8651_v37, %v8578_v20 }
 0x832   : > { %v4105_v39 = vpop.f32.mrf.mxu0 }
 0x833   : > { %v4610_v16 = vadd.f32 %v4609_v6, %v4441_v5  ;;  %v4275_v41 = vadd.f32 %v4274_v53, %v4105_v39 }
 0x834   : > { %4313 = vmatmul.bf16.gmra.mxu1 %v9808_v19 }
 0x835   : > { %4144 = vmatmul.bf16.gmra.mxu0 %v9681_v62  ;;  %v5618_v10 = vadd.f32 %v8653_v42, %v4610_v16  ;;  %4482 = vmatmul.bf16.gmra.mxu2 %v9683_v12 }
 0x836   : > { %4651 = vmatmul.bf16.gmra.mxu3 %v9684_v11 }
 0x837   : > { %v5786_v45 = vpack.c.bf16 %v5618_v10, %v5617_v18 }
 0x838   : > { %v4443_v48 = vpop.f32.mrf.mxu2 }
 0x839   : > { %5914 = vst [vmem:[%s7907_s20 + $0x2b8] sm:$0xff] %v5786_v45  ;;  %v4444_v30 = vadd.f32 %v4443_v48, %v4275_v41  ;;  %v4612_v44 = vpop.f32.mrf.mxu3  ;;  %v4276_v62 = vpop.f32.mrf.mxu1 }
 0x83a   : > { %v4107_v15 = vpop.f32.mrf.mxu0 }
 0x83b   : > { %v4613_v3 = vadd.f32 %v4612_v44, %v4444_v30  ;;  %v4277_v23 = vadd.f32 %v4276_v62, %v4107_v15  ;;  %v5637_v15 = vadd.f32 %v8651_v37, %v8586_v32 }
 0x83d   : > { %v5622_v21 = vadd.f32 %v8653_v42, %v4613_v3 }
 0x83f   : > { %v5788_v13 = vpack.c.bf16 %v5622_v21, %v5621_v43 }
 0x840   : > { %v4445_v40 = vpop.f32.mrf.mxu2 }
 0x841   : > { %5916 = vst [vmem:[%s7907_s20 + $0x2c8] sm:$0xff] %v5788_v13  ;;  %v4446_v12 = vadd.f32 %v4445_v40, %v4277_v23  ;;  %v4614_v11 = vpop.f32.mrf.mxu3  ;;  %v4279_v50 = vpop.f32.mrf.mxu1 }
 0x842   : > { %v4110_v63 = vpop.f32.mrf.mxu0 }
 0x843   : > { %v4615_v54 = vadd.f32 %v4614_v11, %v4446_v12  ;;  %v4280_v27 = vadd.f32 %v4279_v50, %v4110_v63  ;;  %v5641_v11 = vadd.f32 %v8651_v37, %v8588_v47 }
 0x844   : > { %4318 = vmatmul.bf16.gmra.mxu1 %v9810_v7 }
 0x845   : > { %4149 = vmatmul.bf16.gmra.mxu0 %v7792_v61  ;;  %v5626_v1 = vadd.f32 %v8653_v42, %v4615_v54  ;;  %4487 = vmatmul.bf16.gmra.mxu2 %v7796_v60 }
 0x846   : > { %4656 = vmatmul.bf16.gmra.mxu3 %v7798_v35 }
 0x847   : > { %v5790_v34 = vpack.c.bf16 %v5626_v1, %v5625_v9 }
 0x848   : > { %v4448_v14 = vpop.f32.mrf.mxu2 }
 0x849   : > { %5918 = vst [vmem:[%s7907_s20 + $0x2d8] sm:$0xff] %v5790_v34  ;;  %v4449_v22 = vadd.f32 %v4448_v14, %v4280_v27  ;;  %v4617_v28 = vpop.f32.mrf.mxu3  ;;  %v4281_v61 = vpop.f32.mrf.mxu1  ;;  %v5645_v34 = vadd.f32 %v8651_v37, %v8594_v29 }
 0x84a   : > { %v4112_v56 = vpop.f32.mrf.mxu0 }
 0x84b   : > { %v4618_v57 = vadd.f32 %v4617_v28, %v4449_v22  ;;  %v4282_v5 = vadd.f32 %v4281_v61, %v4112_v56 }
 0x84d   : > { %v5630_v59 = vadd.f32 %v8653_v42, %v4618_v57 }
 0x84f   : > { %v5792_v38 = vpack.c.bf16 %v5630_v59, %v5629_v58 }
 0x850   : > { %v4450_v6 = vpop.f32.mrf.mxu2 }
 0x851   : > { %5920 = vst [vmem:[%s7907_s20 + $0x2e8] sm:$0xff] %v5792_v38  ;;  %v4451_v60 = vadd.f32 %v4450_v6, %v4282_v5  ;;  %v4619_v35 = vpop.f32.mrf.mxu3  ;;  %v4284_v53 = vpop.f32.mrf.mxu1  ;;  %v5649_v38 = vadd.f32 %v8651_v37, %v8596_v0 }
 0x852   : > { %v4115_v39 = vpop.f32.mrf.mxu0 }
 0x853   : > { %v4620_v16 = vadd.f32 %v4619_v35, %v4451_v60  ;;  %v4285_v10 = vadd.f32 %v4284_v53, %v4115_v39 }
 0x855   : > { %v5634_v18 = vadd.f32 %v8653_v42, %v4620_v16 }
 0x857   : > { %v5794_v20 = vpack.c.bf16 %v5634_v18, %v5633_v2  ;;  %v5653_v18 = vadd.f32 %v8651_v37, %v8602_v52 }
 0x858   : > { %v4453_v41 = vpop.f32.mrf.mxu2 }
 0x859   : > { %5922 = vst [vmem:[%s7907_s20 + $0x2f8] sm:$0xff] %v5794_v20  ;;  %v4454_v19 = vadd.f32 %v4453_v41, %v4285_v10  ;;  %v4622_v45 = vpop.f32.mrf.mxu3  ;;  %v4286_v30 = vpop.f32.mrf.mxu1 }
 0x85a   : > { %v4117_v48 = vpop.f32.mrf.mxu0 }
 0x85b   : > { %v4623_v44 = vadd.f32 %v4622_v45, %v4454_v19  ;;  %v4287_v8 = vadd.f32 %v4286_v30, %v4117_v48 }
 0x85d   : > { %v5638_v62 = vadd.f32 %v8653_v42, %v4623_v44 }
 0x85f   : > { %v5796_v3 = vpack.c.bf16 %v5638_v62, %v5637_v15  ;;  %v5657_v15 = vadd.f32 %v8651_v37, %v8604_v24 }
 0x860   : > { %v4455_v43 = vpop.f32.mrf.mxu2 }
 0x861   : > { %5924 = vst [vmem:[%s7907_s20 + $0x308] sm:$0xff] %v5796_v3  ;;  %v4456_v21 = vadd.f32 %v4455_v43, %v4287_v8  ;;  %v4624_v13 = vpop.f32.mrf.mxu3  ;;  %v4289_v40 = vpop.f32.mrf.mxu1 }
 0x862   : > { %v4120_v23 = vpop.f32.mrf.mxu0 }
 0x863   : > { %v4625_v12 = vadd.f32 %v4624_v13, %v4456_v21  ;;  %v4290_v50 = vadd.f32 %v4289_v40, %v4120_v23 }
 0x865   : > { %v5642_v63 = vadd.f32 %v8653_v42, %v4625_v12  ;;  %v5661_v12 = vadd.f32 %v8651_v37, %v8610_v17 }
 0x867   : > { %v5798_v32 = vpack.c.bf16 %v5642_v63, %v5641_v11 }
 0x868   : > { %v4458_v54 = vpop.f32.mrf.mxu2 }
 0x869   : > { %5926 = vst [vmem:[%s7907_s20 + $0x318] sm:$0xff] %v5798_v32  ;;  %v4459_v55 = vadd.f32 %v4458_v54, %v4290_v50  ;;  %v4627_v9 = vpop.f32.mrf.mxu3  ;;  %v4291_v27 = vpop.f32.mrf.mxu1 }
 0x86a   : > { %v4122_v1 = vpop.f32.mrf.mxu0 }
 0x86b   : > { %v4628_v7 = vadd.f32 %v4627_v9, %v4459_v55  ;;  %v4292_v47 = vadd.f32 %v4291_v27, %v4122_v1  ;;  %v5665_v27 = vadd.f32 %v8651_v37, %v8612_v36 }
 0x86d   : > { %v5646_v14 = vadd.f32 %v8653_v42, %v4628_v7 }
 0x86f   : > { %v5800_v22 = vpack.c.bf16 %v5646_v14, %v5645_v34 }
 0x870   : > { %v4460_v28 = vpop.f32.mrf.mxu2 }
 0x871   : > { %5928 = vst [vmem:[%s7907_s20 + $0x328] sm:$0xff] %v5800_v22  ;;  %v4461_v56 = vadd.f32 %v4460_v28, %v4292_v47  ;;  %v4629_v61 = vpop.f32.mrf.mxu3  ;;  %v4294_v58 = vpop.f32.mrf.mxu1 }
 0x872   : > { %v4125_v57 = vpop.f32.mrf.mxu0 }
 0x873   : > { %v4630_v59 = vadd.f32 %v4629_v61, %v4461_v56  ;;  %v4295_v6 = vadd.f32 %v4294_v58, %v4125_v57  ;;  %v5669_v57 = vadd.f32 %v8651_v37, %v8618_v33 }
 0x875   : > { %v5650_v5 = vadd.f32 %v8653_v42, %v4630_v59 }
 0x877   : > { %v5802_v29 = vpack.c.bf16 %v5650_v5, %v5649_v38 }
 0x878   : > { %v4463_v60 = vpop.f32.mrf.mxu2 }
 0x879   : > { %5930 = vst [vmem:[%s7907_s20 + $0x338] sm:$0xff] %v5802_v29  ;;  %v4464_v35 = vadd.f32 %v4463_v60, %v4295_v6  ;;  %v4632_v39 = vpop.f32.mrf.mxu3  ;;  %v4296_v16 = vpop.f32.mrf.mxu1 }
 0x87a   : > { %v4127_v53 = vpop.f32.mrf.mxu0 }
 0x87b   : > { %v4633_v2 = vadd.f32 %v4632_v39, %v4464_v35  ;;  %v4297_v0 = vadd.f32 %v4296_v16, %v4127_v53  ;;  %v5673_v39 = vadd.f32 %v8651_v37, %v8620_v49 }
 0x87d   : > { %v5654_v10 = vadd.f32 %v8653_v42, %v4633_v2 }
 0x87f   : > { %v5804_v20 = vpack.c.bf16 %v5654_v10, %v5653_v18 }
 0x880   : > { %v4465_v41 = vpop.f32.mrf.mxu2 }
 0x881   : > { %5932 = vst [vmem:[%s7907_s20 + $0x348] sm:$0xff] %v5804_v20  ;;  %v4466_v19 = vadd.f32 %v4465_v41, %v4297_v0  ;;  %v4634_v45 = vpop.f32.mrf.mxu3  ;;  %v4299_v30 = vpop.f32.mrf.mxu1 }
 0x882   : > { %v4130_v48 = vpop.f32.mrf.mxu0 }
 0x883   : > { %v4635_v44 = vadd.f32 %v4634_v45, %v4466_v19  ;;  %v4300_v3 = vadd.f32 %v4299_v30, %v4130_v48  ;;  %v5677_v19 = vadd.f32 %v8651_v37, %v8626_v25 }
 0x885   : > { %v5658_v62 = vadd.f32 %v8653_v42, %v4635_v44 }
 0x887   : > { %v5806_v52 = vpack.c.bf16 %v5658_v62, %v5657_v15 }
 0x888   : > { %v4468_v8 = vpop.f32.mrf.mxu2 }
 0x889   : > { %5934 = vst [vmem:[%s7907_s20 + $0x358] sm:$0xff] %v5806_v52  ;;  %v4469_v43 = vadd.f32 %v4468_v8, %v4300_v3  ;;  %v4637_v21 = vpop.f32.mrf.mxu3  ;;  %v4301_v23 = vpop.f32.mrf.mxu1  ;;  %v5681_v8 = vadd.f32 %v8651_v37, %v8628_v4 }
 0x88a   : > { %v4132_v13 = vpop.f32.mrf.mxu0 }
 0x88b   : > { %v4638_v40 = vadd.f32 %v4637_v21, %v4469_v43  ;;  %v4302_v24 = vadd.f32 %v4301_v23, %v4132_v13 }
 0x88d   : > { %v5662_v11 = vadd.f32 %v8653_v42, %v4638_v40 }
 0x88f   : > { %v5808_v63 = vpack.c.bf16 %v5662_v11, %v5661_v12 }
 0x890   : > { %v4470_v50 = vpop.f32.mrf.mxu2 }
 0x891   : > { %5936 = vst [vmem:[%s7907_s20 + $0x368] sm:$0xff] %v5808_v63  ;;  %v4471_v32 = vadd.f32 %v4470_v50, %v4302_v24  ;;  %v4639_v54 = vpop.f32.mrf.mxu3  ;;  %v4304_v9 = vpop.f32.mrf.mxu1  ;;  %v5685_v24 = vadd.f32 %v8651_v37, %v8634_v31 }
 0x892   : > { %v4135_v55 = vpop.f32.mrf.mxu0 }
 0x893   : > { %v4640_v1 = vadd.f32 %v4639_v54, %v4471_v32  ;;  %v4305_v34 = vadd.f32 %v4304_v9, %v4135_v55 }
 0x895   : > { %v5666_v7 = vadd.f32 %v8653_v42, %v4640_v1 }
 0x897   : > { %v5810_v17 = vpack.c.bf16 %v5666_v7, %v5665_v27 }
 0x898   : > { %v4473_v14 = vpop.f32.mrf.mxu2 }
 0x899   : > { %5938 = vst [vmem:[%s7907_s20 + $0x378] sm:$0xff] %v5810_v17  ;;  %v4474_v22 = vadd.f32 %v4473_v14, %v4305_v34  ;;  %v4642_v47 = vpop.f32.mrf.mxu3  ;;  %v4306_v56 = vpop.f32.mrf.mxu1  ;;  %v5689_v34 = vadd.f32 %v8651_v37, %v8636_v26 }
 0x89a   : > { %v4137_v28 = vpop.f32.mrf.mxu0 }
 0x89b   : > { %v4643_v61 = vadd.f32 %v4642_v47, %v4474_v22  ;;  %v4307_v36 = vadd.f32 %v4306_v56, %v4137_v28 }
 0x89d   : > { %v5670_v58 = vadd.f32 %v8653_v42, %v4643_v61 }
 0x89f   : > { %v5812_v59 = vpack.c.bf16 %v5670_v58, %v5669_v57  ;;  %v5693_v58 = vadd.f32 %v8651_v37, %v8642_v46  ;;  %v5697_v46 = vadd.f32 %v8651_v37, %v8644_v51 }
 0x8a0   : > { %v4475_v38 = vpop.f32.mrf.mxu2 }
 0x8a1   : > { %5940 = vst [vmem:[%s7907_s20 + $0x388] sm:$0xff] %v5812_v59  ;;  %v4476_v5 = vadd.f32 %v4475_v38, %v4307_v36  ;;  %v4644_v6 = vpop.f32.mrf.mxu3  ;;  %v4309_v60 = vpop.f32.mrf.mxu1 }
 0x8a2   : > { %v4140_v29 = vpop.f32.mrf.mxu0 }
 0x8a3   : > { %v4645_v35 = vadd.f32 %v4644_v6, %v4476_v5  ;;  %v4310_v16 = vadd.f32 %v4309_v60, %v4140_v29 }
 0x8a5   : > { %v5674_v53 = vadd.f32 %v8653_v42, %v4645_v35 }
 0x8a7   : > { %v5814_v33 = vpack.c.bf16 %v5674_v53, %v5673_v39 }
 0x8a8   : > { %v4478_v2 = vpop.f32.mrf.mxu2 }
 0x8a9   : > { %5942 = vst [vmem:[%s7907_s20 + $0x398] sm:$0xff] %v5814_v33  ;;  %v4479_v18 = vadd.f32 %v4478_v2, %v4310_v16  ;;  %v4647_v10 = vpop.f32.mrf.mxu3  ;;  %v4311_v0 = vpop.f32.mrf.mxu1 }
 0x8aa   : > { %v4142_v20 = vpop.f32.mrf.mxu0 }
 0x8ab   : > { %v4648_v41 = vadd.f32 %v4647_v10, %v4479_v18  ;;  %v4312_v49 = vadd.f32 %v4311_v0, %v4142_v20 }
 0x8ad   : > { %v5678_v45 = vadd.f32 %v8653_v42, %v4648_v41 }
 0x8af   : > { %v5816_v48 = vpack.c.bf16 %v5678_v45, %v5677_v19 }
 0x8b0   : > { %v4480_v30 = vpop.f32.mrf.mxu2 }
 0x8b1   : > { %5944 = vst [vmem:[%s7907_s20 + $0x3a8] sm:$0xff] %v5816_v48  ;;  %v4481_v44 = vadd.f32 %v4480_v30, %v4312_v49  ;;  %v4649_v15 = vpop.f32.mrf.mxu3  ;;  %v4314_v3 = vpop.f32.mrf.mxu1 }
 0x8b2   : > { %v4145_v62 = vpop.f32.mrf.mxu0 }
 0x8b3   : > { %v4650_v52 = vadd.f32 %v4649_v15, %v4481_v44  ;;  %v4315_v21 = vadd.f32 %v4314_v3, %v4145_v62 }
 0x8b5   : > { %v5682_v43 = vadd.f32 %v8653_v42, %v4650_v52 }
 0x8b7   : > { %v5818_v25 = vpack.c.bf16 %v5682_v43, %v5681_v8 }
 0x8b8   : > { %v4483_v13 = vpop.f32.mrf.mxu2 }
 0x8b9   : > { %5946 = vst [vmem:[%s7907_s20 + $0x3b8] sm:$0xff] %v5818_v25  ;;  %v4484_v23 = vadd.f32 %v4483_v13, %v4315_v21  ;;  %v4652_v40 = vpop.f32.mrf.mxu3  ;;  %v4316_v11 = vpop.f32.mrf.mxu1 }
 0x8ba   : > { %v4147_v12 = vpop.f32.mrf.mxu0 }
 0x8bb   : > { %v4653_v63 = vadd.f32 %v4652_v40, %v4484_v23  ;;  %v4317_v4 = vadd.f32 %v4316_v11, %v4147_v12 }
 0x8bd   : > { %v5686_v50 = vadd.f32 %v8653_v42, %v4653_v63 }
 0x8bf   : > { %v5820_v32 = vpack.c.bf16 %v5686_v50, %v5685_v24 }
 0x8c0   : > { %v4485_v54 = vpop.f32.mrf.mxu2 }
 0x8c1   : > { %5948 = vst [vmem:[%s7907_s20 + $0x3c8] sm:$0xff] %v5820_v32  ;;  %v4486_v55 = vadd.f32 %v4485_v54, %v4317_v4  ;;  %v4654_v9 = vpop.f32.mrf.mxu3  ;;  %v4319_v27 = vpop.f32.mrf.mxu1 }
 0x8c2   : > { %v4150_v1 = vpop.f32.mrf.mxu0 }
 0x8c3   : > { %v4655_v7 = vadd.f32 %v4654_v9, %v4486_v55  ;;  %v4320_v14 = vadd.f32 %v4319_v27, %v4150_v1 }
 0x8c5   : > { %v5690_v17 = vadd.f32 %v8653_v42, %v4655_v7 }
 0x8c7   : > { %v5822_v31 = vpack.c.bf16 %v5690_v17, %v5689_v34 }
 0x8c8   : > { %v4488_v22 = vpop.f32.mrf.mxu2 }
 0x8c9   : > { %5950 = vst [vmem:[%s7907_s20 + $0x3d8] sm:$0xff] %v5822_v31  ;;  %v4489_v47 = vadd.f32 %v4488_v22, %v4320_v14  ;;  %v4657_v28 = vpop.f32.mrf.mxu3  ;;  %v4321_v57 = vpop.f32.mrf.mxu1 }
 0x8ca   : > { %v4152_v61 = vpop.f32.mrf.mxu0 }
 0x8cb   : > { %v4658_v56 = vadd.f32 %v4657_v28, %v4489_v47  ;;  %v4322_v36 = vadd.f32 %v4321_v57, %v4152_v61 }
 0x8cd   : > { %v5694_v59 = vadd.f32 %v8653_v42, %v4658_v56 }
 0x8cf   : > { %v5824_v26 = vpack.c.bf16 %v5694_v59, %v5693_v58 }
 0x8d0   : > { %v4490_v38 = vpop.f32.mrf.mxu2 }
 0x8d1   : > { %5952 = vst [vmem:[%s7907_s20 + $0x3e8] sm:$0xff] %v5824_v26  ;;  %v4491_v5 = vadd.f32 %v4490_v38, %v4322_v36  ;;  %v4659_v6 = vpop.f32.mrf.mxu3 }
 0x8d3   : > { %v4660_v29 = vadd.f32 %v4659_v6, %v4491_v5 }
 0x8d5   : > { %v5698_v60 = vadd.f32 %v8653_v42, %v4660_v29 }
 0x8d7   : > { %v5826_v35 = vpack.c.bf16 %v5698_v60, %v5697_v46 }
 0x8d9   : > { %5954 = vst [vmem:[%s7907_s20 + $0x3f8] sm:$0xff] %v5826_v35 }
 0x8da   : > { %6967 = shalt.err (!%p6964_p11)
}
 0x8db   : > { %s7034_s29 = smov 256   ;;  %s7035_s6 = smov 768  }
 0x8dc   : > { %s7036_s1 = smov 16  }
 0x8dd   : > { %6771 = dma.vmem_to_hbm [thread:$0]  (%p7146_p13), %s5972_s5, 16384, %s5974_s8, %s5956_s15, %s7034_s29, %s7035_s6, %s7036_s1  }
 0x8de PF: > { %p6791_p12 = scmp.ge.s32.totalorder %s7026_s17, 2  ;;  %s5988_s7 = sand.u32 1, %s7006_s12  }
 0x8df   : > { %s5989_s11 = scalar_lea.sflag [#allocation5], %s5988_s7 }
 0x8e0   : > { %p6785_p2 = pnand %p6791_p12, %p7150_p0 }
 0x8e2   : > { %p6786_p3 = pneg %p6785_p2 }
 0x8e4   : > { %7001 = dma.done.wait (%p6786_p3), %s5989_s11, 16384  }
 0x8e5   : > { %7003 = vsyncadd (%p6786_p3), %s5989_s11, 4294950912  ;;  %s20_s17 = sadd.s32 1, %s7026_s17   ;;  %s9811_s12 = smov %s7010_s13 }
 0x8e6   : > { %p17_p1 = scmp.ge.s32.totalorder %s20_s17, 5   ;;  %s9812_s13 = smov %s7014_s14 }
 0x8e7   : > { %s9813_s14 = smov %s7108_s25  ;;  %s9814_s15 = smov %s7022_s16 }
 0x8e8   : > { %s9815_s16 = smov %s9817_s18  ;;  %19 = sbr.rel (!%p17_p1) target bundleno = 10 (0xa), region = 102 }
 0x8ed   :  { %5995 = vsyncpa [#allocation4], 1 }
 0x8ee   :  { %5997 = vsyncpa [#allocation4 + $0x1], 1 }
 0x8ef   :  { %5998 = vsyncpa [#allocation7], 1 }
 0x8f0   :  { %6000 = vsyncpa [#allocation7 + $0x1], 1 }
 0x8f1   :  { %6001 = vsyncpa [#allocation5], 1 }
 0x8f2   :  { %6003 = vsyncpa [#allocation5 + $0x1], 1 }

</bundles_post_ra>
